<compile_context>
chip_gen: v5e
topology: v5e:2x2
jax: 0.10.0
libtpu: 0.0.40
codegen_flags: <defaults>
</compile_context>

<pallas_src>
import functools
import math

import numpy as np

import jax
import jax.numpy as jnp
from jax.experimental import pallas as pl
from jax.experimental.pallas import tpu as pltpu

_COL0 = 16          # sublane-aligned interior column offset of halo buffers
_EPS = 1e-5


# ------------------------------------------------------------------ in-kernel helpers

def _conv3x3_taps(src_ref, w_ref, b, H, W):
    """3x3 'same' conv as 9 accumulating K=Cin MXU matmuls over shifted views.

    src_ref : (H+2, W+2*_COL0, Cin) buffer. Interior at rows [1,H+1),
              cols [_COL0, _COL0+W); the 1-element halo ring around it is zero.
    w_ref   : (9, Cin, Cout) bf16 weight ref, tap index t = dy*3 + dx.
    b       : (1, Cout) f32 bias.
    returns : (H*W, Cout) float32.
    """
    cin = src_ref.shape[-1]
    acc = None
    for dy in range(3):
        for dx in range(3):
            t = dy * 3 + dx
            c0 = _COL0 - 1 + dx
            lhs = src_ref[dy:dy + H, c0:c0 + W, :].reshape(H * W, cin)
            lhs = lhs.astype(jnp.bfloat16)
            part = jnp.dot(lhs, w_ref[t], preferred_element_type=jnp.float32)
            acc = part if acc is None else acc + part
    return acc + b


def _zero_halo(buf_ref, H, W):
    """Zero only the 1-element halo ring the 3x3 conv reads (cheap, every step)."""
    C = buf_ref.shape[-1]
    z_row = jnp.zeros((1, W + 2, C), buf_ref.dtype)
    buf_ref[0:1, _COL0 - 1:_COL0 + W + 1, :] = z_row
    buf_ref[H + 1:H + 2, _COL0 - 1:_COL0 + W + 1, :] = z_row
    z_col = jnp.zeros((H, 1, C), buf_ref.dtype)
    buf_ref[1:H + 1, _COL0 - 1:_COL0, :] = z_col
    buf_ref[1:H + 1, _COL0 + W:_COL0 + W + 1, :] = z_col


def _spade_gamma_beta(segp_ref, w_sh_ref, b_sh, w_g_ref, b_g, w_b_ref, b_b,
                      actvp_ref, H, W):
    """mlp_shared (3x3 conv + ReLU), then gamma / beta 3x3 convs.

    gamma/beta use separate weight stacks -> no cross-lane split of a fused
    (gamma|beta) output. Nothing leaves VMEM.
    """
    nh = actvp_ref.shape[-1]
    act = jnp.maximum(_conv3x3_taps(segp_ref, w_sh_ref, b_sh, H, W), 0.0)
    _zero_halo(actvp_ref, H, W)
    actvp_ref[1:H + 1, _COL0:_COL0 + W, :] = (
        act.reshape(H, W, nh).astype(actvp_ref.dtype))
    gamma = _conv3x3_taps(actvp_ref, w_g_ref, b_g, H, W)
    beta = _conv3x3_taps(actvp_ref, w_b_ref, b_b, H, W)
    return gamma, beta


def _instnorm_modulate(x, gamma, beta, H, W, eps, leaky):
    """Param-free InstanceNorm2d (one-pass sum/sumsq stats), SPADE modulation,
    optional LeakyReLU(0.2)."""
    C = x.shape[-1]
    xf = x.astype(jnp.float32).reshape(H * W, C)
    mean = jnp.mean(xf, axis=0, keepdims=True)
    mean_sq = jnp.mean(xf * xf, axis=0, keepdims=True)
    var = mean_sq - mean * mean                     # biased, like InstanceNorm2d
    xn = (xf - mean) * jax.lax.rsqrt(var + eps)
    out = xn * (1.0 + gamma) + beta
    if leaky:
        out = jnp.where(out >= 0.0, out, 0.2 * out)
    return out                                      # (H*W, C) float32


def _spade_conv_body(x_ref, segp_ref, w_sh_ref, b_sh, w_g_ref, b_g,
                     w_b_ref, b_b, wc_ref, bc, actvp_ref, hp_ref, H, W, eps):
    """SPADE -> LeakyReLU(0.2) -> 3x3 conv, all resident in VMEM."""
    C = x_ref.shape[-1]
    gamma, beta = _spade_gamma_beta(segp_ref, w_sh_ref, b_sh, w_g_ref, b_g,
                                    w_b_ref, b_b, actvp_ref, H, W)
    mod = _instnorm_modulate(x_ref[...], gamma, beta, H, W, eps, leaky=True)
    _zero_halo(hp_ref, H, W)
    hp_ref[1:H + 1, _COL0:_COL0 + W, :] = (
        mod.reshape(H, W, C).astype(hp_ref.dtype))
    return _conv3x3_taps(hp_ref, wc_ref, bc, H, W)


# ------------------------------------------------------------------ kernels

def _spade_kernel(x_ref, segp_ref, w_sh_ref, b_sh_ref, w_g_ref, b_g_ref,
                  w_b_ref, b_b_ref, o_ref, actvp_ref, *, H, W, eps):
    """norm_s: SPADE modulation only (no activation, no conv)."""
    C = o_ref.shape[-1]
    gamma, beta = _spade_gamma_beta(segp_ref, w_sh_ref, b_sh_ref[...],
                                    w_g_ref, b_g_ref[...],
                                    w_b_ref, b_b_ref[...], actvp_ref, H, W)
    mod = _instnorm_modulate(x_ref[...], gamma, beta, H, W, eps, leaky=False)
    o_ref[...] = mod.reshape(H, W, C).astype(o_ref.dtype)


def _spade_conv_kernel(x_ref, segp_ref, w_sh_ref, b_sh_ref, w_g_ref, b_g_ref,
                       w_b_ref, b_b_ref, wc_ref, bc_ref, o_ref,
                       actvp_ref, hp_ref, *, H, W, eps):
    """stage 0: conv_0(lrelu(norm_0(x))) fused in one kernel."""
    Cout = o_ref.shape[-1]
    y = _spade_conv_body(x_ref, segp_ref, w_sh_ref, b_sh_ref[...],
                         w_g_ref, b_g_ref[...], w_b_ref, b_b_ref[...],
                         wc_ref, bc_ref[...], actvp_ref, hp_ref, H, W, eps)
    o_ref[...] = y.reshape(H, W, Cout).astype(o_ref.dtype)


def _spade_conv_res_kernel(x_ref, xs_ref, segp_ref, w_sh_ref, b_sh_ref,
                           w_g_ref, b_g_ref, w_b_ref, b_b_ref, wc_ref, bc_ref,
                           *rest, H, W, eps, shortcut_matmul):
    """stage 1: conv_1(lrelu(norm_1(dx))) + shortcut (optional 1x1) + residual."""
    if shortcut_matmul:
        ws_ref, o_ref, actvp_ref, hp_ref = rest
    else:
        o_ref, actvp_ref, hp_ref = rest
    Cout = o_ref.shape[-1]
    y = _spade_conv_body(x_ref, segp_ref, w_sh_ref, b_sh_ref[...],
                         w_g_ref, b_g_ref[...], w_b_ref, b_b_ref[...],
                         wc_ref, bc_ref[...], actvp_ref, hp_ref, H, W, eps)
    xs = xs_ref[...].astype(jnp.float32).reshape(H * W, -1)
    if shortcut_matmul:
        xs = jnp.dot(xs.astype(jnp.bfloat16), ws_ref[...],
                     preferred_element_type=jnp.float32)      # fused conv_s (1x1)
    o_ref[...] = (y + xs).reshape(H, W, Cout).astype(o_ref.dtype)


# ------------------------------------------------------------------ pallas_call wrappers

def _nbytes(shape, dtype):
    return int(math.prod(shape)) * np.dtype(dtype).itemsize


def _compiler_params(scratch_bytes, block_bytes):
    # scoped VMEM = scratch + double-buffered per-step blocks + headroom;
    # clamp to [32 MiB, 64 MiB] so it is valid on every generation (v7x: 64 MiB/TC).
    need = scratch_bytes + 2 * block_bytes + (4 << 20)
    limit = int(min(64 << 20, max(32 << 20, need)))
    return pltpu.CompilerParams(dimension_semantics=("parallel",),
                                vmem_limit_bytes=limit)


def _spade_call(x, segp, sp, eps=_EPS):
    N, H, W, C = x.shape
    _, Hp, Wp, L = segp.shape
    nh = sp["w_shared"].shape[-1]
    kern = functools.partial(_spade_kernel, H=H, W=W, eps=eps)
    weights = (sp["w_shared"], sp["b_shared"], sp["w_gamma"], sp["b_gamma"],
               sp["w_beta"], sp["b_beta"])
    scratch_bytes = _nbytes((Hp, Wp, nh), jnp.bfloat16)
    block_bytes = (2 * _nbytes((H, W, C), x.dtype)
                   + _nbytes((Hp, Wp, L), segp.dtype)
                   + sum(_nbytes(a.shape, a.dtype) for a in weights))
    return pl.pallas_call(
        kern,
        out_shape=jax.ShapeDtypeStruct((N, H, W, C), x.dtype),
        grid=(N,),
        in_specs=[
            pl.BlockSpec((None, H, W, C), lambda n: (n, 0, 0, 0)),
            pl.BlockSpec((None, Hp, Wp, L), lambda n: (n, 0, 0, 0)),
            pl.BlockSpec((9, L, nh), lambda n: (0, 0, 0)),
            pl.BlockSpec((1, nh), lambda n: (0, 0)),
            pl.BlockSpec((9, nh, C), lambda n: (0, 0, 0)),
            pl.BlockSpec((1, C), lambda n: (0, 0)),
            pl.BlockSpec((9, nh, C), lambda n: (0, 0, 0)),
            pl.BlockSpec((1, C), lambda n: (0, 0)),
        ],
        out_specs=pl.BlockSpec((None, H, W, C), lambda n: (n, 0, 0, 0)),
        scratch_shapes=[pltpu.VMEM((Hp, Wp, nh), jnp.bfloat16)],
        compiler_params=_compiler_params(scratch_bytes, block_bytes),
    )(x, segp, *weights)


def _spade_conv_call(x, segp, sp, wc, bc, eps=_EPS):
    N, H, W, C = x.shape
    _, Hp, Wp, L = segp.shape
    nh = sp["w_shared"].shape[-1]
    Cout = wc.shape[-1]
    kern = functools.partial(_spade_conv_kernel, H=H, W=W, eps=eps)
    weights = (sp["w_shared"], sp["b_shared"], sp["w_gamma"], sp["b_gamma"],
               sp["w_beta"], sp["b_beta"], wc, bc)
    scratch_bytes = (_nbytes((Hp, Wp, nh), jnp.bfloat16)
                     + _nbytes((Hp, Wp, C), jnp.bfloat16))
    block_bytes = (_nbytes((H, W, C), x.dtype) + _nbytes((H, W, Cout), x.dtype)
                   + _nbytes((Hp, Wp, L), segp.dtype)
                   + sum(_nbytes(a.shape, a.dtype) for a in weights))
    return pl.pallas_call(
        kern,
        out_shape=jax.ShapeDtypeStruct((N, H, W, Cout), x.dtype),
        grid=(N,),
        in_specs=[
            pl.BlockSpec((None, H, W, C), lambda n: (n, 0, 0, 0)),
            pl.BlockSpec((None, Hp, Wp, L), lambda n: (n, 0, 0, 0)),
            pl.BlockSpec((9, L, nh), lambda n: (0, 0, 0)),
            pl.BlockSpec((1, nh), lambda n: (0, 0)),
            pl.BlockSpec((9, nh, C), lambda n: (0, 0, 0)),
            pl.BlockSpec((1, C), lambda n: (0, 0)),
            pl.BlockSpec((9, nh, C), lambda n: (0, 0, 0)),
            pl.BlockSpec((1, C), lambda n: (0, 0)),
            pl.BlockSpec((9, C, Cout), lambda n: (0, 0, 0)),
            pl.BlockSpec((1, Cout), lambda n: (0, 0)),
        ],
        out_specs=pl.BlockSpec((None, H, W, Cout), lambda n: (n, 0, 0, 0)),
        scratch_shapes=[pltpu.VMEM((Hp, Wp, nh), jnp.bfloat16),
                        pltpu.VMEM((Hp, Wp, C), jnp.bfloat16)],
        compiler_params=_compiler_params(scratch_bytes, block_bytes),
    )(x, segp, *weights)


def _spade_conv_res_call(x, xs, segp, sp, wc, bc, ws=None, eps=_EPS):
    N, H, W, C = x.shape
    Cs = xs.shape[-1]
    _, Hp, Wp, L = segp.shape
    nh = sp["w_shared"].shape[-1]
    Cout = wc.shape[-1]
    shortcut_matmul = ws is not None
    kern = functools.partial(_spade_conv_res_kernel, H=H, W=W, eps=eps,
                             shortcut_matmul=shortcut_matmul)
    in_specs = [
        pl.BlockSpec((None, H, W, C), lambda n: (n, 0, 0, 0)),
        pl.BlockSpec((None, H, W, Cs), lambda n: (n, 0, 0, 0)),
        pl.BlockSpec((None, Hp, Wp, L), lambda n: (n, 0, 0, 0)),
        pl.BlockSpec((9, L, nh), lambda n: (0, 0, 0)),
        pl.BlockSpec((1, nh), lambda n: (0, 0)),
        pl.BlockSpec((9, nh, C), lambda n: (0, 0, 0)),
        pl.BlockSpec((1, C), lambda n: (0, 0)),
        pl.BlockSpec((9, nh, C), lambda n: (0, 0, 0)),
        pl.BlockSpec((1, C), lambda n: (0, 0)),
        pl.BlockSpec((9, C, Cout), lambda n: (0, 0, 0)),
        pl.BlockSpec((1, Cout), lambda n: (0, 0)),
    ]
    args = [x, xs, segp, sp["w_shared"], sp["b_shared"], sp["w_gamma"],
            sp["b_gamma"], sp["w_beta"], sp["b_beta"], wc, bc]
    if shortcut_matmul:
        in_specs.append(pl.BlockSpec((Cs, Cout), lambda n: (0, 0)))
        args.append(ws)
    scratch_bytes = (_nbytes((Hp, Wp, nh), jnp.bfloat16)
                     + _nbytes((Hp, Wp, C), jnp.bfloat16))
    block_bytes = (_nbytes((H, W, C), x.dtype) + _nbytes((H, W, Cs), xs.dtype)
                   + _nbytes((H, W, Cout), x.dtype)
                   + _nbytes((Hp, Wp, L), segp.dtype)
                   + sum(_nbytes(a.shape, a.dtype) for a in args[3:]))
    return pl.pallas_call(
        kern,
        out_shape=jax.ShapeDtypeStruct((N, H, W, Cout), x.dtype),
        grid=(N,),
        in_specs=in_specs,
        out_specs=pl.BlockSpec((None, H, W, Cout), lambda n: (n, 0, 0, 0)),
        scratch_shapes=[pltpu.VMEM((Hp, Wp, nh), jnp.bfloat16),
                        pltpu.VMEM((Hp, Wp, C), jnp.bfloat16)],
        compiler_params=_compiler_params(scratch_bytes, block_bytes),
    )(*args)


# ------------------------------------------------------------------ glue + block forward

def _nearest_resize(seg, H, W):
    """F.interpolate(mode='nearest') equivalent (pure indexing, XLA glue)."""
    N, Hs, Ws, C = seg.shape
    if (Hs, Ws) == (H, W):
        return seg
    rows = (jnp.arange(H) * Hs // H).astype(jnp.int32)
    cols = (jnp.arange(W) * Ws // W).astype(jnp.int32)
    return seg[:, rows][:, :, cols]


def fg_resnet_block(x_nchw, seg_nchw, params):
    """FGResnetBlock.forward. Inputs NCHW (PyTorch layout), output NCHW."""
    x = jnp.transpose(x_nchw, (0, 2, 3, 1))      # -> NHWC (channels on lanes)
    seg = jnp.transpose(seg_nchw, (0, 2, 3, 1))
    N, H, W, _ = x.shape

    # Hoisted: resized + halo-padded segmap shared by norm_0 / norm_1 / norm_s,
    # laid out with its interior at the sublane-aligned column the kernels expect.
    seg_r = _nearest_resize(seg, H, W)
    segp = jnp.pad(seg_r, ((0, 0), (1, 1), (_COL0, _COL0), (0, 0)))

    if params["learned_shortcut"]:
        # norm_s only (shortcut has no activation); conv_s fused into last kernel.
        x_s = _spade_call(x, segp, params["norm_s"])
    else:
        x_s = x

    # stage 0: norm_0 -> LeakyReLU -> conv_0                    (one pallas_call)
    dx = _spade_conv_call(x, segp, params["norm_0"], params["w0"], params["b0"])
    # stage 1: norm_1 -> LeakyReLU -> conv_1 + shortcut + add   (one pallas_call)
    out = _spade_conv_res_call(dx, x_s, segp, params["norm_1"],
                               params["w1"], params["b1"], params.get("w_s"))
    return jnp.transpose(out, (0, 3, 1, 2))      # -> NCHW


# ------------------------------------------------------------------ params (kernel-ready layouts)

def _conv_w_taps(key, cin, cout):
    fan_in = 9 * cin
    w = jax.random.normal(key, (3, 3, cin, cout), jnp.float32) / jnp.sqrt(float(fan_in))
    return w.reshape(9, cin, cout).astype(jnp.bfloat16)     # per-tap, bf16 for MXU


def _conv_b(key, cout):
    return (0.01 * jax.random.normal(key, (cout,), jnp.float32)).reshape(1, cout)


def _init_spade(key, norm_nc, label_nc, nhidden=128):
    ks = jax.random.split(key, 6)
    return dict(
        w_shared=_conv_w_taps(ks[0], label_nc, nhidden),
        b_shared=_conv_b(ks[1], nhidden),
        w_gamma=_conv_w_taps(ks[2], nhidden, norm_nc),
        b_gamma=_conv_b(ks[3], norm_nc),
        w_beta=_conv_w_taps(ks[4], nhidden, norm_nc),
        b_beta=_conv_b(ks[5], norm_nc),
    )


def init_fg_resnet_block(key, fin, fout, n_heatmaps):
    learned_shortcut = fin != fout
    fmiddle = min(fin, fout)
    ks = jax.random.split(key, 8)
    params = dict(
        learned_shortcut=learned_shortcut,
        w0=_conv_w_taps(ks[0], fin, fmiddle), b0=_conv_b(ks[1], fmiddle),
        w1=_conv_w_taps(ks[2], fmiddle, fout), b1=_conv_b(ks[3], fout),
        norm_0=_init_spade(ks[4], fin, n_heatmaps),
        norm_1=_init_spade(ks[5], fmiddle, n_heatmaps),
    )
    if learned_shortcut:
        params["w_s"] = (jax.random.normal(ks[6], (fin, fout), jnp.float32) /
                         jnp.sqrt(float(fin))).astype(jnp.bfloat16)   # 1x1 conv as matmul
        params["norm_s"] = _init_spade(ks[7], fin, n_heatmaps)
    return params


# ------------------------------------------------------------------ pure-JAX reference (same numerics)

def _conv3x3_ref(x, w_taps, b_row):
    cin, cout = w_taps.shape[1], w_taps.shape[2]
    w = w_taps.reshape(3, 3, cin, cout)
    y = jax.lax.conv_general_dilated(
        x.astype(jnp.bfloat16), w.astype(jnp.bfloat16),
        window_strides=(1, 1), padding="SAME",
        dimension_numbers=("NHWC", "HWIO", "NHWC"),
        preferred_element_type=jnp.float32)
    return y + b_row.reshape(1, 1, 1, cout)


def _spade_ref(x, seg_r, sp, eps=_EPS):
    actv = jax.nn.relu(_conv3x3_ref(seg_r, sp["w_shared"], sp["b_shared"]))
    gamma = _conv3x3_ref(actv, sp["w_gamma"], sp["b_gamma"])
    beta = _conv3x3_ref(actv, sp["w_beta"], sp["b_beta"])
    mean = jnp.mean(x, axis=(1, 2), keepdims=True)
    var = jnp.mean(jnp.square(x - mean), axis=(1, 2), keepdims=True)
    xn = (x - mean) * jax.lax.rsqrt(var + eps)
    return xn * (1.0 + gamma) + beta


def fg_resnet_block_ref(x_nchw, seg_nchw, params):
    x = jnp.transpose(x_nchw, (0, 2, 3, 1))
    seg = jnp.transpose(seg_nchw, (0, 2, 3, 1))
    N, H, W, _ = x.shape
    seg_r = _nearest_resize(seg, H, W)
    leaky = lambda v: jnp.where(v >= 0.0, v, 0.2 * v)
    if params["learned_shortcut"]:
        xs = _spade_ref(x, seg_r, params["norm_s"])
        xs = jnp.einsum("nhwc,cf->nhwf", xs.astype(jnp.bfloat16), params["w_s"],
                        preferred_element_type=jnp.float32)
    else:
        xs = x
    dx = _conv3x3_ref(leaky(_spade_ref(x, seg_r, params["norm_0"])),
                      params["w0"], params["b0"])
    dx = _conv3x3_ref(leaky(_spade_ref(dx, seg_r, params["norm_1"])),
                      params["w1"], params["b1"])
    return jnp.transpose(xs + dx, (0, 3, 1, 2))


# ------------------------------------------------------------------ main

if __name__ == "__main__":
    fin, fout, n_heatmaps = 4, 8, 3
    N, H, W = 2, 16, 16

    key = jax.random.PRNGKey(0)
    kx, kseg, kp = jax.random.split(key, 3)
    x = jax.random.normal(kx, (N, fin, H, W), jnp.float32)            # NCHW like PyTorch
    seg = jax.random.normal(kseg, (N, n_heatmaps, H, W), jnp.float32)

    params = init_fg_resnet_block(kp, fin, fout, n_heatmaps)

    out = jax.block_until_ready(fg_resnet_block(x, seg, params))
    assert out.shape == (N, fout, H, W)

    ref = jax.block_until_ready(fg_resnet_block_ref(x, seg, params))
    err = float(jnp.max(jnp.abs(out - ref)))
    assert err < 2e-2, f"mismatch vs reference: max abs err {err}"

    print("KERNEL_OK")
</pallas_src>

<mosaic_0001>
module attributes {stable_mosaic.version = 11 : i64} {
  func.func @_spade_kernel(%arg0: i32, %arg1: memref<1x16x16x4xf32, #tpu.memory_space<vmem>>, %arg2: memref<1x18x48x3xf32, #tpu.memory_space<vmem>>, %arg3: memref<9x3x128xbf16, #tpu.memory_space<vmem>>, %arg4: memref<1x128xf32, #tpu.memory_space<vmem>>, %arg5: memref<9x128x4xbf16, #tpu.memory_space<vmem>>, %arg6: memref<1x4xf32, #tpu.memory_space<vmem>>, %arg7: memref<9x128x4xbf16, #tpu.memory_space<vmem>>, %arg8: memref<1x4xf32, #tpu.memory_space<vmem>>, %arg9: memref<1x16x16x4xf32, #tpu.memory_space<vmem>>, %arg10: memref<18x48x128xbf16, #tpu.memory_space<vmem>>) attributes {dimension_semantics = [#tpu.dimension_semantics<parallel>], iteration_bounds = array<i64: 2>, scalar_prefetch = 0 : i64, scratch_operands = 1 : i64, tpu.core_type = #tpu.core_type<tc>, window_params = [{transform_indices = @transform_0, window_bounds = array<i64: 1, 16, 16, 4>}, {transform_indices = @transform_1, window_bounds = array<i64: 1, 18, 48, 3>}, {pipeline_mode = #tpu.pipeline_mode<synchronous>, transform_indices = @transform_2, window_bounds = array<i64: 9, 3, 128>}, {pipeline_mode = #tpu.pipeline_mode<synchronous>, transform_indices = @transform_3, window_bounds = array<i64: 1, 128>}, {pipeline_mode = #tpu.pipeline_mode<synchronous>, transform_indices = @transform_4, window_bounds = array<i64: 9, 128, 4>}, {pipeline_mode = #tpu.pipeline_mode<synchronous>, transform_indices = @transform_5, window_bounds = array<i64: 1, 4>}, {pipeline_mode = #tpu.pipeline_mode<synchronous>, transform_indices = @transform_6, window_bounds = array<i64: 9, 128, 4>}, {pipeline_mode = #tpu.pipeline_mode<synchronous>, transform_indices = @transform_7, window_bounds = array<i64: 1, 4>}, {transform_indices = @transform_8, window_bounds = array<i64: 1, 16, 16, 4>}]} {
    %c0 = arith.constant 0 : index
    %c0_0 = arith.constant 0 : index
    %0 = vector.load %arg4[%c0, %c0_0] : memref<1x128xf32, #tpu.memory_space<vmem>>, vector<1x128xf32>
    %c0_1 = arith.constant 0 : index
    %c0_2 = arith.constant 0 : index
    %1 = vector.load %arg6[%c0_1, %c0_2] : memref<1x4xf32, #tpu.memory_space<vmem>>, vector<1x4xf32>
    %c0_3 = arith.constant 0 : index
    %c0_4 = arith.constant 0 : index
    %2 = vector.load %arg8[%c0_3, %c0_4] : memref<1x4xf32, #tpu.memory_space<vmem>>, vector<1x4xf32>
    %c0_5 = arith.constant 0 : index
    %c0_6 = arith.constant 0 : index
    %c15 = arith.constant 15 : index
    %c0_7 = arith.constant 0 : index
    %3 = vector.load %arg2[%c0_5, %c0_6, %c15, %c0_7] : memref<1x18x48x3xf32, #tpu.memory_space<vmem>>, vector<1x16x16x3xf32>
    %4 = vector.shape_cast %3 : vector<1x16x16x3xf32> to vector<16x16x3xf32>
    %5 = vector.shape_cast %4 : vector<16x16x3xf32> to vector<256x3xf32>
    %6 = arith.truncf %5 : vector<256x3xf32> to vector<256x3xbf16>
    %c0_8 = arith.constant 0 : index
    %c0_9 = arith.constant 0 : index
    %c0_10 = arith.constant 0 : index
    %7 = vector.load %arg3[%c0_8, %c0_9, %c0_10] : memref<9x3x128xbf16, #tpu.memory_space<vmem>>, vector<1x3x128xbf16>
    %8 = vector.shape_cast %7 : vector<1x3x128xbf16> to vector<3x128xbf16>
    %cst = arith.constant dense<0.000000e+00> : vector<256x128xf32>
    %9 = tpu.matmul %6, %8, %cst {dimension_numbers = #tpu.dot_dimension_numbers<[1], [0], [0], [1], [0, 0, 1, 1], [], []>} : vector<256x3xbf16>, vector<3x128xbf16>, vector<256x128xf32> -> vector<256x128xf32>
    %c0_11 = arith.constant 0 : index
    %c0_12 = arith.constant 0 : index
    %c16 = arith.constant 16 : index
    %c0_13 = arith.constant 0 : index
    %10 = vector.load %arg2[%c0_11, %c0_12, %c16, %c0_13] : memref<1x18x48x3xf32, #tpu.memory_space<vmem>>, vector<1x16x16x3xf32>
    %11 = vector.shape_cast %10 : vector<1x16x16x3xf32> to vector<16x16x3xf32>
    %12 = vector.shape_cast %11 : vector<16x16x3xf32> to vector<256x3xf32>
    %13 = arith.truncf %12 : vector<256x3xf32> to vector<256x3xbf16>
    %c1 = arith.constant 1 : index
    %c0_14 = arith.constant 0 : index
    %c0_15 = arith.constant 0 : index
    %14 = vector.load %arg3[%c1, %c0_14, %c0_15] : memref<9x3x128xbf16, #tpu.memory_space<vmem>>, vector<1x3x128xbf16>
    %15 = vector.shape_cast %14 : vector<1x3x128xbf16> to vector<3x128xbf16>
    %cst_16 = arith.constant dense<0.000000e+00> : vector<256x128xf32>
    %16 = tpu.matmul %13, %15, %cst_16 {dimension_numbers = #tpu.dot_dimension_numbers<[1], [0], [0], [1], [0, 0, 1, 1], [], []>} : vector<256x3xbf16>, vector<3x128xbf16>, vector<256x128xf32> -> vector<256x128xf32>
    %17 = arith.addf %9, %16 : vector<256x128xf32>
    %c0_17 = arith.constant 0 : index
    %c0_18 = arith.constant 0 : index
    %c17 = arith.constant 17 : index
    %c0_19 = arith.constant 0 : index
    %18 = vector.load %arg2[%c0_17, %c0_18, %c17, %c0_19] : memref<1x18x48x3xf32, #tpu.memory_space<vmem>>, vector<1x16x16x3xf32>
    %19 = vector.shape_cast %18 : vector<1x16x16x3xf32> to vector<16x16x3xf32>
    %20 = vector.shape_cast %19 : vector<16x16x3xf32> to vector<256x3xf32>
    %21 = arith.truncf %20 : vector<256x3xf32> to vector<256x3xbf16>
    %c2 = arith.constant 2 : index
    %c0_20 = arith.constant 0 : index
    %c0_21 = arith.constant 0 : index
    %22 = vector.load %arg3[%c2, %c0_20, %c0_21] : memref<9x3x128xbf16, #tpu.memory_space<vmem>>, vector<1x3x128xbf16>
    %23 = vector.shape_cast %22 : vector<1x3x128xbf16> to vector<3x128xbf16>
    %cst_22 = arith.constant dense<0.000000e+00> : vector<256x128xf32>
    %24 = tpu.matmul %21, %23, %cst_22 {dimension_numbers = #tpu.dot_dimension_numbers<[1], [0], [0], [1], [0, 0, 1, 1], [], []>} : vector<256x3xbf16>, vector<3x128xbf16>, vector<256x128xf32> -> vector<256x128xf32>
    %25 = arith.addf %17, %24 : vector<256x128xf32>
    %c0_23 = arith.constant 0 : index
    %c1_24 = arith.constant 1 : index
    %c15_25 = arith.constant 15 : index
    %c0_26 = arith.constant 0 : index
    %26 = vector.load %arg2[%c0_23, %c1_24, %c15_25, %c0_26] : memref<1x18x48x3xf32, #tpu.memory_space<vmem>>, vector<1x16x16x3xf32>
    %27 = vector.shape_cast %26 : vector<1x16x16x3xf32> to vector<16x16x3xf32>
    %28 = vector.shape_cast %27 : vector<16x16x3xf32> to vector<256x3xf32>
    %29 = arith.truncf %28 : vector<256x3xf32> to vector<256x3xbf16>
    %c3 = arith.constant 3 : index
    %c0_27 = arith.constant 0 : index
    %c0_28 = arith.constant 0 : index
    %30 = vector.load %arg3[%c3, %c0_27, %c0_28] : memref<9x3x128xbf16, #tpu.memory_space<vmem>>, vector<1x3x128xbf16>
    %31 = vector.shape_cast %30 : vector<1x3x128xbf16> to vector<3x128xbf16>
    %cst_29 = arith.constant dense<0.000000e+00> : vector<256x128xf32>
    %32 = tpu.matmul %29, %31, %cst_29 {dimension_numbers = #tpu.dot_dimension_numbers<[1], [0], [0], [1], [0, 0, 1, 1], [], []>} : vector<256x3xbf16>, vector<3x128xbf16>, vector<256x128xf32> -> vector<256x128xf32>
    %33 = arith.addf %25, %32 : vector<256x128xf32>
    %c0_30 = arith.constant 0 : index
    %c1_31 = arith.constant 1 : index
    %c16_32 = arith.constant 16 : index
    %c0_33 = arith.constant 0 : index
    %34 = vector.load %arg2[%c0_30, %c1_31, %c16_32, %c0_33] : memref<1x18x48x3xf32, #tpu.memory_space<vmem>>, vector<1x16x16x3xf32>
    %35 = vector.shape_cast %34 : vector<1x16x16x3xf32> to vector<16x16x3xf32>
    %36 = vector.shape_cast %35 : vector<16x16x3xf32> to vector<256x3xf32>
    %37 = arith.truncf %36 : vector<256x3xf32> to vector<256x3xbf16>
    %c4 = arith.constant 4 : index
    %c0_34 = arith.constant 0 : index
    %c0_35 = arith.constant 0 : index
    %38 = vector.load %arg3[%c4, %c0_34, %c0_35] : memref<9x3x128xbf16, #tpu.memory_space<vmem>>, vector<1x3x128xbf16>
    %39 = vector.shape_cast %38 : vector<1x3x128xbf16> to vector<3x128xbf16>
    %cst_36 = arith.constant dense<0.000000e+00> : vector<256x128xf32>
    %40 = tpu.matmul %37, %39, %cst_36 {dimension_numbers = #tpu.dot_dimension_numbers<[1], [0], [0], [1], [0, 0, 1, 1], [], []>} : vector<256x3xbf16>, vector<3x128xbf16>, vector<256x128xf32> -> vector<256x128xf32>
    %41 = arith.addf %33, %40 : vector<256x128xf32>
    %c0_37 = arith.constant 0 : index
    %c1_38 = arith.constant 1 : index
    %c17_39 = arith.constant 17 : index
    %c0_40 = arith.constant 0 : index
    %42 = vector.load %arg2[%c0_37, %c1_38, %c17_39, %c0_40] : memref<1x18x48x3xf32, #tpu.memory_space<vmem>>, vector<1x16x16x3xf32>
    %43 = vector.shape_cast %42 : vector<1x16x16x3xf32> to vector<16x16x3xf32>
    %44 = vector.shape_cast %43 : vector<16x16x3xf32> to vector<256x3xf32>
    %45 = arith.truncf %44 : vector<256x3xf32> to vector<256x3xbf16>
    %c5 = arith.constant 5 : index
    %c0_41 = arith.constant 0 : index
    %c0_42 = arith.constant 0 : index
    %46 = vector.load %arg3[%c5, %c0_41, %c0_42] : memref<9x3x128xbf16, #tpu.memory_space<vmem>>, vector<1x3x128xbf16>
    %47 = vector.shape_cast %46 : vector<1x3x128xbf16> to vector<3x128xbf16>
    %cst_43 = arith.constant dense<0.000000e+00> : vector<256x128xf32>
    %48 = tpu.matmul %45, %47, %cst_43 {dimension_numbers = #tpu.dot_dimension_numbers<[1], [0], [0], [1], [0, 0, 1, 1], [], []>} : vector<256x3xbf16>, vector<3x128xbf16>, vector<256x128xf32> -> vector<256x128xf32>
    %49 = arith.addf %41, %48 : vector<256x128xf32>
    %c0_44 = arith.constant 0 : index
    %c2_45 = arith.constant 2 : index
    %c15_46 = arith.constant 15 : index
    %c0_47 = arith.constant 0 : index
    %50 = vector.load %arg2[%c0_44, %c2_45, %c15_46, %c0_47] : memref<1x18x48x3xf32, #tpu.memory_space<vmem>>, vector<1x16x16x3xf32>
    %51 = vector.shape_cast %50 : vector<1x16x16x3xf32> to vector<16x16x3xf32>
    %52 = vector.shape_cast %51 : vector<16x16x3xf32> to vector<256x3xf32>
    %53 = arith.truncf %52 : vector<256x3xf32> to vector<256x3xbf16>
    %c6 = arith.constant 6 : index
    %c0_48 = arith.constant 0 : index
    %c0_49 = arith.constant 0 : index
    %54 = vector.load %arg3[%c6, %c0_48, %c0_49] : memref<9x3x128xbf16, #tpu.memory_space<vmem>>, vector<1x3x128xbf16>
    %55 = vector.shape_cast %54 : vector<1x3x128xbf16> to vector<3x128xbf16>
    %cst_50 = arith.constant dense<0.000000e+00> : vector<256x128xf32>
    %56 = tpu.matmul %53, %55, %cst_50 {dimension_numbers = #tpu.dot_dimension_numbers<[1], [0], [0], [1], [0, 0, 1, 1], [], []>} : vector<256x3xbf16>, vector<3x128xbf16>, vector<256x128xf32> -> vector<256x128xf32>
    %57 = arith.addf %49, %56 : vector<256x128xf32>
    %c0_51 = arith.constant 0 : index
    %c2_52 = arith.constant 2 : index
    %c16_53 = arith.constant 16 : index
    %c0_54 = arith.constant 0 : index
    %58 = vector.load %arg2[%c0_51, %c2_52, %c16_53, %c0_54] : memref<1x18x48x3xf32, #tpu.memory_space<vmem>>, vector<1x16x16x3xf32>
    %59 = vector.shape_cast %58 : vector<1x16x16x3xf32> to vector<16x16x3xf32>
    %60 = vector.shape_cast %59 : vector<16x16x3xf32> to vector<256x3xf32>
    %61 = arith.truncf %60 : vector<256x3xf32> to vector<256x3xbf16>
    %c7 = arith.constant 7 : index
    %c0_55 = arith.constant 0 : index
    %c0_56 = arith.constant 0 : index
    %62 = vector.load %arg3[%c7, %c0_55, %c0_56] : memref<9x3x128xbf16, #tpu.memory_space<vmem>>, vector<1x3x128xbf16>
    %63 = vector.shape_cast %62 : vector<1x3x128xbf16> to vector<3x128xbf16>
    %cst_57 = arith.constant dense<0.000000e+00> : vector<256x128xf32>
    %64 = tpu.matmul %61, %63, %cst_57 {dimension_numbers = #tpu.dot_dimension_numbers<[1], [0], [0], [1], [0, 0, 1, 1], [], []>} : vector<256x3xbf16>, vector<3x128xbf16>, vector<256x128xf32> -> vector<256x128xf32>
    %65 = arith.addf %57, %64 : vector<256x128xf32>
    %c0_58 = arith.constant 0 : index
    %c2_59 = arith.constant 2 : index
    %c17_60 = arith.constant 17 : index
    %c0_61 = arith.constant 0 : index
    %66 = vector.load %arg2[%c0_58, %c2_59, %c17_60, %c0_61] : memref<1x18x48x3xf32, #tpu.memory_space<vmem>>, vector<1x16x16x3xf32>
    %67 = vector.shape_cast %66 : vector<1x16x16x3xf32> to vector<16x16x3xf32>
    %68 = vector.shape_cast %67 : vector<16x16x3xf32> to vector<256x3xf32>
    %69 = arith.truncf %68 : vector<256x3xf32> to vector<256x3xbf16>
    %c8 = arith.constant 8 : index
    %c0_62 = arith.constant 0 : index
    %c0_63 = arith.constant 0 : index
    %70 = vector.load %arg3[%c8, %c0_62, %c0_63] : memref<9x3x128xbf16, #tpu.memory_space<vmem>>, vector<1x3x128xbf16>
    %71 = vector.shape_cast %70 : vector<1x3x128xbf16> to vector<3x128xbf16>
    %cst_64 = arith.constant dense<0.000000e+00> : vector<256x128xf32>
    %72 = tpu.matmul %69, %71, %cst_64 {dimension_numbers = #tpu.dot_dimension_numbers<[1], [0], [0], [1], [0, 0, 1, 1], [], []>} : vector<256x3xbf16>, vector<3x128xbf16>, vector<256x128xf32> -> vector<256x128xf32>
    %73 = arith.addf %65, %72 : vector<256x128xf32>
    %74 = vector.broadcast %0 : vector<1x128xf32> to vector<256x128xf32>
    %75 = arith.addf %73, %74 : vector<256x128xf32>
    %cst_65 = arith.constant 0.000000e+00 : f32
    %76 = vector.broadcast %cst_65 : f32 to vector<256x128xf32>
    %77 = arith.maximumf %75, %76 : vector<256x128xf32>
    %cst_66 = arith.constant 0.000000e+00 : bf16
    %78 = vector.broadcast %cst_66 : bf16 to vector<1x18x128xbf16>
    %c0_67 = arith.constant 0 : index
    %c15_68 = arith.constant 15 : index
    %c0_69 = arith.constant 0 : index
    %79 = vector.load %arg10[%c0_67, %c15_68, %c0_69] : memref<18x48x128xbf16, #tpu.memory_space<vmem>>, vector<1x18x128xbf16>
    tpu.vector_store %arg10[%c0_67, %c15_68, %c0_69], %78 {strides = array<i32>} : memref<18x48x128xbf16, #tpu.memory_space<vmem>>, vector<1x18x128xbf16>,
    %c17_70 = arith.constant 17 : index
    %c15_71 = arith.constant 15 : index
    %c0_72 = arith.constant 0 : index
    %80 = vector.load %arg10[%c17_70, %c15_71, %c0_72] : memref<18x48x128xbf16, #tpu.memory_space<vmem>>, vector<1x18x128xbf16>
    tpu.vector_store %arg10[%c17_70, %c15_71, %c0_72], %78 {strides = array<i32>} : memref<18x48x128xbf16, #tpu.memory_space<vmem>>, vector<1x18x128xbf16>,
    %cst_73 = arith.constant 0.000000e+00 : bf16
    %81 = vector.broadcast %cst_73 : bf16 to vector<16x1x128xbf16>
    %c1_74 = arith.constant 1 : index
    %c15_75 = arith.constant 15 : index
    %c0_76 = arith.constant 0 : index
    %82 = vector.load %arg10[%c1_74, %c15_75, %c0_76] : memref<18x48x128xbf16, #tpu.memory_space<vmem>>, vector<16x1x128xbf16>
    tpu.vector_store %arg10[%c1_74, %c15_75, %c0_76], %81 {strides = array<i32>} : memref<18x48x128xbf16, #tpu.memory_space<vmem>>, vector<16x1x128xbf16>,
    %c1_77 = arith.constant 1 : index
    %c32 = arith.constant 32 : index
    %c0_78 = arith.constant 0 : index
    %83 = vector.load %arg10[%c1_77, %c32, %c0_78] : memref<18x48x128xbf16, #tpu.memory_space<vmem>>, vector<16x1x128xbf16>
    tpu.vector_store %arg10[%c1_77, %c32, %c0_78], %81 {strides = array<i32>} : memref<18x48x128xbf16, #tpu.memory_space<vmem>>, vector<16x1x128xbf16>,
    %84 = vector.shape_cast %77 : vector<256x128xf32> to vector<16x16x128xf32>
    %85 = arith.truncf %84 : vector<16x16x128xf32> to vector<16x16x128xbf16>
    %c1_79 = arith.constant 1 : index
    %c16_80 = arith.constant 16 : index
    %c0_81 = arith.constant 0 : index
    %86 = vector.load %arg10[%c1_79, %c16_80, %c0_81] : memref<18x48x128xbf16, #tpu.memory_space<vmem>>, vector<16x16x128xbf16>
    tpu.vector_store %arg10[%c1_79, %c16_80, %c0_81], %85 {strides = array<i32>} : memref<18x48x128xbf16, #tpu.memory_space<vmem>>, vector<16x16x128xbf16>,
    %c0_82 = arith.constant 0 : index
    %c15_83 = arith.constant 15 : index
    %c0_84 = arith.constant 0 : index
    %87 = vector.load %arg10[%c0_82, %c15_83, %c0_84] : memref<18x48x128xbf16, #tpu.memory_space<vmem>>, vector<16x16x128xbf16>
    %88 = vector.shape_cast %87 : vector<16x16x128xbf16> to vector<256x128xbf16>
    %c0_85 = arith.constant 0 : index
    %c0_86 = arith.constant 0 : index
    %c0_87 = arith.constant 0 : index
    %89 = vector.load %arg5[%c0_85, %c0_86, %c0_87] : memref<9x128x4xbf16, #tpu.memory_space<vmem>>, vector<1x128x4xbf16>
    %90 = vector.shape_cast %89 : vector<1x128x4xbf16> to vector<128x4xbf16>
    %cst_88 = arith.constant dense<0.000000e+00> : vector<256x4xf32>
    %91 = tpu.matmul %88, %90, %cst_88 {dimension_numbers = #tpu.dot_dimension_numbers<[1], [0], [0], [1], [0, 0, 1, 1], [], []>} : vector<256x128xbf16>, vector<128x4xbf16>, vector<256x4xf32> -> vector<256x4xf32>
    %c0_89 = arith.constant 0 : index
    %c16_90 = arith.constant 16 : index
    %c0_91 = arith.constant 0 : index
    %92 = vector.load %arg10[%c0_89, %c16_90, %c0_91] : memref<18x48x128xbf16, #tpu.memory_space<vmem>>, vector<16x16x128xbf16>
    %93 = vector.shape_cast %92 : vector<16x16x128xbf16> to vector<256x128xbf16>
    %c1_92 = arith.constant 1 : index
    %c0_93 = arith.constant 0 : index
    %c0_94 = arith.constant 0 : index
    %94 = vector.load %arg5[%c1_92, %c0_93, %c0_94] : memref<9x128x4xbf16, #tpu.memory_space<vmem>>, vector<1x128x4xbf16>
    %95 = vector.shape_cast %94 : vector<1x128x4xbf16> to vector<128x4xbf16>
    %cst_95 = arith.constant dense<0.000000e+00> : vector<256x4xf32>
    %96 = tpu.matmul %93, %95, %cst_95 {dimension_numbers = #tpu.dot_dimension_numbers<[1], [0], [0], [1], [0, 0, 1, 1], [], []>} : vector<256x128xbf16>, vector<128x4xbf16>, vector<256x4xf32> -> vector<256x4xf32>
    %97 = arith.addf %91, %96 : vector<256x4xf32>
    %c0_96 = arith.constant 0 : index
    %c17_97 = arith.constant 17 : index
    %c0_98 = arith.constant 0 : index
    %98 = vector.load %arg10[%c0_96, %c17_97, %c0_98] : memref<18x48x128xbf16, #tpu.memory_space<vmem>>, vector<16x16x128xbf16>
    %99 = vector.shape_cast %98 : vector<16x16x128xbf16> to vector<256x128xbf16>
    %c2_99 = arith.constant 2 : index
    %c0_100 = arith.constant 0 : index
    %c0_101 = arith.constant 0 : index
    %100 = vector.load %arg5[%c2_99, %c0_100, %c0_101] : memref<9x128x4xbf16, #tpu.memory_space<vmem>>, vector<1x128x4xbf16>
    %101 = vector.shape_cast %100 : vector<1x128x4xbf16> to vector<128x4xbf16>
    %cst_102 = arith.constant dense<0.000000e+00> : vector<256x4xf32>
    %102 = tpu.matmul %99, %101, %cst_102 {dimension_numbers = #tpu.dot_dimension_numbers<[1], [0], [0], [1], [0, 0, 1, 1], [], []>} : vector<256x128xbf16>, vector<128x4xbf16>, vector<256x4xf32> -> vector<256x4xf32>
    %103 = arith.addf %97, %102 : vector<256x4xf32>
    %c1_103 = arith.constant 1 : index
    %c15_104 = arith.constant 15 : index
    %c0_105 = arith.constant 0 : index
    %104 = vector.load %arg10[%c1_103, %c15_104, %c0_105] : memref<18x48x128xbf16, #tpu.memory_space<vmem>>, vector<16x16x128xbf16>
    %105 = vector.shape_cast %104 : vector<16x16x128xbf16> to vector<256x128xbf16>
    %c3_106 = arith.constant 3 : index
    %c0_107 = arith.constant 0 : index
    %c0_108 = arith.constant 0 : index
    %106 = vector.load %arg5[%c3_106, %c0_107, %c0_108] : memref<9x128x4xbf16, #tpu.memory_space<vmem>>, vector<1x128x4xbf16>
    %107 = vector.shape_cast %106 : vector<1x128x4xbf16> to vector<128x4xbf16>
    %cst_109 = arith.constant dense<0.000000e+00> : vector<256x4xf32>
    %108 = tpu.matmul %105, %107, %cst_109 {dimension_numbers = #tpu.dot_dimension_numbers<[1], [0], [0], [1], [0, 0, 1, 1], [], []>} : vector<256x128xbf16>, vector<128x4xbf16>, vector<256x4xf32> -> vector<256x4xf32>
    %109 = arith.addf %103, %108 : vector<256x4xf32>
    %c1_110 = arith.constant 1 : index
    %c16_111 = arith.constant 16 : index
    %c0_112 = arith.constant 0 : index
    %110 = vector.load %arg10[%c1_110, %c16_111, %c0_112] : memref<18x48x128xbf16, #tpu.memory_space<vmem>>, vector<16x16x128xbf16>
    %111 = vector.shape_cast %110 : vector<16x16x128xbf16> to vector<256x128xbf16>
    %c4_113 = arith.constant 4 : index
    %c0_114 = arith.constant 0 : index
    %c0_115 = arith.constant 0 : index
    %112 = vector.load %arg5[%c4_113, %c0_114, %c0_115] : memref<9x128x4xbf16, #tpu.memory_space<vmem>>, vector<1x128x4xbf16>
    %113 = vector.shape_cast %112 : vector<1x128x4xbf16> to vector<128x4xbf16>
    %cst_116 = arith.constant dense<0.000000e+00> : vector<256x4xf32>
    %114 = tpu.matmul %111, %113, %cst_116 {dimension_numbers = #tpu.dot_dimension_numbers<[1], [0], [0], [1], [0, 0, 1, 1], [], []>} : vector<256x128xbf16>, vector<128x4xbf16>, vector<256x4xf32> -> vector<256x4xf32>
    %115 = arith.addf %109, %114 : vector<256x4xf32>
    %c1_117 = arith.constant 1 : index
    %c17_118 = arith.constant 17 : index
    %c0_119 = arith.constant 0 : index
    %116 = vector.load %arg10[%c1_117, %c17_118, %c0_119] : memref<18x48x128xbf16, #tpu.memory_space<vmem>>, vector<16x16x128xbf16>
    %117 = vector.shape_cast %116 : vector<16x16x128xbf16> to vector<256x128xbf16>
    %c5_120 = arith.constant 5 : index
    %c0_121 = arith.constant 0 : index
    %c0_122 = arith.constant 0 : index
    %118 = vector.load %arg5[%c5_120, %c0_121, %c0_122] : memref<9x128x4xbf16, #tpu.memory_space<vmem>>, vector<1x128x4xbf16>
    %119 = vector.shape_cast %118 : vector<1x128x4xbf16> to vector<128x4xbf16>
    %cst_123 = arith.constant dense<0.000000e+00> : vector<256x4xf32>
    %120 = tpu.matmul %117, %119, %cst_123 {dimension_numbers = #tpu.dot_dimension_numbers<[1], [0], [0], [1], [0, 0, 1, 1], [], []>} : vector<256x128xbf16>, vector<128x4xbf16>, vector<256x4xf32> -> vector<256x4xf32>
    %121 = arith.addf %115, %120 : vector<256x4xf32>
    %c2_124 = arith.constant 2 : index
    %c15_125 = arith.constant 15 : index
    %c0_126 = arith.constant 0 : index
    %122 = vector.load %arg10[%c2_124, %c15_125, %c0_126] : memref<18x48x128xbf16, #tpu.memory_space<vmem>>, vector<16x16x128xbf16>
    %123 = vector.shape_cast %122 : vector<16x16x128xbf16> to vector<256x128xbf16>
    %c6_127 = arith.constant 6 : index
    %c0_128 = arith.constant 0 : index
    %c0_129 = arith.constant 0 : index
    %124 = vector.load %arg5[%c6_127, %c0_128, %c0_129] : memref<9x128x4xbf16, #tpu.memory_space<vmem>>, vector<1x128x4xbf16>
    %125 = vector.shape_cast %124 : vector<1x128x4xbf16> to vector<128x4xbf16>
    %cst_130 = arith.constant dense<0.000000e+00> : vector<256x4xf32>
    %126 = tpu.matmul %123, %125, %cst_130 {dimension_numbers = #tpu.dot_dimension_numbers<[1], [0], [0], [1], [0, 0, 1, 1], [], []>} : vector<256x128xbf16>, vector<128x4xbf16>, vector<256x4xf32> -> vector<256x4xf32>
    %127 = arith.addf %121, %126 : vector<256x4xf32>
    %c2_131 = arith.constant 2 : index
    %c16_132 = arith.constant 16 : index
    %c0_133 = arith.constant 0 : index
    %128 = vector.load %arg10[%c2_131, %c16_132, %c0_133] : memref<18x48x128xbf16, #tpu.memory_space<vmem>>, vector<16x16x128xbf16>
    %129 = vector.shape_cast %128 : vector<16x16x128xbf16> to vector<256x128xbf16>
    %c7_134 = arith.constant 7 : index
    %c0_135 = arith.constant 0 : index
    %c0_136 = arith.constant 0 : index
    %130 = vector.load %arg5[%c7_134, %c0_135, %c0_136] : memref<9x128x4xbf16, #tpu.memory_space<vmem>>, vector<1x128x4xbf16>
    %131 = vector.shape_cast %130 : vector<1x128x4xbf16> to vector<128x4xbf16>
    %cst_137 = arith.constant dense<0.000000e+00> : vector<256x4xf32>
    %132 = tpu.matmul %129, %131, %cst_137 {dimension_numbers = #tpu.dot_dimension_numbers<[1], [0], [0], [1], [0, 0, 1, 1], [], []>} : vector<256x128xbf16>, vector<128x4xbf16>, vector<256x4xf32> -> vector<256x4xf32>
    %133 = arith.addf %127, %132 : vector<256x4xf32>
    %c2_138 = arith.constant 2 : index
    %c17_139 = arith.constant 17 : index
    %c0_140 = arith.constant 0 : index
    %134 = vector.load %arg10[%c2_138, %c17_139, %c0_140] : memref<18x48x128xbf16, #tpu.memory_space<vmem>>, vector<16x16x128xbf16>
    %135 = vector.shape_cast %134 : vector<16x16x128xbf16> to vector<256x128xbf16>
    %c8_141 = arith.constant 8 : index
    %c0_142 = arith.constant 0 : index
    %c0_143 = arith.constant 0 : index
    %136 = vector.load %arg5[%c8_141, %c0_142, %c0_143] : memref<9x128x4xbf16, #tpu.memory_space<vmem>>, vector<1x128x4xbf16>
    %137 = vector.shape_cast %136 : vector<1x128x4xbf16> to vector<128x4xbf16>
    %cst_144 = arith.constant dense<0.000000e+00> : vector<256x4xf32>
    %138 = tpu.matmul %135, %137, %cst_144 {dimension_numbers = #tpu.dot_dimension_numbers<[1], [0], [0], [1], [0, 0, 1, 1], [], []>} : vector<256x128xbf16>, vector<128x4xbf16>, vector<256x4xf32> -> vector<256x4xf32>
    %139 = arith.addf %133, %138 : vector<256x4xf32>
    %140 = vector.broadcast %1 : vector<1x4xf32> to vector<256x4xf32>
    %141 = arith.addf %139, %140 : vector<256x4xf32>
    %c0_145 = arith.constant 0 : index
    %c15_146 = arith.constant 15 : index
    %c0_147 = arith.constant 0 : index
    %142 = vector.load %arg10[%c0_145, %c15_146, %c0_147] : memref<18x48x128xbf16, #tpu.memory_space<vmem>>, vector<16x16x128xbf16>
    %143 = vector.shape_cast %142 : vector<16x16x128xbf16> to vector<256x128xbf16>
    %c0_148 = arith.constant 0 : index
    %c0_149 = arith.constant 0 : index
    %c0_150 = arith.constant 0 : index
    %144 = vector.load %arg7[%c0_148, %c0_149, %c0_150] : memref<9x128x4xbf16, #tpu.memory_space<vmem>>, vector<1x128x4xbf16>
    %145 = vector.shape_cast %144 : vector<1x128x4xbf16> to vector<128x4xbf16>
    %cst_151 = arith.constant dense<0.000000e+00> : vector<256x4xf32>
    %146 = tpu.matmul %143, %145, %cst_151 {dimension_numbers = #tpu.dot_dimension_numbers<[1], [0], [0], [1], [0, 0, 1, 1], [], []>} : vector<256x128xbf16>, vector<128x4xbf16>, vector<256x4xf32> -> vector<256x4xf32>
    %c0_152 = arith.constant 0 : index
    %c16_153 = arith.constant 16 : index
    %c0_154 = arith.constant 0 : index
    %147 = vector.load %arg10[%c0_152, %c16_153, %c0_154] : memref<18x48x128xbf16, #tpu.memory_space<vmem>>, vector<16x16x128xbf16>
    %148 = vector.shape_cast %147 : vector<16x16x128xbf16> to vector<256x128xbf16>
    %c1_155 = arith.constant 1 : index
    %c0_156 = arith.constant 0 : index
    %c0_157 = arith.constant 0 : index
    %149 = vector.load %arg7[%c1_155, %c0_156, %c0_157] : memref<9x128x4xbf16, #tpu.memory_space<vmem>>, vector<1x128x4xbf16>
    %150 = vector.shape_cast %149 : vector<1x128x4xbf16> to vector<128x4xbf16>
    %cst_158 = arith.constant dense<0.000000e+00> : vector<256x4xf32>
    %151 = tpu.matmul %148, %150, %cst_158 {dimension_numbers = #tpu.dot_dimension_numbers<[1], [0], [0], [1], [0, 0, 1, 1], [], []>} : vector<256x128xbf16>, vector<128x4xbf16>, vector<256x4xf32> -> vector<256x4xf32>
    %152 = arith.addf %146, %151 : vector<256x4xf32>
    %c0_159 = arith.constant 0 : index
    %c17_160 = arith.constant 17 : index
    %c0_161 = arith.constant 0 : index
    %153 = vector.load %arg10[%c0_159, %c17_160, %c0_161] : memref<18x48x128xbf16, #tpu.memory_space<vmem>>, vector<16x16x128xbf16>
    %154 = vector.shape_cast %153 : vector<16x16x128xbf16> to vector<256x128xbf16>
    %c2_162 = arith.constant 2 : index
    %c0_163 = arith.constant 0 : index
    %c0_164 = arith.constant 0 : index
    %155 = vector.load %arg7[%c2_162, %c0_163, %c0_164] : memref<9x128x4xbf16, #tpu.memory_space<vmem>>, vector<1x128x4xbf16>
    %156 = vector.shape_cast %155 : vector<1x128x4xbf16> to vector<128x4xbf16>
    %cst_165 = arith.constant dense<0.000000e+00> : vector<256x4xf32>
    %157 = tpu.matmul %154, %156, %cst_165 {dimension_numbers = #tpu.dot_dimension_numbers<[1], [0], [0], [1], [0, 0, 1, 1], [], []>} : vector<256x128xbf16>, vector<128x4xbf16>, vector<256x4xf32> -> vector<256x4xf32>
    %158 = arith.addf %152, %157 : vector<256x4xf32>
    %c1_166 = arith.constant 1 : index
    %c15_167 = arith.constant 15 : index
    %c0_168 = arith.constant 0 : index
    %159 = vector.load %arg10[%c1_166, %c15_167, %c0_168] : memref<18x48x128xbf16, #tpu.memory_space<vmem>>, vector<16x16x128xbf16>
    %160 = vector.shape_cast %159 : vector<16x16x128xbf16> to vector<256x128xbf16>
    %c3_169 = arith.constant 3 : index
    %c0_170 = arith.constant 0 : index
    %c0_171 = arith.constant 0 : index
    %161 = vector.load %arg7[%c3_169, %c0_170, %c0_171] : memref<9x128x4xbf16, #tpu.memory_space<vmem>>, vector<1x128x4xbf16>
    %162 = vector.shape_cast %161 : vector<1x128x4xbf16> to vector<128x4xbf16>
    %cst_172 = arith.constant dense<0.000000e+00> : vector<256x4xf32>
    %163 = tpu.matmul %160, %162, %cst_172 {dimension_numbers = #tpu.dot_dimension_numbers<[1], [0], [0], [1], [0, 0, 1, 1], [], []>} : vector<256x128xbf16>, vector<128x4xbf16>, vector<256x4xf32> -> vector<256x4xf32>
    %164 = arith.addf %158, %163 : vector<256x4xf32>
    %c1_173 = arith.constant 1 : index
    %c16_174 = arith.constant 16 : index
    %c0_175 = arith.constant 0 : index
    %165 = vector.load %arg10[%c1_173, %c16_174, %c0_175] : memref<18x48x128xbf16, #tpu.memory_space<vmem>>, vector<16x16x128xbf16>
    %166 = vector.shape_cast %165 : vector<16x16x128xbf16> to vector<256x128xbf16>
    %c4_176 = arith.constant 4 : index
    %c0_177 = arith.constant 0 : index
    %c0_178 = arith.constant 0 : index
    %167 = vector.load %arg7[%c4_176, %c0_177, %c0_178] : memref<9x128x4xbf16, #tpu.memory_space<vmem>>, vector<1x128x4xbf16>
    %168 = vector.shape_cast %167 : vector<1x128x4xbf16> to vector<128x4xbf16>
    %cst_179 = arith.constant dense<0.000000e+00> : vector<256x4xf32>
    %169 = tpu.matmul %166, %168, %cst_179 {dimension_numbers = #tpu.dot_dimension_numbers<[1], [0], [0], [1], [0, 0, 1, 1], [], []>} : vector<256x128xbf16>, vector<128x4xbf16>, vector<256x4xf32> -> vector<256x4xf32>
    %170 = arith.addf %164, %169 : vector<256x4xf32>
    %c1_180 = arith.constant 1 : index
    %c17_181 = arith.constant 17 : index
    %c0_182 = arith.constant 0 : index
    %171 = vector.load %arg10[%c1_180, %c17_181, %c0_182] : memref<18x48x128xbf16, #tpu.memory_space<vmem>>, vector<16x16x128xbf16>
    %172 = vector.shape_cast %171 : vector<16x16x128xbf16> to vector<256x128xbf16>
    %c5_183 = arith.constant 5 : index
    %c0_184 = arith.constant 0 : index
    %c0_185 = arith.constant 0 : index
    %173 = vector.load %arg7[%c5_183, %c0_184, %c0_185] : memref<9x128x4xbf16, #tpu.memory_space<vmem>>, vector<1x128x4xbf16>
    %174 = vector.shape_cast %173 : vector<1x128x4xbf16> to vector<128x4xbf16>
    %cst_186 = arith.constant dense<0.000000e+00> : vector<256x4xf32>
    %175 = tpu.matmul %172, %174, %cst_186 {dimension_numbers = #tpu.dot_dimension_numbers<[1], [0], [0], [1], [0, 0, 1, 1], [], []>} : vector<256x128xbf16>, vector<128x4xbf16>, vector<256x4xf32> -> vector<256x4xf32>
    %176 = arith.addf %170, %175 : vector<256x4xf32>
    %c2_187 = arith.constant 2 : index
    %c15_188 = arith.constant 15 : index
    %c0_189 = arith.constant 0 : index
    %177 = vector.load %arg10[%c2_187, %c15_188, %c0_189] : memref<18x48x128xbf16, #tpu.memory_space<vmem>>, vector<16x16x128xbf16>
    %178 = vector.shape_cast %177 : vector<16x16x128xbf16> to vector<256x128xbf16>
    %c6_190 = arith.constant 6 : index
    %c0_191 = arith.constant 0 : index
    %c0_192 = arith.constant 0 : index
    %179 = vector.load %arg7[%c6_190, %c0_191, %c0_192] : memref<9x128x4xbf16, #tpu.memory_space<vmem>>, vector<1x128x4xbf16>
    %180 = vector.shape_cast %179 : vector<1x128x4xbf16> to vector<128x4xbf16>
    %cst_193 = arith.constant dense<0.000000e+00> : vector<256x4xf32>
    %181 = tpu.matmul %178, %180, %cst_193 {dimension_numbers = #tpu.dot_dimension_numbers<[1], [0], [0], [1], [0, 0, 1, 1], [], []>} : vector<256x128xbf16>, vector<128x4xbf16>, vector<256x4xf32> -> vector<256x4xf32>
    %182 = arith.addf %176, %181 : vector<256x4xf32>
    %c2_194 = arith.constant 2 : index
    %c16_195 = arith.constant 16 : index
    %c0_196 = arith.constant 0 : index
    %183 = vector.load %arg10[%c2_194, %c16_195, %c0_196] : memref<18x48x128xbf16, #tpu.memory_space<vmem>>, vector<16x16x128xbf16>
    %184 = vector.shape_cast %183 : vector<16x16x128xbf16> to vector<256x128xbf16>
    %c7_197 = arith.constant 7 : index
    %c0_198 = arith.constant 0 : index
    %c0_199 = arith.constant 0 : index
    %185 = vector.load %arg7[%c7_197, %c0_198, %c0_199] : memref<9x128x4xbf16, #tpu.memory_space<vmem>>, vector<1x128x4xbf16>
    %186 = vector.shape_cast %185 : vector<1x128x4xbf16> to vector<128x4xbf16>
    %cst_200 = arith.constant dense<0.000000e+00> : vector<256x4xf32>
    %187 = tpu.matmul %184, %186, %cst_200 {dimension_numbers = #tpu.dot_dimension_numbers<[1], [0], [0], [1], [0, 0, 1, 1], [], []>} : vector<256x128xbf16>, vector<128x4xbf16>, vector<256x4xf32> -> vector<256x4xf32>
    %188 = arith.addf %182, %187 : vector<256x4xf32>
    %c2_201 = arith.constant 2 : index
    %c17_202 = arith.constant 17 : index
    %c0_203 = arith.constant 0 : index
    %189 = vector.load %arg10[%c2_201, %c17_202, %c0_203] : memref<18x48x128xbf16, #tpu.memory_space<vmem>>, vector<16x16x128xbf16>
    %190 = vector.shape_cast %189 : vector<16x16x128xbf16> to vector<256x128xbf16>
    %c8_204 = arith.constant 8 : index
    %c0_205 = arith.constant 0 : index
    %c0_206 = arith.constant 0 : index
    %191 = vector.load %arg7[%c8_204, %c0_205, %c0_206] : memref<9x128x4xbf16, #tpu.memory_space<vmem>>, vector<1x128x4xbf16>
    %192 = vector.shape_cast %191 : vector<1x128x4xbf16> to vector<128x4xbf16>
    %cst_207 = arith.constant dense<0.000000e+00> : vector<256x4xf32>
    %193 = tpu.matmul %190, %192, %cst_207 {dimension_numbers = #tpu.dot_dimension_numbers<[1], [0], [0], [1], [0, 0, 1, 1], [], []>} : vector<256x128xbf16>, vector<128x4xbf16>, vector<256x4xf32> -> vector<256x4xf32>
    %194 = arith.addf %188, %193 : vector<256x4xf32>
    %195 = vector.broadcast %2 : vector<1x4xf32> to vector<256x4xf32>
    %196 = arith.addf %194, %195 : vector<256x4xf32>
    %c0_208 = arith.constant 0 : index
    %c0_209 = arith.constant 0 : index
    %c0_210 = arith.constant 0 : index
    %c0_211 = arith.constant 0 : index
    %197 = vector.load %arg1[%c0_208, %c0_209, %c0_210, %c0_211] : memref<1x16x16x4xf32, #tpu.memory_space<vmem>>, vector<1x16x16x4xf32>
    %198 = vector.shape_cast %197 : vector<1x16x16x4xf32> to vector<16x16x4xf32>
    %199 = vector.shape_cast %198 : vector<16x16x4xf32> to vector<256x4xf32>
    %cst_212 = arith.constant dense<0.000000e+00> : vector<4xf32>
    %200 = vector.multi_reduction <add>, %199, %cst_212 [0] : vector<256x4xf32> to vector<4xf32>
    %201 = vector.shape_cast %200 : vector<4xf32> to vector<1x4xf32>
    %cst_213 = arith.constant 2.560000e+02 : f32
    %202 = vector.broadcast %cst_213 : f32 to vector<1x4xf32>
    %203 = arith.divf %201, %202 : vector<1x4xf32>
    %204 = arith.mulf %199, %199 : vector<256x4xf32>
    %cst_214 = arith.constant dense<0.000000e+00> : vector<4xf32>
    %205 = vector.multi_reduction <add>, %204, %cst_214 [0] : vector<256x4xf32> to vector<4xf32>
    %206 = vector.shape_cast %205 : vector<4xf32> to vector<1x4xf32>
    %cst_215 = arith.constant 2.560000e+02 : f32
    %207 = vector.broadcast %cst_215 : f32 to vector<1x4xf32>
    %208 = arith.divf %206, %207 : vector<1x4xf32>
    %209 = arith.mulf %203, %203 : vector<1x4xf32>
    %210 = arith.subf %208, %209 : vector<1x4xf32>
    %211 = vector.broadcast %203 : vector<1x4xf32> to vector<256x4xf32>
    %212 = arith.subf %199, %211 : vector<256x4xf32>
    %cst_216 = arith.constant 9.99999974E-6 : f32
    %213 = vector.broadcast %cst_216 : f32 to vector<1x4xf32>
    %214 = arith.addf %210, %213 : vector<1x4xf32>
    %215 = math.rsqrt %214 : vector<1x4xf32>
    %216 = vector.broadcast %215 : vector<1x4xf32> to vector<256x4xf32>
    %217 = arith.mulf %212, %216 : vector<256x4xf32>
    %cst_217 = arith.constant 1.000000e+00 : f32
    %218 = vector.broadcast %cst_217 : f32 to vector<256x4xf32>
    %219 = arith.addf %218, %141 : vector<256x4xf32>
    %220 = arith.mulf %217, %219 : vector<256x4xf32>
    %221 = arith.addf %220, %196 : vector<256x4xf32>
    %222 = vector.shape_cast %221 : vector<256x4xf32> to vector<16x16x4xf32>
    %c0_218 = arith.constant 0 : index
    %c0_219 = arith.constant 0 : index
    %c0_220 = arith.constant 0 : index
    %c0_221 = arith.constant 0 : index
    %223 = vector.load %arg9[%c0_218, %c0_219, %c0_220, %c0_221] : memref<1x16x16x4xf32, #tpu.memory_space<vmem>>, vector<1x16x16x4xf32>
    %224 = vector.shape_cast %223 : vector<1x16x16x4xf32> to vector<16x16x4xf32>
    %225 = vector.shape_cast %222 : vector<16x16x4xf32> to vector<1x16x16x4xf32>
    tpu.vector_store %arg9[%c0_218, %c0_219, %c0_220, %c0_221], %225 {strides = array<i32>} : memref<1x16x16x4xf32, #tpu.memory_space<vmem>>, vector<1x16x16x4xf32>,
    return
  }
  func.func @transform_0(%arg0: i32) -> (i32, i32, i32, i32) {
    %c0_i32 = arith.constant 0 : i32
    %c0_i32_0 = arith.constant 0 : i32
    %c0_i32_1 = arith.constant 0 : i32
    %c0_i32_2 = arith.constant 0 : i32
    return %arg0, %c0_i32, %c0_i32_0, %c0_i32_1 : i32, i32, i32, i32
  }
  func.func @transform_1(%arg0: i32) -> (i32, i32, i32, i32) {
    %c0_i32 = arith.constant 0 : i32
    %c0_i32_0 = arith.constant 0 : i32
    %c0_i32_1 = arith.constant 0 : i32
    %c0_i32_2 = arith.constant 0 : i32
    return %arg0, %c0_i32, %c0_i32_0, %c0_i32_1 : i32, i32, i32, i32
  }
  func.func @transform_2(%arg0: i32) -> (i32, i32, i32) {
    %c0_i32 = arith.constant 0 : i32
    %c0_i32_0 = arith.constant 0 : i32
    %c0_i32_1 = arith.constant 0 : i32
    %c0_i32_2 = arith.constant 0 : i32
    return %c0_i32, %c0_i32_0, %c0_i32_1 : i32, i32, i32
  }
  func.func @transform_3(%arg0: i32) -> (i32, i32) {
    %c0_i32 = arith.constant 0 : i32
    %c0_i32_0 = arith.constant 0 : i32
    %c0_i32_1 = arith.constant 0 : i32
    return %c0_i32, %c0_i32_0 : i32, i32
  }
  func.func @transform_4(%arg0: i32) -> (i32, i32, i32) {
    %c0_i32 = arith.constant 0 : i32
    %c0_i32_0 = arith.constant 0 : i32
    %c0_i32_1 = arith.constant 0 : i32
    %c0_i32_2 = arith.constant 0 : i32
    return %c0_i32, %c0_i32_0, %c0_i32_1 : i32, i32, i32
  }
  func.func @transform_5(%arg0: i32) -> (i32, i32) {
    %c0_i32 = arith.constant 0 : i32
    %c0_i32_0 = arith.constant 0 : i32
    %c0_i32_1 = arith.constant 0 : i32
    return %c0_i32, %c0_i32_0 : i32, i32
  }
  func.func @transform_6(%arg0: i32) -> (i32, i32, i32) {
    %c0_i32 = arith.constant 0 : i32
    %c0_i32_0 = arith.constant 0 : i32
    %c0_i32_1 = arith.constant 0 : i32
    %c0_i32_2 = arith.constant 0 : i32
    return %c0_i32, %c0_i32_0, %c0_i32_1 : i32, i32, i32
  }
  func.func @transform_7(%arg0: i32) -> (i32, i32) {
    %c0_i32 = arith.constant 0 : i32
    %c0_i32_0 = arith.constant 0 : i32
    %c0_i32_1 = arith.constant 0 : i32
    return %c0_i32, %c0_i32_0 : i32, i32
  }
  func.func @transform_8(%arg0: i32) -> (i32, i32, i32, i32) {
    %c0_i32 = arith.constant 0 : i32
    %c0_i32_0 = arith.constant 0 : i32
    %c0_i32_1 = arith.constant 0 : i32
    %c0_i32_2 = arith.constant 0 : i32
    return %arg0, %c0_i32, %c0_i32_0, %c0_i32_1 : i32, i32, i32, i32
  }
}

</mosaic_0001>

<bundles_post_ra>
// kernel: tpu_custom_call.1
= control target key start
LH: loop header
LB: loop body
LE: loop exit
PB: predicated region body
PF: predicated region fallthrough
CT: control target
= control target key end

     0   :  { %s11334_s27 = smov 0   ;;  %s15773_s0 = inlined_call_operand.vmem [shape: f32[2,16,16,4], index: 0, kind: input, shape index: {}]   ;;  %s15774_s1 = inlined_call_operand.vmem [shape: f32[2,18,48,3], index: 1, kind: input, shape index: {}]   ;;  %s15775_s2 = inlined_call_operand.vmem [shape: bf16[9,3,128], index: 2, kind: input, shape index: {}]   ;;  %s15776_s3 = inlined_call_operand.vmem [shape: f32[1,128], index: 3, kind: input, shape index: {}]   ;;  %s15777_s4 = inlined_call_operand.vmem [shape: bf16[9,128,4], index: 4, kind: input, shape index: {}]   ;;  %s15778_s5 = inlined_call_operand.vmem [shape: f32[1,4], index: 5, kind: input, shape index: {}]   ;;  %s15779_s6 = inlined_call_operand.vmem [shape: bf16[9,128,4], index: 6, kind: input, shape index: {}]   ;;  %s15780_s7 = inlined_call_operand.vmem [shape: f32[1,4], index: 7, kind: input, shape index: {}]   ;;  %s15781_s8 = inlined_call_operand.vmem [shape: f32[2,16,16,4], index: 8, kind: output, shape index: {}]  }
   0x1 LB: > { %s9467_s28 = sadd.s32 4294967295, %s11284_s27   ;;  %p9471_p0 = scmp.ge.s32.totalorder %s11284_s27, 1  ;;  %s11284_s27 = sphi %s11334_s27, %s18_s27  }
   0x2   : > { %p272_p1 = scmp.lt.s32.totalorder %s11284_s27, 3 }
   0x4   : > { %p273_p2 = pnand %p9471_p0, %p272_p1 }
   0x6   : > { %276 = sbr.rel (%p273_p2) target bundleno = 2085 (0x825), region = 52 }
   0xb   : > { %v9477_v0 = vld [vmem:[%s15775_s2 + $0x2] sm:$0x3]  ;;  %vm478_vm0 = vcmask 1040384   ;;  %vm479_vm1 = vcmask 1041408   ;;  %p311_p3 = scmp.lt.s32.totalorder %s9467_s28, 1  ;;  %v11286_v1 = vmov 65535  }
   0xc   : > { %v480_v2 = vsel %vm478_vm0, 4294967295, %v11286_v1  ;;  %v378_v4 = vld [vmem:[%s15775_s2] sm:$0x3]  ;;  %v9510_v5 = vld [vmem:[%s15775_s2 + $0x4] sm:$0x3]  ;;  %vm429_vm2 = vcmask 23552  }
   0xd   : > { %v11346_v3 = vsel %vm479_vm1, %v480_v2, 0  ;;  %s16359_s28 = smov (!%p311_p3, %s9467_s28), 1  ;;  %v9608_v9 = vld [vmem:[%s15775_s2 + $0x8] sm:$0x3]  ;;  %vm2337_vm3 = vcmask 1043459   ;;  %vm9015_vm13 = vcmask 31744  }
   0xe   : > { %v483_v6 = vand.u32 %v9477_v0, %v11346_v3  ;;  %v623_v7 = vand.u32 %v11346_v3, %v378_v4  ;;  %v813_v8 = vand.u32 %v9510_v5, %v11346_v3  ;;  %s11188_s15 = smul.u32 864, %s16359_s28  ;;  %v1258_v10 = vand.u32 %v9608_v9, %v11346_v3  ;;  %s10895_s23 = sshll.u32 %s16359_s28, 8 }
   0xf   : > { %vm2338_vm4 = vsmask.f32 7950  ;;  %vm2346_vm6 = vsmask.f32 256  ;;  %vm2569_vm7 = vsmask.f32 4368  ;;  %s15006_s26 = scalar_lea.vmem %s15773_s0, %s10895_s23  ;;  %s15420_s16 = scalar_lea.vmem %s15781_s8, %s10895_s23 }
  0x10   : > { %492 = vmatpush.bf16.msra.mxu0 %v483_v6  ;;  %11185 = vmatpush.bf16.msra.mxu3 %v483_v6  ;;  %s11367_s18 = scalar_lea.vmem %s15774_s1, %s11188_s15  ;;  %vm12107_vm5 = vmand %vm2337_vm3, %vm2338_vm4  ;;  %vm3438_vm10 = vsmask.f32 3328  ;;  %vm3439_vm11 = vsmask.f32 7440 }
  0x11   : > { %632 = vmatpush.bf16.msra.mxu1 %v623_v7  ;;  %822 = vmatpush.bf16.msra.mxu2 %v813_v8  ;;  %v379_v11 = vld [vmem:[%s11367_s18 + $0x10] sm:$0xff]  ;;  %v380_v12 = vld [vmem:[%s11367_s18 + $0x18] sm:$0xff]  ;;  %v381_v23 = vld [vmem:[%s11367_s18 + $0x40] sm:$0xff] }
  0x12   : > { %v403_v13 = vld [vmem:[%s11367_s18 + $0x250] sm:$0xff]  ;;  %v411_v14 = vpack.c.bf16 %v380_v12, %v379_v11  ;;  %v404_v15 = vld [vmem:[%s11367_s18 + $0x258] sm:$0xff]  ;;  %v382_v24 = vld [vmem:[%s11367_s18 + $0x48] sm:$0xff] }
  0x13   : > { %v330_v16 = vld [vmem:[%s11367_s18 + $0xf] sm:$0xff]  ;;  %v331_v17 = vld [vmem:[%s11367_s18 + $0x17] sm:$0xff]  ;;  %v423_v18 = vpack.c.bf16 %v404_v15, %v403_v13  ;;  %v405_v25 = vld [vmem:[%s11367_s18 + $0x280] sm:$0xff]  ;;  %v11389_v31 = vpack.c.bf16 %v382_v24, %v381_v23 }
  0x14   : > { %11186 = vmatpush.bf16.msrb.mxu3 %v623_v7  ;;  %1267 = vmatpush.bf16.msrb.mxu0 %v1258_v10  ;;  %v362_v19 = vpack.c.bf16 %v331_v17, %v330_v16  ;;  %v714_v20 = vld [vmem:[%s11367_s18 + $0x11] sm:$0xff]  ;;  %v715_v21 = vld [vmem:[%s11367_s18 + $0x19] sm:$0xff]  ;;  %v406_v26 = vld [vmem:[%s11367_s18 + $0x288] sm:$0xff] }
  0x15   : > { %9478 = vmatmul.msk.bf16.vlgmr.msra.gmra.mxu0 %vm429_vm2, %v411_v14  ;;  %v746_v22 = vpack.c.bf16 %v715_v21, %v714_v20  ;;  %9490 = vmatmul.msk.bf16.vlgmr.msra.gmra.mxu3 %vm429_vm2, %v423_v18  ;;  %v332_v27 = vld [vmem:[%s11367_s18 + $0x3f] sm:$0xff]  ;;  %v333_v28 = vld [vmem:[%s11367_s18 + $0x47] sm:$0xff]  ;;  %v424_v32 = vpack.c.bf16 %v406_v26, %v405_v25  ;;  %v383_v35 = vld [vmem:[%s11367_s18 + $0x70] sm:$0xff] }
  0x16   : > { %9494 = vmatmul.msk.bf16.vlgmr.msra.gmra.mxu1 %vm429_vm2, %v362_v19  ;;  %v716_v29 = vld [vmem:[%s11367_s18 + $0x41] sm:$0xff]  ;;  %v717_v30 = vld [vmem:[%s11367_s18 + $0x49] sm:$0xff]  ;;  %v11391_v33 = vpack.c.bf16 %v333_v28, %v332_v27  ;;  %v384_v36 = vld [vmem:[%s11367_s18 + $0x78] sm:$0xff] }
  0x17   : > { %9511 = vmatmul.msk.bf16.vlgmr.msra.gmra.mxu2 %vm429_vm2, %v746_v22  ;;  %v11393_v34 = vpack.c.bf16 %v717_v30, %v716_v29  ;;  %v407_v37 = vld [vmem:[%s11367_s18 + $0x2b0] sm:$0xff]  ;;  %v408_v38 = vld [vmem:[%s11367_s18 + $0x2b8] sm:$0xff]  ;;  %v11410_v43 = vpack.c.bf16 %v384_v36, %v383_v35  ;;  %v385_v47 = vld [vmem:[%s11367_s18 + $0xa0] sm:$0xff] }
  0x18   : > { %11187 = vmatpush.bf16.msra.mxu3 %v813_v8  ;;  %v334_v39 = vld [vmem:[%s11367_s18 + $0x6f] sm:$0xff]  ;;  %v335_v40 = vld [vmem:[%s11367_s18 + $0x77] sm:$0xff]  ;;  %v425_v44 = vpack.c.bf16 %v408_v38, %v407_v37  ;;  %v409_v49 = vld [vmem:[%s11367_s18 + $0x2e0] sm:$0xff] }
  0x19   : > { %v718_v41 = vld [vmem:[%s11367_s18 + $0x71] sm:$0xff]  ;;  %v719_v42 = vld [vmem:[%s11367_s18 + $0x79] sm:$0xff]  ;;  %v11412_v45 = vpack.c.bf16 %v335_v40, %v334_v39  ;;  %v386_v48 = vld [vmem:[%s11367_s18 + $0xa8] sm:$0xff] }
  0x1a   : > { %v11414_v46 = vpack.c.bf16 %v719_v42, %v718_v41  ;;  %v410_v50 = vld [vmem:[%s11367_s18 + $0x2e8] sm:$0xff]  ;;  %v336_v51 = vld [vmem:[%s11367_s18 + $0x9f] sm:$0xff]  ;;  %v11431_v55 = vpack.c.bf16 %v386_v48, %v385_v47  ;;  %v387_v59 = vld [vmem:[%s11367_s18 + $0xd0] sm:$0xff] }
  0x1b   : > { %v337_v52 = vld [vmem:[%s11367_s18 + $0xa7] sm:$0xff]  ;;  %v426_v56 = vpack.c.bf16 %v410_v50, %v409_v49  ;;  %v388_v60 = vld [vmem:[%s11367_s18 + $0xd8] sm:$0xff]  ;;  %v338_v61 = vld [vmem:[%s11367_s18 + $0xcf] sm:$0xff] }
  0x1c   : > { %v720_v53 = vld [vmem:[%s11367_s18 + $0xa1] sm:$0xff]  ;;  %v721_v54 = vld [vmem:[%s11367_s18 + $0xa9] sm:$0xff]  ;;  %v11433_v57 = vpack.c.bf16 %v337_v52, %v336_v51  ;;  %v339_v62 = vld [vmem:[%s11367_s18 + $0xd7] sm:$0xff]  ;;  %v11452_v4 = vpack.c.bf16 %v388_v60, %v387_v59 }
  0x1d   : > { %v11435_v58 = vpack.c.bf16 %v721_v54, %v720_v53  ;;  %v354_v63 = vld [vmem:[%s11367_s18 + $0x24f] sm:$0xff]  ;;  %v355_v0 = vld [vmem:[%s11367_s18 + $0x257] sm:$0xff]  ;;  %v11454_v5 = vpack.c.bf16 %v339_v62, %v338_v61  ;;  %v389_v8 = vld [vmem:[%s11367_s18 + $0x100] sm:$0xff] }
  0x1e   : > { %v722_v1 = vld [vmem:[%s11367_s18 + $0xd1] sm:$0xff]  ;;  %v723_v2 = vld [vmem:[%s11367_s18 + $0xd9] sm:$0xff]  ;;  %v11456_v6 = vpack.c.bf16 %v355_v0, %v354_v63  ;;  %v390_v9 = vld [vmem:[%s11367_s18 + $0x108] sm:$0xff] }
  0x1f   : > { %v11458_v7 = vpack.c.bf16 %v723_v2, %v722_v1  ;;  %v340_v10 = vld [vmem:[%s11367_s18 + $0xff] sm:$0xff]  ;;  %v341_v11 = vld [vmem:[%s11367_s18 + $0x107] sm:$0xff]  ;;  %v11476_v16 = vpack.c.bf16 %v390_v9, %v389_v8  ;;  %v391_v20 = vld [vmem:[%s11367_s18 + $0x130] sm:$0xff] }
  0x20   : > { %v356_v12 = vld [vmem:[%s11367_s18 + $0x27f] sm:$0xff]  ;;  %v357_v13 = vld [vmem:[%s11367_s18 + $0x287] sm:$0xff]  ;;  %v11478_v17 = vpack.c.bf16 %v341_v11, %v340_v10  ;;  %v342_v22 = vld [vmem:[%s11367_s18 + $0x12f] sm:$0xff] }
  0x21   : > { %v724_v14 = vld [vmem:[%s11367_s18 + $0x101] sm:$0xff]  ;;  %v725_v15 = vld [vmem:[%s11367_s18 + $0x109] sm:$0xff]  ;;  %v375_v18 = vpack.c.bf16 %v357_v13, %v356_v12  ;;  %v392_v21 = vld [vmem:[%s11367_s18 + $0x138] sm:$0xff] }
  0x22   : > { %v11480_v19 = vpack.c.bf16 %v725_v15, %v724_v14  ;;  %v343_v23 = vld [vmem:[%s11367_s18 + $0x137] sm:$0xff]  ;;  %v358_v24 = vld [vmem:[%s11367_s18 + $0x2af] sm:$0xff]  ;;  %v11497_v28 = vpack.c.bf16 %v392_v21, %v391_v20  ;;  %v9559_v35 = vld [vmem:[%s15775_s2 + $0x6] sm:$0x3] }
  0x23   : > { %v359_v25 = vld [vmem:[%s11367_s18 + $0x2b7] sm:$0xff]  ;;  %v11499_v29 = vpack.c.bf16 %v343_v23, %v342_v22  ;;  %v1036_v36 = vand.u32 %v9559_v35, %v11346_v3  ;;  %v393_v37 = vld [vmem:[%s11367_s18 + $0x160] sm:$0xff]  ;;  %v394_v38 = vld [vmem:[%s11367_s18 + $0x168] sm:$0xff] }
  0x24   : > { %v726_v26 = vld [vmem:[%s11367_s18 + $0x131] sm:$0xff]  ;;  %v727_v27 = vld [vmem:[%s11367_s18 + $0x139] sm:$0xff]  ;;  %v376_v30 = vpack.c.bf16 %v359_v25, %v358_v24  ;;  %v345_v40 = vld [vmem:[%s11367_s18 + $0x167] sm:$0xff]  ;;  %v11522_v48 = vpack.c.bf16 %v394_v38, %v393_v37 }
  0x25   : > { %9479 = vmatmul.msk.bf16.gmra.mxu0 %vm429_vm2, %v11389_v31  ;;  %9491 = vmatmul.msk.bf16.gmra.mxu3 %vm429_vm2, %v424_v32  ;;  %v11501_v32 = vpack.c.bf16 %v727_v27, %v726_v26  ;;  %v344_v39 = vld [vmem:[%s11367_s18 + $0x15f] sm:$0xff]  ;;  %v361_v42 = vld [vmem:[%s11367_s18 + $0x2e7] sm:$0xff]  ;;  %v395_v54 = vld [vmem:[%s11367_s18 + $0x190] sm:$0xff] }
  0x26   : > { %9495 = vmatmul.msk.bf16.gmra.mxu1 %vm429_vm2, %v11391_v33  ;;  %v360_v41 = vld [vmem:[%s11367_s18 + $0x2df] sm:$0xff]  ;;  %v729_v47 = vld [vmem:[%s11367_s18 + $0x169] sm:$0xff]  ;;  %v11524_v49 = vpack.c.bf16 %v345_v40, %v344_v39  ;;  %v347_v60 = vld [vmem:[%s11367_s18 + $0x197] sm:$0xff] }
  0x27   : > { %9512 = vmatmul.msk.bf16.gmra.mxu2 %vm429_vm2, %v11393_v34  ;;  %v377_v50 = vpack.c.bf16 %v361_v42, %v360_v41  ;;  %v9706_v52 = vld [vmem:[%s15775_s2 + $0xc] sm:$0x3]  ;;  %v346_v59 = vld [vmem:[%s11367_s18 + $0x18f] sm:$0xff]  ;;  %v739_v62 = vld [vmem:[%s11367_s18 + $0x259] sm:$0xff] }
  0x28   : > { %v1703_v53 = vand.u32 %v9706_v52, %v11346_v3  ;;  %v738_v61 = vld [vmem:[%s11367_s18 + $0x251] sm:$0xff]  ;;  %v731_v0 = vld [vmem:[%s11367_s18 + $0x199] sm:$0xff]  ;;  %v11549_v8 = vpack.c.bf16 %v347_v60, %v346_v59  ;;  %v9657_v13 = vld [vmem:[%s15775_s2 + $0xa] sm:$0x3] }
  0x29   : > { %v730_v63 = vld [vmem:[%s11367_s18 + $0x191] sm:$0xff]  ;;  %v11551_v9 = vpack.c.bf16 %v739_v62, %v738_v61  ;;  %v1480_v14 = vand.u32 %v9657_v13, %v11346_v3  ;;  %v397_v24 = vld [vmem:[%s11367_s18 + $0x1c0] sm:$0xff]  ;;  %v398_v25 = vld [vmem:[%s11367_s18 + $0x1c8] sm:$0xff] }
  0x2a   : > { %1712 = vmatpush.bf16.msrb.mxu2 %v1703_v53  ;;  %v11553_v11 = vpack.c.bf16 %v731_v0, %v730_v63  ;;  %v348_v26 = vld [vmem:[%s11367_s18 + $0x1bf] sm:$0xff]  ;;  %v349_v27 = vld [vmem:[%s11367_s18 + $0x1c7] sm:$0xff]  ;;  %v11581_v39 = vpack.c.bf16 %v398_v25, %v397_v24  ;;  %v399_v63 = vld [vmem:[%s11367_s18 + $0x1f0] sm:$0xff] }
  0x2b   : > { %1489 = vmatpush.bf16.msrb.mxu1 %v1480_v14  ;;  %v741_v35 = vld [vmem:[%s11367_s18 + $0x289] sm:$0xff]  ;;  %v11583_v42 = vpack.c.bf16 %v349_v27, %v348_v26  ;;  %v400_v0 = vld [vmem:[%s11367_s18 + $0x1f8] sm:$0xff]  ;;  %vm12121_vm8 = vmor %vm2346_vm6, %vm2569_vm7 }
  0x2c   : > { %v733_v37 = vld [vmem:[%s11367_s18 + $0x1c9] sm:$0xff]  ;;  %v743_v13 = vld [vmem:[%s11367_s18 + $0x2b9] sm:$0xff]  ;;  %v734_v14 = vld [vmem:[%s11367_s18 + $0x1f1] sm:$0xff] }
  0x2d   : > { %vm12166_vm9 = vmand %vm478_vm0, %vm2346_vm6 }
  0x2e   : > { %vm12503_vm12 = vmor %vm3438_vm10, %vm3439_vm11 }
  0x35   : > { %9480 = vmatmul.msk.bf16.gmra.mxu0 %vm429_vm2, %v11410_v43  ;;  %9492 = vmatmul.msk.bf16.gmra.mxu3 %vm429_vm2, %v425_v44  ;;  %v728_v44 = vld [vmem:[%s11367_s18 + $0x161] sm:$0xff] }
  0x36   : > { %9496 = vmatmul.msk.bf16.gmra.mxu1 %vm429_vm2, %v11412_v45  ;;  %v11526_v51 = vpack.c.bf16 %v729_v47, %v728_v44 }
  0x37   : > { %9513 = vmatmul.msk.bf16.gmra.mxu2 %vm429_vm2, %v11414_v46 }
  0x45   : > { %9481 = vmatmul.msk.bf16.gmra.mxu0 %vm429_vm2, %v11431_v55  ;;  %9493 = vmatmul.msk.bf16.gmra.mxu3 %vm429_vm2, %v426_v56  ;;  %v396_v56 = vld [vmem:[%s11367_s18 + $0x198] sm:$0xff] }
  0x46   : > { %9497 = vmatmul.msk.bf16.gmra.mxu1 %vm429_vm2, %v11433_v57  ;;  %v11547_v1 = vpack.c.bf16 %v396_v56, %v395_v54 }
  0x47   : > { %9514 = vmatmul.msk.bf16.gmra.mxu2 %vm429_vm2, %v11435_v58 }
  0x55   : > { %9482 = vmatmul.msk.bf16.gmra.mxu0 %vm429_vm2, %v11452_v4  ;;  %9506 = vmatmul.msk.bf16.vlgmr.msrb.gmra.mxu3 %vm429_vm2, %v11456_v6 }
  0x56   : > { %9498 = vmatmul.msk.bf16.gmra.mxu1 %vm429_vm2, %v11454_v5  ;;  %1045 = vmatpush.bf16.msrb.mxu3 %v1036_v36  ;;  %v732_v36 = vld [vmem:[%s11367_s18 + $0x1c1] sm:$0xff] }
  0x57   : > { %9515 = vmatmul.msk.bf16.gmra.mxu2 %vm429_vm2, %v11458_v7  ;;  %v11589_v52 = vpack.c.bf16 %v733_v37, %v732_v36  ;;  %v9755_v37 = vld [vmem:[%s15775_s2 + $0xe] sm:$0x3] }
  0x65   : > { %9483 = vmatmul.msk.bf16.gmra.mxu0 %vm429_vm2, %v11476_v16  ;;  %9507 = vmatmul.msk.bf16.gmra.mxu3 %vm429_vm2, %v375_v18 }
  0x66   : > { %9499 = vmatmul.msk.bf16.gmra.mxu1 %vm429_vm2, %v11478_v17 }
  0x67   : > { %9516 = vmatmul.msk.bf16.gmra.mxu2 %vm429_vm2, %v11480_v19 }
  0x75   : > { %9484 = vmatmul.msk.bf16.gmra.mxu0 %vm429_vm2, %v11497_v28  ;;  %9508 = vmatmul.msk.bf16.gmra.mxu3 %vm429_vm2, %v376_v30  ;;  %v740_v30 = vld [vmem:[%s11367_s18 + $0x281] sm:$0xff] }
  0x76   : > { %9500 = vmatmul.msk.bf16.gmra.mxu1 %vm429_vm2, %v11499_v29  ;;  %v11585_v44 = vpack.c.bf16 %v741_v35, %v740_v30 }
  0x77   : > { %9517 = vmatmul.msk.bf16.gmra.mxu2 %vm429_vm2, %v11501_v32 }
  0x85   : > { %9485 = vmatmul.msk.bf16.gmra.mxu0 %vm429_vm2, %v11522_v48  ;;  %9509 = vmatmul.msk.bf16.gmra.mxu3 %vm429_vm2, %v377_v50 }
  0x86   : > { %9501 = vmatmul.msk.bf16.gmra.mxu1 %vm429_vm2, %v11524_v49 }
  0x87   : > { %9518 = vmatmul.msk.bf16.gmra.mxu2 %vm429_vm2, %v11526_v51 }
  0x92   : > { %v494_v2 = vpop.f32.mrf.mxu0 }
  0x93   : > { %v634_v10 = vpop.f32.mrf.mxu1 }
  0x94   : > { %v635_v12 = vadd.f32 %v634_v10, %v494_v2  ;;  %v350_v2 = vld [vmem:[%s11367_s18 + $0x1ef] sm:$0xff]  ;;  %v351_v10 = vld [vmem:[%s11367_s18 + $0x1f7] sm:$0xff] }
  0x95   : > { %9486 = vmatmul.msk.bf16.gmra.mxu0 %vm429_vm2, %v11547_v1  ;;  %9523 = vmatmul.msk.bf16.vlgmr.msra.gmra.mxu3 %vm429_vm2, %v11551_v9  ;;  %v11615_v25 = vpack.c.bf16 %v351_v10, %v350_v2  ;;  %v402_v2 = vld [vmem:[%s11367_s18 + $0x228] sm:$0xff]  ;;  %v352_v10 = vld [vmem:[%s11367_s18 + $0x21f] sm:$0xff] }
  0x96   : > { %9502 = vmatmul.msk.bf16.gmra.mxu1 %vm429_vm2, %v11549_v8 }
  0x97   : > { %9519 = vmatmul.msk.bf16.gmra.mxu2 %vm429_vm2, %v11553_v11 }
  0x98   : > { %v11567_v15 = vpop.f32.mrf.mxu3 }
  0x9a   : > { %v824_v18 = vpop.f32.mrf.mxu2  ;;  %v496_v20 = vpop.f32.mrf.mxu0 }
  0x9b   : > { %v11569_v21 = vadd.f32 %v824_v18, %v635_v12  ;;  %v636_v22 = vpop.f32.mrf.mxu1  ;;  %v742_v12 = vld [vmem:[%s11367_s18 + $0x2b1] sm:$0xff]  ;;  %v735_v18 = vld [vmem:[%s11367_s18 + $0x1f9] sm:$0xff] }
  0x9c   : > { %v637_v23 = vadd.f32 %v636_v22, %v496_v20  ;;  %v11613_v22 = vpack.c.bf16 %v400_v0, %v399_v63  ;;  %v11617_v26 = vpack.c.bf16 %v743_v13, %v742_v12  ;;  %v11621_v35 = vpack.c.bf16 %v735_v18, %v734_v14  ;;  %v401_v0 = vld [vmem:[%s11367_s18 + $0x220] sm:$0xff]  ;;  %v745_v14 = vld [vmem:[%s11367_s18 + $0x2e9] sm:$0xff] }
  0x9d   : > { %v353_v12 = vld [vmem:[%s11367_s18 + $0x227] sm:$0xff] }
  0x9e   : > { %15891 = vst [vmem:[#allocation3_spill] sm:$0xff] %v11617_v26  ;;  %v744_v13 = vld [vmem:[%s11367_s18 + $0x2e1] sm:$0xff] }
  0x9f   : > { %v736_v18 = vld [vmem:[%s11367_s18 + $0x221] sm:$0xff] }
  0xa0   : > { %v11579_v38 = vpop.f32.mrf.mxu3 }
  0xa2   : > { %v826_v40 = vpop.f32.mrf.mxu2  ;;  %v499_v41 = vpop.f32.mrf.mxu0 }
  0xa3   : > { %v11587_v47 = vadd.f32 %v826_v40, %v637_v23  ;;  %v639_v50 = vpop.f32.mrf.mxu1  ;;  %v1925_v40 = vand.u32 %v9755_v37, %v11346_v3 }
  0xa4   : > { %v640_v53 = vadd.f32 %v639_v50, %v499_v41 }
  0xa5   : > { %9487 = vmatmul.msk.bf16.gmra.mxu0 %vm429_vm2, %v11581_v39  ;;  %9524 = vmatmul.msk.bf16.gmra.mxu3 %vm429_vm2, %v11585_v44 }
  0xa6   : > { %9503 = vmatmul.msk.bf16.gmra.mxu1 %vm429_vm2, %v11583_v42  ;;  %1934 = vmatpush.bf16.msra.mxu3 %v1925_v40  ;;  %v11655_v40 = vpack.c.bf16 %v353_v12, %v352_v10 }
  0xa7   : > { %9520 = vmatmul.msk.bf16.gmra.mxu2 %vm429_vm2, %v11589_v52 }
  0xa8   : > { %v11599_v54 = vpop.f32.mrf.mxu3 }
  0xaa   : > { %v829_v56 = vpop.f32.mrf.mxu2  ;;  %v501_v59 = vpop.f32.mrf.mxu0 }
  0xab   : > { %v11601_v60 = vadd.f32 %v829_v56, %v640_v53  ;;  %v641_v61 = vpop.f32.mrf.mxu1 }
  0xac   : > { %v642_v62 = vadd.f32 %v641_v61, %v501_v59 }
  0xb0   : > { %v11611_v20 = vpop.f32.mrf.mxu3 }
  0xb2   : > { %v831_v23 = vpop.f32.mrf.mxu2  ;;  %v504_v24 = vpop.f32.mrf.mxu0 }
  0xb3   : > { %v11619_v27 = vadd.f32 %v831_v23, %v642_v62  ;;  %v644_v30 = vpop.f32.mrf.mxu1  ;;  %v9804_v62 = vld [vmem:[%s15775_s2 + $0x10] sm:$0x3] }
  0xb4   : > { %v645_v36 = vadd.f32 %v644_v30, %v504_v24  ;;  %v2147_v63 = vand.u32 %v9804_v62, %v11346_v3  ;;  %v737_v23 = vld [vmem:[%s11367_s18 + $0x229] sm:$0xff]  ;;  %v11653_v30 = vpack.c.bf16 %v402_v2, %v401_v0 }
  0xb5   : > { %9488 = vmatmul.msk.bf16.gmra.mxu0 %vm429_vm2, %v11613_v22  ;;  %9525 = vmatmul.msk.bf16.gmra.mxu3 %vm429_vm2, %v11617_v26 }
  0xb6   : > { %9504 = vmatmul.msk.bf16.gmra.mxu1 %vm429_vm2, %v11615_v25  ;;  %2156 = vmatpush.bf16.msra.mxu0 %v2147_v63 }
  0xb7   : > { %9521 = vmatmul.msk.bf16.gmra.mxu2 %vm429_vm2, %v11621_v35 }
  0xb8   : > { %v11635_v41 = vpop.f32.mrf.mxu3 }
  0xba   : > { %v834_v50 = vpop.f32.mrf.mxu2  ;;  %v506_v53 = vpop.f32.mrf.mxu0 }
  0xbb   : > { %v11637_v56 = vadd.f32 %v834_v50, %v645_v36  ;;  %v646_v59 = vpop.f32.mrf.mxu1  ;;  %v11657_v50 = vpack.c.bf16 %v745_v14, %v744_v13 }
  0xbc   : > { %v647_v61 = vadd.f32 %v646_v59, %v506_v53  ;;  %v11661_v59 = vpack.c.bf16 %v737_v23, %v736_v18 }
  0xbd   : > { %15892 = vst [vmem:[#allocation4_spill] sm:$0xff] %v11657_v50 }
  0xc0   : > { %v11651_v24 = vpop.f32.mrf.mxu3 }
  0xc2   : > { %v836_v36 = vpop.f32.mrf.mxu2  ;;  %v509_v37 = vpop.f32.mrf.mxu0 }
  0xc3   : > { %v11659_v3 = vadd.f32 %v836_v36, %v647_v61  ;;  %v649_v53 = vpop.f32.mrf.mxu1 }
  0xc4   : > { %v650_v62 = vadd.f32 %v649_v53, %v509_v37 }
  0xc5   : > { %9489 = vmatmul.msk.bf16.gmra.mxu0 %vm429_vm2, %v11653_v30  ;;  %9526 = vmatmul.msk.bf16.gmra.mxu3 %vm429_vm2, %v11657_v50 }
  0xc6   : > { %9505 = vmatmul.msk.bf16.gmra.mxu1 %vm429_vm2, %v11655_v40 }
  0xc7   : > { %9522 = vmatmul.msk.bf16.gmra.mxu2 %vm429_vm2, %v11661_v59 }
  0xc8   : > { %v11671_v63 = vpop.f32.mrf.mxu3 }
  0xca   : > { %v839_v61 = vpop.f32.mrf.mxu2  ;;  %v511_v0 = vpop.f32.mrf.mxu0 }
  0xcb   : > { %v11673_v2 = vadd.f32 %v839_v61, %v650_v62  ;;  %v651_v10 = vpop.f32.mrf.mxu1 }
  0xcc   : > { %v652_v12 = vadd.f32 %v651_v10, %v511_v0 }
  0xd0   : > { %v11675_v13 = vpop.f32.mrf.mxu3 }
  0xd2   : > { %v841_v14 = vpop.f32.mrf.mxu2  ;;  %v514_v18 = vpop.f32.mrf.mxu0 }
  0xd3   : > { %v11677_v23 = vadd.f32 %v841_v14, %v652_v12  ;;  %v654_v36 = vpop.f32.mrf.mxu1 }
  0xd4   : > { %v655_v37 = vadd.f32 %v654_v36, %v514_v18 }
  0xd5   : > { %9609 = vmatmul.msk.bf16.vlgmr.msrb.gmra.mxu0 %vm429_vm2, %v11389_v31  ;;  %9560 = vmatmul.msk.bf16.vlgmr.msrb.gmra.mxu3 %vm429_vm2, %v11391_v33 }
  0xd6   : > { %9658 = vmatmul.msk.bf16.vlgmr.msrb.gmra.mxu1 %vm429_vm2, %v11393_v34 }
  0xd7   : > { %9707 = vmatmul.msk.bf16.vlgmr.msrb.gmra.mxu2 %vm429_vm2, %v11412_v45 }
  0xd8   : > { %v694_v53 = vpop.f32.mrf.mxu3 }
  0xd9   : > { %v11688_v62 = vadd.f32 %v694_v53, %v11567_v15 }
  0xda   : > { %v844_v61 = vpop.f32.mrf.mxu2  ;;  %v516_v0 = vpop.f32.mrf.mxu0 }
  0xdb   : > { %v11690_v10 = vadd.f32 %v844_v61, %v655_v37  ;;  %v656_v12 = vpop.f32.mrf.mxu1 }
  0xdc   : > { %v657_v14 = vadd.f32 %v656_v12, %v516_v0 }
  0xe0   : > { %v696_v31 = vpop.f32.mrf.mxu3 }
  0xe1   : > { %v11693_v18 = vadd.f32 %v696_v31, %v11579_v38 }
  0xe2   : > { %v846_v33 = vpop.f32.mrf.mxu2  ;;  %v519_v36 = vpop.f32.mrf.mxu0 }
  0xe3   : > { %v11695_v34 = vadd.f32 %v846_v33, %v657_v14  ;;  %v659_v50 = vpop.f32.mrf.mxu1 }
  0xe4   : > { %v660_v26 = vadd.f32 %v659_v50, %v519_v36 }
  0xe5   : > { %9610 = vmatmul.msk.bf16.gmra.mxu0 %vm429_vm2, %v11410_v43  ;;  %9561 = vmatmul.msk.bf16.gmra.mxu3 %vm429_vm2, %v11412_v45 }
  0xe6   : > { %9659 = vmatmul.msk.bf16.gmra.mxu1 %vm429_vm2, %v11414_v46 }
  0xe7   : > { %9708 = vmatmul.msk.bf16.gmra.mxu2 %vm429_vm2, %v11433_v57 }
  0xe8   : > { %v699_v15 = vpop.f32.mrf.mxu3 }
  0xe9   : > { %v11706_v38 = vadd.f32 %v699_v15, %v11599_v54 }
  0xea   : > { %v849_v37 = vpop.f32.mrf.mxu2  ;;  %v521_v53 = vpop.f32.mrf.mxu0 }
  0xeb   : > { %v11708_v61 = vadd.f32 %v849_v37, %v660_v26  ;;  %v661_v50 = vpop.f32.mrf.mxu1 }
  0xec   : > { %v662_v0 = vadd.f32 %v661_v50, %v521_v53 }
  0xf0   : > { %v701_v43 = vpop.f32.mrf.mxu3 }
  0xf1   : > { %v11711_v12 = vadd.f32 %v701_v43, %v11611_v20 }
  0xf2   : > { %v851_v45 = vpop.f32.mrf.mxu2  ;;  %v524_v14 = vpop.f32.mrf.mxu0 }
  0xf3   : > { %v11713_v46 = vadd.f32 %v851_v45, %v662_v0  ;;  %v664_v31 = vpop.f32.mrf.mxu1 }
  0xf4   : > { %v665_v33 = vadd.f32 %v664_v31, %v524_v14 }
  0xf5   : > { %9611 = vmatmul.msk.bf16.gmra.mxu0 %vm429_vm2, %v11431_v55  ;;  %9562 = vmatmul.msk.bf16.gmra.mxu3 %vm429_vm2, %v11433_v57 }
  0xf6   : > { %9660 = vmatmul.msk.bf16.gmra.mxu1 %vm429_vm2, %v11435_v58 }
  0xf7   : > { %9709 = vmatmul.msk.bf16.gmra.mxu2 %vm429_vm2, %v11454_v5 }
  0xf8   : > { %v704_v54 = vpop.f32.mrf.mxu3 }
  0xf9   : > { %v11724_v20 = vadd.f32 %v704_v54, %v11635_v41 }
  0xfa   : > { %v854_v26 = vpop.f32.mrf.mxu2  ;;  %v526_v36 = vpop.f32.mrf.mxu0 }
  0xfb   : > { %v11726_v15 = vadd.f32 %v854_v26, %v665_v33  ;;  %v666_v37 = vpop.f32.mrf.mxu1 }
  0xfc   : > { %v667_v53 = vadd.f32 %v666_v37, %v526_v36 }
 0x100   : > { %v706_v55 = vpop.f32.mrf.mxu3 }
 0x101   : > { %v11729_v50 = vadd.f32 %v706_v55, %v11651_v24 }
 0x102   : > { %v856_v57 = vpop.f32.mrf.mxu2  ;;  %v529_v0 = vpop.f32.mrf.mxu0 }
 0x103   : > { %v11731_v58 = vadd.f32 %v856_v57, %v667_v53  ;;  %v669_v43 = vpop.f32.mrf.mxu1 }
 0x104   : > { %v670_v45 = vadd.f32 %v669_v43, %v529_v0 }
 0x105   : > { %9612 = vmatmul.msk.bf16.gmra.mxu0 %vm429_vm2, %v11452_v4  ;;  %9563 = vmatmul.msk.bf16.gmra.mxu3 %vm429_vm2, %v11454_v5 }
 0x106   : > { %9661 = vmatmul.msk.bf16.gmra.mxu1 %vm429_vm2, %v11458_v7 }
 0x107   : > { %9710 = vmatmul.msk.bf16.gmra.mxu2 %vm429_vm2, %v11478_v17 }
 0x108   : > { %v709_v41 = vpop.f32.mrf.mxu3 }
 0x109   : > { %v11742_v24 = vadd.f32 %v709_v41, %v11671_v63 }
 0x10a   : > { %v859_v14 = vpop.f32.mrf.mxu2  ;;  %v531_v31 = vpop.f32.mrf.mxu0 }
 0x10b   : > { %v11744_v33 = vadd.f32 %v859_v14, %v670_v45  ;;  %v671_v54 = vpop.f32.mrf.mxu1 }
 0x10c   : > { %v672_v26 = vadd.f32 %v671_v54, %v531_v31 }
 0x110   : > { %v711_v4 = vpop.f32.mrf.mxu3 }
 0x111   : > { %v11747_v36 = vadd.f32 %v711_v4, %v11675_v13 }
 0x112   : > { %v861_v5 = vpop.f32.mrf.mxu2  ;;  %v534_v37 = vpop.f32.mrf.mxu0 }
 0x113   : > { %v11749_v7 = vadd.f32 %v861_v5, %v672_v26  ;;  %v674_v53 = vpop.f32.mrf.mxu1 }
 0x114   : > { %v675_v55 = vadd.f32 %v674_v53, %v534_v37 }
 0x115   : > { %9613 = vmatmul.msk.bf16.gmra.mxu0 %vm429_vm2, %v11476_v16  ;;  %9564 = vmatmul.msk.bf16.gmra.mxu3 %vm429_vm2, %v11478_v17 }
 0x116   : > { %9662 = vmatmul.msk.bf16.gmra.mxu1 %vm429_vm2, %v11480_v19 }
 0x117   : > { %9711 = vmatmul.msk.bf16.gmra.mxu2 %vm429_vm2, %v11499_v29 }
 0x118   : > { %v884_v63 = vpop.f32.mrf.mxu3 }
 0x119   : > { %v11760_v57 = vadd.f32 %v884_v63, %v11688_v62 }
 0x11a   : > { %v864_v13 = vpop.f32.mrf.mxu2  ;;  %v536_v0 = vpop.f32.mrf.mxu0 }
 0x11b   : > { %v11762_v43 = vadd.f32 %v864_v13, %v675_v55  ;;  %v676_v45 = vpop.f32.mrf.mxu1 }
 0x11c   : > { %v677_v41 = vadd.f32 %v676_v45, %v536_v0 }
 0x120   : > { %v886_v16 = vpop.f32.mrf.mxu3 }
 0x121   : > { %v11765_v17 = vadd.f32 %v886_v16, %v11693_v18 }
 0x122   : > { %v866_v14 = vpop.f32.mrf.mxu2  ;;  %v539_v31 = vpop.f32.mrf.mxu0 }
 0x123   : > { %v11767_v19 = vadd.f32 %v866_v14, %v677_v41  ;;  %v679_v54 = vpop.f32.mrf.mxu1 }
 0x124   : > { %v680_v26 = vadd.f32 %v679_v54, %v539_v31 }
 0x125   : > { %9614 = vmatmul.msk.bf16.gmra.mxu0 %vm429_vm2, %v11497_v28  ;;  %9565 = vmatmul.msk.bf16.gmra.mxu3 %vm429_vm2, %v11499_v29 }
 0x126   : > { %9663 = vmatmul.msk.bf16.gmra.mxu1 %vm429_vm2, %v11501_v32 }
 0x127   : > { %9712 = vmatmul.msk.bf16.gmra.mxu2 %vm429_vm2, %v11524_v49 }
 0x128   : > { %v889_v62 = vpop.f32.mrf.mxu3 }
 0x129   : > { %v11778_v4 = vadd.f32 %v889_v62, %v11706_v38 }
 0x12a   : > { %v869_v18 = vpop.f32.mrf.mxu2  ;;  %v541_v5 = vpop.f32.mrf.mxu0 }
 0x12b   : > { %v11780_v37 = vadd.f32 %v869_v18, %v680_v26  ;;  %v681_v53 = vpop.f32.mrf.mxu1 }
 0x12c   : > { %v682_v55 = vadd.f32 %v681_v53, %v541_v5 }
 0x130   : > { %v891_v28 = vpop.f32.mrf.mxu3 }
 0x131   : > { %v11783_v29 = vadd.f32 %v891_v28, %v11711_v12 }
 0x132   : > { %v871_v63 = vpop.f32.mrf.mxu2  ;;  %v544_v13 = vpop.f32.mrf.mxu0 }
 0x133   : > { %v11785_v32 = vadd.f32 %v871_v63, %v682_v55  ;;  %v684_v0 = vpop.f32.mrf.mxu1 }
 0x134   : > { %v685_v45 = vadd.f32 %v684_v0, %v544_v13 }
 0x135   : > { %9615 = vmatmul.msk.bf16.gmra.mxu0 %vm429_vm2, %v11522_v48  ;;  %9566 = vmatmul.msk.bf16.gmra.mxu3 %vm429_vm2, %v11524_v49 }
 0x136   : > { %9664 = vmatmul.msk.bf16.gmra.mxu1 %vm429_vm2, %v11526_v51 }
 0x137   : > { %9713 = vmatmul.msk.bf16.gmra.mxu2 %vm429_vm2, %v11549_v8 }
 0x138   : > { %v894_v38 = vpop.f32.mrf.mxu3 }
 0x139   : > { %v11796_v41 = vadd.f32 %v894_v38, %v11724_v20 }
 0x13a   : > { %v874_v12 = vpop.f32.mrf.mxu2  ;;  %v546_v16 = vpop.f32.mrf.mxu0 }
 0x13b   : > { %v11798_v14 = vadd.f32 %v874_v12, %v685_v45  ;;  %v686_v31 = vpop.f32.mrf.mxu1 }
 0x13c   : > { %v687_v54 = vadd.f32 %v686_v31, %v546_v16 }
 0x140   : > { %v896_v48 = vpop.f32.mrf.mxu3 }
 0x141   : > { %v11801_v49 = vadd.f32 %v896_v48, %v11729_v50 }
 0x142   : > { %v876_v26 = vpop.f32.mrf.mxu2  ;;  %v549_v62 = vpop.f32.mrf.mxu0 }
 0x143   : > { %v11803_v51 = vadd.f32 %v876_v26, %v687_v54  ;;  %v689_v18 = vpop.f32.mrf.mxu1 }
 0x144   : > { %v690_v5 = vadd.f32 %v689_v18, %v549_v62 }
 0x145   : > { %9616 = vmatmul.msk.bf16.gmra.mxu0 %vm429_vm2, %v11547_v1  ;;  %9567 = vmatmul.msk.bf16.gmra.mxu3 %vm429_vm2, %v11549_v8  ;;  %v10920_v1 = vld [vmem:[%s15777_s4 + $0x38] sm:$0xff] }
 0x146   : > { %9665 = vmatmul.msk.bf16.gmra.mxu1 %vm429_vm2, %v11553_v11  ;;  %3301 = vmatpush.bf16.msra.mxu2 %v10920_v1 }
 0x147   : > { %9714 = vmatmul.msk.bf16.gmra.mxu2 %vm429_vm2, %v11583_v42 }
 0x148   : > { %v899_v20 = vpop.f32.mrf.mxu3 }
 0x149   : > { %v11814_v53 = vadd.f32 %v899_v20, %v11742_v24  ;;  %v10928_v24 = vld [vmem:[%s15777_s4 + $0x78] sm:$0xff] }
 0x14a   : > { %v879_v50 = vpop.f32.mrf.mxu2  ;;  %v551_v55 = vpop.f32.mrf.mxu0  ;;  %3100 = vmatpush.bf16.msra.mxu1 %v10928_v24 }
 0x14b   : > { %v11816_v28 = vadd.f32 %v879_v50, %v690_v5  ;;  %v691_v63 = vpop.f32.mrf.mxu1 }
 0x14c   : > { %v692_v13 = vadd.f32 %v691_v63, %v551_v55 }
 0x150   : > { %v901_v8 = vpop.f32.mrf.mxu3 }
 0x151   : > { %v11822_v11 = vadd.f32 %v901_v8, %v11747_v36 }
 0x152   : > { %v881_v0 = vpop.f32.mrf.mxu2  ;;  %v1269_v45 = vpop.f32.mrf.mxu0 }
 0x153   : > { %v11827_v38 = vadd.f32 %v881_v0, %v692_v13  ;;  %v1491_v12 = vpop.f32.mrf.mxu1 }
 0x155   : > { %9617 = vmatmul.msk.bf16.gmra.mxu0 %vm429_vm2, %v11581_v39  ;;  %9568 = vmatmul.msk.bf16.gmra.mxu3 %vm429_vm2, %v11583_v42 }
 0x156   : > { %9666 = vmatmul.msk.bf16.gmra.mxu1 %vm429_vm2, %v11589_v52 }
 0x157   : > { %9715 = vmatmul.msk.bf16.gmra.mxu2 %vm429_vm2, %v11615_v25 }
 0x158   : > { %v1047_v36 = vpop.f32.mrf.mxu3 }
 0x159   : > { %v1127_v16 = vadd.f32 %v1047_v36, %v11569_v21 }
 0x15a   : > { %v1271_v31 = vpop.f32.mrf.mxu0  ;;  %v1714_v54 = vpop.f32.mrf.mxu2 }
 0x15b   : > { %v1493_v48 = vpop.f32.mrf.mxu1  ;;  %v1349_v26 = vadd.f32 %v1269_v45, %v1127_v16 }
 0x15d   : > { %v1571_v62 = vadd.f32 %v1491_v12, %v1349_v26 }
 0x15f   : > { %v11838_v18 = vadd.f32 %v1714_v54, %v1571_v62 }
 0x160   : > { %v1049_v39 = vpop.f32.mrf.mxu3 }
 0x161   : > { %v1128_v5 = vadd.f32 %v1049_v39, %v11587_v47 }
 0x162   : > { %v1274_v42 = vpop.f32.mrf.mxu0  ;;  %v1716_v20 = vpop.f32.mrf.mxu2 }
 0x163   : > { %v1496_v50 = vpop.f32.mrf.mxu1  ;;  %v1350_v52 = vadd.f32 %v1271_v31, %v1128_v5 }
 0x165   : > { %9618 = vmatmul.msk.bf16.gmra.mxu0 %vm429_vm2, %v11613_v22  ;;  %v1572_v55 = vadd.f32 %v1493_v48, %v1350_v52  ;;  %9569 = vmatmul.msk.bf16.gmra.mxu3 %vm429_vm2, %v11615_v25  ;;  %v10919_v25 = vld [vmem:[%s15777_s4 + $0x30] sm:$0xff] }
 0x166   : > { %9667 = vmatmul.msk.bf16.gmra.mxu1 %vm429_vm2, %v11621_v35  ;;  %3302 = vmatpush.bf16.msra.mxu2 %v10919_v25  ;;  %v9550_v52 = vld [vmem:[%s11367_s18 + $0x257] sm:$0xff] }
 0x167   : > { %9716 = vmatmul.msk.bf16.gmra.mxu2 %vm429_vm2, %v11655_v40  ;;  %v11849_v21 = vadd.f32 %v1716_v20, %v1572_v55  ;;  %v9598_v20 = vld [vmem:[%s11367_s18 + $0x250] sm:$0xff] }
 0x168   : > { %v1052_v47 = vpop.f32.mrf.mxu3 }
 0x169   : > { %v1129_v63 = vadd.f32 %v1052_v47, %v11601_v60  ;;  %v10927_v60 = vld [vmem:[%s15777_s4 + $0x70] sm:$0xff]  ;;  %v9697_v47 = vld [vmem:[%s11367_s18 + $0x287] sm:$0xff] }
 0x16a   : > { %v1276_v13 = vpop.f32.mrf.mxu0  ;;  %v1719_v1 = vpop.f32.mrf.mxu2  ;;  %3101 = vmatpush.bf16.msra.mxu1 %v10927_v60 }
 0x16b   : > { %v1498_v8 = vpop.f32.mrf.mxu1  ;;  %v1351_v0 = vadd.f32 %v1274_v42, %v1129_v63 }
 0x16d   : > { %v1573_v22 = vadd.f32 %v1496_v50, %v1351_v0  ;;  %v9549_v50 = vld [vmem:[%s11367_s18 + $0x24f] sm:$0xff] }
 0x16f   : > { %v11852_v45 = vadd.f32 %v1719_v1, %v1573_v22 }
 0x170   : > { %v1054_v35 = vpop.f32.mrf.mxu3 }
 0x171   : > { %v1130_v24 = vadd.f32 %v1054_v35, %v11619_v27 }
 0x172   : > { %v1279_v12 = vpop.f32.mrf.mxu0  ;;  %v1721_v36 = vpop.f32.mrf.mxu2 }
 0x173   : > { %v1501_v16 = vpop.f32.mrf.mxu1  ;;  %v1352_v31 = vadd.f32 %v1276_v13, %v1130_v24 }
 0x175   : > { %9619 = vmatmul.msk.bf16.gmra.mxu0 %vm429_vm2, %v11653_v30  ;;  %v1574_v54 = vadd.f32 %v1498_v8, %v1352_v31  ;;  %9570 = vmatmul.msk.bf16.gmra.mxu3 %vm429_vm2, %v11655_v40  ;;  %v9599_v40 = vld [vmem:[%s11367_s18 + $0x258] sm:$0xff] }
 0x176   : > { %9668 = vmatmul.msk.bf16.gmra.mxu1 %vm429_vm2, %v11661_v59  ;;  %v9696_v59 = vld [vmem:[%s11367_s18 + $0x27f] sm:$0xff] }
 0x177   : > { %9717 = vmatmul.msk.bf16.gmra.mxu2 %vm429_vm2, %v11456_v6  ;;  %v11869_v27 = vadd.f32 %v1721_v36, %v1574_v54  ;;  %v11880_v6 = vpack.c.bf16 %v9599_v40, %v9598_v20  ;;  %v1647_v0 = vpack.c.bf16 %v9697_v47, %v9696_v59  ;;  %v10926_v40 = vld [vmem:[%s15777_s4 + $0x68] sm:$0xff] }
 0x178   : > { %v1057_v48 = vpop.f32.mrf.mxu3  ;;  %3102 = vmatpush.bf16.msra.mxu1 %v10926_v40  ;;  %v9604_v40 = vld [vmem:[%s11367_s18 + $0x2e0] sm:$0xff] }
 0x179   : > { %v1131_v26 = vadd.f32 %v1057_v48, %v11637_v56  ;;  %v980_v56 = vpack.c.bf16 %v9550_v52, %v9549_v50  ;;  %v9600_v48 = vld [vmem:[%s11367_s18 + $0x280] sm:$0xff] }
 0x17a   : > { %v1281_v62 = vpop.f32.mrf.mxu0  ;;  %v1724_v30 = vpop.f32.mrf.mxu2 }
 0x17b   : > { %v1503_v39 = vpop.f32.mrf.mxu1  ;;  %v1353_v5 = vadd.f32 %v1279_v12, %v1131_v26  ;;  %v9601_v26 = vld [vmem:[%s11367_s18 + $0x288] sm:$0xff] }
 0x17d   : > { %v1575_v42 = vadd.f32 %v1501_v16, %v1353_v5 }
 0x17f   : > { %v11876_v55 = vadd.f32 %v1724_v30, %v1575_v42  ;;  %v9698_v30 = vld [vmem:[%s11367_s18 + $0x2af] sm:$0xff]  ;;  %v11901_v42 = vpack.c.bf16 %v9601_v26, %v9600_v48 }
 0x180   : > { %v1059_v63 = vpop.f32.mrf.mxu3 }
 0x181   : > { %v1132_v13 = vadd.f32 %v1059_v63, %v11659_v3 }
 0x182   : > { %v1284_v1 = vpop.f32.mrf.mxu0  ;;  %v1726_v8 = vpop.f32.mrf.mxu2 }
 0x183   : > { %v1506_v22 = vpop.f32.mrf.mxu1  ;;  %v1354_v25 = vadd.f32 %v1281_v62, %v1132_v13 }
 0x185   : > { %9620 = vmatmul.msk.bf16.gmra.mxu0 %vm429_vm2, %v11880_v6  ;;  %v1576_v35 = vadd.f32 %v1503_v39, %v1354_v25  ;;  %9571 = vmatmul.msk.bf16.gmra.mxu3 %vm429_vm2, %v980_v56  ;;  %v9699_v39 = vld [vmem:[%s11367_s18 + $0x2b7] sm:$0xff] }
 0x186   : > { %9669 = vmatmul.msk.bf16.gmra.mxu1 %vm429_vm2, %v11551_v9  ;;  %v10918_v9 = vld [vmem:[%s15777_s4 + $0x28] sm:$0xff]  ;;  %v1648_v52 = vpack.c.bf16 %v9699_v39, %v9698_v30  ;;  %v15893_v30 = vld [vmem:[#allocation3_spill] sm:$0xff] }
 0x187   : > { %9718 = vmatmul.msk.bf16.gmra.mxu2 %vm429_vm2, %v1647_v0  ;;  %v11889_v3 = vadd.f32 %v1726_v8, %v1576_v35 }
 0x188   : > { %v1062_v24 = vpop.f32.mrf.mxu3  ;;  %3303 = vmatpush.bf16.msra.mxu2 %v10918_v9 }
 0x189   : > { %v1133_v12 = vadd.f32 %v1062_v24, %v11673_v2  ;;  %v9602_v24 = vld [vmem:[%s11367_s18 + $0x2b0] sm:$0xff] }
 0x18a   : > { %v1286_v36 = vpop.f32.mrf.mxu0  ;;  %v1729_v60 = vpop.f32.mrf.mxu2 }
 0x18b   : > { %v1508_v16 = vpop.f32.mrf.mxu1  ;;  %v1355_v31 = vadd.f32 %v1284_v1, %v1133_v12  ;;  %v9603_v12 = vld [vmem:[%s11367_s18 + $0x2b8] sm:$0xff] }
 0x18d   : > { %v1577_v54 = vadd.f32 %v1506_v22, %v1355_v31 }
 0x18f   : > { %v11894_v62 = vadd.f32 %v1729_v60, %v1577_v54  ;;  %v9701_v60 = vld [vmem:[%s11367_s18 + $0x2e7] sm:$0xff] }
 0x190   : > { %v1064_v5 = vpop.f32.mrf.mxu3 }
 0x191   : > { %v1134_v2 = vadd.f32 %v1064_v5, %v11677_v23 }
 0x192   : > { %v1289_v20 = vpop.f32.mrf.mxu0  ;;  %v1731_v50 = vpop.f32.mrf.mxu2 }
 0x193   : > { %v1511_v59 = vpop.f32.mrf.mxu1  ;;  %v1356_v47 = vadd.f32 %v1286_v36, %v1134_v2 }
 0x195   : > { %9621 = vmatmul.msk.bf16.gmra.mxu0 %vm429_vm2, %v11901_v42  ;;  %v1578_v63 = vadd.f32 %v1508_v16, %v1356_v47  ;;  %9572 = vmatmul.msk.bf16.gmra.mxu3 %vm429_vm2, %v1647_v0  ;;  %v9700_v0 = vld [vmem:[%s11367_s18 + $0x2df] sm:$0xff]  ;;  %v1204_v16 = vpack.c.bf16 %v9603_v12, %v9602_v24  ;;  %v9703_v47 = vld [vmem:[%s11367_s18 + $0x317] sm:$0xff] }
 0x196   : > { %9670 = vmatmul.msk.bf16.gmra.mxu1 %vm429_vm2, %v11585_v44 }
 0x197   : > { %9719 = vmatmul.msk.bf16.gmra.mxu2 %vm429_vm2, %v1648_v52  ;;  %v11913_v23 = vadd.f32 %v1731_v50, %v1578_v63  ;;  %v9605_v50 = vld [vmem:[%s11367_s18 + $0x2e8] sm:$0xff] }
 0x198   : > { %v1067_v13 = vpop.f32.mrf.mxu3 }
 0x199   : > { %v1135_v1 = vadd.f32 %v1067_v13, %v11690_v10  ;;  %v1649_v10 = vpack.c.bf16 %v9701_v60, %v9700_v0  ;;  %v1205_v13 = vpack.c.bf16 %v9605_v50, %v9604_v40 }
 0x19a   : > { %v1291_v56 = vpop.f32.mrf.mxu0  ;;  %v1734_v25 = vpop.f32.mrf.mxu2 }
 0x19b   : > { %v11916_v8 = vpop.f32.mrf.mxu1  ;;  %v1357_v22 = vadd.f32 %v1289_v20, %v1135_v1 }
 0x19d   : > { %v1579_v35 = vadd.f32 %v1511_v59, %v1357_v22  ;;  %v9702_v59 = vld [vmem:[%s11367_s18 + $0x30f] sm:$0xff] }
 0x19e   : > { %v1650_v22 = vpack.c.bf16 %v9703_v47, %v9702_v59 }
 0x19f   : > { %v11920_v36 = vadd.f32 %v1734_v25, %v1579_v35 }
 0x1a0   : > { %v1069_v44 = vpop.f32.mrf.mxu3 }
 0x1a1   : > { %v1136_v31 = vadd.f32 %v1069_v44, %v11695_v34 }
 0x1a2   : > { %v1294_v54 = vpop.f32.mrf.mxu0 }
 0x1a3   : > { %v1516_v48 = vpop.f32.mrf.mxu1  ;;  %v11925_v26 = vadd.f32 %v1291_v56, %v1136_v31  ;;  %v9606_v31 = vld [vmem:[%s11367_s18 + $0x310] sm:$0xff] }
 0x1a5   : > { %9622 = vmatmul.msk.bf16.gmra.mxu0 %vm429_vm2, %v1204_v16  ;;  %9573 = vmatmul.msk.bf16.gmra.mxu3 %vm429_vm2, %v1648_v52  ;;  %v10917_v52 = vld [vmem:[%s15777_s4 + $0x20] sm:$0xff] }
 0x1a6   : > { %9671 = vmatmul.msk.bf16.gmra.mxu1 %vm429_vm2, %v15893_v30  ;;  %3304 = vmatpush.bf16.msra.mxu2 %v10917_v52  ;;  %v9656_v30 = vld [vmem:[%s11367_s18 + $0x319] sm:$0xff] }
 0x1a7   : > { %9720 = vmatmul.msk.bf16.gmra.mxu2 %vm429_vm2, %v1649_v10 }
 0x1a8   : > { %v1072_v39 = vpop.f32.mrf.mxu3 }
 0x1a9   : > { %v1137_v34 = vadd.f32 %v1072_v39, %v11708_v61  ;;  %v10925_v61 = vld [vmem:[%s15777_s4 + $0x60] sm:$0xff] }
 0x1aa   : > { %v1296_v9 = vpop.f32.mrf.mxu0  ;;  %3103 = vmatpush.bf16.msra.mxu1 %v10925_v61  ;;  %v9704_v39 = vld [vmem:[%s11367_s18 + $0x33f] sm:$0xff]  ;;  %v9772_v61 = vld [vmem:[%s11367_s18 + $0x71] sm:$0xff] }
 0x1ab   : > { %v11933_v5 = vpop.f32.mrf.mxu1  ;;  %v1359_v2 = vadd.f32 %v1294_v54, %v1137_v34  ;;  %v9607_v54 = vld [vmem:[%s11367_s18 + $0x318] sm:$0xff] }
 0x1ad   : > { %v11935_v20 = vadd.f32 %v1516_v48, %v1359_v2  ;;  %v9655_v48 = vld [vmem:[%s11367_s18 + $0x311] sm:$0xff] }
 0x1b0   : > { %v1074_v63 = vpop.f32.mrf.mxu3 }
 0x1b1   : > { %v1138_v1 = vadd.f32 %v1074_v63, %v11713_v46  ;;  %v15894_v46 = vld [vmem:[#allocation4_spill] sm:$0xff] }
 0x1b2   : > { %v1299_v56 = vpop.f32.mrf.mxu0 }
 0x1b3   : > { %v1521_v25 = vpop.f32.mrf.mxu1  ;;  %v11948_v35 = vadd.f32 %v1296_v9, %v1138_v1  ;;  %v1206_v9 = vpack.c.bf16 %v9607_v54, %v9606_v31  ;;  %v10924_v54 = vld [vmem:[%s15777_s4 + $0x58] sm:$0xff] }
 0x1b4   : > { %3104 = vmatpush.bf16.msra.mxu1 %v10924_v54  ;;  %v9727_v54 = vld [vmem:[%s11367_s18 + $0xd0] sm:$0xff] }
 0x1b5   : > { %9623 = vmatmul.msk.bf16.gmra.mxu0 %vm429_vm2, %v1205_v13  ;;  %9574 = vmatmul.msk.bf16.gmra.mxu3 %vm429_vm2, %v1649_v10  ;;  %v9705_v10 = vld [vmem:[%s11367_s18 + $0x347] sm:$0xff] }
 0x1b6   : > { %9672 = vmatmul.msk.bf16.gmra.mxu1 %vm429_vm2, %v15894_v46  ;;  %v1651_v50 = vpack.c.bf16 %v9705_v10, %v9704_v39  ;;  %v9723_v46 = vld [vmem:[%s11367_s18 + $0x70] sm:$0xff] }
 0x1b7   : > { %9721 = vmatmul.msk.bf16.gmra.mxu2 %vm429_vm2, %v1650_v22 }
 0x1b8   : > { %v1077_v24 = vpop.f32.mrf.mxu3 }
 0x1b9   : > { %v1139_v12 = vadd.f32 %v1077_v24, %v11726_v15  ;;  %v1428_v15 = vpack.c.bf16 %v9656_v30, %v9655_v48  ;;  %v9724_v24 = vld [vmem:[%s11367_s18 + $0x78] sm:$0xff] }
 0x1ba   : > { %v1301_v0 = vpop.f32.mrf.mxu0  ;;  %v1858_v31 = vpack.c.bf16 %v9724_v24, %v9723_v46  ;;  %v12007_v46 = vpop.f32.mrf.mxu2 }
 0x1bb   : > { %v11956_v60 = vpop.f32.mrf.mxu1  ;;  %v1361_v44 = vadd.f32 %v1299_v56, %v1139_v12 }
 0x1bd   : > { %v11958_v16 = vadd.f32 %v1521_v25, %v1361_v44  ;;  %v9773_v25 = vld [vmem:[%s11367_s18 + $0x79] sm:$0xff] }
 0x1c0   : > { %v1079_v34 = vpop.f32.mrf.mxu3 }
 0x1c1   : > { %v1140_v2 = vadd.f32 %v1079_v34, %v11731_v58 }
 0x1c2   : > { %v1304_v40 = vpop.f32.mrf.mxu0 }
 0x1c3   : > { %v1526_v59 = vpop.f32.mrf.mxu1  ;;  %v11967_v47 = vadd.f32 %v1301_v0, %v1140_v2  ;;  %v2080_v0 = vpack.c.bf16 %v9773_v25, %v9772_v61 }
 0x1c5   : > { %9624 = vmatmul.msk.bf16.gmra.mxu0 %vm429_vm2, %v1206_v9  ;;  %9575 = vmatmul.msk.bf16.gmra.mxu3 %vm429_vm2, %v1650_v22  ;;  %v10916_v22 = vld [vmem:[%s15777_s4 + $0x18] sm:$0xff] }
 0x1c6   : > { %9673 = vmatmul.msk.bf16.gmra.mxu1 %vm429_vm2, %v1428_v15  ;;  %3305 = vmatpush.bf16.msra.mxu2 %v10916_v22  ;;  %v9775_v15 = vld [vmem:[%s11367_s18 + $0xa9] sm:$0xff] }
 0x1c7   : > { %9722 = vmatmul.msk.bf16.gmra.mxu2 %vm429_vm2, %v1651_v50  ;;  %v9725_v50 = vld [vmem:[%s11367_s18 + $0xa0] sm:$0xff] }
 0x1c8   : > { %v1082_v52 = vpop.f32.mrf.mxu3 }
 0x1c9   : > { %v1141_v58 = vadd.f32 %v1082_v52, %v11744_v33 }
 0x1ca   : > { %v1306_v63 = vpop.f32.mrf.mxu0 }
 0x1cb   : > { %v11974_v13 = vpop.f32.mrf.mxu1  ;;  %v1363_v1 = vadd.f32 %v1304_v40, %v1141_v58  ;;  %v9774_v40 = vld [vmem:[%s11367_s18 + $0xa1] sm:$0xff] }
 0x1cc   : > { %v2081_v58 = vpack.c.bf16 %v9775_v15, %v9774_v40 }
 0x1cd   : > { %v11976_v56 = vadd.f32 %v1526_v59, %v1363_v1  ;;  %v9726_v59 = vld [vmem:[%s11367_s18 + $0xa8] sm:$0xff] }
 0x1d0   : > { %v1084_v12 = vpop.f32.mrf.mxu3 }
 0x1d1   : > { %v1142_v44 = vadd.f32 %v1084_v12, %v11749_v7 }
 0x1d2   : > { %v1309_v33 = vpop.f32.mrf.mxu0 }
 0x1d3   : > { %v1531_v48 = vpop.f32.mrf.mxu1  ;;  %v11989_v30 = vadd.f32 %v1306_v63, %v1142_v44 }
 0x1d5   : > { %9805 = vmatmul.msk.bf16.vlgmr.msra.gmra.mxu0 %vm429_vm2, %v2080_v0  ;;  %9756 = vmatmul.msk.bf16.vlgmr.msra.gmra.mxu3 %vm429_vm2, %v1858_v31  ;;  %v9777_v31 = vld [vmem:[%s11367_s18 + $0xd9] sm:$0xff] }
 0x1d8   : > { %v1087_v7 = vpop.f32.mrf.mxu3 }
 0x1d9   : > { %v1143_v39 = vadd.f32 %v1087_v7, %v11762_v43  ;;  %v1859_v43 = vpack.c.bf16 %v9726_v59, %v9725_v50  ;;  %v10915_v7 = vld [vmem:[%s15777_s4 + $0x10] sm:$0xff] }
 0x1da   : > { %v1311_v10 = vpop.f32.mrf.mxu0  ;;  %3306 = vmatpush.bf16.msra.mxu2 %v10915_v7  ;;  %v10923_v50 = vld [vmem:[%s15777_s4 + $0x50] sm:$0xff] }
 0x1db   : > { %v11994_v34 = vpop.f32.mrf.mxu1  ;;  %v1365_v9 = vadd.f32 %v1309_v33, %v1143_v39  ;;  %v9776_v33 = vld [vmem:[%s11367_s18 + $0xd1] sm:$0xff]  ;;  %3105 = vmatpush.bf16.msra.mxu1 %v10923_v50 }
 0x1dd   : > { %v11996_v2 = vadd.f32 %v1531_v48, %v1365_v9  ;;  %v9728_v48 = vld [vmem:[%s11367_s18 + $0xd8] sm:$0xff]  ;;  %v12021_v9 = vpop.f32.mrf.mxu2 }
 0x1de   : > { %v1860_v15 = vpack.c.bf16 %v9728_v48, %v9727_v54 }
 0x1e0   : > { %v1089_v52 = vpop.f32.mrf.mxu3 }
 0x1e1   : > { %v1144_v63 = vadd.f32 %v1089_v52, %v11767_v19 }
 0x1e2   : > { %v1314_v1 = vpop.f32.mrf.mxu0 }
 0x1e3   : > { %v1536_v61 = vpop.f32.mrf.mxu1  ;;  %v12003_v25 = vadd.f32 %v1311_v10, %v1144_v63  ;;  %v2082_v10 = vpack.c.bf16 %v9777_v31, %v9776_v33  ;;  %v9730_v33 = vld [vmem:[%s11367_s18 + $0x108] sm:$0xff] }
 0x1e5   : > { %9806 = vmatmul.msk.bf16.gmra.mxu0 %vm429_vm2, %v2081_v58  ;;  %9757 = vmatmul.msk.bf16.gmra.mxu3 %vm429_vm2, %v1859_v43  ;;  %v12034_v43 = vpop.f32.mrf.mxu2 }
 0x1e8   : > { %v1092_v24 = vpop.f32.mrf.mxu3 }
 0x1e9   : > { %v1145_v22 = vadd.f32 %v1092_v24, %v11780_v37 }
 0x1ea   : > { %v1316_v12 = vpop.f32.mrf.mxu0 }
 0x1eb   : > { %v12010_v0 = vpop.f32.mrf.mxu1  ;;  %v1367_v19 = vadd.f32 %v1314_v1, %v1145_v22  ;;  %v9778_v22 = vld [vmem:[%s11367_s18 + $0x101] sm:$0xff] }
 0x1ed   : > { %v12012_v44 = vadd.f32 %v1536_v61, %v1367_v19  ;;  %v9779_v19 = vld [vmem:[%s11367_s18 + $0x109] sm:$0xff] }
 0x1ee   : > { %v2083_v54 = vpack.c.bf16 %v9779_v19, %v9778_v22  ;;  %v9731_v22 = vld [vmem:[%s11367_s18 + $0x130] sm:$0xff] }
 0x1ef   : > { %15895 = vst [vmem:[#allocation3_spill] sm:$0xff] %v12012_v44 }
 0x1f0   : > { %v1094_v39 = vpop.f32.mrf.mxu3 }
 0x1f1   : > { %v1146_v37 = vadd.f32 %v1094_v39, %v11785_v32 }
 0x1f2   : > { %v1319_v40 = vpop.f32.mrf.mxu0 }
 0x1f3   : > { %v1541_v59 = vpop.f32.mrf.mxu1  ;;  %v12027_v52 = vadd.f32 %v1316_v12, %v1146_v37  ;;  %v9729_v12 = vld [vmem:[%s11367_s18 + $0x100] sm:$0xff]  ;;  %v12046_v37 = vpop.f32.mrf.mxu2 }
 0x1f4   : > { %v1861_v7 = vpack.c.bf16 %v9730_v33, %v9729_v12  ;;  %v10914_v12 = vld [vmem:[%s15777_s4 + $0x8] sm:$0xff] }
 0x1f5   : > { %9807 = vmatmul.msk.bf16.gmra.mxu0 %vm429_vm2, %v2082_v10  ;;  %9758 = vmatmul.msk.bf16.gmra.mxu3 %vm429_vm2, %v1860_v15 }
 0x1f6   : > { %3307 = vmatpush.bf16.msra.mxu2 %v10914_v12  ;;  %v9783_v12 = vld [vmem:[%s11367_s18 + $0x169] sm:$0xff] }
 0x1f8   : > { %v1097_v32 = vpop.f32.mrf.mxu3 }
 0x1f9   : > { %v1147_v58 = vadd.f32 %v1097_v32, %v11798_v14 }
 0x1fa   : > { %v1321_v63 = vpop.f32.mrf.mxu0 }
 0x1fb   : > { %v12032_v1 = vpop.f32.mrf.mxu1  ;;  %v1369_v61 = vadd.f32 %v1319_v40, %v1147_v58  ;;  %v9780_v58 = vld [vmem:[%s11367_s18 + $0x131] sm:$0xff]  ;;  %v12058_v19 = vpop.f32.mrf.mxu2 }
 0x1fc   : > { %15896 = vst [vmem:[#allocation4_spill] sm:$0xff] %v12032_v1 }
 0x1fd   : > { %v12036_v24 = vadd.f32 %v1541_v59, %v1369_v61  ;;  %v9781_v61 = vld [vmem:[%s11367_s18 + $0x139] sm:$0xff] }
 0x1ff   : > { %15897 = vst [vmem:[#allocation5_spill] sm:$0xff] %v12036_v24  ;;  %v9738_v24 = vld [vmem:[%s11367_s18 + $0x1c8] sm:$0xff] }
 0x200   : > { %v1099_v31 = vpop.f32.mrf.mxu3 }
 0x201   : > { %v1148_v48 = vadd.f32 %v1099_v31, %v11803_v51  ;;  %v2084_v31 = vpack.c.bf16 %v9781_v61, %v9780_v58 }
 0x202   : > { %v1324_v14 = vpop.f32.mrf.mxu0 }
 0x203   : > { %v1546_v39 = vpop.f32.mrf.mxu1  ;;  %v12043_v10 = vadd.f32 %v1321_v63, %v1148_v48  ;;  %v9732_v63 = vld [vmem:[%s11367_s18 + $0x138] sm:$0xff] }
 0x204   : > { %v1862_v48 = vpack.c.bf16 %v9732_v63, %v9731_v22  ;;  %v9782_v63 = vld [vmem:[%s11367_s18 + $0x161] sm:$0xff] }
 0x205   : > { %15898 = vst [vmem:[#allocation6_spill] sm:$0xff] %v12043_v10  ;;  %9808 = vmatmul.msk.bf16.gmra.mxu0 %vm429_vm2, %v2083_v54  ;;  %9759 = vmatmul.msk.bf16.gmra.mxu3 %vm429_vm2, %v1861_v7 }
 0x208   : > { %v1102_v40 = vpop.f32.mrf.mxu3 }
 0x209   : > { %v1149_v15 = vadd.f32 %v1102_v40, %v11816_v28  ;;  %v12071_v40 = vpop.f32.mrf.mxu2 }
 0x20a   : > { %v1326_v50 = vpop.f32.mrf.mxu0 }
 0x20b   : > { %v12050_v59 = vpop.f32.mrf.mxu1  ;;  %v1371_v51 = vadd.f32 %v1324_v14, %v1149_v15  ;;  %v10922_v14 = vld [vmem:[%s15777_s4 + $0x48] sm:$0xff] }
 0x20c   : > { %15899 = vst [vmem:[#allocation7_spill] sm:$0xff] %v12050_v59  ;;  %3106 = vmatpush.bf16.msra.mxu1 %v10922_v14 }
 0x20d   : > { %v12052_v32 = vadd.f32 %v1546_v39, %v1371_v51 }
 0x20f   : > { %15900 = vst [vmem:[#allocation8_spill] sm:$0xff] %v12052_v32  ;;  %v9737_v32 = vld [vmem:[%s11367_s18 + $0x1c0] sm:$0xff] }
 0x210   : > { %v1104_v33 = vpop.f32.mrf.mxu3 }
 0x211   : > { %v1150_v28 = vadd.f32 %v1104_v33, %v11827_v38  ;;  %v9734_v33 = vld [vmem:[%s11367_s18 + $0x168] sm:$0xff] }
 0x212   : > { %v1329_v54 = vpop.f32.mrf.mxu0 }
 0x213   : > { %v1551_v7 = vpop.f32.mrf.mxu1  ;;  %v12067_v39 = vadd.f32 %v1326_v50, %v1150_v28  ;;  %v9733_v50 = vld [vmem:[%s11367_s18 + $0x160] sm:$0xff] }
 0x214   : > { %v1863_v59 = vpack.c.bf16 %v9734_v33, %v9733_v50  ;;  %v9736_v33 = vld [vmem:[%s11367_s18 + $0x198] sm:$0xff] }
 0x215   : > { %15901 = vst [vmem:[#allocation9_spill] sm:$0xff] %v12067_v39  ;;  %9809 = vmatmul.msk.bf16.gmra.mxu0 %vm429_vm2, %v2084_v31  ;;  %9760 = vmatmul.msk.bf16.gmra.mxu3 %vm429_vm2, %v1862_v48  ;;  %v2085_v31 = vpack.c.bf16 %v9783_v12, %v9782_v63  ;;  %v9735_v12 = vld [vmem:[%s11367_s18 + $0x190] sm:$0xff] }
 0x218   : > { %v1107_v38 = vpop.f32.mrf.mxu3 }
 0x219   : > { %v1151_v15 = vadd.f32 %v1107_v38, %v11760_v57  ;;  %v12083_v38 = vpop.f32.mrf.mxu2 }
 0x21a   : > { %v1331_v51 = vpop.f32.mrf.mxu0 }
 0x21b   : > { %v12074_v58 = vpop.f32.mrf.mxu1  ;;  %v1373_v61 = vadd.f32 %v1329_v54, %v1151_v15 }
 0x21c   : > { %15902 = vst [vmem:[#allocation10_spill] sm:$0xff] %v12074_v58 }
 0x21d   : > { %v12076_v22 = vadd.f32 %v1551_v7, %v1373_v61 }
 0x21f   : > { %15903 = vst [vmem:[#allocation11_spill] sm:$0xff] %v12076_v22  ;;  %v9784_v22 = vld [vmem:[%s11367_s18 + $0x191] sm:$0xff] }
 0x220   : > { %v1109_v28 = vpop.f32.mrf.mxu3 }
 0x221   : > { %v1152_v48 = vadd.f32 %v1109_v28, %v11765_v17  ;;  %v12093_v28 = vpop.f32.mrf.mxu2 }
 0x222   : > { %v1334_v14 = vpop.f32.mrf.mxu0 }
 0x223   : > { %v1556_v57 = vpop.f32.mrf.mxu1  ;;  %v12085_v54 = vadd.f32 %v1331_v51, %v1152_v48  ;;  %v9785_v51 = vld [vmem:[%s11367_s18 + $0x199] sm:$0xff]  ;;  %v1864_v48 = vpack.c.bf16 %v9736_v33, %v9735_v12 }
 0x224   : > { %v2086_v58 = vpack.c.bf16 %v9785_v51, %v9784_v22 }
 0x225   : > { %15904 = vst [vmem:[#allocation12_spill] sm:$0xff] %v12085_v54  ;;  %9810 = vmatmul.msk.bf16.gmra.mxu0 %vm429_vm2, %v2085_v31  ;;  %9761 = vmatmul.msk.bf16.gmra.mxu3 %vm429_vm2, %v1863_v59  ;;  %v10913_v31 = vld [vmem:[%s15777_s4] sm:$0xff]  ;;  %v9787_v54 = vld [vmem:[%s11367_s18 + $0x1c9] sm:$0xff] }
 0x226   : > { %3308 = vmatpush.bf16.msra.mxu2 %v10913_v31 }
 0x228   : > { %v1112_v7 = vpop.f32.mrf.mxu3 }
 0x229   : > { %v1153_v15 = vadd.f32 %v1112_v7, %v11778_v4  ;;  %v10921_v7 = vld [vmem:[%s15777_s4 + $0x40] sm:$0xff]  ;;  %v12117_v12 = vpop.f32.mrf.mxu2 }
 0x22a   : > { %v1336_v61 = vpop.f32.mrf.mxu0  ;;  %3107 = vmatpush.bf16.msra.mxu1 %v10921_v7 }
 0x22b   : > { %v1375_v63 = vadd.f32 %v1334_v14, %v1153_v15  ;;  %v12090_v17 = vpop.f32.mrf.mxu1  ;;  %v2340_v15 = vld [vmem:[#allocation2 + $0x4] sm:$0x8] }
 0x22c   : > { %15905 = vst [vmem:[#allocation13_spill] sm:$0xff] %v12090_v17 }
 0x22d   : > { %v12095_v50 = vadd.f32 %v1556_v57, %v1375_v63  ;;  %v15907_v57 = vmov 0  ;;  %v11287_v63 = vmov 0  }
 0x22e   : > { %v15908_v57 = vsel %vm12107_vm5, 4294967295, %v15907_v57  ;;  %2343 = vst [vmem:[#allocation2 + $0x8] sm:$0xf] %v11287_v63 }
 0x22f   : > { %15906 = vst [vmem:[#allocation14_spill] sm:$0xff] %v12095_v50 }
 0x230   : > { %v1114_v59 = vpop.f32.mrf.mxu3  ;;  %15909 = vst [vmem:[#allocation15_spill] sm:$0xff] %v15908_v57 }
 0x231   : > { %v1154_v4 = vadd.f32 %v1114_v59, %v11783_v29  ;;  %v2341_v29 = vsel %vm12107_vm5, 0, %v2340_v15  ;;  %2344 = vst [vmem:[#allocation2 + $0xc] sm:$0xf] %v11287_v63  ;;  %v12135_v44 = vpop.f32.mrf.mxu2 }
 0x232   : > { %v1339_v14 = vpop.f32.mrf.mxu0  ;;  %2342 = vst [vmem:[#allocation2 + $0x4] sm:$0x8] %v2341_v29 }
 0x233   : > { %v12111_v17 = vadd.f32 %v1336_v61, %v1154_v4  ;;  %2355 = vst [vmem:[#allocation2 + $0x1a0] sm:$0xf] %v11287_v63  ;;  %v1561_v22 = vpop.f32.mrf.mxu1 }
 0x234   : > { %2356 = vst [vmem:[#allocation2 + $0x1a4] sm:$0xf] %v11287_v63 }
 0x235   : > { %15910 = vst [vmem:[#allocation16_spill] sm:$0xff] %v12111_v17  ;;  %9811 = vmatmul.msk.bf16.gmra.mxu0 %vm429_vm2, %v2086_v58  ;;  %9762 = vmatmul.msk.bf16.gmra.mxu3 %vm429_vm2, %v1864_v48  ;;  %v2522_v31 = vld [vmem:[#allocation2 + $0x8] sm:$0xf] }
 0x236   : > { %v2577_v59 = vshrl.u32 %v2522_v31, 16  ;;  %v2580_v29 = vshll.u32 %v2522_v31, 16 }
 0x238   : > { %v1117_v33 = vpop.f32.mrf.mxu3  ;;  %v2523_v58 = vld [vmem:[#allocation2 + $0xc] sm:$0xf]  ;;  %v2579_v63 = vrot.slane %v2577_v59, 7 }
 0x239   : > { %v1155_v61 = vadd.f32 %v1117_v33, %v11796_v41  ;;  %v2521_v48 = vld [vmem:[#allocation2 + $0x4] sm:$0x8]  ;;  %v2586_v7 = vshrl.u32 %v2523_v58, 16  ;;  %v2589_v17 = vshll.u32 %v2523_v58, 16 }
 0x23a   : > { %v1341_v51 = vpop.f32.mrf.mxu0  ;;  %v2572_v15 = vshrl.u32 %v2521_v48, 16  ;;  %v9786_v33 = vld [vmem:[%s11367_s18 + $0x1c1] sm:$0xff] }
 0x23b   : > { %v1377_v4 = vadd.f32 %v1339_v14, %v1155_v61  ;;  %v2588_v39 = vrot.slane %v2586_v7, 7  ;;  %v2582_v14 = vor.u32 %v2580_v29, %v2579_v63  ;;  %v2584_v61 = vrot.slane %v2579_v63, 4  ;;  %v12131_v59 = vpop.f32.mrf.mxu1  ;;  %v2361_v63 = vld [vmem:[#allocation2 + $0x1c] sm:$0x8] }
 0x23c   : > { %v9821_v1 = vrot.slane %v2572_v15, 11  ;;  %15914 = vst [vmem:[#allocation18_spill] sm:$0xff] %v12131_v59  ;;  %v2087_v31 = vpack.c.bf16 %v9787_v54, %v9786_v33 }
 0x23d   : > { %v12125_v41 = vadd.f32 %v1561_v22, %v1377_v4  ;;  %v2591_v10 = vor.u32 %v2589_v17, %v2588_v39  ;;  %v12148_v17 = vpop.f32.mrf.mxu2 }
 0x23e   : > { %v2583_v58 = vsel %vm12121_vm8, %v9821_v1, %v2582_v14  ;;  %v10897_v1 = vld [vmem:[#allocation2 + $0x8] sm:$0xff]  ;;  %v9788_v14 = vld [vmem:[%s11367_s18 + $0x1f1] sm:$0xff] }
 0x23f   : > { %15913 = vst [vmem:[#allocation17_spill] sm:$0xff] %v12125_v41  ;;  %v1865_v41 = vpack.c.bf16 %v9738_v24, %v9737_v32  ;;  %v2592_v7 = vsel %vm12121_vm8, %v2584_v61, %v2591_v10  ;;  %v3189_v15 = vunpack.c.l.b16 %v2583_v58  ;;  %3108 = vmatmul.bf16.vlgmr.msra.gmra.mxu1 %v10897_v1  ;;  %v9789_v61 = vld [vmem:[%s11367_s18 + $0x1f9] sm:$0xff] }
 0x240   : > { %v1119_v48 = vpop.f32.mrf.mxu3  ;;  %v3190_v29 = vunpack.c.l.b16 %v2592_v7  ;;  %v10976_v58 = vld [vmem:[%s15777_s4 + $0x178] sm:$0xff]  ;;  %v2088_v7 = vpack.c.bf16 %v9789_v61, %v9788_v14 }
 0x241   : > { %v1156_v22 = vadd.f32 %v1119_v48, %v11801_v49  ;;  %v2362_v48 = vsel %vm12107_vm5, 0, %v2361_v63  ;;  %5568 = vmatpush.bf16.msrb.mxu2 %v10976_v58  ;;  %v10968_v61 = vld [vmem:[%s15777_s4 + $0x138] sm:$0xff]  ;;  %v9741_v58 = vld [vmem:[%s11367_s18 + $0x220] sm:$0xff] }
 0x242   : > { %v1344_v4 = vpop.f32.mrf.mxu0  ;;  %v12143_v54 = vpack.c.b16 %v3190_v29, %v3189_v15  ;;  %2363 = vst [vmem:[#allocation2 + $0x1c] sm:$0x8] %v2362_v48  ;;  %v2364_v48 = vld [vmem:[#allocation2 + $0x34] sm:$0x8]  ;;  %4886 = vmatpush.bf16.msrb.mxu1 %v10968_v61 }
 0x243   : > { %v12140_v39 = vadd.f32 %v1341_v51, %v1156_v22  ;;  %v1566_v32 = vpop.f32.mrf.mxu1  ;;  %v15918_v22 = vmov 0 }
 0x244   : > { %15916 = vst [vmem:[#allocation20_spill] sm:$0xff] %v12143_v54  ;;  %3309 = vmatmul.bf16.vlgmr.msra.gmra.mxu2 %v12143_v54  ;;  %v15919_v22 = vsel %vm12166_vm9, 4294967295, %v15918_v22 }
 0x245   : > { %15915 = vst [vmem:[#allocation19_spill] sm:$0xff] %v12140_v39  ;;  %9812 = vmatmul.msk.bf16.gmra.mxu0 %vm429_vm2, %v2087_v31  ;;  %9763 = vmatmul.msk.bf16.gmra.mxu3 %vm429_vm2, %v1865_v41  ;;  %v9739_v41 = vld [vmem:[%s11367_s18 + $0x1f0] sm:$0xff]  ;;  %v9740_v31 = vld [vmem:[%s11367_s18 + $0x1f8] sm:$0xff] }
 0x246   : > { %15920 = vst [vmem:[#allocation22_spill] sm:$0xff] %v15919_v22  ;;  %v1866_v1 = vpack.c.bf16 %v9740_v31, %v9739_v41  ;;  %v9790_v41 = vld [vmem:[%s11367_s18 + $0x221] sm:$0xff]  ;;  %v9791_v31 = vld [vmem:[%s11367_s18 + $0x229] sm:$0xff] }
 0x248   : > { %v1122_v49 = vpop.f32.mrf.mxu3 }
 0x249   : > { %v1157_v24 = vadd.f32 %v1122_v49, %v11814_v53  ;;  %v10936_v53 = vld [vmem:[%s15777_s4 + $0xb8] sm:$0xff]  ;;  %v2409_v49 = vld [vmem:[#allocation2 + $0x28] sm:$0x1] }
 0x24a   : > { %v1346_v10 = vpop.f32.mrf.mxu0  ;;  %3954 = vmatpush.bf16.msrb.mxu3 %v10936_v53  ;;  %v2365_v53 = vsel %vm12107_vm5, 0, %v2364_v48 }
 0x24b   : > { %v1379_v51 = vadd.f32 %v1344_v4, %v1157_v24  ;;  %2366 = vst [vmem:[#allocation2 + $0x34] sm:$0x8] %v2365_v53 }
 0x24d   : > { %v12150_v33 = vadd.f32 %v1566_v32, %v1379_v51  ;;  %v2410_v32 = vsel %vm12166_vm9, 0, %v2409_v49  ;;  %v12176_v51 = vpop.f32.mrf.mxu2  ;;  %v2089_v49 = vpack.c.bf16 %v9791_v31, %v9790_v41  ;;  %v2412_v31 = vld [vmem:[#allocation2 + $0x40] sm:$0x1] }
 0x24e   : > { %2411 = vst [vmem:[#allocation2 + $0x28] sm:$0x1] %v2410_v32 }
 0x24f   : > { %15917 = vst [vmem:[#allocation21_spill] sm:$0xff] %v12150_v33 }
 0x250   : > { %v1124_v4 = vpop.f32.mrf.mxu3 }
 0x251   : > { %v1158_v15 = vadd.f32 %v1124_v4, %v11822_v11  ;;  %v9742_v4 = vld [vmem:[%s11367_s18 + $0x228] sm:$0xff] }
 0x252   : > { %v2158_v29 = vpop.f32.mrf.mxu0 }
 0x253   : > { %v12171_v24 = vadd.f32 %v1346_v10, %v1158_v15  ;;  %v10960_v10 = vld [vmem:[%s15777_s4 + $0xf8] sm:$0xff]  ;;  %v12197_v15 = vld [vmem:[%s15776_s3] ss:$0 sm:$0xff] }
 0x254   : > { %4604 = vmatpush.bf16.msrb.mxu0 %v10960_v10  ;;  %v1867_v10 = vpack.c.bf16 %v9742_v4, %v9741_v58  ;;  %v2367_v4 = vld [vmem:[#allocation2 + $0x4c] sm:$0x8] }
 0x255   : > { %15921 = vst [vmem:[#allocation23_spill] sm:$0xff] %v12171_v24  ;;  %9813 = vmatmul.msk.bf16.gmra.mxu0 %vm429_vm2, %v2088_v7  ;;  %9764 = vmatmul.msk.bf16.gmra.mxu3 %vm429_vm2, %v1866_v1 }
 0x258   : > { %v1936_v11 = vpop.f32.mrf.mxu3 }
 0x259   : > { %v2016_v14 = vadd.f32 %v1936_v11, %v11838_v18  ;;  %v12192_v18 = vpop.f32.mrf.mxu2 }
 0x25a   : > { %v2160_v63 = vpop.f32.mrf.mxu0 }
 0x25b   : > { %v2238_v7 = vadd.f32 %v2158_v29, %v2016_v14 }
 0x25d   : > { %v2273_v61 = vadd.f32 %v12197_v15, %v2238_v7  ;;  %v9792_v7 = vld [vmem:[%s11367_s18 + $0x251] sm:$0xff] }
 0x25f   : > { %v2305_v14 = vmax.f32 %v2273_v61, 0.0  ;;  %v10935_v61 = vld [vmem:[%s15777_s4 + $0xb0] sm:$0xff] }
 0x260   : > { %v1938_v1 = vpop.f32.mrf.mxu3  ;;  %3955 = vmatpush.bf16.msrb.mxu3 %v10935_v61 }
 0x261   : > { %v2017_v32 = vadd.f32 %v1938_v1, %v11849_v21  ;;  %v12204_v24 = vpop.f32.mrf.mxu2  ;;  %v9793_v1 = vld [vmem:[%s11367_s18 + $0x259] sm:$0xff] }
 0x262   : > { %v2163_v11 = vpop.f32.mrf.mxu0 }
 0x263   : > { %v2239_v48 = vadd.f32 %v2160_v63, %v2017_v32  ;;  %v2413_v63 = vsel %vm12166_vm9, 0, %v2412_v31  ;;  %v2368_v32 = vsel %vm12107_vm5, 0, %v2367_v4 }
 0x264   : > { %2414 = vst [vmem:[#allocation2 + $0x40] sm:$0x1] %v2413_v63 }
 0x265   : > { %9814 = vmatmul.msk.bf16.gmra.mxu0 %vm429_vm2, %v2089_v49  ;;  %v2274_v29 = vadd.f32 %v12197_v15, %v2239_v48  ;;  %9765 = vmatmul.msk.bf16.gmra.mxu3 %vm429_vm2, %v1867_v10  ;;  %v2524_v49 = vld [vmem:[#allocation2 + $0x1c] sm:$0x8]  ;;  %2369 = vst [vmem:[#allocation2 + $0x4c] sm:$0x8] %v2368_v32  ;;  %v2090_v48 = vpack.c.bf16 %v9793_v1, %v9792_v7 }
 0x267   : > { %v2306_v53 = vmax.f32 %v2274_v29, 0.0  ;;  %v2594_v29 = vshrl.u32 %v2524_v49, 16 }
 0x268   : > { %v1941_v54 = vpop.f32.mrf.mxu3 }
 0x269   : > { %v11092_v41 = vpack.c.bf16 %v2306_v53, %v2305_v14  ;;  %v2018_v58 = vadd.f32 %v1941_v54, %v11852_v45  ;;  %v10975_v45 = vld [vmem:[%s15777_s4 + $0x170] sm:$0xff]  ;;  %v12221_v63 = vpop.f32.mrf.mxu2  ;;  %v9822_v7 = vrot.slane %v2594_v29, 11 }
 0x26a   : > { %v2165_v21 = vpop.f32.mrf.mxu0  ;;  %5569 = vmatpush.bf16.msrb.mxu2 %v10975_v45 }
 0x26b   : > { %11169 = vst [vmem:[#allocation2 + $0x20] sm:$0xff] %v11092_v41   ;;  %v2240_v10 = vadd.f32 %v2163_v11, %v2018_v58 }
 0x26d   : > { %v2275_v41 = vadd.f32 %v12197_v15, %v2240_v10 }
 0x26f   : > { %v2307_v45 = vmax.f32 %v2275_v41, 0.0  ;;  %v10959_v41 = vld [vmem:[%s15777_s4 + $0xf0] sm:$0xff] }
 0x270   : > { %v1943_v54 = vpop.f32.mrf.mxu3  ;;  %4605 = vmatpush.bf16.msrb.mxu0 %v10959_v41 }
 0x271   : > { %v2019_v14 = vadd.f32 %v1943_v54, %v11869_v27 }
 0x272   : > { %v2168_v53 = vpop.f32.mrf.mxu0  ;;  %v10898_v11 = vld [vmem:[#allocation2 + $0x20] sm:$0xff] }
 0x273   : > { %v2525_v31 = vld [vmem:[#allocation2 + $0x20] sm:$0xf]  ;;  %v2526_v58 = vld [vmem:[#allocation2 + $0x24] sm:$0xf]  ;;  %v2241_v4 = vadd.f32 %v2165_v21, %v2019_v14  ;;  %3113 = vmatmul.bf16.gmra.mxu1 %v10898_v11 }
 0x274   : > { %v2599_v32 = vshrl.u32 %v2525_v31, 16  ;;  %v2608_v33 = vshrl.u32 %v2526_v58, 16  ;;  %v2602_v1 = vshll.u32 %v2525_v31, 16  ;;  %v2611_v61 = vshll.u32 %v2526_v58, 16 }
 0x275   : > { %9815 = vmatmul.msk.bf16.gmra.mxu0 %vm429_vm2, %v2090_v48  ;;  %v2276_v27 = vadd.f32 %v12197_v15, %v2241_v4  ;;  %9766 = vmatmul.msk.bf16.gmra.mxu3 %vm429_vm2, %v11880_v6  ;;  %v10967_v4 = vld [vmem:[%s15777_s4 + $0x130] sm:$0xff] }
 0x276   : > { %v2601_v49 = vrot.slane %v2599_v32, 7  ;;  %v2610_v10 = vrot.slane %v2608_v33, 7  ;;  %4887 = vmatpush.bf16.msrb.mxu1 %v10967_v4 }
 0x277   : > { %v2308_v54 = vmax.f32 %v2276_v27, 0.0  ;;  %v9795_v27 = vld [vmem:[%s11367_s18 + $0x289] sm:$0xff] }
 0x278   : > { %v2604_v59 = vor.u32 %v2602_v1, %v2601_v49  ;;  %v2606_v21 = vrot.slane %v2601_v49, 4  ;;  %v2613_v14 = vor.u32 %v2611_v61, %v2610_v10  ;;  %v1946_v39 = vpop.f32.mrf.mxu3  ;;  %v9794_v1 = vld [vmem:[%s11367_s18 + $0x281] sm:$0xff]  ;;  %v2527_v49 = vld [vmem:[#allocation2 + $0x34] sm:$0x8] }
 0x279   : > { %v11097_v48 = vpack.c.bf16 %v2308_v54, %v2307_v45  ;;  %v2020_v6 = vadd.f32 %v1946_v39, %v11876_v55  ;;  %v2415_v39 = vld [vmem:[#allocation2 + $0x58] sm:$0x1]  ;;  %v2091_v45 = vpack.c.bf16 %v9795_v27, %v9794_v1  ;;  %v2616_v54 = vshrl.u32 %v2527_v49, 16 }
 0x27a   : > { %v2170_v11 = vpop.f32.mrf.mxu0  ;;  %v2605_v29 = vsel %vm12121_vm8, %v9822_v7, %v2604_v59  ;;  %v2614_v31 = vsel %vm12121_vm8, %v2606_v21, %v2613_v14  ;;  %v2370_v59 = vld [vmem:[#allocation2 + $0x64] sm:$0x8]  ;;  %v12241_v7 = vpop.f32.mrf.mxu2  ;;  %v2416_v21 = vsel %vm12166_vm9, 0, %v2415_v39 }
 0x27b   : > { %v3191_v33 = vunpack.c.l.b16 %v2605_v29  ;;  %v3192_v58 = vunpack.c.l.b16 %v2614_v31  ;;  %11170 = vst [vmem:[#allocation2 + $0x38] sm:$0xff] %v11097_v48   ;;  %v2371_v55 = vsel %vm12107_vm5, 0, %v2370_v59  ;;  %v2242_v10 = vadd.f32 %v2168_v53, %v2020_v6 }
 0x27c   : > { %2372 = vst [vmem:[#allocation2 + $0x64] sm:$0x8] %v2371_v55  ;;  %v9823_v4 = vrot.slane %v2616_v54, 11 }
 0x27d   : > { %v12238_v32 = vpack.c.b16 %v3192_v58, %v3191_v33  ;;  %2417 = vst [vmem:[#allocation2 + $0x58] sm:$0x1] %v2416_v21  ;;  %v2277_v29 = vadd.f32 %v12197_v15, %v2242_v10 }
 0x27f   : > { %15922 = vst [vmem:[#allocation24_spill] sm:$0xff] %v12238_v32  ;;  %3314 = vmatmul.bf16.gmra.mxu2 %v12238_v32  ;;  %v2309_v55 = vmax.f32 %v2277_v29, 0.0 }
 0x280   : > { %v1948_v61 = vpop.f32.mrf.mxu3 }
 0x281   : > { %v2021_v14 = vadd.f32 %v1948_v61, %v11889_v3 }
 0x282   : > { %v2173_v48 = vpop.f32.mrf.mxu0  ;;  %v10899_v31 = vld [vmem:[#allocation2 + $0x38] sm:$0xff]  ;;  %v12255_v39 = vpop.f32.mrf.mxu2 }
 0x283   : > { %v2528_v33 = vld [vmem:[#allocation2 + $0x38] sm:$0xf]  ;;  %v2529_v58 = vld [vmem:[#allocation2 + $0x3c] sm:$0xf]  ;;  %v2243_v41 = vadd.f32 %v2170_v11, %v2021_v14  ;;  %3118 = vmatmul.bf16.gmra.mxu1 %v10899_v31 }
 0x284   : > { %v2621_v53 = vshrl.u32 %v2528_v33, 16  ;;  %v2630_v6 = vshrl.u32 %v2529_v58, 16  ;;  %v2624_v1 = vshll.u32 %v2528_v33, 16  ;;  %v2633_v49 = vshll.u32 %v2529_v58, 16 }
 0x285   : > { %9816 = vmatmul.msk.bf16.gmra.mxu0 %vm429_vm2, %v2091_v45  ;;  %v2278_v59 = vadd.f32 %v12197_v15, %v2243_v41  ;;  %9767 = vmatmul.msk.bf16.gmra.mxu3 %vm429_vm2, %v11901_v42 }
 0x286   : > { %v2623_v3 = vrot.slane %v2621_v53, 7  ;;  %v2632_v27 = vrot.slane %v2630_v6, 7  ;;  %v9796_v53 = vld [vmem:[%s11367_s18 + $0x2b1] sm:$0xff]  ;;  %v2373_v6 = vld [vmem:[#allocation2 + $0x7c] sm:$0x8] }
 0x287   : > { %v2310_v11 = vmax.f32 %v2278_v59, 0.0  ;;  %v2530_v59 = vld [vmem:[#allocation2 + $0x4c] sm:$0x8] }
 0x288   : > { %v2626_v10 = vor.u32 %v2624_v1, %v2623_v3  ;;  %v2628_v61 = vrot.slane %v2623_v3, 4  ;;  %v2635_v45 = vor.u32 %v2633_v49, %v2632_v27  ;;  %v1951_v21 = vpop.f32.mrf.mxu3  ;;  %v9797_v1 = vld [vmem:[%s11367_s18 + $0x2b9] sm:$0xff]  ;;  %v2374_v3 = vsel %vm12107_vm5, 0, %v2373_v6  ;;  %v2418_v27 = vld [vmem:[#allocation2 + $0x70] sm:$0x1] }
 0x289   : > { %v11102_v54 = vpack.c.bf16 %v2310_v11, %v2309_v55  ;;  %v2022_v29 = vadd.f32 %v1951_v21, %v11894_v62  ;;  %v9747_v49 = vld [vmem:[%s11367_s18 + $0x2b0] sm:$0xff]  ;;  %v9748_v55 = vld [vmem:[%s11367_s18 + $0x2b8] sm:$0xff]  ;;  %2375 = vst [vmem:[#allocation2 + $0x7c] sm:$0x8] %v2374_v3  ;;  %v10934_v62 = vld [vmem:[%s15777_s4 + $0xa8] sm:$0xff]  ;;  %v2419_v21 = vsel %vm12166_vm9, 0, %v2418_v27 }
 0x28a   : > { %v2175_v14 = vpop.f32.mrf.mxu0  ;;  %v2627_v31 = vsel %vm12121_vm8, %v9823_v4, %v2626_v10  ;;  %v2636_v42 = vsel %vm12121_vm8, %v2628_v61, %v2635_v45  ;;  %v10974_v11 = vld [vmem:[%s15777_s4 + $0x168] sm:$0xff]  ;;  %v2092_v61 = vpack.c.bf16 %v9797_v1, %v9796_v53  ;;  %v2638_v45 = vshrl.u32 %v2530_v59, 16  ;;  %3956 = vmatpush.bf16.msrb.mxu3 %v10934_v62  ;;  %2420 = vst [vmem:[#allocation2 + $0x70] sm:$0x1] %v2419_v21 }
 0x28b   : > { %v3193_v33 = vunpack.c.l.b16 %v2627_v31  ;;  %v3194_v58 = vunpack.c.l.b16 %v2636_v42  ;;  %11171 = vst [vmem:[#allocation2 + $0x50] sm:$0xff] %v11102_v54   ;;  %v2244_v4 = vadd.f32 %v2173_v48, %v2022_v29  ;;  %v12279_v48 = vpop.f32.mrf.mxu2  ;;  %v1870_v42 = vpack.c.bf16 %v9748_v55, %v9747_v49  ;;  %5570 = vmatpush.bf16.msrb.mxu2 %v10974_v11 }
 0x28c   : > { %v9824_v59 = vrot.slane %v2638_v45, 11 }
 0x28d   : > { %v12262_v41 = vpack.c.b16 %v3194_v58, %v3193_v33  ;;  %v2279_v29 = vadd.f32 %v12197_v15, %v2244_v4 }
 0x28f   : > { %15923 = vst [vmem:[#allocation25_spill] sm:$0xff] %v12262_v41  ;;  %3319 = vmatmul.bf16.gmra.mxu2 %v12262_v41  ;;  %v2311_v11 = vmax.f32 %v2279_v29, 0.0  ;;  %v1580_v29 = vadd.f32 %v11916_v8, %v11925_v26 }
 0x290   : > { %v1953_v10 = vpop.f32.mrf.mxu3 }
 0x291   : > { %v2023_v54 = vadd.f32 %v1953_v10, %v11913_v23 }
 0x292   : > { %v2178_v31 = vpop.f32.mrf.mxu0  ;;  %v10900_v33 = vld [vmem:[#allocation2 + $0x50] sm:$0xff] }
 0x293   : > { %v2531_v58 = vld [vmem:[#allocation2 + $0x50] sm:$0xf]  ;;  %v2532_v6 = vld [vmem:[#allocation2 + $0x54] sm:$0xf]  ;;  %v2245_v3 = vadd.f32 %v2175_v14, %v2023_v54  ;;  %3123 = vmatmul.bf16.gmra.mxu1 %v10900_v33 }
 0x294   : > { %v2643_v53 = vshrl.u32 %v2531_v58, 16  ;;  %v2652_v1 = vshrl.u32 %v2532_v6, 16  ;;  %v2646_v27 = vshll.u32 %v2531_v58, 16  ;;  %v2655_v62 = vshll.u32 %v2532_v6, 16 }
 0x295   : > { %9817 = vmatmul.msk.bf16.gmra.mxu0 %vm429_vm2, %v2092_v61  ;;  %v2280_v23 = vadd.f32 %v12197_v15, %v2245_v3  ;;  %9768 = vmatmul.msk.bf16.gmra.mxu3 %vm429_vm2, %v1870_v42  ;;  %v12293_v3 = vpop.f32.mrf.mxu2 }
 0x296   : > { %v2645_v49 = vrot.slane %v2643_v53, 7  ;;  %v2654_v55 = vrot.slane %v2652_v1, 7  ;;  %v10958_v53 = vld [vmem:[%s15777_s4 + $0xe8] sm:$0xff] }
 0x297   : > { %v2312_v4 = vmax.f32 %v2280_v23, 0.0  ;;  %v2533_v23 = vld [vmem:[#allocation2 + $0x64] sm:$0x8]  ;;  %4606 = vmatpush.bf16.msrb.mxu0 %v10958_v53 }
 0x298   : > { %v2648_v10 = vor.u32 %v2646_v27, %v2645_v49  ;;  %v2650_v21 = vrot.slane %v2645_v49, 4  ;;  %v2657_v41 = vor.u32 %v2655_v62, %v2654_v55  ;;  %v1956_v14 = vpop.f32.mrf.mxu3  ;;  %v9799_v27 = vld [vmem:[%s11367_s18 + $0x2e9] sm:$0xff]  ;;  %v9749_v49 = vld [vmem:[%s11367_s18 + $0x2e0] sm:$0xff]  ;;  %v1803_v62 = vadd.f32 %v12007_v46, %v1580_v29 }
 0x299   : > { %v11107_v54 = vpack.c.bf16 %v2312_v4, %v2311_v11  ;;  %v2024_v42 = vadd.f32 %v1956_v14, %v11920_v36  ;;  %v2376_v36 = vld [vmem:[#allocation2 + $0x94] sm:$0x8]  ;;  %v9750_v55 = vld [vmem:[%s11367_s18 + $0x2e8] sm:$0xff] }
 0x29a   : > { %v2180_v61 = vpop.f32.mrf.mxu0  ;;  %v2649_v45 = vsel %vm12121_vm8, %v9824_v59, %v2648_v10  ;;  %v2658_v33 = vsel %vm12121_vm8, %v2650_v21, %v2657_v41  ;;  %v10966_v41 = vld [vmem:[%s15777_s4 + $0x128] sm:$0xff]  ;;  %v2377_v8 = vsel %vm12107_vm5, 0, %v2376_v36  ;;  %v2660_v10 = vshrl.u32 %v2533_v23, 16 }
 0x29b   : > { %v3195_v58 = vunpack.c.l.b16 %v2649_v45  ;;  %v3196_v6 = vunpack.c.l.b16 %v2658_v33  ;;  %11172 = vst [vmem:[#allocation2 + $0x68] sm:$0xff] %v11107_v54   ;;  %v9798_v59 = vld [vmem:[%s11367_s18 + $0x2e1] sm:$0xff]  ;;  %4888 = vmatpush.bf16.msrb.mxu1 %v10966_v41  ;;  %v2246_v26 = vadd.f32 %v2178_v31, %v2024_v42  ;;  %v1871_v54 = vpack.c.bf16 %v9750_v55, %v9749_v49  ;;  %v10956_v55 = vld [vmem:[%s15777_s4 + $0xd8] sm:$0xff] }
 0x29c   : > { %2378 = vst [vmem:[#allocation2 + $0x94] sm:$0x8] %v2377_v8  ;;  %v2093_v4 = vpack.c.bf16 %v9799_v27, %v9798_v59  ;;  %v10933_v45 = vld [vmem:[%s15777_s4 + $0xa0] sm:$0xff]  ;;  %v9825_v41 = vrot.slane %v2660_v10, 11  ;;  %v2348_v59 = vld [vmem:[#allocation2 + $0x10] sm:$0x1] }
 0x29d   : > { %v12301_v1 = vpack.c.b16 %v3196_v6, %v3195_v58  ;;  %v10957_v31 = vld [vmem:[%s15777_s4 + $0xe0] sm:$0xff]  ;;  %v2281_v33 = vadd.f32 %v12197_v15, %v2246_v26  ;;  %3957 = vmatpush.bf16.msrb.mxu3 %v10933_v45  ;;  %v12321_v27 = vpop.f32.mrf.mxu2 }
 0x29e   : > { %4607 = vmatpush.bf16.msrb.mxu0 %v10957_v31 }
 0x29f   : > { %15924 = vst [vmem:[#allocation26_spill] sm:$0xff] %v12301_v1  ;;  %3324 = vmatmul.bf16.gmra.mxu2 %v12301_v1 }
 0x2a0   : > { %v1958_v11 = vpop.f32.mrf.mxu3 }
 0x2a1   : > { %v2025_v21 = vadd.f32 %v1958_v11, %v1803_v62  ;;  %v2313_v62 = vmax.f32 %v2281_v33, 0.0  ;;  %v2349_v11 = vsel %vm12166_vm9, 0, %v2348_v59 }
 0x2a2   : > { %v12311_v14 = vpop.f32.mrf.mxu0  ;;  %v10901_v42 = vld [vmem:[#allocation2 + $0x68] sm:$0xff]  ;;  %4608 = vmatpush.bf16.msrb.mxu0 %v10956_v55  ;;  %2350 = vst [vmem:[#allocation2 + $0x10] sm:$0x1] %v2349_v11  ;;  %v12376_v11 = vld [vmem:[#allocation2 + $0x24] sm:$0xf] }
 0x2a3   : > { %v2534_v58 = vld [vmem:[#allocation2 + $0x68] sm:$0xf]  ;;  %v2535_v46 = vld [vmem:[#allocation2 + $0x6c] sm:$0xf]  ;;  %v2247_v6 = vadd.f32 %v2180_v61, %v2025_v21  ;;  %3128 = vmatmul.bf16.gmra.mxu1 %v10901_v42  ;;  %v10932_v61 = vld [vmem:[%s15777_s4 + $0x98] sm:$0xff]  ;;  %v1582_v42 = vadd.f32 %v11933_v5, %v11948_v35 }
 0x2a4   : > { %v2665_v29 = vshrl.u32 %v2534_v58, 16  ;;  %v2674_v53 = vshrl.u32 %v2535_v46, 16  ;;  %v2668_v36 = vshll.u32 %v2534_v58, 16  ;;  %v2677_v49 = vshll.u32 %v2535_v46, 16  ;;  %3958 = vmatpush.bf16.msrb.mxu3 %v10932_v61  ;;  %v2536_v61 = vld [vmem:[#allocation2 + $0x7c] sm:$0x8] }
 0x2a5   : > { %9818 = vmatmul.msk.bf16.gmra.mxu0 %vm429_vm2, %v2093_v4  ;;  %v2282_v23 = vadd.f32 %v12197_v15, %v2247_v6  ;;  %9769 = vmatmul.msk.bf16.gmra.mxu3 %vm429_vm2, %v1871_v54  ;;  %v1804_v54 = vadd.f32 %v12021_v9, %v11935_v20  ;;  %v10955_v20 = vld [vmem:[%s15777_s4 + $0xd0] sm:$0xff] }
 0x2a6   : > { %v2667_v8 = vrot.slane %v2665_v29, 7  ;;  %v2676_v26 = vrot.slane %v2674_v53, 7  ;;  %v10931_v29 = vld [vmem:[%s15777_s4 + $0x90] sm:$0xff]  ;;  %v1584_v53 = vadd.f32 %v11956_v60, %v11967_v47  ;;  %4609 = vmatpush.bf16.msrb.mxu0 %v10955_v20  ;;  %v10930_v60 = vld [vmem:[%s15777_s4 + $0x88] sm:$0xff] }
 0x2a7   : > { %v2314_v4 = vmax.f32 %v2282_v23, 0.0  ;;  %v9800_v23 = vld [vmem:[%s11367_s18 + $0x311] sm:$0xff]  ;;  %v10954_v47 = vld [vmem:[%s15777_s4 + $0xc8] sm:$0xff] }
 0x2a8   : > { %v2670_v10 = vor.u32 %v2668_v36, %v2667_v8  ;;  %v2672_v21 = vrot.slane %v2667_v8, 4  ;;  %v2679_v45 = vor.u32 %v2677_v49, %v2676_v26  ;;  %v1961_v31 = vpop.f32.mrf.mxu3  ;;  %3959 = vmatpush.bf16.msrb.mxu3 %v10931_v29  ;;  %v12351_v36 = vld [vmem:[#allocation2 + $0x20] sm:$0xf]  ;;  %v12357_v26 = vld [vmem:[#allocation2 + $0x1c] sm:$0x8]  ;;  %v1805_v49 = vadd.f32 %v12034_v43, %v1582_v42  ;;  %v9751_v43 = vld [vmem:[%s11367_s18 + $0x310] sm:$0xff] }
 0x2a9   : > { %v11112_v58 = vpack.c.bf16 %v2314_v4, %v2313_v62  ;;  %v2026_v9 = vadd.f32 %v1961_v31, %v1804_v54  ;;  %v9801_v8 = vld [vmem:[%s11367_s18 + $0x319] sm:$0xff]  ;;  %v4129_v4 = vshrl.u32 %v12351_v36, 16 }
 0x2aa   : > { %v2185_v33 = vpop.f32.mrf.mxu0  ;;  %v2671_v46 = vsel %vm12121_vm8, %v9825_v41, %v2670_v10  ;;  %v2680_v6 = vsel %vm12121_vm8, %v2672_v21, %v2679_v45  ;;  %v1586_v41 = vadd.f32 %v11974_v13, %v11989_v30  ;;  %v12368_v13 = vadd.f32 %v12046_v37, %v11958_v16  ;;  %v9752_v62 = vld [vmem:[%s11367_s18 + $0x318] sm:$0xff]  ;;  %4610 = vmatpush.bf16.msrb.mxu0 %v10954_v47  ;;  %v10929_v42 = vld [vmem:[%s15777_s4 + $0x80] sm:$0xff] }
 0x2ab   : > { %v3197_v5 = vunpack.c.l.b16 %v2671_v46  ;;  %v3198_v35 = vunpack.c.l.b16 %v2680_v6  ;;  %11173 = vst [vmem:[#allocation2 + $0x80] sm:$0xff] %v11112_v58   ;;  %v1588_v30 = vadd.f32 %v11994_v34, %v12003_v25  ;;  %v2248_v55 = vadd.f32 %v12311_v14, %v2026_v9  ;;  %v12389_v34 = vpop.f32.mrf.mxu2  ;;  %v10973_v25 = vld [vmem:[%s15777_s4 + $0x160] sm:$0xff] }
 0x2ac   : > { %v12380_v10 = vadd.f32 %v12058_v19, %v1584_v53  ;;  %v12384_v16 = vadd.f32 %v12071_v40, %v11976_v56  ;;  %v12387_v37 = vadd.f32 %v12083_v38, %v1586_v41  ;;  %3960 = vmatpush.bf16.msrb.mxu3 %v10930_v60  ;;  %v1590_v14 = vadd.f32 %v12010_v0, %v12027_v52  ;;  %v2379_v40 = vld [vmem:[#allocation2 + $0xac] sm:$0x8]  ;;  %v10953_v58 = vld [vmem:[%s15777_s4 + $0xc0] sm:$0xff]  ;;  %v15926_v53 = vld [vmem:[#allocation3_spill] sm:$0xff] }
 0x2ad   : > { %v12353_v59 = vpack.c.b16 %v3198_v35, %v3197_v5  ;;  %v2094_v21 = vpack.c.bf16 %v9801_v8, %v9800_v23  ;;  %v2682_v45 = vshrl.u32 %v2536_v61, 16  ;;  %v4124_v56 = vshrl.u32 %v12357_v26, 16  ;;  %5571 = vmatpush.bf16.msrb.mxu2 %v10973_v25  ;;  %v3393_v61 = vld [vmem:[#allocation2 + $0x20] sm:$0xf] }
 0x2ae   : > { %v1872_v31 = vpack.c.bf16 %v9752_v62, %v9751_v43  ;;  %v4138_v0 = vshrl.u32 %v12376_v11, 16  ;;  %v2380_v52 = vsel %vm12107_vm5, 0, %v2379_v40  ;;  %v12410_v46 = vadd.f32 %v12093_v28, %v11996_v2  ;;  %4611 = vmatpush.bf16.msrb.mxu0 %v10953_v58  ;;  %v3391_v43 = vld [vmem:[#allocation2 + $0xc] sm:$0xf] }
 0x2af   : > { %15925 = vst [vmem:[#allocation27_spill] sm:$0xff] %v12353_v59  ;;  %3329 = vmatmul.bf16.gmra.mxu2 %v12353_v59  ;;  %v12413_v6 = vadd.f32 %v12117_v12, %v1588_v30  ;;  %v2283_v29 = vadd.f32 %v12197_v15, %v2248_v55  ;;  %v12416_v35 = vrot.slane %v4129_v4, 7  ;;  %v12420_v41 = vadd.f32 %v12135_v44, %v15926_v53  ;;  %v3390_v30 = vld [vmem:[#allocation2 + $0x8] sm:$0xf] }
 0x2b0   : > { %v1963_v19 = vpop.f32.mrf.mxu3  ;;  %3961 = vmatpush.bf16.msrb.mxu3 %v10929_v42  ;;  %2381 = vst [vmem:[#allocation2 + $0xac] sm:$0x8] %v2380_v52  ;;  %v12423_v2 = vadd.f32 %v12148_v17, %v1590_v14  ;;  %v9826_v28 = vrot.slane %v2682_v45, 11  ;;  %v12429_v17 = vrot.slane %v4124_v56, 11  ;;  %v4140_v4 = vrot.slane %v4138_v0, 7 }
 0x2b1   : > { %v2027_v54 = vadd.f32 %v1963_v19, %v1805_v49  ;;  %v4132_v49 = vshll.u32 %v12351_v36, 16  ;;  %v2315_v55 = vmax.f32 %v2283_v29, 0.0  ;;  %v3442_v40 = vshrl.u32 %v3390_v30, 16 }
 0x2b2   : > { %v12397_v38 = vpop.f32.mrf.mxu0  ;;  %v10902_v20 = vld [vmem:[#allocation2 + $0x80] sm:$0xff]  ;;  %v3466_v42 = vshrl.u32 %v3393_v61, 16  ;;  %v3469_v58 = vshll.u32 %v3393_v61, 16 }
 0x2b3   : > { %v2537_v9 = vld [vmem:[#allocation2 + $0x80] sm:$0xf]  ;;  %v2538_v5 = vld [vmem:[#allocation2 + $0x84] sm:$0xf]  ;;  %v2249_v23 = vadd.f32 %v2185_v33, %v2027_v54  ;;  %3133 = vmatmul.bf16.gmra.mxu1 %v10902_v20  ;;  %v12432_v62 = vor.u32 %v4132_v49, %v12416_v35  ;;  %v3445_v54 = vshll.u32 %v3390_v30, 16  ;;  %v12434_v52 = vpop.f32.mrf.mxu2 }
 0x2b4   : > { %v2687_v8 = vshrl.u32 %v2537_v9, 16  ;;  %v2696_v26 = vshrl.u32 %v2538_v5, 16  ;;  %v2690_v12 = vshll.u32 %v2537_v9, 16  ;;  %v2699_v47 = vshll.u32 %v2538_v5, 16  ;;  %v12451_v30 = vld [vmem:[#allocation2 + $0x34] sm:$0x8] }
 0x2b5   : > { %9819 = vmatmul.msk.bf16.gmra.mxu0 %vm429_vm2, %v2094_v21  ;;  %v2284_v44 = vadd.f32 %v12197_v15, %v2249_v23  ;;  %9770 = vmatmul.msk.bf16.gmra.mxu3 %vm429_vm2, %v1872_v31  ;;  %v3395_v21 = vld [vmem:[#allocation2 + $0x28] sm:$0x1]  ;;  %v3394_v31 = vld [vmem:[#allocation2 + $0x24] sm:$0xf]  ;;  %v3451_v9 = vshll.u32 %v3391_v43, 16 }
 0x2b6   : > { %v2689_v33 = vrot.slane %v2687_v8, 7  ;;  %v2698_v60 = vrot.slane %v2696_v26, 7  ;;  %v3455_v8 = vshrl.u32 %v3391_v43, 16  ;;  %v10965_v26 = vld [vmem:[%s15777_s4 + $0x120] sm:$0xff]  ;;  %v3475_v49 = vshll.u32 %v3394_v31, 16  ;;  %v15929_v43 = vld [vmem:[#allocation4_spill] sm:$0xff] }
 0x2b7   : > { %v2316_v25 = vmax.f32 %v2284_v44, 0.0  ;;  %v3479_v61 = vshrl.u32 %v3394_v31, 16  ;;  %4889 = vmatpush.bf16.msrb.mxu1 %v10965_v26  ;;  %v12466_v31 = vrot.slane %v3451_v9, 5 }
 0x2b8   : > { %v2692_v14 = vor.u32 %v2690_v12, %v2689_v33  ;;  %v2694_v36 = vrot.slane %v2689_v33, 4  ;;  %v2701_v19 = vor.u32 %v2699_v47, %v2698_v60  ;;  %v1966_v45 = vpop.f32.mrf.mxu3  ;;  %v4141_v12 = vshll.u32 %v12376_v11, 16  ;;  %v9802_v33 = vld [vmem:[%s11367_s18 + $0x341] sm:$0xff]  ;;  %v2539_v11 = vld [vmem:[#allocation2 + $0x94] sm:$0x8] }
 0x2b9   : > { %v11117_v29 = vpack.c.bf16 %v2316_v25, %v2315_v55  ;;  %v2028_v5 = vadd.f32 %v1966_v45, %v12368_v13  ;;  %v3444_v60 = vrot.slane %v3442_v40, 4  ;;  %v3447_v13 = vrot.slane %v3445_v54, 5  ;;  %v15928_v55 = vld [vmem:[#allocation6_spill] sm:$0xff]  ;;  %v9753_v40 = vld [vmem:[%s11367_s18 + $0x340] sm:$0xff] }
 0x2ba   : > { %v12436_v56 = vpop.f32.mrf.mxu0  ;;  %v2693_v0 = vsel %vm12121_vm8, %v9826_v28, %v2692_v14  ;;  %v2702_v20 = vsel %vm12121_vm8, %v2694_v36, %v2701_v19  ;;  %v3485_v28 = vshll.u32 %v3395_v21, 16  ;;  %v4136_v47 = vrot.slane %v12416_v35, 4  ;;  %v9803_v14 = vld [vmem:[%s11367_s18 + $0x349] sm:$0xff]  ;;  %v2421_v45 = vld [vmem:[#allocation2 + $0x88] sm:$0x1] }
 0x2bb   : > { %v3199_v53 = vunpack.c.l.b16 %v2693_v0  ;;  %v3200_v23 = vunpack.c.l.b16 %v2702_v20  ;;  %11174 = vst [vmem:[#allocation2 + $0x98] sm:$0xff] %v11117_v29   ;;  %v12455_v25 = vadd.f32 %v15929_v43, %v15928_v55  ;;  %v4135_v36 = vsel %vm12121_vm8, %v12429_v17, %v12432_v62  ;;  %v9754_v54 = vld [vmem:[%s11367_s18 + $0x348] sm:$0xff]  ;;  %v3392_v20 = vld [vmem:[#allocation2 + $0x10] sm:$0x1] }
 0x2bc   : > { %v4143_v19 = vor.u32 %v4141_v12, %v4140_v4  ;;  %v3468_v21 = vrot.slane %v3466_v42, 4  ;;  %v2250_v35 = vadd.f32 %v12397_v38, %v2028_v5  ;;  %v3457_v29 = vrot.slane %v3455_v8, 4 }
 0x2bd   : > { %v12447_v44 = vpack.c.b16 %v3200_v23, %v3199_v53  ;;  %v3471_v0 = vrot.slane %v3469_v58, 5  ;;  %v12468_v53 = vrot.slane %v3475_v49, 5  ;;  %v12470_v23 = vrot.slane %v3479_v61, 4  ;;  %v12486_v61 = vld [vmem:[#allocation2 + $0x38] sm:$0xf] }
 0x2be   : > { %v12472_v26 = vrot.slane %v3485_v28, 5  ;;  %v2095_v4 = vpack.c.bf16 %v9803_v14, %v9802_v33  ;;  %v2704_v38 = vshrl.u32 %v2539_v11, 16  ;;  %v3448_v42 = vor.u32 %v3447_v13, %v3444_v60  ;;  %v12490_v14 = vpop.f32.mrf.mxu1  ;;  %v12492_v11 = vpop.f32.mrf.mxu2 }
 0x2bf   : > { %15927 = vst [vmem:[#allocation3_spill] sm:$0xff] %v12447_v44  ;;  %3334 = vmatmul.bf16.gmra.mxu2 %v12447_v44  ;;  %v2422_v5 = vsel %vm12166_vm9, 0, %v2421_v45  ;;  %v1873_v58 = vpack.c.bf16 %v9754_v54, %v9753_v40  ;;  %v12482_v12 = vsel %vm12121_vm8, %v4136_v47, %v4143_v19  ;;  %v12484_v49 = vunpack.c.l.b16 %v4135_v36 }
 0x2c0   : > { %v1968_v62 = vpop.f32.mrf.mxu3  ;;  %2423 = vst [vmem:[#allocation2 + $0x88] sm:$0x1] %v2422_v5  ;;  %v2285_v28 = vadd.f32 %v12197_v15, %v2250_v35  ;;  %v3458_v55 = vor.u32 %v3457_v29, %v12466_v31  ;;  %v3472_v43 = vor.u32 %v3471_v0, %v3468_v21  ;;  %v3482_v45 = vor.u32 %v12470_v23, %v12468_v53 }
 0x2c1   : > { %v2029_v9 = vadd.f32 %v1968_v62, %v12380_v10  ;;  %v3461_v10 = vshll.u32 %v3392_v20, 16  ;;  %v9827_v35 = vrot.slane %v2704_v38, 11  ;;  %v3449_v54 = vrot.slane %v3448_v42, 4  ;;  %v3398_v62 = vld [vmem:[#allocation2 + $0x40] sm:$0x1] }
 0x2c2   : > { %v12478_v8 = vpop.f32.mrf.mxu0  ;;  %v10903_v33 = vld [vmem:[#allocation2 + $0x98] sm:$0xff]  ;;  %v4151_v29 = vshrl.u32 %v12486_v61, 16  ;;  %v2317_v5 = vmax.f32 %v2285_v28, 0.0  ;;  %v3473_v23 = vrot.slane %v3472_v43, 4 }
 0x2c3   : > { %v2540_v60 = vld [vmem:[#allocation2 + $0x98] sm:$0xf]  ;;  %v2541_v13 = vld [vmem:[#allocation2 + $0x9c] sm:$0xf]  ;;  %v2251_v47 = vadd.f32 %v12436_v56, %v2029_v9  ;;  %3138 = vmatmul.bf16.gmra.mxu1 %v10903_v33  ;;  %v3459_v9 = vrot.slane %v3458_v55, 4  ;;  %v3463_v17 = vrot.slane %v3461_v10, 5 }
 0x2c4   : > { %v2709_v36 = vshrl.u32 %v2540_v60, 16  ;;  %v2718_v19 = vshrl.u32 %v2541_v13, 16  ;;  %v2712_v40 = vshll.u32 %v2540_v60, 16  ;;  %v2721_v56 = vshll.u32 %v2541_v13, 16  ;;  %v2382_v60 = vld [vmem:[#allocation2 + $0xc4] sm:$0x8] }
 0x2c5   : > { %9820 = vmatmul.msk.bf16.gmra.mxu0 %vm429_vm2, %v2095_v4  ;;  %v2286_v21 = vadd.f32 %v12197_v15, %v2251_v47  ;;  %9771 = vmatmul.msk.bf16.gmra.mxu3 %vm429_vm2, %v1873_v58  ;;  %v4493_v58 = vunpack.c.l.b16 %v12482_v12  ;;  %v12508_v13 = vld [vmem:[#allocation2 + $0x3c] sm:$0xf]  ;;  %v12510_v28 = vrot.slane %v4151_v29, 7  ;;  %v2383_v55 = vsel %vm12107_vm5, 0, %v2382_v60 }
 0x2c6   : > { %v2711_v0 = vrot.slane %v2709_v36, 7  ;;  %v2720_v20 = vrot.slane %v2718_v19, 7  ;;  %v3509_v10 = vshll.u32 %v3398_v62, 16  ;;  %v3454_v12 = vsel %vm12503_vm12, %v3449_v54, %v12466_v31  ;;  %2384 = vst [vmem:[#allocation2 + $0xc4] sm:$0x8] %v2383_v55  ;;  %v11064_v47 = vld [vmem:[%s15779_s6 + $0x178] sm:$0xff] }
 0x2c7   : > { %v2318_v44 = vmax.f32 %v2286_v21, 0.0  ;;  %v3396_v21 = vld [vmem:[#allocation2 + $0x38] sm:$0xf]  ;;  %v3483_v62 = vrot.slane %v3482_v45, 4  ;;  %v4160_v31 = vshrl.u32 %v12508_v13, 16  ;;  %v3310_v54 = vpop.f32.mrf.mxu2  ;;  %v3842_v45 = vunpack.c.l.b16 %v3454_v12 }
 0x2c8   : > { %v2714_v4 = vor.u32 %v2712_v40, %v2711_v0  ;;  %v2716_v33 = vrot.slane %v2711_v0, 4  ;;  %v2723_v38 = vor.u32 %v2721_v56, %v2720_v20  ;;  %v1971_v42 = vpop.f32.mrf.mxu3  ;;  %v3109_v56 = vpop.f32.mrf.mxu1  ;;  %v3493_v60 = vshll.u32 %v3396_v21, 16 }
 0x2c9   : > { %v11122_v43 = vpack.c.bf16 %v2318_v44, %v2317_v5  ;;  %v2030_v29 = vadd.f32 %v1971_v42, %v12384_v16  ;;  %v3464_v44 = vsel %vm12503_vm12, %v3459_v9, %v3463_v17  ;;  %v4154_v5 = vshll.u32 %v12486_v61, 16  ;;  %v15933_v17 = vld [vmem:[#allocation5_spill] sm:$0xff] }
 0x2ca   : > { %v2195_v36 = vpop.f32.mrf.mxu0  ;;  %v2715_v19 = vsel %vm12121_vm8, %v9827_v35, %v2714_v4  ;;  %v2724_v40 = vsel %vm12121_vm8, %v2716_v33, %v2723_v38  ;;  %v3478_v35 = vsel %vm12503_vm12, %v3473_v23, %v12468_v53  ;;  %v2424_v4 = vld [vmem:[#allocation2 + $0xa0] sm:$0x1]  ;;  %v12531_v16 = vadd.f32 %v3310_v54, %v3109_v56  ;;  %v2542_v23 = vld [vmem:[#allocation2 + $0xac] sm:$0x8] }
 0x2cb   : > { %v3201_v0 = vunpack.c.l.b16 %v2715_v19  ;;  %v3202_v20 = vunpack.c.l.b16 %v2724_v40  ;;  %11175 = vst [vmem:[#allocation2 + $0xb0] sm:$0xff] %v11122_v43   ;;  %v3490_v38 = vshrl.u32 %v3396_v21, 16  ;;  %v12535_v9 = vadd.f32 %v12176_v51, %v15933_v17  ;;  %v3397_v40 = vld [vmem:[#allocation2 + $0x3c] sm:$0xf] }
 0x2cc   : > { %v12539_v53 = vadd.f32 %v12192_v18, %v12455_v25  ;;  %v3843_v61 = vunpack.c.l.b16 %v3464_v44  ;;  %v2252_v42 = vadd.f32 %v12478_v8, %v2030_v29  ;;  %v15934_v55 = vshrl.u32 %v12451_v30, 16  ;;  %v10972_v30 = vld [vmem:[%s15777_s4 + $0x158] sm:$0xff] }
 0x2cd   : > { %v12529_v33 = vpack.c.b16 %v3202_v20, %v3201_v0  ;;  %v12548_v19 = vor.u32 %v4154_v5, %v12510_v28  ;;  %v2425_v51 = vsel %vm12166_vm9, 0, %v2424_v4  ;;  %v12553_v18 = vpack.c.b16 %v4493_v58, %v12484_v49  ;;  %5572 = vmatpush.bf16.msrb.mxu2 %v10972_v30 }
 0x2ce   : > { %v12545_v43 = vrot.slane %v15934_v55, 11  ;;  %v3488_v25 = vsel %vm12503_vm12, %v3483_v62, %v12472_v26  ;;  %v12558_v8 = vunpack.c.l.b16 %v3478_v35  ;;  %v12563_v12 = vrot.slane %v3509_v10, 5  ;;  %2426 = vst [vmem:[#allocation2 + $0xa0] sm:$0x1] %v2425_v51  ;;  %v12572_v62 = vld [vmem:[#allocation2 + $0x4c] sm:$0x8] }
 0x2cf   : > { %15932 = vst [vmem:[#allocation6_spill] sm:$0xff] %v12529_v33  ;;  %3339 = vmatmul.bf16.gmra.mxu2 %v12529_v33  ;;  %v2726_v29 = vshrl.u32 %v2542_v23, 16  ;;  %v4162_v0 = vrot.slane %v4160_v31, 7  ;;  %v3492_v20 = vrot.slane %v3490_v38, 4  ;;  %v3495_v49 = vrot.slane %v3493_v60, 5 }
 0x2d0   : > { %15935 = vst [vmem:[#allocation4_spill] sm:$0xff] %v12553_v18  ;;  %v1973_v21 = vpop.f32.mrf.mxu3  ;;  %v12568_v26 = vpack.c.b16 %v3843_v61, %v3842_v45  ;;  %v4158_v56 = vrot.slane %v12510_v28, 4  ;;  %v4163_v35 = vshll.u32 %v12508_v13, 16  ;;  %v2287_v10 = vadd.f32 %v12197_v15, %v2252_v42  ;;  %v12579_v13 = vld [vmem:[#allocation2 + $0x58] sm:$0x1] }
 0x2d1   : > { %v2031_v58 = vadd.f32 %v1973_v21, %v12387_v37  ;;  %v3845_v4 = vunpack.c.l.b16 %v3488_v25  ;;  %v4157_v37 = vsel %vm12121_vm8, %v12545_v43, %v12548_v19  ;;  %v3499_v38 = vshll.u32 %v3397_v40, 16  ;;  %v12586_v21 = vld [vmem:[#allocation2 + $0x54] sm:$0xf] }
 0x2d2   : > { %v12566_v44 = vpop.f32.mrf.mxu0  ;;  %15936 = vst [vmem:[#allocation5_spill] sm:$0xff] %v12568_v26  ;;  %v10904_v5 = vld [vmem:[#allocation2 + $0xb0] sm:$0xff]  ;;  %v3503_v45 = vshrl.u32 %v3397_v40, 16  ;;  %v9828_v61 = vrot.slane %v2726_v29, 11  ;;  %v4165_v42 = vor.u32 %v4163_v35, %v4162_v0  ;;  %v3496_v55 = vor.u32 %v3495_v49, %v3492_v20 }
 0x2d3   : > { %v2543_v54 = vld [vmem:[#allocation2 + $0xb0] sm:$0xf]  ;;  %v2544_v31 = vld [vmem:[#allocation2 + $0xb4] sm:$0xf]  ;;  %v2253_v60 = vadd.f32 %v2195_v36, %v2031_v58  ;;  %3143 = vmatmul.bf16.gmra.mxu1 %v10904_v5  ;;  %v2319_v30 = vmax.f32 %v2287_v10, 0.0  ;;  %v3501_v40 = vrot.slane %v3499_v38, 5 }
 0x2d4   : > { %v2731_v17 = vshrl.u32 %v2543_v54, 16  ;;  %v2740_v28 = vshrl.u32 %v2544_v31, 16  ;;  %v2734_v23 = vshll.u32 %v2543_v54, 16  ;;  %v2743_v19 = vshll.u32 %v2544_v31, 16  ;;  %v12584_v36 = vld [vmem:[#allocation2 + $0x50] sm:$0xf] }
 0x2d5   : > { %4612 = vmatmul.bf16.vlgmr.msrb.gmra.mxu0 %v12553_v18  ;;  %v2288_v51 = vadd.f32 %v12197_v15, %v2253_v60  ;;  %3962 = vmatmul.bf16.vlgmr.msrb.gmra.mxu3 %v12568_v26  ;;  %v4168_v58 = vshrl.u32 %v12572_v62, 16  ;;  %v3533_v29 = vshll.u32 %v12579_v13, 16  ;;  %v4166_v35 = vsel %vm12121_vm8, %v4158_v56, %v4165_v42  ;;  %v2385_v13 = vld [vmem:[#allocation2 + $0xdc] sm:$0x8] }
 0x2d6   : > { %v2733_v25 = vrot.slane %v2731_v17, 7  ;;  %v2742_v43 = vrot.slane %v2740_v28, 7  ;;  %v3497_v54 = vrot.slane %v3496_v55, 4  ;;  %v3505_v31 = vrot.slane %v3503_v45, 4  ;;  %v15937_v42 = vld [vmem:[#allocation8_spill] sm:$0xff] }
 0x2d7   : > { %v2320_v5 = vmax.f32 %v2288_v51, 0.0  ;;  %v4173_v60 = vshrl.u32 %v12584_v36, 16  ;;  %v4182_v28 = vshrl.u32 %v12586_v21, 16  ;;  %v2386_v45 = vsel %vm12107_vm5, 0, %v2385_v13 }
 0x2d8   : > { %v2736_v0 = vor.u32 %v2734_v23, %v2733_v25  ;;  %v2738_v20 = vrot.slane %v2733_v25, 4  ;;  %v2745_v49 = vor.u32 %v2743_v19, %v2742_v43  ;;  %v1976_v15 = vpop.f32.mrf.mxu3  ;;  %v3399_v23 = vld [vmem:[#allocation2 + $0x50] sm:$0xf]  ;;  %v12603_v55 = vadd.f32 %v12204_v24, %v15937_v42  ;;  %v15938_v43 = vld [vmem:[#allocation9_spill] sm:$0xff]  ;;  %2387 = vst [vmem:[#allocation2 + $0xdc] sm:$0x8] %v2386_v45 }
 0x2d9   : > { %v11127_v10 = vpack.c.bf16 %v2320_v5, %v2319_v30  ;;  %v2032_v51 = vadd.f32 %v1976_v15, %v12410_v46  ;;  %v4494_v30 = vunpack.c.l.b16 %v4157_v37  ;;  %v4495_v5 = vunpack.c.l.b16 %v4166_v35  ;;  %v10964_v46 = vld [vmem:[%s15777_s4 + $0x118] sm:$0xff] }
 0x2da   : > { %v2200_v38 = vpop.f32.mrf.mxu0  ;;  %v2737_v17 = vsel %vm12121_vm8, %v9828_v61, %v2736_v0  ;;  %v2746_v62 = vsel %vm12121_vm8, %v2738_v20, %v2745_v49  ;;  %v15939_v61 = vld [vmem:[#allocation7_spill] sm:$0xff]  ;;  %v2427_v20 = vld [vmem:[#allocation2 + $0xb8] sm:$0x1]  ;;  %v12615_v15 = vpack.c.b16 %v3845_v4, %v12558_v8  ;;  %v3514_v24 = vshrl.u32 %v3399_v23, 16  ;;  %4890 = vmatpush.bf16.msrb.mxu1 %v10964_v46 }
 0x2db   : > { %v3203_v25 = vunpack.c.l.b16 %v2737_v17  ;;  %v3204_v56 = vunpack.c.l.b16 %v2746_v62  ;;  %v12607_v19 = vadd.f32 %v15939_v61, %v15938_v43  ;;  %11176 = vst [vmem:[#allocation2 + $0xc8] sm:$0xff] %v11127_v10   ;;  %v3400_v0 = vld [vmem:[#allocation2 + $0x54] sm:$0xf]  ;;  %v3517_v17 = vshll.u32 %v3399_v23, 16  ;;  %v2545_v62 = vld [vmem:[#allocation2 + $0xc4] sm:$0x8] }
 0x2dc   : > { %15941 = vst [vmem:[#allocation9_spill] sm:$0xff] %v12615_v15  ;;  %v3502_v37 = vsel %vm12503_vm12, %v3497_v54, %v3501_v40  ;;  %v3506_v35 = vor.u32 %v3505_v31, %v3501_v40  ;;  %v12619_v10 = vrot.slane %v4168_v58, 11  ;;  %v4175_v13 = vrot.slane %v4173_v60, 7 }
 0x2dd   : > { %v12612_v49 = vpack.c.b16 %v3204_v56, %v3203_v25  ;;  %v2254_v42 = vadd.f32 %v12566_v44, %v2032_v51  ;;  %v4184_v25 = vrot.slane %v4182_v28, 7  ;;  %v3523_v56 = vshll.u32 %v3400_v0, 16 }
 0x2de   : > { %v2428_v8 = vsel %vm12166_vm9, 0, %v2427_v20  ;;  %v12625_v4 = vpack.c.b16 %v4495_v5, %v4494_v30  ;;  %v4176_v23 = vshll.u32 %v12584_v36, 16  ;;  %v3527_v45 = vshrl.u32 %v3400_v0, 16  ;;  %v12636_v5 = vld [vmem:[#allocation2 + $0x68] sm:$0xf] }
 0x2df   : > { %15940 = vst [vmem:[#allocation8_spill] sm:$0xff] %v12612_v49  ;;  %3344 = vmatmul.bf16.gmra.mxu2 %v12612_v49  ;;  %v12628_v43 = vrot.slane %v3533_v29, 5  ;;  %v2748_v58 = vshrl.u32 %v2545_v62, 16  ;;  %v4185_v54 = vshll.u32 %v12586_v21, 16  ;;  %v3516_v44 = vrot.slane %v3514_v24, 4 }
 0x2e0   : > { %15942 = vst [vmem:[#allocation7_spill] sm:$0xff] %v12625_v4  ;;  %v1978_v40 = vpop.f32.mrf.mxu3  ;;  %v3519_v31 = vrot.slane %v3517_v17, 5  ;;  %v3507_v51 = vrot.slane %v3506_v35, 4  ;;  %v12634_v61 = vunpack.c.l.b16 %v3502_v37  ;;  %v4180_v30 = vrot.slane %v4175_v13, 4  ;;  %v12641_v36 = vld [vmem:[%s15776_s3] ss:$0 sm:$0xff] }
 0x2e1   : > { %2429 = vst [vmem:[#allocation2 + $0xb8] sm:$0x1] %v2428_v8  ;;  %v2033_v60 = vadd.f32 %v1978_v40, %v12413_v6  ;;  %v2289_v29 = vadd.f32 %v12641_v36, %v2254_v42  ;;  %v4178_v20 = vor.u32 %v4176_v23, %v4175_v13  ;;  %v4187_v6 = vor.u32 %v4185_v54, %v4184_v25  ;;  %v4084_v8 = vld [vmem:[#allocation2 + $0x64] sm:$0x8] }
 0x2e2   : > { %v12632_v28 = vpop.f32.mrf.mxu0  ;;  %v10905_v21 = vld [vmem:[#allocation2 + $0xc8] sm:$0xff]  ;;  %v12644_v24 = vrot.slane %v3523_v56, 5  ;;  %v3529_v35 = vrot.slane %v3527_v45, 4  ;;  %v9829_v40 = vrot.slane %v2748_v58, 11  ;;  %v3520_v49 = vor.u32 %v3519_v31, %v3516_v44  ;;  %v12658_v31 = vpop.f32.mrf.mxu1 }
 0x2e3   : > { %v2546_v46 = vld [vmem:[#allocation2 + $0xc8] sm:$0xf]  ;;  %v2547_v0 = vld [vmem:[#allocation2 + $0xcc] sm:$0xf]  ;;  %v2255_v17 = vadd.f32 %v2200_v38, %v2033_v60  ;;  %3148 = vmatmul.bf16.gmra.mxu1 %v10905_v21  ;;  %v4195_v42 = vshrl.u32 %v12636_v5, 16  ;;  %v2321_v23 = vmax.f32 %v2289_v29, 0.0  ;;  %v3512_v45 = vsel %vm12503_vm12, %v3507_v51, %v12563_v12 }
 0x2e4   : > { %v2753_v62 = vshrl.u32 %v2546_v46, 16  ;;  %v2762_v37 = vshrl.u32 %v2547_v0, 16  ;;  %v2756_v18 = vshll.u32 %v2546_v46, 16  ;;  %v2765_v56 = vshll.u32 %v2547_v0, 16  ;;  %v12650_v38 = vld [vmem:[#allocation2 + $0x70] sm:$0x1] }
 0x2e5   : > { %4617 = vmatmul.bf16.gmra.mxu0 %v12625_v4  ;;  %v2290_v33 = vadd.f32 %v12641_v36, %v2255_v17  ;;  %3967 = vmatmul.bf16.gmra.mxu3 %v12615_v15  ;;  %v4179_v58 = vsel %vm12121_vm8, %v12619_v10, %v4178_v20  ;;  %v4190_v54 = vshrl.u32 %v4084_v8, 16  ;;  %v12660_v17 = vld [vmem:[#allocation2 + $0x6c] sm:$0xf]  ;;  %v4188_v29 = vsel %vm12121_vm8, %v4180_v30, %v4187_v6  ;;  %v3402_v8 = vld [vmem:[#allocation2 + $0x68] sm:$0xf] }
 0x2e6   : > { %v2755_v13 = vrot.slane %v2753_v62, 7  ;;  %v2764_v25 = vrot.slane %v2762_v37, 7  ;;  %v3521_v62 = vrot.slane %v3520_v49, 4  ;;  %v3530_v12 = vor.u32 %v3529_v35, %v12644_v24  ;;  %v2388_v6 = vld [vmem:[#allocation2 + $0xf4] sm:$0x8] }
 0x2e7   : > { %v2322_v44 = vmax.f32 %v2290_v33, 0.0  ;;  %v12670_v20 = vrot.slane %v4195_v42, 7  ;;  %v4204_v49 = vshrl.u32 %v12660_v17, 16  ;;  %v3847_v35 = vunpack.c.l.b16 %v3512_v45 }
 0x2e8   : > { %v2758_v60 = vor.u32 %v2756_v18, %v2755_v13  ;;  %v2760_v21 = vrot.slane %v2755_v13, 4  ;;  %v2767_v46 = vor.u32 %v2765_v56, %v2764_v25  ;;  %v1981_v0 = vpop.f32.mrf.mxu3  ;;  %v4496_v56 = vunpack.c.l.b16 %v4179_v58 }
 0x2e9   : > { %v11132_v37 = vpack.c.bf16 %v2322_v44, %v2321_v23  ;;  %v2034_v13 = vadd.f32 %v1981_v0, %v12420_v41  ;;  %v4497_v23 = vunpack.c.l.b16 %v4188_v29  ;;  %v3403_v44 = vld [vmem:[#allocation2 + $0x6c] sm:$0xf]  ;;  %v4198_v42 = vshll.u32 %v12636_v5, 16  ;;  %v2548_v0 = vld [vmem:[#allocation2 + $0xdc] sm:$0x8] }
 0x2ea   : > { %v2205_v10 = vpop.f32.mrf.mxu0  ;;  %v2759_v33 = vsel %vm12121_vm8, %v9829_v40, %v2758_v60  ;;  %v2768_v18 = vsel %vm12121_vm8, %v2760_v21, %v2767_v46  ;;  %v2389_v40 = vsel %vm12107_vm5, 0, %v2388_v6  ;;  %v2430_v60 = vld [vmem:[#allocation2 + $0xd0] sm:$0x1]  ;;  %v3538_v41 = vshrl.u32 %v3402_v8, 16 }
 0x2eb   : > { %v3205_v25 = vunpack.c.l.b16 %v2759_v33  ;;  %v3206_v30 = vunpack.c.l.b16 %v2768_v18  ;;  %11177 = vst [vmem:[#allocation2 + $0xe0] sm:$0xff] %v11132_v37   ;;  %v3541_v46 = vshll.u32 %v3402_v8, 16  ;;  %v3526_v37 = vsel %vm12503_vm12, %v3521_v62, %v12644_v24 }
 0x2ec   : > { %2390 = vst [vmem:[#allocation2 + $0xf4] sm:$0x8] %v2389_v40  ;;  %v12682_v45 = vrot.slane %v3530_v12, 4  ;;  %v12684_v58 = vrot.slane %v4190_v54, 11  ;;  %v4207_v29 = vshll.u32 %v12660_v17, 16  ;;  %v2256_v33 = vadd.f32 %v12632_v28, %v2034_v13  ;;  %v10971_v28 = vld [vmem:[%s15777_s4 + $0x150] sm:$0xff] }
 0x2ed   : > { %v12676_v21 = vpack.c.b16 %v3206_v30, %v3205_v25  ;;  %v12690_v5 = vor.u32 %v4198_v42, %v12670_v20  ;;  %v4206_v18 = vrot.slane %v4204_v49, 7  ;;  %v2431_v8 = vsel %vm12166_vm9, 0, %v2430_v60  ;;  %v12706_v12 = vld [vmem:[#allocation2 + $0x80] sm:$0xf]  ;;  %5573 = vmatpush.bf16.msrb.mxu2 %v10971_v28  ;;  %v4087_v40 = vld [vmem:[#allocation2 + $0x7c] sm:$0x8] }
 0x2ee   : > { %v12696_v24 = vadd.f32 %v12221_v63, %v12607_v19  ;;  %v12699_v54 = vpack.c.b16 %v3847_v35, %v12634_v61  ;;  %v12701_v62 = vpack.c.b16 %v4497_v23, %v4496_v56  ;;  %v3547_v17 = vshll.u32 %v3403_v44, 16  ;;  %2432 = vst [vmem:[#allocation2 + $0xd0] sm:$0x1] %v2431_v8 }
 0x2ef   : > { %15943 = vst [vmem:[#allocation28_spill] sm:$0xff] %v12676_v21  ;;  %3349 = vmatmul.bf16.gmra.mxu2 %v12676_v21  ;;  %v2770_v25 = vshrl.u32 %v2548_v0, 16  ;;  %v3540_v30 = vrot.slane %v3538_v41, 4  ;;  %v3543_v49 = vrot.slane %v3541_v46, 5  ;;  %v3551_v6 = vshrl.u32 %v3403_v44, 16 }
 0x2f0   : > { %15944 = vst [vmem:[#allocation29_spill] sm:$0xff] %v12699_v54  ;;  %v1983_v13 = vpop.f32.mrf.mxu3  ;;  %v12711_v61 = vpop.f32.mrf.mxu1  ;;  %v3536_v35 = vsel %vm12503_vm12, %v12682_v45, %v12628_v43  ;;  %v12717_v56 = vunpack.c.l.b16 %v3526_v37  ;;  %v4202_v23 = vrot.slane %v12670_v20, 4  ;;  %v2291_v60 = vadd.f32 %v12641_v36, %v2256_v33  ;;  %v12728_v20 = vld [vmem:[#allocation2 + $0x84] sm:$0xf] }
 0x2f1   : > { %15945 = vst [vmem:[#allocation30_spill] sm:$0xff] %v12701_v62  ;;  %v2035_v63 = vadd.f32 %v1983_v13, %v12423_v2  ;;  %v4201_v41 = vsel %vm12121_vm8, %v12684_v58, %v12690_v5  ;;  %v4209_v46 = vor.u32 %v4207_v29, %v4206_v18  ;;  %v4217_v0 = vshrl.u32 %v12706_v12, 16 }
 0x2f2   : > { %v12709_v19 = vpop.f32.mrf.mxu0  ;;  %v10906_v44 = vld [vmem:[#allocation2 + $0xe0] sm:$0xff]  ;;  %v12726_v8 = vrot.slane %v3547_v17, 5  ;;  %v9830_v33 = vrot.slane %v2770_v25, 11  ;;  %v3544_v13 = vor.u32 %v3543_v49, %v3540_v30  ;;  %v3553_v51 = vrot.slane %v3551_v6, 4  ;;  %v12736_v30 = vpop.f32.mrf.mxu2 }
 0x2f3   : > { %v2549_v42 = vld [vmem:[#allocation2 + $0xe0] sm:$0xf]  ;;  %v2550_v2 = vld [vmem:[#allocation2 + $0xe4] sm:$0xf]  ;;  %v2257_v43 = vadd.f32 %v2205_v10, %v2035_v63  ;;  %3153 = vmatmul.bf16.gmra.mxu1 %v10906_v44  ;;  %v2323_v5 = vmax.f32 %v2291_v60, 0.0  ;;  %v4212_v18 = vshrl.u32 %v4087_v40, 16  ;;  %v4210_v6 = vsel %vm12121_vm8, %v4202_v23, %v4209_v46 }
 0x2f4   : > { %v2775_v37 = vshrl.u32 %v2549_v42, 16  ;;  %v2784_v45 = vshrl.u32 %v2550_v2, 16  ;;  %v2778_v28 = vshll.u32 %v2549_v42, 16  ;;  %v2787_v10 = vshll.u32 %v2550_v2, 16  ;;  %v3405_v44 = vld [vmem:[#allocation2 + $0x80] sm:$0xf] }
 0x2f5   : > { %4622 = vmatmul.bf16.gmra.mxu0 %v12701_v62  ;;  %v2292_v4 = vadd.f32 %v12641_v36, %v2257_v43  ;;  %3972 = vmatmul.bf16.gmra.mxu3 %v12699_v54  ;;  %v12733_v17 = vrot.slane %v4217_v0, 7  ;;  %v4226_v63 = vshrl.u32 %v12728_v20, 16  ;;  %v3545_v43 = vrot.slane %v3544_v13, 4 }
 0x2f6   : > { %v2777_v58 = vrot.slane %v2775_v37, 7  ;;  %v2786_v29 = vrot.slane %v2784_v45, 7  ;;  %v3554_v2 = vor.u32 %v3553_v51, %v12726_v8  ;;  %v4220_v40 = vshll.u32 %v12706_v12, 16 }
 0x2f7   : > { %v2324_v21 = vmax.f32 %v2292_v4, 0.0  ;;  %v3565_v46 = vshll.u32 %v3405_v44, 16  ;;  %v3849_v51 = vunpack.c.l.b16 %v3536_v35  ;;  %v10033_v12 = vrot.slane %v4212_v18, 11 }
 0x2f8   : > { %v2780_v62 = vor.u32 %v2778_v28, %v2777_v58  ;;  %v2782_v25 = vrot.slane %v2777_v58, 4  ;;  %v2789_v42 = vor.u32 %v2787_v10, %v2786_v29  ;;  %v1986_v49 = vpop.f32.mrf.mxu3  ;;  %v12742_v37 = vpop.f32.mrf.mxu1  ;;  %v3562_v28 = vshrl.u32 %v3405_v44, 16 }
 0x2f9   : > { %v11137_v60 = vpack.c.bf16 %v2324_v21, %v2323_v5  ;;  %v2036_v58 = vadd.f32 %v1986_v49, %v12535_v9  ;;  %v10963_v21 = vld [vmem:[%s15777_s4 + $0x110] sm:$0xff]  ;;  %v4222_v13 = vor.u32 %v4220_v40, %v12733_v17  ;;  %v4228_v10 = vrot.slane %v4226_v63, 7  ;;  %v15947_v5 = vld [vmem:[#allocation10_spill] sm:$0xff] }
 0x2fa   : > { %v2210_v0 = vpop.f32.mrf.mxu0  ;;  %v2781_v4 = vsel %vm12121_vm8, %v9830_v33, %v2780_v62  ;;  %v2790_v45 = vsel %vm12121_vm8, %v2782_v25, %v2789_v42  ;;  %v2433_v62 = vld [vmem:[#allocation2 + $0xe8] sm:$0x1]  ;;  %v15946_v33 = vld [vmem:[#allocation12_spill] sm:$0xff]  ;;  %v4498_v9 = vunpack.c.l.b16 %v4201_v41  ;;  %v15949_v44 = vshll.u32 %v12650_v38, 16  ;;  %4891 = vmatpush.bf16.msrb.mxu1 %v10963_v21 }
 0x2fb   : > { %v3207_v29 = vunpack.c.l.b16 %v2781_v4  ;;  %v3208_v23 = vunpack.c.l.b16 %v2790_v45  ;;  %11178 = vst [vmem:[#allocation2 + $0xf8] sm:$0xff] %v11137_v60   ;;  %v12755_v25 = vadd.f32 %v15947_v5, %v15946_v33  ;;  %v4499_v35 = vunpack.c.l.b16 %v4210_v6  ;;  %v2551_v60 = vld [vmem:[#allocation2 + $0xf4] sm:$0x8]  ;;  %v3406_v4 = vld [vmem:[#allocation2 + $0x84] sm:$0xf] }
 0x2fc   : > { %v3559_v49 = vrot.slane %v15949_v44, 5  ;;  %v3550_v18 = vsel %vm12503_vm12, %v3545_v43, %v12726_v8  ;;  %v3555_v40 = vrot.slane %v3554_v2, 4  ;;  %v4229_v63 = vshll.u32 %v12728_v20, 16  ;;  %v2391_v20 = vld [vmem:[#allocation2 + $0x10c] sm:$0x8] }
 0x2fd   : > { %v12757_v42 = vpack.c.b16 %v3208_v23, %v3207_v29  ;;  %v2258_v45 = vadd.f32 %v12709_v19, %v2036_v58  ;;  %v3564_v29 = vrot.slane %v3562_v28, 4  ;;  %v3567_v41 = vrot.slane %v3565_v46, 5 }
 0x2fe   : > { %v2434_v38 = vsel %vm12166_vm9, 0, %v2433_v62  ;;  %v12770_v6 = vpack.c.b16 %v3849_v51, %v12717_v56  ;;  %v4223_v23 = vsel %vm12121_vm8, %v10033_v12, %v4222_v13  ;;  %v4224_v8 = vrot.slane %v12733_v17, 4 }
 0x2ff   : > { %15948 = vst [vmem:[#allocation12_spill] sm:$0xff] %v12757_v42  ;;  %3354 = vmatmul.bf16.gmra.mxu2 %v12757_v42  ;;  %v4231_v43 = vor.u32 %v4229_v63, %v4228_v10  ;;  %v2792_v19 = vshrl.u32 %v2551_v60, 16  ;;  %v2392_v28 = vsel %vm12107_vm5, 0, %v2391_v20  ;;  %v3571_v58 = vshll.u32 %v3406_v4, 16  ;;  %v12795_v20 = vld [vmem:[#allocation2 + $0x98] sm:$0xf] }
 0x300   : > { %15950 = vst [vmem:[#allocation10_spill] sm:$0xff] %v12770_v6  ;;  %v1988_v2 = vpop.f32.mrf.mxu3  ;;  %v3575_v46 = vshrl.u32 %v3406_v4, 16  ;;  %v12780_v51 = vpack.c.b16 %v4499_v35, %v4498_v9  ;;  %v3560_v17 = vsel %vm12503_vm12, %v3555_v40, %v3559_v49  ;;  %v12784_v12 = vunpack.c.l.b16 %v3550_v18  ;;  %v12790_v33 = vpop.f32.mrf.mxu1  ;;  %v4090_v18 = vld [vmem:[#allocation2 + $0x94] sm:$0x8] }
 0x301   : > { %2435 = vst [vmem:[#allocation2 + $0xe8] sm:$0x1] %v2434_v38  ;;  %v2037_v21 = vadd.f32 %v1988_v2, %v12539_v53  ;;  %v2293_v13 = vadd.f32 %v12641_v36, %v2258_v45  ;;  %v4500_v60 = vunpack.c.l.b16 %v4223_v23  ;;  %v3568_v63 = vor.u32 %v3567_v41, %v3564_v29  ;;  %v3407_v23 = vld [vmem:[#allocation2 + $0x88] sm:$0x1] }
 0x302   : > { %v3315_v62 = vpop.f32.mrf.mxu2  ;;  %v12778_v56 = vpop.f32.mrf.mxu0  ;;  %15951 = vst [vmem:[#allocation31_spill] sm:$0xff] %v12780_v51  ;;  %v10907_v5 = vld [vmem:[#allocation2 + $0xf8] sm:$0xff]  ;;  %v4232_v49 = vsel %vm12121_vm8, %v4224_v8, %v4231_v43  ;;  %v9831_v40 = vrot.slane %v2792_v19, 11  ;;  %v3573_v45 = vrot.slane %v3571_v58, 5  ;;  %v3577_v38 = vrot.slane %v3575_v46, 4 }
 0x303   : > { %2393 = vst [vmem:[#allocation2 + $0x10c] sm:$0x8] %v2392_v28  ;;  %v12788_v10 = vadd.f32 %v3315_v62, %v12711_v61  ;;  %v2552_v53 = vld [vmem:[#allocation2 + $0xf8] sm:$0xf]  ;;  %v2553_v44 = vld [vmem:[#allocation2 + $0xfc] sm:$0xf]  ;;  %v2259_v9 = vadd.f32 %v2210_v0, %v2037_v21  ;;  %3158 = vmatmul.bf16.gmra.mxu1 %v10907_v5  ;;  %v3851_v8 = vunpack.c.l.b16 %v3560_v17  ;;  %v4501_v43 = vunpack.c.l.b16 %v4232_v49 }
 0x304   : > { %v2797_v35 = vshrl.u32 %v2552_v53, 16  ;;  %v2806_v4 = vshrl.u32 %v2553_v44, 16  ;;  %v2800_v61 = vshll.u32 %v2552_v53, 16  ;;  %v2809_v41 = vshll.u32 %v2553_v44, 16  ;;  %v12799_v62 = vld [vmem:[#allocation2 + $0x9c] sm:$0xf] }
 0x305   : > { %4627 = vmatmul.bf16.gmra.mxu0 %v12780_v51  ;;  %v2294_v2 = vadd.f32 %v12641_v36, %v2259_v9  ;;  %3977 = vmatmul.bf16.gmra.mxu3 %v12770_v6  ;;  %v2325_v28 = vmax.f32 %v2293_v13, 0.0  ;;  %v3569_v21 = vrot.slane %v3568_v63, 4  ;;  %v3578_v51 = vor.u32 %v3577_v38, %v3573_v45 }
 0x306   : > { %v2799_v0 = vrot.slane %v2797_v35, 7  ;;  %v2808_v29 = vrot.slane %v2806_v4, 7  ;;  %v3581_v42 = vshll.u32 %v3407_v23, 16  ;;  %v4234_v9 = vshrl.u32 %v4090_v18, 16  ;;  %v15953_v23 = vld [vmem:[#allocation14_spill] sm:$0xff] }
 0x307   : > { %v2326_v19 = vmax.f32 %v2294_v2, 0.0  ;;  %v4239_v59 = vshrl.u32 %v12795_v20, 16  ;;  %v4248_v63 = vshrl.u32 %v12799_v62, 16 }
 0x308   : > { %v2802_v5 = vor.u32 %v2800_v61, %v2799_v0  ;;  %v2804_v58 = vrot.slane %v2799_v0, 4  ;;  %v2811_v46 = vor.u32 %v2809_v41, %v2808_v29  ;;  %v1991_v53 = vpop.f32.mrf.mxu3  ;;  %v12811_v38 = vpop.f32.mrf.mxu1  ;;  %v3408_v0 = vld [vmem:[#allocation2 + $0x98] sm:$0xf]  ;;  %v15952_v29 = vld [vmem:[#allocation11_spill] sm:$0xff] }
 0x309   : > { %v11142_v35 = vpack.c.bf16 %v2326_v19, %v2325_v28  ;;  %v2038_v49 = vadd.f32 %v1991_v53, %v12603_v55  ;;  %v12815_v41 = vadd.f32 %v12241_v7, %v15952_v29  ;;  %v12823_v28 = vadd.f32 %v12279_v48, %v15953_v23  ;;  %v15954_v55 = vld [vmem:[#allocation16_spill] sm:$0xff]  ;;  %v12862_v23 = vld [vmem:[#allocation2 + $0xb0] sm:$0xf] }
 0x30a   : > { %v3317_v4 = vpop.f32.mrf.mxu2  ;;  %v2215_v44 = vpop.f32.mrf.mxu0  ;;  %v2803_v17 = vsel %vm12121_vm8, %v9831_v40, %v2802_v5  ;;  %v2812_v13 = vsel %vm12121_vm8, %v2804_v58, %v2811_v46  ;;  %v12819_v40 = vadd.f32 %v12255_v39, %v12755_v25  ;;  %v3574_v58 = vsel %vm12503_vm12, %v3569_v21, %v3573_v45  ;;  %v3409_v39 = vld [vmem:[#allocation2 + $0x9c] sm:$0xf]  ;;  %v2554_v53 = vld [vmem:[#allocation2 + $0x10c] sm:$0x8] }
 0x30b   : > { %v12809_v61 = vadd.f32 %v3317_v4, %v12742_v37  ;;  %v3209_v18 = vunpack.c.l.b16 %v2803_v17  ;;  %v3210_v2 = vunpack.c.l.b16 %v2812_v13  ;;  %v15955_v37 = vld [vmem:[#allocation13_spill] sm:$0xff]  ;;  %11179 = vst [vmem:[#allocation2 + $0x110] sm:$0xff] %v11142_v35   ;;  %v12833_v7 = vrot.slane %v3578_v51, 4 }
 0x30c   : > { %v12827_v19 = vadd.f32 %v15955_v37, %v15954_v55  ;;  %v12835_v46 = vrot.slane %v3581_v42, 5  ;;  %v12838_v25 = vpack.c.b16 %v3851_v8, %v12784_v12  ;;  %v12840_v48 = vpack.c.b16 %v4501_v43, %v4500_v60  ;;  %v2394_v8 = vld [vmem:[#allocation2 + $0x124] sm:$0x8] }
 0x30d   : > { %v12829_v5 = vpack.c.b16 %v3210_v2, %v3209_v18  ;;  %v4241_v4 = vrot.slane %v4239_v59, 7  ;;  %v3586_v17 = vshrl.u32 %v3408_v0, 16  ;;  %v2260_v35 = vadd.f32 %v12778_v56, %v2038_v49  ;;  %v10970_v59 = vld [vmem:[%s15777_s4 + $0x148] sm:$0xff] }
 0x30e   : > { %15957 = vst [vmem:[#allocation14_spill] sm:$0xff] %v12838_v25  ;;  %v12844_v13 = vrot.slane %v4234_v9, 11  ;;  %v4250_v45 = vrot.slane %v4248_v63, 7  ;;  %v3589_v51 = vshll.u32 %v3408_v0, 16  ;;  %v12846_v21 = vunpack.c.l.b16 %v3574_v58  ;;  %5574 = vmatpush.bf16.msrb.mxu2 %v10970_v59 }
 0x30f   : > { %15956 = vst [vmem:[#allocation11_spill] sm:$0xff] %v12829_v5  ;;  %3359 = vmatmul.bf16.gmra.mxu2 %v12829_v5  ;;  %v4242_v42 = vshll.u32 %v12795_v20, 16  ;;  %v4251_v12 = vshll.u32 %v12799_v62, 16  ;;  %v3595_v60 = vshll.u32 %v3409_v39, 16  ;;  %v2814_v56 = vshrl.u32 %v2554_v53, 16 }
 0x310   : > { %15958 = vst [vmem:[#allocation16_spill] sm:$0xff] %v12840_v48  ;;  %v1993_v43 = vpop.f32.mrf.mxu3  ;;  %v2395_v63 = vsel %vm12107_vm5, 0, %v2394_v8  ;;  %v3599_v49 = vshrl.u32 %v3409_v39, 16  ;;  %v4246_v0 = vrot.slane %v4241_v4, 4  ;;  %v3588_v29 = vrot.slane %v3586_v17, 4  ;;  %v12868_v58 = vpop.f32.mrf.mxu1 }
 0x311   : > { %v2039_v20 = vadd.f32 %v1993_v43, %v12696_v24  ;;  %v4244_v2 = vor.u32 %v4242_v42, %v4241_v4  ;;  %2396 = vst [vmem:[#allocation2 + $0x124] sm:$0x8] %v2395_v63  ;;  %v2295_v55 = vadd.f32 %v12641_v36, %v2260_v35  ;;  %v4253_v8 = vor.u32 %v4251_v12, %v4250_v45  ;;  %v12872_v17 = vld [vmem:[#allocation2 + $0xb4] sm:$0xf]  ;;  %v3410_v12 = vld [vmem:[#allocation2 + $0xa0] sm:$0x1] }
 0x312   : > { %v3320_v62 = vpop.f32.mrf.mxu2  ;;  %v12860_v18 = vpop.f32.mrf.mxu0  ;;  %v10908_v39 = vld [vmem:[#allocation2 + $0x110] sm:$0xff]  ;;  %v3591_v43 = vrot.slane %v3589_v51, 5  ;;  %v12870_v63 = vrot.slane %v3595_v60, 5  ;;  %v9832_v35 = vrot.slane %v2814_v56, 11  ;;  %v3601_v59 = vrot.slane %v3599_v49, 4 }
 0x313   : > { %v12866_v37 = vadd.f32 %v3320_v62, %v12790_v33  ;;  %v2555_v53 = vld [vmem:[#allocation2 + $0x110] sm:$0xf]  ;;  %v2556_v24 = vld [vmem:[#allocation2 + $0x114] sm:$0xf]  ;;  %v2261_v9 = vadd.f32 %v2215_v44, %v2039_v20  ;;  %3163 = vmatmul.bf16.gmra.mxu1 %v10908_v39  ;;  %v4093_v62 = vld [vmem:[#allocation2 + $0xac] sm:$0x8]  ;;  %v4245_v20 = vsel %vm12121_vm8, %v12844_v13, %v4244_v2  ;;  %v4254_v56 = vsel %vm12121_vm8, %v4246_v0, %v4253_v8 }
 0x314   : > { %v2819_v42 = vshrl.u32 %v2555_v53, 16  ;;  %v2828_v4 = vshrl.u32 %v2556_v24, 16  ;;  %v2822_v33 = vshll.u32 %v2555_v53, 16  ;;  %v4261_v5 = vshrl.u32 %v12862_v23, 16 }
 0x315   : > { %4632 = vmatmul.bf16.gmra.mxu0 %v12840_v48  ;;  %v2296_v6 = vadd.f32 %v12641_v36, %v2261_v9  ;;  %3982 = vmatmul.bf16.gmra.mxu3 %v12838_v25  ;;  %v2831_v51 = vshll.u32 %v2556_v24, 16  ;;  %v2327_v60 = vmax.f32 %v2295_v55, 0.0  ;;  %v4270_v49 = vshrl.u32 %v12872_v17, 16 }
 0x316   : > { %v2821_v44 = vrot.slane %v2819_v42, 7  ;;  %v2830_v45 = vrot.slane %v2828_v4, 7  ;;  %v3592_v25 = vor.u32 %v3591_v43, %v3588_v29  ;;  %v3602_v42 = vor.u32 %v3601_v59, %v12870_v63  ;;  %v3411_v59 = vld [vmem:[#allocation2 + $0xb0] sm:$0xf] }
 0x317   : > { %v2328_v39 = vmax.f32 %v2296_v6, 0.0  ;;  %v3605_v24 = vshll.u32 %v3410_v12, 16  ;;  %v4256_v4 = vshrl.u32 %v4093_v62, 16  ;;  %v4263_v0 = vrot.slane %v4261_v5, 7 }
 0x318   : > { %v2824_v53 = vor.u32 %v2822_v33, %v2821_v44  ;;  %v2826_v48 = vrot.slane %v2821_v44, 4  ;;  %v2833_v9 = vor.u32 %v2831_v51, %v2830_v45  ;;  %v1996_v1 = vpop.f32.mrf.mxu3  ;;  %v12893_v29 = vpop.f32.mrf.mxu1  ;;  %v4502_v44 = vunpack.c.l.b16 %v4245_v20  ;;  %v3412_v51 = vld [vmem:[#allocation2 + $0xb4] sm:$0xf]  ;;  %v2557_v12 = vld [vmem:[#allocation2 + $0x124] sm:$0x8] }
 0x319   : > { %v11147_v55 = vpack.c.bf16 %v2328_v39, %v2327_v60  ;;  %v2040_v6 = vadd.f32 %v1996_v1, %v12815_v41  ;;  %v10962_v1 = vld [vmem:[%s15777_s4 + $0x108] sm:$0xff]  ;;  %v3593_v5 = vrot.slane %v3592_v25, 4  ;;  %v4264_v45 = vshll.u32 %v12862_v23, 16 }
 0x31a   : > { %v3322_v54 = vpop.f32.mrf.mxu2  ;;  %v2220_v32 = vpop.f32.mrf.mxu0  ;;  %v2825_v13 = vsel %vm12121_vm8, %v9832_v35, %v2824_v53  ;;  %v2834_v2 = vsel %vm12121_vm8, %v2826_v48, %v2833_v9  ;;  %v15959_v35 = vsel %vm12503_vm12, %v12833_v7, %v12835_v46  ;;  %v4503_v48 = vunpack.c.l.b16 %v4254_v56  ;;  %4892 = vmatpush.bf16.msrb.mxu1 %v10962_v1  ;;  %v2397_v9 = vld [vmem:[#allocation2 + $0x13c] sm:$0x8] }
 0x31b   : > { %v12891_v8 = vadd.f32 %v3322_v54, %v12811_v38  ;;  %v3211_v43 = vunpack.c.l.b16 %v2825_v13  ;;  %v3212_v33 = vunpack.c.l.b16 %v2834_v2  ;;  %11180 = vst [vmem:[#allocation2 + $0x128] sm:$0xff] %v11147_v55   ;;  %v3853_v62 = vunpack.c.l.b16 %v15959_v35 }
 0x31c   : > { %v4272_v54 = vrot.slane %v4270_v49, 7  ;;  %v12905_v38 = vadd.f32 %v12293_v3, %v12827_v19  ;;  %v3603_v7 = vrot.slane %v3602_v42, 4  ;;  %v3607_v46 = vrot.slane %v3605_v24, 5 }
 0x31d   : > { %v12907_v41 = vpack.c.b16 %v3212_v33, %v3211_v43  ;;  %v4273_v60 = vshll.u32 %v12872_v17, 16  ;;  %v3610_v20 = vshrl.u32 %v3411_v59, 16  ;;  %v2262_v56 = vadd.f32 %v12860_v18, %v2040_v6 }
 0x31e   : > { %v10035_v49 = vrot.slane %v4256_v4, 11  ;;  %v4266_v3 = vor.u32 %v4264_v45, %v4263_v0  ;;  %v3613_v19 = vshll.u32 %v3411_v59, 16  ;;  %v12914_v39 = vpack.c.b16 %v3853_v62, %v12846_v21 }
 0x31f   : > { %15960 = vst [vmem:[#allocation13_spill] sm:$0xff] %v12907_v41  ;;  %3364 = vmatmul.bf16.gmra.mxu2 %v12907_v41  ;;  %v12916_v25 = vpack.c.b16 %v4503_v48, %v4502_v44  ;;  %v4268_v23 = vrot.slane %v4263_v0, 4  ;;  %v4275_v53 = vor.u32 %v4273_v60, %v4272_v54  ;;  %v2836_v24 = vshrl.u32 %v2557_v12, 16 }
 0x320   : > { %15961 = vst [vmem:[#allocation32_spill] sm:$0xff] %v12914_v39  ;;  %v1998_v42 = vpop.f32.mrf.mxu3  ;;  %v2398_v17 = vsel %vm12107_vm5, 0, %v2397_v9  ;;  %v3619_v55 = vshll.u32 %v3412_v51, 16  ;;  %v3623_v18 = vshrl.u32 %v3412_v51, 16  ;;  %v3598_v21 = vsel %vm12503_vm12, %v3593_v5, %v12870_v63  ;;  %v12932_v59 = vpop.f32.mrf.mxu1 }
 0x321   : > { %15962 = vst [vmem:[#allocation33_spill] sm:$0xff] %v12916_v25  ;;  %v2041_v13 = vadd.f32 %v1998_v42, %v12819_v40  ;;  %v3608_v0 = vsel %vm12503_vm12, %v3603_v7, %v3607_v46  ;;  %v3612_v6 = vrot.slane %v3610_v20, 4  ;;  %v2297_v43 = vadd.f32 %v12641_v36, %v2262_v56  ;;  %v3413_v20 = vld [vmem:[#allocation2 + $0xb8] sm:$0x1] }
 0x322   : > { %v3325_v4 = vpop.f32.mrf.mxu2  ;;  %v12921_v2 = vpop.f32.mrf.mxu0  ;;  %2399 = vst [vmem:[#allocation2 + $0x13c] sm:$0x8] %v2398_v17  ;;  %v10909_v40 = vld [vmem:[#allocation2 + $0x128] sm:$0xff]  ;;  %v4267_v44 = vsel %vm12121_vm8, %v10035_v49, %v4266_v3  ;;  %v3615_v48 = vrot.slane %v3613_v19, 5  ;;  %v4276_v5 = vsel %vm12121_vm8, %v4268_v23, %v4275_v53  ;;  %v12939_v51 = vrot.slane %v3619_v55, 5 }
 0x323   : > { %v12930_v33 = vadd.f32 %v3325_v4, %v12868_v58  ;;  %v2558_v35 = vld [vmem:[#allocation2 + $0x128] sm:$0xf]  ;;  %v2559_v62 = vld [vmem:[#allocation2 + $0x12c] sm:$0xf]  ;;  %v2263_v63 = vadd.f32 %v2220_v32, %v2041_v13  ;;  %3168 = vmatmul.bf16.gmra.mxu1 %v10909_v40  ;;  %v9833_v58 = vrot.slane %v2836_v24, 11  ;;  %v3625_v12 = vrot.slane %v3623_v18, 4 }
 0x324   : > { %v2841_v1 = vshrl.u32 %v2558_v35, 16  ;;  %v2850_v54 = vshrl.u32 %v2559_v62, 16  ;;  %v2844_v45 = vshll.u32 %v2558_v35, 16  ;;  %v2853_v32 = vshll.u32 %v2559_v62, 16  ;;  %v12943_v23 = vld [vmem:[#allocation2 + $0xc8] sm:$0xf] }
 0x325   : > { %4637 = vmatmul.bf16.gmra.mxu0 %v12916_v25  ;;  %v2298_v7 = vadd.f32 %v12641_v36, %v2263_v63  ;;  %3987 = vmatmul.bf16.gmra.mxu3 %v12914_v39  ;;  %v2329_v56 = vmax.f32 %v2297_v43, 0.0  ;;  %v3854_v49 = vunpack.c.l.b16 %v3598_v21  ;;  %v3855_v3 = vunpack.c.l.b16 %v3608_v0  ;;  %v12946_v40 = vld [vmem:[#allocation2 + $0xcc] sm:$0xf]  ;;  %v13108_v39 = vld [vmem:[#allocation2 + $0xf8] sm:$0xf] }
 0x326   : > { %v2843_v46 = vrot.slane %v2841_v1, 7  ;;  %v2852_v60 = vrot.slane %v2850_v54, 7  ;;  %v3616_v19 = vor.u32 %v3615_v48, %v3612_v6  ;;  %v4504_v55 = vunpack.c.l.b16 %v4267_v44  ;;  %v12953_v48 = vld [vmem:[#allocation2 + $0x20] sm:$0xf] }
 0x327   : > { %v2330_v53 = vmax.f32 %v2298_v7, 0.0  ;;  %v4505_v18 = vunpack.c.l.b16 %v4276_v5  ;;  %v3626_v13 = vor.u32 %v3625_v12, %v12939_v51  ;;  %v3629_v4 = vshll.u32 %v3413_v20, 16  ;;  %v3414_v12 = vld [vmem:[#allocation2 + $0xc8] sm:$0xf]  ;;  %v15963_v7 = vld [vmem:[#allocation17_spill] sm:$0xff] }
 0x328   : > { %v2846_v9 = vor.u32 %v2844_v45, %v2843_v46  ;;  %v2848_v42 = vrot.slane %v2843_v46, 4  ;;  %v2855_v24 = vor.u32 %v2853_v32, %v2852_v60  ;;  %v2001_v17 = vpop.f32.mrf.mxu3  ;;  %v4283_v6 = vshrl.u32 %v12943_v23, 16  ;;  %v12959_v1 = vpop.f32.mrf.mxu1  ;;  %v4096_v45 = vld [vmem:[#allocation2 + $0xc4] sm:$0x8]  ;;  %v15964_v46 = vld [vmem:[#allocation19_spill] sm:$0xff]  ;;  %v15965_v60 = vld [vmem:[#allocation18_spill] sm:$0xff] }
 0x329   : > { %v11152_v35 = vpack.c.bf16 %v2330_v53, %v2329_v56  ;;  %v2042_v44 = vadd.f32 %v2001_v17, %v12823_v28  ;;  %v12967_v32 = vadd.f32 %v15965_v60, %v15964_v46  ;;  %v12969_v20 = vrot.slane %v3616_v19, 4  ;;  %v3415_v53 = vld [vmem:[#allocation2 + $0xcc] sm:$0xf] }
 0x32a   : > { %v3327_v62 = vpop.f32.mrf.mxu2  ;;  %v2225_v43 = vpop.f32.mrf.mxu0  ;;  %v2847_v21 = vsel %vm12121_vm8, %v9833_v58, %v2846_v9  ;;  %v2856_v0 = vsel %vm12121_vm8, %v2848_v42, %v2855_v24  ;;  %v12963_v58 = vadd.f32 %v12321_v27, %v15963_v7  ;;  %v4292_v28 = vshrl.u32 %v12946_v40, 16  ;;  %v2560_v24 = vld [vmem:[#allocation2 + $0x13c] sm:$0x8] }
 0x32b   : > { %v12957_v63 = vadd.f32 %v3327_v62, %v12893_v29  ;;  %v3213_v54 = vunpack.c.l.b16 %v2847_v21  ;;  %v3214_v5 = vunpack.c.l.b16 %v2856_v0  ;;  %11181 = vst [vmem:[#allocation2 + $0x140] sm:$0xff] %v11152_v35   ;;  %v12974_v56 = vpack.c.b16 %v3855_v3, %v3854_v49 }
 0x32c   : > { %v12978_v27 = vpack.c.b16 %v4505_v18, %v4504_v55  ;;  %v4278_v17 = vshrl.u32 %v4096_v45, 16  ;;  %v12980_v62 = vrot.slane %v4283_v6, 7  ;;  %v3634_v35 = vshrl.u32 %v3414_v12, 16 }
 0x32d   : > { %v12972_v29 = vpack.c.b16 %v3214_v5, %v3213_v54  ;;  %15967 = vst [vmem:[#allocation19_spill] sm:$0xff] %v12974_v56  ;;  %v2264_v19 = vadd.f32 %v12921_v2, %v2042_v44  ;;  %v12984_v21 = vrot.slane %v3626_v13, 4  ;;  %v12986_v49 = vrot.slane %v3629_v4, 5  ;;  %v2400_v54 = vld [vmem:[#allocation2 + $0x154] sm:$0x8]  ;;  %v10969_v2 = vld [vmem:[%s15777_s4 + $0x140] sm:$0xff] }
 0x32e   : > { %15968 = vst [vmem:[#allocation18_spill] sm:$0xff] %v12978_v27  ;;  %v3637_v3 = vshll.u32 %v3414_v12, 16  ;;  %v3622_v55 = vsel %vm12503_vm12, %v12969_v20, %v12939_v51  ;;  %v4286_v18 = vshll.u32 %v12943_v23, 16  ;;  %v4294_v0 = vrot.slane %v4292_v28, 7  ;;  %5575 = vmatpush.bf16.msrb.mxu2 %v10969_v2 }
 0x32f   : > { %15966 = vst [vmem:[#allocation17_spill] sm:$0xff] %v12972_v29  ;;  %3369 = vmatmul.bf16.gmra.mxu2 %v12972_v29  ;;  %v4295_v6 = vshll.u32 %v12946_v40, 16  ;;  %v2858_v44 = vshrl.u32 %v2560_v24, 16  ;;  %v2401_v4 = vsel %vm12107_vm5, 0, %v2400_v54  ;;  %v3643_v5 = vshll.u32 %v3415_v53, 16 }
 0x330   : > { %v2003_v13 = vpop.f32.mrf.mxu3  ;;  %v3647_v45 = vshrl.u32 %v3415_v53, 16  ;;  %v10036_v23 = vrot.slane %v4278_v17, 11  ;;  %v4290_v40 = vrot.slane %v12980_v62, 4  ;;  %2402 = vst [vmem:[#allocation2 + $0x154] sm:$0x8] %v2401_v4  ;;  %v3636_v46 = vrot.slane %v3634_v35, 4  ;;  %v13007_v28 = vpop.f32.mrf.mxu1 }
 0x331   : > { %v2043_v12 = vadd.f32 %v2003_v13, %v12905_v38  ;;  %v2299_v60 = vadd.f32 %v12641_v36, %v2264_v19  ;;  %v4288_v38 = vor.u32 %v4286_v18, %v12980_v62  ;;  %v3639_v13 = vrot.slane %v3637_v3, 5  ;;  %v3416_v3 = vld [vmem:[#allocation2 + $0xd0] sm:$0x1] }
 0x332   : > { %v3330_v51 = vpop.f32.mrf.mxu2  ;;  %v13000_v7 = vpop.f32.mrf.mxu0  ;;  %v10910_v24 = vld [vmem:[#allocation2 + $0x140] sm:$0xff]  ;;  %v4297_v25 = vor.u32 %v4295_v6, %v4294_v0  ;;  %v9834_v35 = vrot.slane %v2858_v44, 11  ;;  %v13011_v2 = vrot.slane %v3643_v5, 5  ;;  %v3632_v18 = vsel %vm12503_vm12, %v12984_v21, %v12986_v49 }
 0x333   : > { %v13005_v20 = vadd.f32 %v3330_v51, %v12932_v59  ;;  %v2561_v53 = vld [vmem:[#allocation2 + $0x140] sm:$0xf]  ;;  %v2562_v54 = vld [vmem:[#allocation2 + $0x144] sm:$0xf]  ;;  %v2265_v42 = vadd.f32 %v2225_v43, %v2043_v12  ;;  %3173 = vmatmul.bf16.gmra.mxu1 %v10910_v24  ;;  %v3649_v59 = vrot.slane %v3647_v45, 4  ;;  %v2331_v43 = vmax.f32 %v2299_v60, 0.0 }
 0x334   : > { %v2863_v17 = vshrl.u32 %v2561_v53, 16  ;;  %v2872_v9 = vshrl.u32 %v2562_v54, 16  ;;  %v2866_v19 = vshll.u32 %v2561_v53, 16  ;;  %v2875_v62 = vshll.u32 %v2562_v54, 16  ;;  %v13019_v44 = vld [vmem:[#allocation2 + $0xe0] sm:$0xf] }
 0x335   : > { %4642 = vmatmul.bf16.gmra.mxu0 %v12978_v27  ;;  %v2300_v4 = vadd.f32 %v12641_v36, %v2265_v42  ;;  %3992 = vmatmul.bf16.gmra.mxu3 %v12974_v56  ;;  %v3856_v0 = vunpack.c.l.b16 %v3622_v55  ;;  %v3640_v6 = vor.u32 %v3639_v13, %v3636_v46  ;;  %v4298_v60 = vsel %vm12121_vm8, %v4290_v40, %v4297_v25  ;;  %v3419_v56 = vld [vmem:[#allocation2 + $0xe8] sm:$0x1] }
 0x336   : > { %v2865_v51 = vrot.slane %v2863_v17, 7  ;;  %v2874_v29 = vrot.slane %v2872_v9, 7  ;;  %v4289_v9 = vsel %vm12121_vm8, %v10036_v23, %v4288_v38  ;;  %v3650_v24 = vor.u32 %v3649_v59, %v13011_v2 }
 0x337   : > { %v2332_v5 = vmax.f32 %v2300_v4, 0.0  ;;  %v3653_v53 = vshll.u32 %v3416_v3, 16  ;;  %v4305_v13 = vshrl.u32 %v13019_v44, 16  ;;  %v3857_v59 = vunpack.c.l.b16 %v3632_v18 }
 0x338   : > { %v2868_v45 = vor.u32 %v2866_v19, %v2865_v51  ;;  %v2870_v12 = vrot.slane %v2865_v51, 4  ;;  %v2877_v36 = vor.u32 %v2875_v62, %v2874_v29  ;;  %v2006_v42 = vpop.f32.mrf.mxu3  ;;  %v4099_v29 = vld [vmem:[#allocation2 + $0xdc] sm:$0x8]  ;;  %v13035_v25 = vpop.f32.mrf.mxu1  ;;  %v13037_v19 = vld [vmem:[#allocation2 + $0xe4] sm:$0xf]  ;;  %v4507_v4 = vunpack.c.l.b16 %v4298_v60 }
 0x339   : > { %v11157_v54 = vpack.c.bf16 %v2332_v5, %v2331_v43  ;;  %v2044_v23 = vadd.f32 %v2006_v42, %v12963_v58  ;;  %v10961_v51 = vld [vmem:[%s15777_s4 + $0x100] sm:$0xff]  ;;  %v13042_v62 = vrot.slane %v3640_v6, 4  ;;  %v2403_v58 = vld [vmem:[#allocation2 + $0x16c] sm:$0x8]  ;;  %v4300_v43 = vshrl.u32 %v4099_v29, 16 }
 0x33a   : > { %v3332_v21 = vpop.f32.mrf.mxu2  ;;  %v2230_v49 = vpop.f32.mrf.mxu0  ;;  %v2869_v55 = vsel %vm12121_vm8, %v9834_v35, %v2868_v45  ;;  %v2878_v46 = vsel %vm12121_vm8, %v2870_v12, %v2877_v36  ;;  %v4506_v35 = vunpack.c.l.b16 %v4289_v9  ;;  %v2404_v5 = vsel %vm12107_vm5, 0, %v2403_v58  ;;  %v15970_v45 = vld [vmem:[#allocation21_spill] sm:$0xff]  ;;  %v2563_v36 = vld [vmem:[#allocation2 + $0x154] sm:$0x8]  ;;  %4893 = vmatpush.bf16.msrb.mxu1 %v10961_v51 }
 0x33b   : > { %v13033_v38 = vadd.f32 %v3332_v21, %v12959_v1  ;;  %v3215_v40 = vunpack.c.l.b16 %v2869_v55  ;;  %v3216_v17 = vunpack.c.l.b16 %v2878_v46  ;;  %11182 = vst [vmem:[#allocation2 + $0x158] sm:$0xff] %v11157_v54   ;;  %v13046_v1 = vrot.slane %v3653_v53, 5  ;;  %v15971_v9 = vld [vmem:[#allocation23_spill] sm:$0xff]  ;;  %v13093_v51 = vld [vmem:[%s15776_s3] ss:$0 sm:$0xff] }
 0x33c   : > { %v1823_v18 = vadd.f32 %v12389_v34, %v12967_v32  ;;  %v13054_v12 = vadd.f32 %v12434_v52, %v15970_v45  ;;  %v3651_v6 = vrot.slane %v3650_v24, 4  ;;  %v4314_v42 = vshrl.u32 %v13037_v19, 16  ;;  %2405 = vst [vmem:[#allocation2 + $0x16c] sm:$0x8] %v2404_v5  ;;  %v3417_v34 = vld [vmem:[#allocation2 + $0xe0] sm:$0xf] }
 0x33d   : > { %v13044_v3 = vpack.c.b16 %v3216_v17, %v3215_v40  ;;  %v13059_v60 = vadd.f32 %v12490_v14, %v15971_v9  ;;  %v2266_v53 = vadd.f32 %v13000_v7, %v2044_v23  ;;  %v13063_v54 = vrot.slane %v4305_v13, 7 }
 0x33e   : > { %v15972_v52 = vshrl.u32 %v12953_v48, 16  ;;  %v13069_v21 = vpack.c.b16 %v3857_v59, %v3856_v0  ;;  %v13071_v24 = vpack.c.b16 %v4507_v4, %v4506_v35  ;;  %v3646_v14 = vsel %vm12503_vm12, %v13042_v62, %v13011_v2 }
 0x33f   : > { %15969 = vst [vmem:[#allocation34_spill] sm:$0xff] %v13044_v3  ;;  %3374 = vmatmul.bf16.gmra.mxu2 %v13044_v3  ;;  %v15975_v7 = vshll.u32 %v12953_v48, 16  ;;  %v2880_v29 = vshrl.u32 %v2563_v36, 16  ;;  %v13081_v13 = vrot.slane %v4300_v43, 11  ;;  %v4308_v23 = vshll.u32 %v13019_v44, 16 }
 0x340   : > { %v13067_v32 = vrot.slane %v15972_v52, 4  ;;  %15973 = vst [vmem:[#allocation21_spill] sm:$0xff] %v13069_v21  ;;  %v2008_v46 = vpop.f32.mrf.mxu3  ;;  %v4317_v0 = vshll.u32 %v13037_v19, 16  ;;  %v3656_v2 = vsel %vm12503_vm12, %v3651_v6, %v13046_v1  ;;  %v4316_v35 = vrot.slane %v4314_v42, 7  ;;  %v3418_v48 = vld [vmem:[#allocation2 + $0xe4] sm:$0xf]  ;;  %v13099_v62 = vpop.f32.mrf.mxu1 }
 0x341   : > { %15974 = vst [vmem:[#allocation23_spill] sm:$0xff] %v13071_v24  ;;  %v13079_v55 = vrot.slane %v15975_v7, 5  ;;  %v2045_v40 = vadd.f32 %v2008_v46, %v1823_v18  ;;  %v3658_v4 = vshrl.u32 %v3417_v34, 16  ;;  %v2301_v44 = vadd.f32 %v13093_v51, %v2266_v53 }
 0x342   : > { %v3335_v17 = vpop.f32.mrf.mxu2  ;;  %v13085_v59 = vpop.f32.mrf.mxu0  ;;  %v10911_v58 = vld [vmem:[#allocation2 + $0x158] sm:$0xff]  ;;  %v4310_v1 = vor.u32 %v4308_v23, %v13063_v54  ;;  %v3661_v18 = vshll.u32 %v3417_v34, 16  ;;  %v4312_v42 = vrot.slane %v13063_v54, 4  ;;  %v9835_v9 = vrot.slane %v2880_v29, 11 }
 0x343   : > { %v13097_v19 = vadd.f32 %v3335_v17, %v13007_v28  ;;  %v2564_v43 = vld [vmem:[#allocation2 + $0x158] sm:$0xf]  ;;  %v2565_v5 = vld [vmem:[#allocation2 + $0x15c] sm:$0xf]  ;;  %v2267_v45 = vadd.f32 %v2230_v49, %v2045_v40  ;;  %3178 = vmatmul.bf16.gmra.mxu1 %v10911_v58  ;;  %v3667_v28 = vshll.u32 %v3418_v48, 16  ;;  %v3671_v52 = vshrl.u32 %v3418_v48, 16 }
 0x344   : > { %v2885_v36 = vshrl.u32 %v2564_v43, 16  ;;  %v2894_v6 = vshrl.u32 %v2565_v5, 16  ;;  %v2888_v53 = vshll.u32 %v2564_v43, 16  ;;  %v2897_v23 = vshll.u32 %v2565_v5, 16 }
 0x345   : > { %4647 = vmatmul.bf16.gmra.mxu0 %v13071_v24  ;;  %v2302_v7 = vadd.f32 %v13093_v51, %v2267_v45  ;;  %3997 = vmatmul.bf16.gmra.mxu3 %v13069_v21  ;;  %v2333_v34 = vmax.f32 %v2301_v44, 0.0  ;;  %v4319_v49 = vor.u32 %v4317_v0, %v4316_v35  ;;  %v3660_v40 = vrot.slane %v3658_v4, 4  ;;  %v11000_v4 = vld [vmem:[%s15777_s4 + $0x1b8] sm:$0xff] }
 0x346   : > { %v2887_v46 = vrot.slane %v2885_v36, 7  ;;  %v2896_v17 = vrot.slane %v2894_v6, 7  ;;  %v3663_v27 = vrot.slane %v3661_v18, 5  ;;  %v3858_v29 = vunpack.c.l.b16 %v3646_v14  ;;  %6219 = vmatpush.bf16.msra.mxu3 %v11000_v4 }
 0x347   : > { %v2334_v3 = vmax.f32 %v2302_v7, 0.0  ;;  %v3859_v43 = vunpack.c.l.b16 %v3656_v2  ;;  %v13106_v48 = vrot.slane %v3667_v28, 5  ;;  %v3673_v45 = vrot.slane %v3671_v52, 4  ;;  %v4102_v2 = vld [vmem:[#allocation2 + $0xf4] sm:$0x8] }
 0x348   : > { %v2890_v54 = vor.u32 %v2888_v53, %v2887_v46  ;;  %v2892_v58 = vrot.slane %v2887_v46, 4  ;;  %v2899_v41 = vor.u32 %v2897_v23, %v2896_v17  ;;  %v2011_v24 = vpop.f32.mrf.mxu3  ;;  %v4311_v14 = vsel %vm12121_vm8, %v13081_v13, %v4310_v1  ;;  %v13124_v18 = vpop.f32.mrf.mxu1  ;;  %v13126_v28 = vld [vmem:[#allocation2 + $0xfc] sm:$0xf]  ;;  %v5008_v7 = vld [vmem:[#allocation2 + $0x24] sm:$0xf] }
 0x349   : > { %v11162_v36 = vpack.c.bf16 %v2334_v3, %v2333_v34  ;;  %v2046_v44 = vadd.f32 %v2011_v24, %v13054_v12  ;;  %v3664_v13 = vor.u32 %v3663_v27, %v3660_v40  ;;  %v3677_v1 = vshll.u32 %v3419_v56, 16  ;;  %v2566_v17 = vld [vmem:[#allocation2 + $0x16c] sm:$0x8]  ;;  %v11032_v40 = vld [vmem:[%s15779_s6 + $0x78] sm:$0xff] }
 0x34a   : > { %v3337_v6 = vpop.f32.mrf.mxu2  ;;  %v2235_v5 = vpop.f32.mrf.mxu0  ;;  %v2891_v0 = vsel %vm12121_vm8, %v9835_v9, %v2890_v54  ;;  %v2900_v35 = vsel %vm12121_vm8, %v2892_v58, %v2899_v41  ;;  %v4320_v41 = vsel %vm12121_vm8, %v4312_v42, %v4319_v49  ;;  %v4327_v52 = vshrl.u32 %v13108_v39, 16  ;;  %7420 = vmatpush.bf16.msra.mxu2 %v11032_v40 }
 0x34b   : > { %v13122_v3 = vadd.f32 %v3337_v6, %v13035_v25  ;;  %v3217_v9 = vunpack.c.l.b16 %v2891_v0  ;;  %v3218_v53 = vunpack.c.l.b16 %v2900_v35  ;;  %11183 = vst [vmem:[#allocation2 + $0x170] sm:$0xff] %v11162_v36   ;;  %v3674_v25 = vor.u32 %v3673_v45, %v13106_v48 }
 0x34c   : > { %v4322_v24 = vshrl.u32 %v4102_v2, 16  ;;  %v1825_v46 = vadd.f32 %v12492_v11, %v13059_v60  ;;  %v4336_v23 = vshrl.u32 %v13126_v28, 16  ;;  %v5062_v42 = vor.u32 %v13079_v55, %v13067_v32 }
 0x34d   : > { %v13131_v12 = vpack.c.b16 %v3218_v53, %v3217_v9  ;;  %v2268_v56 = vadd.f32 %v13085_v59, %v2046_v44  ;;  %v4508_v27 = vunpack.c.l.b16 %v4311_v14  ;;  %v4509_v34 = vunpack.c.l.b16 %v4320_v41  ;;  %v11008_v44 = vld [vmem:[%s15777_s4 + $0x1f8] sm:$0xff] }
 0x34e   : > { %v5065_v49 = vshll.u32 %v5008_v7, 16  ;;  %v13144_v54 = vpack.c.b16 %v3859_v43, %v3858_v29  ;;  %v13146_v11 = vrot.slane %v3664_v13, 4  ;;  %v13148_v60 = vrot.slane %v3677_v1, 5  ;;  %6501 = vmatpush.bf16.msra.mxu0 %v11008_v44 }
 0x34f   : > { %15976 = vst [vmem:[#allocation35_spill] sm:$0xff] %v13131_v12  ;;  %3379 = vmatmul.bf16.gmra.mxu2 %v13131_v12  ;;  %v13150_v58 = vrot.slane %v4327_v52, 7  ;;  %v2902_v36 = vshrl.u32 %v2566_v17, 16  ;;  %v13152_v59 = vrot.slane %v3674_v25, 4  ;;  %v13154_v6 = vrot.slane %v4322_v24, 11 }
 0x350   : > { %15977 = vst [vmem:[#allocation36_spill] sm:$0xff] %v13144_v54  ;;  %v2013_v45 = vpop.f32.mrf.mxu3  ;;  %v5069_v0 = vshrl.u32 %v5008_v7, 16  ;;  %v4330_v29 = vshll.u32 %v13108_v39, 16  ;;  %v4338_v43 = vrot.slane %v4336_v23, 7  ;;  %v4339_v4 = vshll.u32 %v13126_v28, 16  ;;  %v13167_v41 = vpop.f32.mrf.mxu1 }
 0x351   : > { %v2047_v35 = vadd.f32 %v2013_v45, %v1825_v46  ;;  %v2303_v9 = vadd.f32 %v13093_v51, %v2268_v56  ;;  %v13169_v1 = vpack.c.b16 %v4509_v34, %v4508_v27  ;;  %v13171_v39 = vrot.slane %v5065_v49, 5  ;;  %v2436_v17 = vld [vmem:[#allocation2 + $0x100] sm:$0x1]  ;;  %v5009_v27 = vld [vmem:[#allocation2 + $0x28] sm:$0x1] }
 0x352   : > { %v3340_v14 = vpop.f32.mrf.mxu2  ;;  %v13156_v2 = vpop.f32.mrf.mxu0  ;;  %v10912_v13 = vld [vmem:[#allocation2 + $0x170] sm:$0xff]  ;;  %v4332_v46 = vor.u32 %v4330_v29, %v13150_v58  ;;  %v9836_v23 = vrot.slane %v2902_v36, 11  ;;  %v5071_v34 = vrot.slane %v5069_v0, 4  ;;  %v3670_v36 = vsel %vm12503_vm12, %v13146_v11, %v13106_v48  ;;  %v3420_v11 = vld [vmem:[#allocation2 + $0xf8] sm:$0xf] }
 0x353   : > { %v13165_v53 = vadd.f32 %v3340_v14, %v13099_v62  ;;  %15978 = vst [vmem:[#allocation37_spill] sm:$0xff] %v13169_v1  ;;  %v2567_v52 = vld [vmem:[#allocation2 + $0x170] sm:$0xf]  ;;  %v2568_v7 = vld [vmem:[#allocation2 + $0x174] sm:$0xf]  ;;  %v2269_v25 = vadd.f32 %v2235_v5, %v2047_v35  ;;  %v11016_v62 = vld [vmem:[%s15777_s4 + $0x238] sm:$0xff]  ;;  %3183 = vmatmul.bf16.gmra.mxu1 %v10912_v13  ;;  %v4341_v29 = vor.u32 %v4339_v4, %v4338_v43 }
 0x354   : > { %v2907_v28 = vshrl.u32 %v2567_v52, 16  ;;  %v2916_v24 = vshrl.u32 %v2568_v7, 16  ;;  %v2910_v56 = vshll.u32 %v2567_v52, 16  ;;  %v2437_v5 = vsel %vm12166_vm9, 0, %v2436_v17  ;;  %7183 = vmatpush.bf16.msra.mxu1 %v11016_v62 }
 0x355   : > { %4652 = vmatmul.bf16.gmra.mxu0 %v13169_v1  ;;  %v2304_v49 = vadd.f32 %v13093_v51, %v2269_v25  ;;  %4002 = vmatmul.bf16.gmra.mxu3 %v13144_v54  ;;  %v2919_v35 = vshll.u32 %v2568_v7, 16  ;;  %2438 = vst [vmem:[#allocation2 + $0x100] sm:$0x1] %v2437_v5  ;;  %v2335_v14 = vmax.f32 %v2303_v9, 0.0  ;;  %v4334_v0 = vrot.slane %v13150_v58, 4 }
 0x356   : > { %v2909_v40 = vrot.slane %v2907_v28, 7  ;;  %v2918_v45 = vrot.slane %v2916_v24, 7  ;;  %v3680_v7 = vsel %vm12503_vm12, %v13152_v59, %v13148_v60  ;;  %v4333_v9 = vsel %vm12121_vm8, %v13154_v6, %v4332_v46  ;;  %v3421_v59 = vld [vmem:[#allocation2 + $0xfc] sm:$0xf] }
 0x357   : > { %v2336_v44 = vmax.f32 %v2304_v49, 0.0  ;;  %v5072_v28 = vor.u32 %v5071_v34, %v13171_v39  ;;  %v5075_v48 = vshll.u32 %v5009_v27, 16  ;;  %v3860_v27 = vunpack.c.l.b16 %v3670_v36  ;;  %v5010_v49 = vld [vmem:[#allocation2 + $0x38] sm:$0xf] }
 0x358   : > { %v2912_v13 = vor.u32 %v2910_v56, %v2909_v40  ;;  %v2914_v52 = vrot.slane %v2909_v40, 4  ;;  %v2921_v51 = vor.u32 %v2919_v35, %v2918_v45  ;;  %v3963_v25 = vpop.f32.mrf.mxu3  ;;  %v13207_v46 = vpop.f32.mrf.mxu1  ;;  %v3682_v34 = vshrl.u32 %v3420_v11, 16 }
 0x359   : > { %v11167_v58 = vpack.c.bf16 %v2336_v44, %v2335_v14  ;;  %v13196_v43 = vadd.f32 %v3963_v25, %v12531_v16  ;;  %v4342_v16 = vsel %vm12121_vm8, %v4334_v0, %v4341_v29  ;;  %v3685_v5 = vshll.u32 %v3420_v11, 16  ;;  %v4106_v14 = vld [vmem:[#allocation2 + $0x110] sm:$0xf]  ;;  %v4107_v44 = vld [vmem:[#allocation2 + $0x114] sm:$0xf] }
 0x35a   : > { %v3342_v4 = vpop.f32.mrf.mxu2  ;;  %v13198_v24 = vpop.f32.mrf.mxu0  ;;  %v2913_v62 = vsel %vm12121_vm8, %v9836_v23, %v2912_v13  ;;  %v2922_v60 = vsel %vm12121_vm8, %v2914_v52, %v2921_v51  ;;  %v5063_v23 = vrot.slane %v5062_v42, 4  ;;  %v3691_v45 = vshll.u32 %v3421_v59, 16  ;;  %v5011_v42 = vld [vmem:[#allocation2 + $0x3c] sm:$0xf] }
 0x35b   : > { %v13205_v6 = vadd.f32 %v3342_v4, %v13124_v18  ;;  %v3219_v17 = vunpack.c.l.b16 %v2913_v62  ;;  %v3220_v56 = vunpack.c.l.b16 %v2922_v60  ;;  %11184 = vst [vmem:[#allocation2 + $0x188] sm:$0xff] %v11167_v58   ;;  %v3861_v18 = vunpack.c.l.b16 %v3680_v7  ;;  %v4105_v62 = vld [vmem:[#allocation2 + $0x10c] sm:$0x8] }
 0x35c   : > { %v3695_v35 = vshrl.u32 %v3421_v59, 16  ;;  %v4510_v13 = vunpack.c.l.b16 %v4333_v9  ;;  %v4511_v52 = vunpack.c.l.b16 %v4342_v16  ;;  %v5073_v51 = vrot.slane %v5072_v28, 4 }
 0x35d   : > { %v13214_v40 = vpack.c.b16 %v3220_v56, %v3219_v17  ;;  %v5077_v0 = vrot.slane %v5075_v48, 5  ;;  %v5080_v36 = vshrl.u32 %v5010_v49, 16  ;;  %v5083_v29 = vshll.u32 %v5010_v49, 16  ;;  %v3422_v56 = vld [vmem:[#allocation2 + $0x100] sm:$0x1] }
 0x35e   : > { %v4349_v32 = vshrl.u32 %v4106_v14, 16  ;;  %v4358_v55 = vshrl.u32 %v4107_v44, 16  ;;  %v3684_v11 = vrot.slane %v3682_v34, 4  ;;  %v3687_v58 = vrot.slane %v3685_v5, 5  ;;  %v10937_v5 = vld [vmem:[#allocation2 + $0x20] sm:$0xff] }
 0x35f   : > { %15979 = vst [vmem:[#allocation38_spill] sm:$0xff] %v13214_v40  ;;  %3384 = vmatmul.bf16.gmra.mxu2 %v13214_v40  ;;  %v13219_v7 = vrot.slane %v3691_v45, 5  ;;  %v3697_v4 = vrot.slane %v3695_v35, 4  ;;  %v13223_v28 = vpack.c.b16 %v3861_v18, %v3860_v27  ;;  %v13225_v48 = vpack.c.b16 %v4511_v52, %v4510_v13  ;;  %v2439_v18 = vld [vmem:[#allocation2 + $0x118] sm:$0x1] }
 0x360   : > { %v13217_v25 = vpop.f32.mrf.mxu3  ;;  %v5068_v59 = vsel %vm12503_vm12, %v5063_v23, %v13171_v39  ;;  %v5078_v17 = vsel %vm12503_vm12, %v5073_v51, %v5077_v0  ;;  %v13235_v34 = vpop.f32.mrf.mxu1  ;;  %v5082_v49 = vrot.slane %v5080_v36, 4  ;;  %v5085_v45 = vrot.slane %v5083_v29, 5 }
 0x361   : > { %15980 = vst [vmem:[#allocation39_spill] sm:$0xff] %v13223_v28  ;;  %v5089_v27 = vshll.u32 %v5011_v42, 16  ;;  %v4344_v35 = vshrl.u32 %v4105_v62, 16  ;;  %v4351_v13 = vrot.slane %v4349_v32, 7  ;;  %v4360_v52 = vrot.slane %v4358_v55, 7 }
 0x362   : > { %v3345_v60 = vpop.f32.mrf.mxu2  ;;  %v13221_v9 = vpop.f32.mrf.mxu0  ;;  %15981 = vst [vmem:[#allocation40_spill] sm:$0xff] %v13225_v48  ;;  %v2440_v39 = vsel %vm12166_vm9, 0, %v2439_v18  ;;  %v3688_v23 = vor.u32 %v3687_v58, %v3684_v11  ;;  %v3701_v51 = vshll.u32 %v3422_v56, 16  ;;  %v5093_v0 = vshrl.u32 %v5011_v42, 16  ;;  %v5012_v32 = vld [vmem:[#allocation2 + $0x40] sm:$0x1] }
 0x363   : > { %v13233_v16 = vadd.f32 %v3345_v60, %v13167_v41  ;;  %4894 = vmatmul.bf16.vlgmr.msrb.gmra.mxu1 %v10937_v5  ;;  %v3698_v41 = vor.u32 %v3697_v4, %v13219_v7  ;;  %2441 = vst [vmem:[#allocation2 + $0x118] sm:$0x1] %v2440_v39  ;;  %v4352_v36 = vshll.u32 %v4106_v14, 16  ;;  %v4361_v29 = vshll.u32 %v4107_v44, 16  ;;  %v3423_v18 = vld [vmem:[#allocation2 + $0x110] sm:$0xf] }
 0x364   : > { %v5456_v60 = vunpack.c.l.b16 %v5068_v59  ;;  %v5457_v62 = vunpack.c.l.b16 %v5078_v17  ;;  %v5086_v55 = vor.u32 %v5085_v45, %v5082_v49  ;;  %v13242_v1 = vrot.slane %v5089_v27, 5  ;;  %v3424_v58 = vld [vmem:[#allocation2 + $0x114] sm:$0xf] }
 0x365   : > { %4657 = vmatmul.bf16.gmra.mxu0 %v13225_v48  ;;  %4007 = vmatmul.bf16.gmra.mxu3 %v13223_v28  ;;  %v10039_v40 = vrot.slane %v4344_v35, 11  ;;  %v4354_v48 = vor.u32 %v4352_v36, %v4351_v13  ;;  %v4356_v5 = vrot.slane %v4351_v13, 4  ;;  %v4363_v11 = vor.u32 %v4361_v29, %v4360_v52  ;;  %v13244_v28 = vld [vmem:[#allocation2 + $0x50] sm:$0xf] }
 0x366   : > { %v3689_v56 = vrot.slane %v3688_v23, 4  ;;  %v3699_v42 = vrot.slane %v3698_v41, 4  ;;  %v3703_v39 = vrot.slane %v3701_v51, 5  ;;  %v5095_v12 = vrot.slane %v5093_v0, 4  ;;  %v10999_v27 = vld [vmem:[%s15777_s4 + $0x1b0] sm:$0xff] }
 0x367   : > { %v5099_v17 = vshll.u32 %v5012_v32, 16  ;;  %v3706_v49 = vshrl.u32 %v3423_v18, 16  ;;  %v3709_v45 = vshll.u32 %v3423_v18, 16  ;;  %v13259_v52 = vpack.c.b16 %v5457_v62, %v5456_v60  ;;  %v13261_v41 = vld [vmem:[#allocation2 + $0x128] sm:$0xf]  ;;  %6220 = vmatpush.bf16.msra.mxu3 %v10999_v27 }
 0x368   : > { %v3968_v4 = vpop.f32.mrf.mxu3  ;;  %v13257_v13 = vpop.f32.mrf.mxu1  ;;  %v3715_v23 = vshll.u32 %v3424_v58, 16  ;;  %v13263_v51 = vld [vmem:[#allocation2 + $0x12c] sm:$0xf]  ;;  %v4355_v0 = vsel %vm12121_vm8, %v10039_v40, %v4354_v48  ;;  %v4364_v36 = vsel %vm12121_vm8, %v4356_v5, %v4363_v11  ;;  %v5107_v29 = vshll.u32 %v13244_v28, 16  ;;  %v5014_v40 = vld [vmem:[#allocation2 + $0x54] sm:$0xf] }
 0x369   : > { %v13247_v14 = vadd.f32 %v3968_v4, %v12788_v10  ;;  %15983 = vst [vmem:[#allocation42_spill] sm:$0xff] %v13259_v52  ;;  %v3719_v10 = vshrl.u32 %v3424_v58, 16  ;;  %v3694_v60 = vsel %vm12503_vm12, %v3689_v56, %v13219_v7  ;;  %v3704_v62 = vsel %vm12503_vm12, %v3699_v42, %v3703_v39  ;;  %v4108_v5 = vld [vmem:[#allocation2 + $0x124] sm:$0x8] }
 0x36a   : > { %v3347_v44 = vpop.f32.mrf.mxu2  ;;  %v13249_v59 = vpop.f32.mrf.mxu0  ;;  %v13276_v32 = vrot.slane %v5086_v55, 4  ;;  %v5096_v18 = vor.u32 %v5095_v12, %v13242_v1  ;;  %v3708_v48 = vrot.slane %v3706_v49, 4  ;;  %v3711_v58 = vrot.slane %v3709_v45, 5  ;;  %v11031_v55 = vld [vmem:[%s15779_s6 + $0x70] sm:$0xff]  ;;  %v3425_v49 = vld [vmem:[#allocation2 + $0x118] sm:$0x1] }
 0x36b   : > { %15982 = vst [vmem:[#allocation41_spill] sm:$0xff] %v13249_v59  ;;  %v13255_v35 = vadd.f32 %v3347_v44, %v13207_v46  ;;  %v5104_v46 = vshrl.u32 %v13244_v28, 16  ;;  %v4371_v11 = vshrl.u32 %v13261_v41, 16  ;;  %v4380_v4 = vshrl.u32 %v13263_v51, 16  ;;  %7421 = vmatpush.bf16.msra.mxu2 %v11031_v55 }
 0x36c   : > { %v4512_v28 = vunpack.c.l.b16 %v4355_v0  ;;  %v4513_v44 = vunpack.c.l.b16 %v4364_v36  ;;  %v13282_v7 = vrot.slane %v3715_v23, 5  ;;  %v3721_v56 = vrot.slane %v3719_v10, 4 }
 0x36d   : > { %v3862_v12 = vunpack.c.l.b16 %v3694_v60  ;;  %v3863_v42 = vunpack.c.l.b16 %v3704_v62  ;;  %v5101_v39 = vrot.slane %v5099_v17, 5  ;;  %v13287_v45 = vrot.slane %v5104_v46, 4  ;;  %v11007_v17 = vld [vmem:[%s15777_s4 + $0x1f0] sm:$0xff] }
 0x36e   : > { %v5097_v54 = vrot.slane %v5096_v18, 4  ;;  %v4366_v21 = vshrl.u32 %v4108_v5, 16  ;;  %v5113_v15 = vshll.u32 %v5014_v40, 16  ;;  %v3712_v36 = vor.u32 %v3711_v58, %v3708_v48  ;;  %v11015_v48 = vld [vmem:[%s15777_s4 + $0x230] sm:$0xff]  ;;  %6502 = vmatpush.bf16.msra.mxu0 %v11007_v17 }
 0x36f   : > { %5576 = vmatmul.bf16.vlgmr.msrb.gmra.mxu2 %v13259_v52  ;;  %v5117_v52 = vshrl.u32 %v5014_v40, 16  ;;  %v4373_v26 = vrot.slane %v4371_v11, 7  ;;  %v4382_v60 = vrot.slane %v4380_v4, 7  ;;  %v13302_v18 = vpack.c.b16 %v4513_v44, %v4512_v28  ;;  %v10938_v40 = vld [vmem:[#allocation2 + $0x38] sm:$0xff]  ;;  %v2442_v58 = vld [vmem:[#allocation2 + $0x130] sm:$0x1]  ;;  %7184 = vmatpush.bf16.msra.mxu1 %v11015_v48 }
 0x370   : > { %v3970_v27 = vpop.f32.mrf.mxu3  ;;  %v13300_v62 = vpop.f32.mrf.mxu1  ;;  %v3725_v5 = vshll.u32 %v3425_v49, 16  ;;  %v13308_v11 = vpack.c.b16 %v3863_v42, %v3862_v12  ;;  %v4374_v4 = vshll.u32 %v13261_v41, 16  ;;  %v2443_v28 = vsel %vm12166_vm9, 0, %v2442_v58 }
 0x371   : > { %v13290_v23 = vadd.f32 %v3970_v27, %v12809_v61  ;;  %15985 = vst [vmem:[#allocation44_spill] sm:$0xff] %v13302_v18  ;;  %v3722_v61 = vor.u32 %v3721_v56, %v13282_v7  ;;  %v5092_v44 = vsel %vm12503_vm12, %v13276_v32, %v13242_v1  ;;  %v5102_v56 = vsel %vm12503_vm12, %v5097_v54, %v5101_v39  ;;  %v5015_v27 = vld [vmem:[#allocation2 + $0x58] sm:$0x1]  ;;  %v3426_v1 = vld [vmem:[#allocation2 + $0x128] sm:$0xf] }
 0x372   : > { %v3350_v10 = vpop.f32.mrf.mxu2  ;;  %v13292_v0 = vpop.f32.mrf.mxu0  ;;  %15986 = vst [vmem:[#allocation45_spill] sm:$0xff] %v13308_v11  ;;  %v10040_v55 = vrot.slane %v4366_v21, 11  ;;  %v5109_v12 = vrot.slane %v5107_v29, 5  ;;  %v3713_v41 = vrot.slane %v3712_v36, 4  ;;  %v4378_v42 = vrot.slane %v4373_v26, 4 }
 0x373   : > { %15984 = vst [vmem:[#allocation43_spill] sm:$0xff] %v13292_v0  ;;  %v13298_v46 = vadd.f32 %v3350_v10, %v13235_v34  ;;  %v4383_v34 = vshll.u32 %v13263_v51, 16  ;;  %4899 = vmatmul.bf16.gmra.mxu1 %v10938_v40  ;;  %v4376_v51 = vor.u32 %v4374_v4, %v4373_v26  ;;  %v3723_v10 = vrot.slane %v3722_v61, 4  ;;  %v3427_v39 = vld [vmem:[#allocation2 + $0x12c] sm:$0xf] }
 0x374   : > { %2444 = vst [vmem:[#allocation2 + $0x130] sm:$0x1] %v2443_v28  ;;  %v3727_v17 = vrot.slane %v3725_v5, 5  ;;  %v13322_v40 = vrot.slane %v5113_v15, 5  ;;  %v5119_v58 = vrot.slane %v5117_v52, 4  ;;  %v5459_v54 = vunpack.c.l.b16 %v5102_v56 }
 0x375   : > { %4662 = vmatmul.bf16.gmra.mxu0 %v13302_v18  ;;  %4012 = vmatmul.bf16.gmra.mxu3 %v13308_v11  ;;  %v4385_v49 = vor.u32 %v4383_v34, %v4382_v60  ;;  %v5458_v18 = vunpack.c.l.b16 %v5092_v44  ;;  %v5110_v21 = vor.u32 %v5109_v12, %v13287_v45  ;;  %v5123_v29 = vshll.u32 %v5015_v27, 16  ;;  %v5016_v28 = vld [vmem:[#allocation2 + $0x68] sm:$0xf]  ;;  %v5017_v45 = vld [vmem:[#allocation2 + $0x6c] sm:$0xf] }
 0x376   : > { %v3718_v15 = vsel %vm12503_vm12, %v3713_v41, %v13282_v7  ;;  %v4377_v52 = vsel %vm12121_vm8, %v10040_v55, %v4376_v51  ;;  %v3730_v4 = vshrl.u32 %v3426_v1, 16  ;;  %v3733_v34 = vshll.u32 %v3426_v1, 16  ;;  %v4112_v12 = vld [vmem:[#allocation2 + $0x140] sm:$0xf]  ;;  %v4113_v51 = vld [vmem:[#allocation2 + $0x144] sm:$0xf] }
 0x377   : > { %v4386_v61 = vsel %vm12121_vm8, %v4378_v42, %v4385_v49  ;;  %v5120_v44 = vor.u32 %v5119_v58, %v13322_v40  ;;  %v3739_v7 = vshll.u32 %v3427_v39, 16  ;;  %v3743_v56 = vshrl.u32 %v3427_v39, 16 }
 0x378   : > { %v3973_v32 = vpop.f32.mrf.mxu3  ;;  %v13340_v48 = vpop.f32.mrf.mxu1  ;;  %v5128_v55 = vshrl.u32 %v5016_v28, 16  ;;  %v13345_v41 = vpack.c.b16 %v5459_v54, %v5458_v18  ;;  %v5131_v42 = vshll.u32 %v5016_v28, 16  ;;  %v5137_v49 = vshll.u32 %v5017_v45, 16  ;;  %v4111_v18 = vld [vmem:[#allocation2 + $0x13c] sm:$0x8] }
 0x379   : > { %v13326_v36 = vadd.f32 %v3973_v32, %v12866_v37  ;;  %v3728_v37 = vsel %vm12503_vm12, %v3723_v10, %v3727_v17  ;;  %v3864_v27 = vunpack.c.l.b16 %v3718_v15  ;;  %v4515_v11 = vunpack.c.l.b16 %v4386_v61 }
 0x37a   : > { %v3352_v26 = vpop.f32.mrf.mxu2  ;;  %v13328_v60 = vpop.f32.mrf.mxu0  ;;  %15989 = vst [vmem:[#allocation48_spill] sm:$0xff] %v13345_v41  ;;  %v3865_v32 = vunpack.c.l.b16 %v3728_v37  ;;  %v5111_v10 = vrot.slane %v5110_v21, 4  ;;  %v3732_v17 = vrot.slane %v3730_v4, 4  ;;  %v3735_v1 = vrot.slane %v3733_v34, 5 }
 0x37b   : > { %15987 = vst [vmem:[#allocation46_spill] sm:$0xff] %v13326_v36  ;;  %v13338_v5 = vadd.f32 %v3352_v26, %v13257_v13  ;;  %v5141_v13 = vshrl.u32 %v5017_v45, 16  ;;  %v4514_v26 = vunpack.c.l.b16 %v4377_v52  ;;  %v4393_v58 = vshrl.u32 %v4112_v12, 16  ;;  %v3428_v59 = vld [vmem:[#allocation2 + $0x130] sm:$0x1] }
 0x37c   : > { %15988 = vst [vmem:[#allocation47_spill] sm:$0xff] %v13328_v60  ;;  %v5121_v60 = vrot.slane %v5120_v44, 4  ;;  %v13348_v39 = vrot.slane %v3739_v7, 5  ;;  %v3745_v0 = vrot.slane %v3743_v56, 4  ;;  %v4402_v54 = vshrl.u32 %v4113_v51, 16  ;;  %v10939_v44 = vld [vmem:[#allocation2 + $0x50] sm:$0xff] }
 0x37d   : > { %v5125_v28 = vrot.slane %v5123_v29, 5  ;;  %v5130_v45 = vrot.slane %v5128_v55, 4  ;;  %v5133_v15 = vrot.slane %v5131_v42, 5  ;;  %v13350_v37 = vrot.slane %v5137_v49, 5 }
 0x37e   : > { %v13357_v4 = vpack.c.b16 %v3865_v32, %v3864_v27  ;;  %v13359_v34 = vpack.c.b16 %v4515_v11, %v4514_v26  ;;  %v5143_v7 = vrot.slane %v5141_v13, 4  ;;  %v3736_v55 = vor.u32 %v3735_v1, %v3732_v17 }
 0x37f   : > { %5581 = vmatmul.bf16.gmra.mxu2 %v13345_v41  ;;  %v4388_v42 = vshrl.u32 %v4111_v18, 16  ;;  %v4395_v49 = vrot.slane %v4393_v58, 7  ;;  %v5018_v41 = vld [vmem:[#allocation2 + $0x70] sm:$0x1]  ;;  %v4396_v13 = vshll.u32 %v4112_v12, 16  ;;  %v5126_v27 = vsel %vm12503_vm12, %v5121_v60, %v5125_v28 }
 0x380   : > { %v3975_v36 = vpop.f32.mrf.mxu3  ;;  %15992 = vst [vmem:[#allocation51_spill] sm:$0xff] %v13357_v4  ;;  %v13364_v29 = vpop.f32.mrf.mxu1  ;;  %v5147_v32 = vshll.u32 %v5018_v41, 16  ;;  %v3737_v26 = vrot.slane %v3736_v55, 4  ;;  %v5144_v58 = vor.u32 %v5143_v7, %v13350_v37 }
 0x381   : > { %v13353_v52 = vadd.f32 %v3975_v36, %v12891_v8  ;;  %15993 = vst [vmem:[#allocation52_spill] sm:$0xff] %v13359_v34  ;;  %v2445_v8 = vld [vmem:[#allocation2 + $0x148] sm:$0x1]  ;;  %v3746_v36 = vor.u32 %v3745_v0, %v13348_v39  ;;  %v4405_v0 = vshll.u32 %v4113_v51, 16  ;;  %v10041_v17 = vrot.slane %v4388_v42, 11 }
 0x382   : > { %v3355_v21 = vpop.f32.mrf.mxu2  ;;  %v13355_v61 = vpop.f32.mrf.mxu0  ;;  %v2446_v11 = vsel %vm12166_vm9, 0, %v2445_v8  ;;  %v4398_v1 = vor.u32 %v4396_v13, %v4395_v49  ;;  %v3429_v8 = vld [vmem:[#allocation2 + $0x140] sm:$0xf]  ;;  %v13384_v28 = vrot.slane %v5147_v32, 5  ;;  %v13399_v55 = vrot.slane %v5144_v58, 4 }
 0x383   : > { %15990 = vst [vmem:[#allocation49_spill] sm:$0xff] %v13353_v52  ;;  %v13362_v56 = vadd.f32 %v3355_v21, %v13300_v62  ;;  %v3749_v52 = vshll.u32 %v3428_v59, 16  ;;  %4904 = vmatmul.bf16.gmra.mxu1 %v10939_v44  ;;  %v5116_v62 = vsel %vm12503_vm12, %v5111_v10, %v13322_v40  ;;  %v5134_v59 = vor.u32 %v5133_v15, %v5130_v45  ;;  %v3430_v45 = vld [vmem:[#allocation2 + $0x144] sm:$0xf]  ;;  %v10998_v15 = vld [vmem:[%s15777_s4 + $0x1a8] sm:$0xff] }
 0x384   : > { %15991 = vst [vmem:[#allocation50_spill] sm:$0xff] %v13355_v61  ;;  %v4404_v61 = vrot.slane %v4402_v54, 7  ;;  %v3747_v18 = vrot.slane %v3746_v36, 4  ;;  %v4400_v21 = vrot.slane %v4395_v49, 4  ;;  %v5460_v12 = vunpack.c.l.b16 %v5116_v62  ;;  %v5019_v42 = vld [vmem:[#allocation2 + $0x80] sm:$0xf]  ;;  %6221 = vmatpush.bf16.msra.mxu3 %v10998_v15 }
 0x385   : > { %4667 = vmatmul.bf16.gmra.mxu0 %v13359_v34  ;;  %2447 = vst [vmem:[#allocation2 + $0x148] sm:$0x1] %v2446_v11  ;;  %4017 = vmatmul.bf16.gmra.mxu3 %v13357_v4  ;;  %v3751_v54 = vrot.slane %v3749_v52, 5  ;;  %v5461_v10 = vunpack.c.l.b16 %v5126_v27  ;;  %v13382_v41 = vrot.slane %v5134_v59, 4  ;;  %v4399_v7 = vsel %vm12121_vm8, %v10041_v17, %v4398_v1  ;;  %v5020_v49 = vld [vmem:[#allocation2 + $0x84] sm:$0xf] }
 0x386   : > { %v4407_v44 = vor.u32 %v4405_v0, %v4404_v61  ;;  %v3754_v62 = vshrl.u32 %v3429_v8, 16  ;;  %v3757_v13 = vshll.u32 %v3429_v8, 16  ;;  %v3763_v0 = vshll.u32 %v3430_v45, 16  ;;  %v4115_v59 = vld [vmem:[#allocation2 + $0x158] sm:$0xf] }
 0x387   : > { %v3752_v36 = vsel %vm12503_vm12, %v3747_v18, %v3751_v54  ;;  %v13405_v27 = vpack.c.b16 %v5461_v10, %v5460_v12  ;;  %v13407_v32 = vld [vmem:[#allocation2 + $0x15c] sm:$0xf]  ;;  %v5155_v17 = vshll.u32 %v5019_v42, 16  ;;  %v5161_v1 = vshll.u32 %v5020_v49, 16 }
 0x388   : > { %v3978_v40 = vpop.f32.mrf.mxu3  ;;  %v13392_v61 = vpop.f32.mrf.mxu1  ;;  %v5165_v58 = vshrl.u32 %v5020_v49, 16  ;;  %v3867_v54 = vunpack.c.l.b16 %v3752_v36  ;;  %v5140_v12 = vsel %vm12503_vm12, %v13382_v41, %v13350_v37  ;;  %v5150_v10 = vsel %vm12503_vm12, %v13399_v55, %v13384_v28  ;;  %v4114_v49 = vld [vmem:[#allocation2 + $0x154] sm:$0x8] }
 0x389   : > { %v13378_v11 = vadd.f32 %v3978_v40, %v12930_v33  ;;  %v3742_v33 = vsel %vm12503_vm12, %v3737_v26, %v13348_v39  ;;  %15995 = vst [vmem:[#allocation54_spill] sm:$0xff] %v13405_v27  ;;  %v3767_v39 = vshrl.u32 %v3430_v45, 16  ;;  %v5152_v26 = vshrl.u32 %v5019_v42, 16 }
 0x38a   : > { %v3357_v60 = vpop.f32.mrf.mxu2  ;;  %v13380_v51 = vpop.f32.mrf.mxu0  ;;  %v3866_v18 = vunpack.c.l.b16 %v3742_v33  ;;  %v4516_v40 = vunpack.c.l.b16 %v4399_v7  ;;  %v4415_v8 = vshrl.u32 %v4115_v59, 16  ;;  %v3756_v15 = vrot.slane %v3754_v62, 4  ;;  %v11006_v62 = vld [vmem:[%s15777_s4 + $0x1e8] sm:$0xff] }
 0x38b   : > { %15994 = vst [vmem:[#allocation53_spill] sm:$0xff] %v13380_v51  ;;  %v13390_v52 = vadd.f32 %v3357_v60, %v13340_v48  ;;  %v4408_v48 = vsel %vm12121_vm8, %v4400_v21, %v4407_v44  ;;  %v11030_v44 = vld [vmem:[%s15779_s6 + $0x68] sm:$0xff]  ;;  %v4424_v60 = vshrl.u32 %v13407_v32, 16  ;;  %v3759_v33 = vrot.slane %v3757_v13, 5  ;;  %6503 = vmatpush.bf16.msra.mxu0 %v11006_v62 }
 0x38c   : > { %v4517_v21 = vunpack.c.l.b16 %v4408_v48  ;;  %v13422_v7 = vrot.slane %v3763_v0, 5  ;;  %v3769_v42 = vrot.slane %v3767_v39, 4  ;;  %7422 = vmatpush.bf16.msra.mxu2 %v11030_v44  ;;  %v3431_v48 = vld [vmem:[#allocation2 + $0x148] sm:$0x1]  ;;  %v5154_v34 = vrot.slane %v5152_v26, 4 }
 0x38d   : > { %v5157_v28 = vrot.slane %v5155_v17, 5  ;;  %v13429_v55 = vrot.slane %v5161_v1, 5  ;;  %v13439_v39 = vpack.c.b16 %v3867_v54, %v3866_v18  ;;  %v10940_v44 = vld [vmem:[#allocation2 + $0x68] sm:$0xff]  ;;  %v2448_v17 = vld [vmem:[#allocation2 + $0x160] sm:$0x1]  ;;  %v4410_v1 = vshrl.u32 %v4114_v49, 16 }
 0x38e   : > { %v11014_v26 = vld [vmem:[%s15777_s4 + $0x228] sm:$0xff]  ;;  %v4426_v4 = vrot.slane %v4424_v60, 7  ;;  %v3760_v18 = vor.u32 %v3759_v33, %v3756_v15  ;;  %v3770_v54 = vor.u32 %v3769_v42, %v13422_v7  ;;  %v5462_v60 = vunpack.c.l.b16 %v5140_v12  ;;  %v3432_v33 = vld [vmem:[#allocation2 + $0x158] sm:$0xf] }
 0x38f   : > { %5586 = vmatmul.bf16.gmra.mxu2 %v13405_v27  ;;  %15997 = vst [vmem:[#allocation56_spill] sm:$0xff] %v13439_v39  ;;  %v4417_v27 = vrot.slane %v4415_v8, 7  ;;  %v5158_v8 = vor.u32 %v5157_v28, %v5154_v34  ;;  %7185 = vmatpush.bf16.msra.mxu1 %v11014_v26  ;;  %v5463_v49 = vunpack.c.l.b16 %v5150_v10  ;;  %v3433_v10 = vld [vmem:[#allocation2 + $0x15c] sm:$0xf] }
 0x390   : > { %v3980_v45 = vpop.f32.mrf.mxu3  ;;  %v13437_v0 = vpop.f32.mrf.mxu1 }
 0x391   : > { %v13425_v36 = vadd.f32 %v3980_v45, %v12957_v63  ;;  %v13441_v63 = vpack.c.b16 %v4517_v21, %v4516_v40  ;;  %v5167_v45 = vrot.slane %v5165_v58, 4  ;;  %v3773_v58 = vshll.u32 %v3431_v48, 16 }
 0x392   : > { %v3360_v37 = vpop.f32.mrf.mxu2  ;;  %v13427_v41 = vpop.f32.mrf.mxu0  ;;  %v4418_v40 = vshll.u32 %v4115_v59, 16  ;;  %v4427_v21 = vshll.u32 %v13407_v32, 16  ;;  %v3761_v48 = vrot.slane %v3760_v18, 4  ;;  %v5159_v12 = vrot.slane %v5158_v8, 4  ;;  %v13474_v8 = vld [vmem:[#allocation2 + $0x174] sm:$0xf] }
 0x393   : > { %15996 = vst [vmem:[#allocation55_spill] sm:$0xff] %v13427_v41  ;;  %v13435_v13 = vadd.f32 %v3360_v37, %v13364_v29  ;;  %v5021_v41 = vld [vmem:[#allocation2 + $0x88] sm:$0x1]  ;;  %v2449_v29 = vsel %vm12166_vm9, 0, %v2448_v17  ;;  %4909 = vmatmul.bf16.gmra.mxu1 %v10940_v44  ;;  %v5168_v37 = vor.u32 %v5167_v45, %v13429_v55  ;;  %v10042_v17 = vrot.slane %v4410_v1, 11 }
 0x394   : > { %15998 = vst [vmem:[#allocation57_spill] sm:$0xff] %v13441_v63  ;;  %v5171_v62 = vshll.u32 %v5021_v41, 16  ;;  %v4422_v44 = vrot.slane %v4417_v27, 4  ;;  %v4429_v15 = vor.u32 %v4427_v21, %v4426_v4  ;;  %v3775_v51 = vrot.slane %v3773_v58, 5  ;;  %v4118_v21 = vld [vmem:[#allocation2 + $0x170] sm:$0xf] }
 0x395   : > { %4672 = vmatmul.bf16.gmra.mxu0 %v13441_v63  ;;  %2450 = vst [vmem:[#allocation2 + $0x160] sm:$0x1] %v2449_v29  ;;  %4022 = vmatmul.bf16.gmra.mxu3 %v13439_v39  ;;  %v4420_v63 = vor.u32 %v4418_v40, %v4417_v27  ;;  %v3771_v29 = vrot.slane %v3770_v54, 4  ;;  %v13463_v27 = vpack.c.b16 %v5463_v49, %v5462_v60  ;;  %v3778_v4 = vshrl.u32 %v3432_v33, 16  ;;  %v5022_v60 = vld [vmem:[#allocation2 + $0x98] sm:$0xf] }
 0x396   : > { %v3781_v45 = vshll.u32 %v3432_v33, 16  ;;  %v5169_v1 = vrot.slane %v5168_v37, 4  ;;  %v5173_v18 = vrot.slane %v5171_v62, 5  ;;  %v3766_v54 = vsel %vm12503_vm12, %v3761_v48, %v13422_v7  ;;  %v5023_v7 = vld [vmem:[#allocation2 + $0x9c] sm:$0xf] }
 0x397   : > { %16000 = vst [vmem:[#allocation59_spill] sm:$0xff] %v13463_v27  ;;  %v4421_v26 = vsel %vm12121_vm8, %v10042_v17, %v4420_v63  ;;  %v3787_v58 = vshll.u32 %v3433_v10, 16  ;;  %v3791_v40 = vshrl.u32 %v3433_v10, 16  ;;  %v5164_v63 = vsel %vm12503_vm12, %v5159_v12, %v13429_v55 }
 0x398   : > { %v3983_v42 = vpop.f32.mrf.mxu3  ;;  %v13461_v41 = vpop.f32.mrf.mxu1  ;;  %v4518_v49 = vunpack.c.l.b16 %v4421_v26  ;;  %v3780_v62 = vrot.slane %v3778_v4, 4  ;;  %v3783_v17 = vrot.slane %v3781_v45, 5  ;;  %v4437_v33 = vshrl.u32 %v4118_v21, 16  ;;  %v10941_v26 = vld [vmem:[#allocation2 + $0x80] sm:$0xff] }
 0x399   : > { %v13454_v59 = vadd.f32 %v3983_v42, %v13005_v20  ;;  %v4430_v20 = vsel %vm12121_vm8, %v4422_v44, %v4429_v15  ;;  %v3868_v44 = vunpack.c.l.b16 %v3766_v54  ;;  %v4446_v42 = vshrl.u32 %v13474_v8, 16 }
 0x39a   : > { %v3362_v32 = vpop.f32.mrf.mxu2  ;;  %v13456_v34 = vpop.f32.mrf.mxu0  ;;  %v4519_v37 = vunpack.c.l.b16 %v4430_v20  ;;  %v3793_v55 = vrot.slane %v3791_v40, 4  ;;  %v5176_v12 = vshrl.u32 %v5022_v60, 16  ;;  %v5179_v54 = vshll.u32 %v5022_v60, 16  ;;  %v11005_v40 = vld [vmem:[%s15777_s4 + $0x1e0] sm:$0xff]  ;;  %v2451_v60 = vld [vmem:[#allocation2 + $0x178] sm:$0x1] }
 0x39b   : > { %15999 = vst [vmem:[#allocation58_spill] sm:$0xff] %v13456_v34  ;;  %v13459_v28 = vadd.f32 %v3362_v32, %v13392_v61  ;;  %v3776_v61 = vsel %vm12503_vm12, %v3771_v29, %v3775_v51  ;;  %v4117_v51 = vld [vmem:[#allocation2 + $0x16c] sm:$0x8]  ;;  %v5174_v29 = vsel %vm12503_vm12, %v5169_v1, %v5173_v18  ;;  %v13483_v32 = vrot.slane %v3787_v58, 5  ;;  %6504 = vmatpush.bf16.msra.mxu0 %v11005_v40 }
 0x39c   : > { %v3869_v15 = vunpack.c.l.b16 %v3776_v61  ;;  %v3434_v20 = vld [vmem:[#allocation2 + $0x160] sm:$0x1]  ;;  %v5185_v61 = vshll.u32 %v5023_v7, 16  ;;  %v13495_v1 = vpack.c.b16 %v4519_v37, %v4518_v49  ;;  %v3784_v18 = vor.u32 %v3783_v17, %v3780_v62 }
 0x39d   : > { %v4432_v58 = vshrl.u32 %v4117_v51, 16  ;;  %v5464_v49 = vunpack.c.l.b16 %v5164_v63  ;;  %v5465_v37 = vunpack.c.l.b16 %v5174_v29  ;;  %v3794_v62 = vor.u32 %v3793_v55, %v13483_v32  ;;  %v10996_v63 = vld [vmem:[%s15777_s4 + $0x198] sm:$0xff] }
 0x39e   : > { %16003 = vst [vmem:[#allocation62_spill] sm:$0xff] %v13495_v1  ;;  %v3797_v17 = vshll.u32 %v3434_v20, 16  ;;  %v4440_v51 = vshll.u32 %v4118_v21, 16  ;;  %v11004_v21 = vld [vmem:[%s15777_s4 + $0x1d8] sm:$0xff] }
 0x39f   : > { %5591 = vmatmul.bf16.gmra.mxu2 %v13463_v27  ;;  %v5189_v27 = vshrl.u32 %v5023_v7, 16  ;;  %v4439_v7 = vrot.slane %v4437_v33, 7  ;;  %v5181_v33 = vrot.slane %v5179_v54, 5  ;;  %6505 = vmatpush.bf16.msra.mxu0 %v11004_v21  ;;  %v13549_v21 = vld [vmem:[#allocation2 + $0x188] sm:$0xf] }
 0x3a0   : > { %v3985_v48 = vpop.f32.mrf.mxu3  ;;  %v13493_v34 = vpop.f32.mrf.mxu1 }
 0x3a1   : > { %v13486_v10 = vadd.f32 %v3985_v48, %v13033_v38  ;;  %v10997_v38 = vld [vmem:[%s15777_s4 + $0x1a0] sm:$0xff]  ;;  %v13503_v48 = vpack.c.b16 %v3869_v15, %v3868_v44  ;;  %v4449_v44 = vshll.u32 %v13474_v8, 16  ;;  %v5178_v15 = vrot.slane %v5176_v12, 4 }
 0x3a2   : > { %v3365_v4 = vpop.f32.mrf.mxu2  ;;  %v13488_v45 = vpop.f32.mrf.mxu0  ;;  %6222 = vmatpush.bf16.msra.mxu3 %v10997_v38  ;;  %v4442_v29 = vor.u32 %v4440_v51, %v4439_v7  ;;  %v4444_v8 = vrot.slane %v4439_v7, 4  ;;  %v5024_v12 = vld [vmem:[#allocation2 + $0xa0] sm:$0x1]  ;;  %v13531_v51 = vpack.c.b16 %v5465_v37, %v5464_v49 }
 0x3a3   : > { %16001 = vst [vmem:[#allocation60_spill] sm:$0xff] %v13486_v10  ;;  %v13491_v39 = vadd.f32 %v3365_v4, %v13437_v0  ;;  %v4448_v0 = vrot.slane %v4446_v42, 7  ;;  %v2452_v4 = vsel %vm12166_vm9, 0, %v2451_v60  ;;  %4914 = vmatmul.bf16.gmra.mxu1 %v10941_v26  ;;  %v2406_v42 = vld [vmem:[#allocation2 + $0x184] sm:$0x8]  ;;  %v10043_v60 = vrot.slane %v4432_v58, 11 }
 0x3a4   : > { %16002 = vst [vmem:[#allocation61_spill] sm:$0xff] %v13488_v45  ;;  %v3785_v45 = vrot.slane %v3784_v18, 4  ;;  %v13511_v10 = vrot.slane %v5185_v61, 5  ;;  %v5191_v26 = vrot.slane %v5189_v27, 4  ;;  %v2407_v20 = vsel %vm12107_vm5, 0, %v2406_v42 }
 0x3a5   : > { %16004 = vst [vmem:[#allocation63_spill] sm:$0xff] %v13503_v48  ;;  %4677 = vmatmul.bf16.gmra.mxu0 %v13495_v1  ;;  %4027 = vmatmul.bf16.gmra.mxu3 %v13503_v48  ;;  %v4451_v55 = vor.u32 %v4449_v44, %v4448_v0  ;;  %v3795_v61 = vrot.slane %v3794_v62, 4  ;;  %v3799_v18 = vrot.slane %v3797_v17, 5  ;;  %v3435_v27 = vld [vmem:[#allocation2 + $0x170] sm:$0xf]  ;;  %v5195_v17 = vshll.u32 %v5024_v12, 16 }
 0x3a6   : > { %2453 = vst [vmem:[#allocation2 + $0x178] sm:$0x1] %v2452_v4  ;;  %v5182_v4 = vor.u32 %v5181_v33, %v5178_v15  ;;  %v3436_v1 = vld [vmem:[#allocation2 + $0x174] sm:$0xf]  ;;  %v5192_v62 = vor.u32 %v5191_v26, %v13511_v10  ;;  %6223 = vmatpush.bf16.msra.mxu3 %v10996_v63  ;;  %v3802_v49 = vshrl.u32 %v3435_v27, 16  ;;  %v3805_v37 = vshll.u32 %v3435_v27, 16 }
 0x3a7   : > { %2408 = vst [vmem:[#allocation2 + $0x184] sm:$0x8] %v2407_v20  ;;  %v11003_v44 = vld [vmem:[%s15777_s4 + $0x1d0] sm:$0xff]  ;;  %v4452_v15 = vsel %vm12121_vm8, %v4444_v8, %v4451_v55  ;;  %v3790_v33 = vsel %vm12503_vm12, %v3785_v45, %v13483_v32  ;;  %v3800_v42 = vsel %vm12503_vm12, %v3795_v61, %v3799_v18  ;;  %v3811_v26 = vshll.u32 %v3436_v1, 16  ;;  %v13551_v12 = vld [vmem:[#allocation2 + $0x18c] sm:$0xf] }
 0x3a8   : > { %v3988_v54 = vpop.f32.mrf.mxu3  ;;  %v13529_v0 = vpop.f32.mrf.mxu1  ;;  %16006 = vst [vmem:[#allocation65_spill] sm:$0xff] %v13531_v51  ;;  %v3815_v63 = vshrl.u32 %v3436_v1, 16  ;;  %v5183_v20 = vrot.slane %v5182_v4, 4  ;;  %6506 = vmatpush.bf16.msra.mxu0 %v11003_v44  ;;  %v5193_v8 = vrot.slane %v5192_v62, 4  ;;  %v5197_v55 = vrot.slane %v5195_v17, 5  ;;  %v10994_v32 = vld [vmem:[%s15777_s4 + $0x188] sm:$0xff] }
 0x3a9   : > { %v13522_v58 = vadd.f32 %v3988_v54, %v13097_v19  ;;  %v10995_v19 = vld [vmem:[%s15777_s4 + $0x190] sm:$0xff]  ;;  %v11002_v45 = vld [vmem:[%s15777_s4 + $0x1c8] sm:$0xff]  ;;  %v11029_v1 = vld [vmem:[%s15779_s6 + $0x60] sm:$0xff]  ;;  %v3870_v54 = vunpack.c.l.b16 %v3790_v33  ;;  %v3871_v61 = vunpack.c.l.b16 %v3800_v42  ;;  %v4459_v18 = vshrl.u32 %v13549_v21, 16 }
 0x3aa   : > { %v3367_v38 = vpop.f32.mrf.mxu2  ;;  %v13524_v40 = vpop.f32.mrf.mxu0  ;;  %6224 = vmatpush.bf16.msra.mxu3 %v10995_v19  ;;  %v4468_v27 = vshrl.u32 %v13551_v12, 16  ;;  %v3804_v62 = vrot.slane %v3802_v49, 4  ;;  %v3807_v17 = vrot.slane %v3805_v37, 5  ;;  %v13565_v19 = vrot.slane %v3811_v26, 5  ;;  %7423 = vmatpush.bf16.msra.mxu2 %v11029_v1  ;;  %v10942_v33 = vld [vmem:[#allocation2 + $0x98] sm:$0xff]  ;;  %v10993_v1 = vld [vmem:[%s15777_s4 + $0x180] sm:$0xff] }
 0x3ab   : > { %16005 = vst [vmem:[#allocation64_spill] sm:$0xff] %v13524_v40  ;;  %v13527_v7 = vadd.f32 %v3367_v38, %v13461_v41  ;;  %v4443_v41 = vsel %vm12121_vm8, %v10043_v60, %v4442_v29  ;;  %v4521_v29 = vunpack.c.l.b16 %v4452_v15  ;;  %v5025_v38 = vld [vmem:[#allocation2 + $0xb0] sm:$0xf]  ;;  %v3817_v44 = vrot.slane %v3815_v63, 4  ;;  %v5026_v40 = vld [vmem:[#allocation2 + $0xb4] sm:$0xf] }
 0x3ac   : > { %v4520_v60 = vunpack.c.l.b16 %v4443_v41  ;;  %v5188_v42 = vsel %vm12503_vm12, %v5183_v20, %v13511_v10  ;;  %6507 = vmatpush.bf16.msra.mxu0 %v11002_v45  ;;  %v5200_v63 = vshrl.u32 %v5025_v38, 16  ;;  %v11001_v10 = vld [vmem:[%s15777_s4 + $0x1c0] sm:$0xff]  ;;  %v5203_v45 = vshll.u32 %v5025_v38, 16 }
 0x3ad   : > { %v3437_v57 = vld [vmem:[#allocation2 + $0x178] sm:$0x1] }
 0x3ae   : > { %v4120_v41 = vld [vmem:[#allocation2 + $0x184] sm:$0x8]  ;;  %v13580_v26 = vpack.c.b16 %v4521_v29, %v4520_v60  ;;  %6225 = vmatpush.bf16.msra.mxu3 %v10994_v32  ;;  %v4461_v60 = vrot.slane %v4459_v18, 7  ;;  %v4470_v29 = vrot.slane %v4468_v27, 7  ;;  %v3821_v32 = vshll.u32 %v3437_v57, 16 }
 0x3af   : > { %5596 = vmatmul.bf16.gmra.mxu2 %v13531_v51  ;;  %v4454_v20 = vshrl.u32 %v4120_v41, 16 }
 0x3b0   : > { %v3990_v4 = vpop.f32.mrf.mxu3  ;;  %v13578_v37 = vpop.f32.mrf.mxu1  ;;  %16009 = vst [vmem:[#allocation68_spill] sm:$0xff] %v13580_v26  ;;  %6508 = vmatpush.bf16.msra.mxu0 %v11001_v10 }
 0x3b1   : > { %v13568_v15 = vadd.f32 %v3990_v4, %v13122_v3  ;;  %v5198_v3 = vsel %vm12503_vm12, %v5193_v8, %v5197_v55  ;;  %v3808_v8 = vor.u32 %v3807_v17, %v3804_v62  ;;  %v3818_v55 = vor.u32 %v3817_v44, %v13565_v19 }
 0x3b2   : > { %v3370_v51 = vpop.f32.mrf.mxu2  ;;  %v13570_v48 = vpop.f32.mrf.mxu0  ;;  %v4462_v4 = vshll.u32 %v13549_v21, 16  ;;  %v5467_v18 = vunpack.c.l.b16 %v5198_v3  ;;  %6226 = vmatpush.bf16.msra.mxu3 %v10993_v1  ;;  %v10044_v27 = vrot.slane %v4454_v20, 11  ;;  %v4466_v62 = vrot.slane %v4461_v60, 4 }
 0x3b3   : > { %16007 = vst [vmem:[#allocation66_spill] sm:$0xff] %v13568_v15  ;;  %v13576_v49 = vadd.f32 %v3370_v51, %v13493_v34  ;;  %v11013_v34 = vld [vmem:[%s15777_s4 + $0x220] sm:$0xff]  ;;  %v13593_v51 = vpack.c.b16 %v3871_v61, %v3870_v54  ;;  %4919 = vmatmul.bf16.gmra.mxu1 %v10942_v33  ;;  %v5209_v15 = vshll.u32 %v5026_v40, 16  ;;  %v5213_v54 = vshrl.u32 %v5026_v40, 16 }
 0x3b4   : > { %16008 = vst [vmem:[#allocation67_spill] sm:$0xff] %v13570_v48  ;;  %v4471_v48 = vshll.u32 %v13551_v12, 16  ;;  %v5466_v61 = vunpack.c.l.b16 %v5188_v42  ;;  %7186 = vmatpush.bf16.msra.mxu1 %v11013_v34  ;;  %v4464_v41 = vor.u32 %v4462_v4, %v4461_v60  ;;  %v3809_v57 = vrot.slane %v3808_v8, 4  ;;  %v5027_v34 = vld [vmem:[#allocation2 + $0xb8] sm:$0x1] }
 0x3b5   : > { %16010 = vst [vmem:[#allocation69_spill] sm:$0xff] %v13593_v51  ;;  %4682 = vmatmul.bf16.gmra.mxu0 %v13580_v26  ;;  %4032 = vmatmul.bf16.gmra.mxu3 %v13593_v51  ;;  %v3819_v38 = vrot.slane %v3818_v55, 4  ;;  %v3823_v33 = vrot.slane %v3821_v32, 5  ;;  %v5202_v26 = vrot.slane %v5200_v63, 4  ;;  %v5205_v40 = vrot.slane %v5203_v45, 5 }
 0x3b6   : > { %v4473_v17 = vor.u32 %v4471_v48, %v4470_v29  ;;  %v5211_v42 = vrot.slane %v5209_v15, 5  ;;  %v5215_v3 = vrot.slane %v5213_v54, 4  ;;  %v4465_v48 = vsel %vm12121_vm8, %v10044_v27, %v4464_v41  ;;  %v5691_v60 = vld [vmem:[#allocation2 + $0x38] sm:$0xf]  ;;  %v5690_v41 = vld [vmem:[#allocation2 + $0x34] sm:$0x8] }
 0x3b7   : > { %v13612_v20 = vpack.c.b16 %v5467_v18, %v5466_v61  ;;  %v3824_v15 = vsel %vm12503_vm12, %v3819_v38, %v3823_v33  ;;  %v5206_v29 = vor.u32 %v5205_v40, %v5202_v26  ;;  %v5219_v55 = vshll.u32 %v5027_v34, 16  ;;  %v5028_v38 = vld [vmem:[#allocation2 + $0xc8] sm:$0xf]  ;;  %v5029_v34 = vld [vmem:[#allocation2 + $0xcc] sm:$0xf] }
 0x3b8   : > { %v3993_v44 = vpop.f32.mrf.mxu3  ;;  %v3176_v10 = vpop.f32.mrf.mxu1  ;;  %v4474_v63 = vsel %vm12121_vm8, %v4466_v62, %v4473_v17  ;;  %v5216_v8 = vor.u32 %v5215_v3, %v5211_v42  ;;  %v4522_v32 = vunpack.c.l.b16 %v4465_v48  ;;  %v3873_v54 = vunpack.c.l.b16 %v3824_v15  ;;  %v10943_v3 = vld [vmem:[#allocation2 + $0xb0] sm:$0xff] }
 0x3b9   : > { %v13601_v21 = vadd.f32 %v3993_v44, %v13165_v53  ;;  %16011 = vst [vmem:[#allocation70_spill] sm:$0xff] %v13612_v20  ;;  %v3814_v53 = vsel %vm12503_vm12, %v3809_v57, %v13565_v19  ;;  %v4523_v45 = vunpack.c.l.b16 %v4474_v63  ;;  %v5744_v61 = vshrl.u32 %v5691_v60, 16 }
 0x3ba   : > { %v3372_v12 = vpop.f32.mrf.mxu2  ;;  %v13603_v51 = vpop.f32.mrf.mxu0  ;;  %v3872_v4 = vunpack.c.l.b16 %v3814_v53  ;;  %v5207_v44 = vrot.slane %v5206_v29, 4  ;;  %v5217_v26 = vrot.slane %v5216_v8, 4  ;;  %v5221_v57 = vrot.slane %v5219_v55, 5 }
 0x3bb   : > { %v13606_v1 = vadd.f32 %v3372_v12, %v13529_v0  ;;  %v5692_v0 = vld [vmem:[#allocation2 + $0x3c] sm:$0xf]  ;;  %v13628_v40 = vpack.c.b16 %v4523_v45, %v4522_v32  ;;  %v5739_v63 = vshrl.u32 %v5690_v41, 16  ;;  %v5747_v15 = vshll.u32 %v5691_v60, 16 }
 0x3bc   : > { %v5753_v18 = vshrl.u32 %v5692_v0, 16  ;;  %v13630_v48 = vpack.c.b16 %v3873_v54, %v3872_v4  ;;  %v5756_v29 = vshll.u32 %v5692_v0, 16  ;;  %v5224_v8 = vshrl.u32 %v5028_v38, 16 }
 0x3bd   : > { %16012 = vst [vmem:[#allocation71_spill] sm:$0xff] %v13628_v40  ;;  %v5227_v55 = vshll.u32 %v5028_v38, 16  ;;  %v5222_v32 = vsel %vm12503_vm12, %v5217_v26, %v5221_v57  ;;  %v5233_v45 = vshll.u32 %v5029_v34, 16  ;;  %v5237_v4 = vshrl.u32 %v5029_v34, 16  ;;  %v5030_v34 = vld [vmem:[#allocation2 + $0xd0] sm:$0x1] }
 0x3be   : > { %16013 = vst [vmem:[#allocation72_spill] sm:$0xff] %v13630_v48  ;;  %v5755_v53 = vrot.slane %v5753_v18, 7  ;;  %v10253_v54 = vrot.slane %v5739_v63, 11  ;;  %v5469_v60 = vunpack.c.l.b16 %v5222_v32  ;;  %v5226_v0 = vrot.slane %v5224_v8, 4 }
 0x3bf   : > { %5601 = vmatmul.bf16.gmra.mxu2 %v13612_v20  ;;  %v5243_v8 = vshll.u32 %v5030_v34, 16  ;;  %v10944_v34 = vld [vmem:[#allocation2 + $0xc8] sm:$0xff] }
 0x3c0   : > { %v3995_v27 = vpop.f32.mrf.mxu3  ;;  %v3179_v12 = vpop.f32.mrf.mxu1 }
 0x3c1   : > { %v13621_v19 = vadd.f32 %v3995_v27, %v13205_v6  ;;  %v5746_v6 = vrot.slane %v5744_v61, 7  ;;  %v5758_v27 = vor.u32 %v5756_v29, %v5755_v53 }
 0x3c2   : > { %v3375_v62 = vpop.f32.mrf.mxu2  ;;  %v13623_v17 = vpop.f32.mrf.mxu0 }
 0x3c3   : > { %v13626_v33 = vadd.f32 %v3375_v62, %v13578_v37  ;;  %4924 = vmatmul.bf16.gmra.mxu1 %v10943_v3  ;;  %v5212_v37 = vsel %vm12503_vm12, %v5207_v44, %v5211_v42  ;;  %v5749_v61 = vor.u32 %v5747_v15, %v5746_v6  ;;  %v5751_v18 = vrot.slane %v5746_v6, 4  ;;  %v5694_v15 = vld [vmem:[#allocation2 + $0x50] sm:$0xf] }
 0x3c4   : > { %v5468_v62 = vunpack.c.l.b16 %v5212_v37  ;;  %v5229_v3 = vrot.slane %v5227_v55, 5  ;;  %v5235_v42 = vrot.slane %v5233_v45, 5  ;;  %v5239_v44 = vrot.slane %v5237_v4, 4  ;;  %v5695_v55 = vld [vmem:[#allocation2 + $0x54] sm:$0xf] }
 0x3c5   : > { %4687 = vmatmul.bf16.gmra.mxu0 %v13628_v40  ;;  %4037 = vmatmul.bf16.gmra.mxu3 %v13630_v48  ;;  %v5750_v6 = vsel %vm12121_vm8, %v10253_v54, %v5749_v61  ;;  %v5759_v53 = vsel %vm12121_vm8, %v5751_v18, %v5758_v27  ;;  %v5766_v32 = vshrl.u32 %v5694_v15, 16  ;;  %v5693_v54 = vld [vmem:[#allocation2 + $0x4c] sm:$0x8]  ;;  %v5775_v61 = vshrl.u32 %v5695_v55, 16 }
 0x3c6   : > { %v13647_v63 = vpack.c.b16 %v5469_v60, %v5468_v62  ;;  %v5240_v29 = vor.u32 %v5239_v44, %v5235_v42  ;;  %v6108_v37 = vunpack.c.l.b16 %v5759_v53  ;;  %v5245_v60 = vrot.slane %v5243_v8, 5  ;;  %v5032_v53 = vld [vmem:[#allocation2 + $0xe4] sm:$0xf] }
 0x3c7   : > { %v5768_v48 = vrot.slane %v5766_v32, 7  ;;  %v5769_v8 = vshll.u32 %v5694_v15, 16  ;;  %v5261_v32 = vshrl.u32 %v5032_v53, 16 }
 0x3c8   : > { %v3998_v41 = vpop.f32.mrf.mxu3  ;;  %v13645_v57 = vpop.f32.mrf.mxu1  ;;  %16015 = vst [vmem:[#allocation74_spill] sm:$0xff] %v13647_v63  ;;  %v5241_v62 = vrot.slane %v5240_v29, 4 }
 0x3c9   : > { %v13639_v38 = vadd.f32 %v3998_v41, %v13233_v16  ;;  %v5230_v16 = vor.u32 %v5229_v3, %v5226_v0  ;;  %v5031_v0 = vld [vmem:[#allocation2 + $0xe0] sm:$0xf] }
 0x3ca   : > { %v3377_v40 = vpop.f32.mrf.mxu2  ;;  %v13641_v20 = vpop.f32.mrf.mxu0 }
 0x3cb   : > { %16014 = vst [vmem:[#allocation73_spill] sm:$0xff] %v13641_v20  ;;  %v13643_v26 = vadd.f32 %v3377_v40, %v3176_v10  ;;  %v11028_v10 = vld [vmem:[%s15779_s6 + $0x58] sm:$0xff]  ;;  %v6107_v40 = vunpack.c.l.b16 %v5750_v6  ;;  %v5231_v4 = vrot.slane %v5230_v16, 4  ;;  %v5761_v16 = vshrl.u32 %v5693_v54, 16 }
 0x3cc   : > { %7424 = vmatpush.bf16.msra.mxu2 %v11028_v10  ;;  %v10977_v6 = vld [vmem:[#allocation2 + $0x38] sm:$0xff]  ;;  %v5248_v10 = vshrl.u32 %v5031_v0, 16  ;;  %v5778_v54 = vshll.u32 %v5695_v55, 16 }
 0x3cd   : > { %v5236_v29 = vsel %vm12503_vm12, %v5231_v4, %v5235_v42 }
 0x3ce   : > { %v5470_v20 = vunpack.c.l.b16 %v5236_v29  ;;  %v5250_v15 = vrot.slane %v5248_v10, 4 }
 0x3cf   : > { %5606 = vmatmul.bf16.gmra.mxu2 %v13647_v63  ;;  %v13664_v63 = vpack.c.b16 %v6108_v37, %v6107_v40  ;;  %v5246_v40 = vsel %vm12503_vm12, %v5241_v62, %v5245_v60  ;;  %v5251_v37 = vshll.u32 %v5031_v0, 16  ;;  %v5033_v62 = vld [vmem:[#allocation2 + $0xe8] sm:$0x1] }
 0x3d0   : > { %v4000_v45 = vpop.f32.mrf.mxu3  ;;  %v3184_v44 = vpop.f32.mrf.mxu1  ;;  %v5267_v29 = vshll.u32 %v5033_v62, 16  ;;  %v3313_v62 = vadd.f32 %v12736_v30, %v12658_v31 }
 0x3d1   : > { %v13658_v18 = vadd.f32 %v4000_v45, %v13255_v35  ;;  %16018 = vst [vmem:[#allocation77_spill] sm:$0xff] %v13664_v63  ;;  %v11012_v35 = vld [vmem:[%s15777_s4 + $0x218] sm:$0xff]  ;;  %v5257_v45 = vshll.u32 %v5032_v53, 16  ;;  %v5253_v60 = vrot.slane %v5251_v37, 5  ;;  %v5263_v53 = vrot.slane %v5261_v32, 4 }
 0x3d2   : > { %v3380_v27 = vpop.f32.mrf.mxu2  ;;  %v13660_v41 = vpop.f32.mrf.mxu0  ;;  %7187 = vmatpush.bf16.msra.mxu1 %v11012_v35 }
 0x3d3   : > { %16016 = vst [vmem:[#allocation75_spill] sm:$0xff] %v13658_v18  ;;  %v13662_v3 = vadd.f32 %v3380_v27, %v3179_v12  ;;  %4929 = vmatmul.bf16.gmra.mxu1 %v10944_v34  ;;  %v5777_v12 = vrot.slane %v5775_v61, 7  ;;  %v10254_v27 = vrot.slane %v5761_v16, 11  ;;  %v5773_v34 = vrot.slane %v5768_v48, 4 }
 0x3d4   : > { %16017 = vst [vmem:[#allocation76_spill] sm:$0xff] %v13660_v41  ;;  %v5771_v41 = vor.u32 %v5769_v8, %v5768_v48  ;;  %v5471_v18 = vunpack.c.l.b16 %v5246_v40  ;;  %v5259_v0 = vrot.slane %v5257_v45, 5  ;;  %v5697_v8 = vld [vmem:[#allocation2 + $0x68] sm:$0xf]  ;;  %v5254_v10 = vor.u32 %v5253_v60, %v5250_v15 }
 0x3d5   : > { %6509 = vmatmul.bf16.vlgmr.msra.gmra.mxu0 %v10977_v6  ;;  %6227 = vmatmul.bf16.vlgmr.msra.gmra.mxu3 %v13664_v63  ;;  %v5780_v42 = vor.u32 %v5778_v54, %v5777_v12  ;;  %v5698_v12 = vld [vmem:[#allocation2 + $0x6c] sm:$0xf]  ;;  %v5788_v32 = vshrl.u32 %v5697_v8, 16 }
 0x3d6   : > { %v13682_v48 = vpack.c.b16 %v5471_v18, %v5470_v20  ;;  %v5772_v35 = vsel %vm12121_vm8, %v10254_v27, %v5771_v41  ;;  %v5264_v40 = vor.u32 %v5263_v53, %v5259_v0  ;;  %v5797_v54 = vshrl.u32 %v5698_v12, 16 }
 0x3d7   : > { %v6109_v37 = vunpack.c.l.b16 %v5772_v35  ;;  %v5269_v18 = vrot.slane %v5267_v29, 5  ;;  %v10945_v35 = vld [vmem:[#allocation2 + $0xe0] sm:$0xff] }
 0x3d8   : > { %v4003_v6 = vpop.f32.mrf.mxu3  ;;  %v3186_v16 = vpop.f32.mrf.mxu1  ;;  %16020 = vst [vmem:[#allocation79_spill] sm:$0xff] %v13682_v48  ;;  %v5265_v15 = vrot.slane %v5264_v40, 4 }
 0x3d9   : > { %v13675_v4 = vadd.f32 %v4003_v6, %v13298_v46  ;;  %v5781_v46 = vsel %vm12121_vm8, %v5773_v34, %v5780_v42  ;;  %v4693_v34 = vadd.f32 %v13156_v2, %v13196_v43  ;;  %v5255_v42 = vrot.slane %v5254_v10, 4 }
 0x3da   : > { %v3382_v61 = vpop.f32.mrf.mxu2  ;;  %v13677_v63 = vpop.f32.mrf.mxu0  ;;  %v6110_v45 = vunpack.c.l.b16 %v5781_v46  ;;  %v10978_v46 = vld [vmem:[#allocation2 + $0x50] sm:$0xff]  ;;  %v4044_v2 = vadd.f32 %v13217_v25, %v3313_v62  ;;  %v5800_v43 = vshll.u32 %v5698_v12, 16 }
 0x3db   : > { %16019 = vst [vmem:[#allocation78_spill] sm:$0xff] %v13677_v63  ;;  %v13680_v55 = vadd.f32 %v3382_v61, %v13645_v57  ;;  %v5696_v57 = vld [vmem:[#allocation2 + $0x64] sm:$0x8]  ;;  %v5034_v61 = vld [vmem:[#allocation2 + $0xf8] sm:$0xf]  ;;  %v5260_v30 = vsel %vm12503_vm12, %v5255_v42, %v5259_v0 }
 0x3dc   : > { %v5783_v29 = vshrl.u32 %v5696_v57, 16  ;;  %v13700_v63 = vpack.c.b16 %v6110_v45, %v6109_v37  ;;  %v5272_v10 = vshrl.u32 %v5034_v61, 16  ;;  %v5275_v31 = vshll.u32 %v5034_v61, 16 }
 0x3dd   : > { %v4694_v0 = vadd.f32 %v13198_v24, %v4044_v2  ;;  %v5700_v24 = vld [vmem:[#allocation2 + $0x80] sm:$0xf] }
 0x3de   : > { %16023 = vst [vmem:[#allocation82_spill] sm:$0xff] %v13700_v63  ;;  %v10255_v37 = vrot.slane %v5783_v29, 11  ;;  %v5274_v12 = vrot.slane %v5272_v10, 4 }
 0x3df   : > { %5611 = vmatmul.bf16.gmra.mxu2 %v13682_v48 }
 0x3e0   : > { %v4005_v20 = vpop.f32.mrf.mxu3  ;;  %v4895_v53 = vpop.f32.mrf.mxu1 }
 0x3e1   : > { %v13690_v6 = vadd.f32 %v4005_v20, %v13338_v5  ;;  %v5791_v5 = vshll.u32 %v5697_v8, 16  ;;  %v5035_v20 = vld [vmem:[#allocation2 + $0xfc] sm:$0xf]  ;;  %v4975_v48 = vadd.f32 %v4895_v53, %v4693_v34  ;;  %v5277_v34 = vrot.slane %v5275_v31, 5 }
 0x3e2   : > { %v3385_v41 = vpop.f32.mrf.mxu2  ;;  %v13692_v27 = vpop.f32.mrf.mxu0  ;;  %v5281_v8 = vshll.u32 %v5035_v20, 16  ;;  %v5285_v40 = vshrl.u32 %v5035_v20, 16  ;;  %v5701_v20 = vld [vmem:[#allocation2 + $0x84] sm:$0xf] }
 0x3e3   : > { %16021 = vst [vmem:[#allocation80_spill] sm:$0xff] %v13690_v6  ;;  %v13698_v60 = vadd.f32 %v3385_v41, %v3184_v44  ;;  %v5799_v6 = vrot.slane %v5797_v54, 7  ;;  %4934 = vmatmul.bf16.gmra.mxu1 %v10945_v35  ;;  %v5270_v44 = vsel %vm12503_vm12, %v5265_v15, %v5269_v18  ;;  %v5472_v54 = vunpack.c.l.b16 %v5260_v30  ;;  %v5699_v30 = vld [vmem:[#allocation2 + $0x7c] sm:$0x8] }
 0x3e4   : > { %16022 = vst [vmem:[#allocation81_spill] sm:$0xff] %v13692_v27  ;;  %v5790_v27 = vrot.slane %v5788_v32, 7  ;;  %v5473_v41 = vunpack.c.l.b16 %v5270_v44  ;;  %v5283_v42 = vrot.slane %v5281_v8, 5  ;;  %v5287_v53 = vrot.slane %v5285_v40, 4 }
 0x3e5   : > { %6514 = vmatmul.bf16.gmra.mxu0 %v10978_v46  ;;  %6232 = vmatmul.bf16.gmra.mxu3 %v13700_v63  ;;  %v5802_v32 = vor.u32 %v5800_v43, %v5799_v6  ;;  %v11027_v43 = vld [vmem:[%s15779_s6 + $0x50] sm:$0xff]  ;;  %v5810_v44 = vshrl.u32 %v5700_v24, 16  ;;  %v5819_v8 = vshrl.u32 %v5701_v20, 16 }
 0x3e6   : > { %v5793_v45 = vor.u32 %v5791_v5, %v5790_v27  ;;  %v5795_v57 = vrot.slane %v5790_v27, 4  ;;  %v5036_v27 = vld [vmem:[#allocation2 + $0x100] sm:$0x1]  ;;  %v13718_v46 = vpack.c.b16 %v5473_v41, %v5472_v54  ;;  %v5278_v5 = vor.u32 %v5277_v34, %v5274_v12  ;;  %7425 = vmatpush.bf16.msra.mxu2 %v11027_v43  ;;  %v5037_v41 = vld [vmem:[#allocation2 + $0x110] sm:$0xf] }
 0x3e7   : > { %v5288_v2 = vor.u32 %v5287_v53, %v5283_v42  ;;  %v5805_v53 = vshrl.u32 %v5699_v30, 16 }
 0x3e8   : > { %v4008_v25 = vpop.f32.mrf.mxu3  ;;  %v4897_v35 = vpop.f32.mrf.mxu1  ;;  %16024 = vst [vmem:[#allocation83_spill] sm:$0xff] %v13718_v46  ;;  %v5794_v29 = vsel %vm12121_vm8, %v10255_v37, %v5793_v45  ;;  %v5279_v37 = vrot.slane %v5278_v5, 4  ;;  %v11011_v5 = vld [vmem:[%s15777_s4 + $0x210] sm:$0xff] }
 0x3e9   : > { %v13709_v61 = vadd.f32 %v4008_v25, %v13362_v56  ;;  %v13716_v6 = vadd.f32 %v4897_v35, %v4694_v0  ;;  %v5803_v56 = vsel %vm12121_vm8, %v5795_v57, %v5802_v32  ;;  %v6111_v10 = vunpack.c.l.b16 %v5794_v29  ;;  %v10979_v0 = vld [vmem:[#allocation2 + $0x68] sm:$0xff]  ;;  %v5038_v35 = vld [vmem:[#allocation2 + $0x114] sm:$0xf]  ;;  %7188 = vmatpush.bf16.msra.mxu1 %v11011_v5 }
 0x3ea   : > { %v3387_v62 = vpop.f32.mrf.mxu2  ;;  %v13714_v15 = vpop.f32.mrf.mxu0  ;;  %v6112_v31 = vunpack.c.l.b16 %v5803_v56  ;;  %v4695_v32 = vadd.f32 %v13221_v9, %v13247_v14  ;;  %v5289_v25 = vrot.slane %v5288_v2, 4  ;;  %v5812_v56 = vrot.slane %v5810_v44, 7 }
 0x3eb   : > { %v13712_v18 = vadd.f32 %v3387_v62, %v3186_v16  ;;  %v5291_v16 = vshll.u32 %v5036_v27, 16  ;;  %v10946_v62 = vld [vmem:[#allocation2 + $0xf8] sm:$0xff]  ;;  %v5813_v14 = vshll.u32 %v5700_v24, 16  ;;  %v5296_v2 = vshrl.u32 %v5037_v41, 16 }
 0x3ec   : > { %v13735_v29 = vpack.c.b16 %v6112_v31, %v6111_v10  ;;  %v5284_v43 = vsel %vm12503_vm12, %v5279_v37, %v5283_v42  ;;  %v5305_v31 = vshll.u32 %v5038_v35, 16  ;;  %v5309_v30 = vshrl.u32 %v5038_v35, 16  ;;  %v16026_v42 = vld [vmem:[#allocation41_spill] sm:$0xff] }
 0x3ed   : > { %v5293_v54 = vrot.slane %v5291_v16, 5  ;;  %v5299_v16 = vshll.u32 %v5037_v41, 16  ;;  %v10256_v44 = vrot.slane %v5805_v53, 11  ;;  %v5474_v24 = vunpack.c.l.b16 %v5284_v43 }
 0x3ee   : > { %16025 = vst [vmem:[#allocation84_spill] sm:$0xff] %v13735_v29  ;;  %v4696_v37 = vadd.f32 %v16026_v42, %v13290_v23 }
 0x3ef   : > { %5616 = vmatmul.bf16.gmra.mxu2 %v13718_v46  ;;  %v5294_v10 = vsel %vm12503_vm12, %v5289_v25, %v5293_v54  ;;  %v5301_v41 = vrot.slane %v5299_v16, 5  ;;  %v5307_v25 = vrot.slane %v5305_v31, 5  ;;  %v5311_v54 = vrot.slane %v5309_v30, 4  ;;  %v5704_v16 = vld [vmem:[#allocation2 + $0x9c] sm:$0xf] }
 0x3f0   : > { %v4010_v40 = vpop.f32.mrf.mxu3  ;;  %v4900_v34 = vpop.f32.mrf.mxu1  ;;  %v5702_v30 = vld [vmem:[#allocation2 + $0x94] sm:$0x8]  ;;  %v5844_v63 = vshll.u32 %v5704_v16, 16 }
 0x3f1   : > { %v13729_v45 = vadd.f32 %v4010_v40, %v13390_v52  ;;  %v4977_v27 = vadd.f32 %v4900_v34, %v4695_v32  ;;  %v5821_v52 = vrot.slane %v5819_v8, 7  ;;  %v5815_v8 = vor.u32 %v5813_v14, %v5812_v56 }
 0x3f2   : > { %v5577_v57 = vpop.f32.mrf.mxu2  ;;  %v13740_v9 = vpop.f32.mrf.mxu0  ;;  %v5817_v40 = vrot.slane %v5812_v56, 4  ;;  %v5298_v34 = vrot.slane %v5296_v2, 4  ;;  %v5039_v56 = vld [vmem:[#allocation2 + $0x118] sm:$0x1]  ;;  %v5312_v23 = vor.u32 %v5311_v54, %v5307_v25 }
 0x3f3   : > { %v13733_v12 = vadd.f32 %v5577_v57, %v4975_v48  ;;  %4939 = vmatmul.bf16.gmra.mxu1 %v10946_v62  ;;  %v5822_v48 = vshll.u32 %v5701_v20, 16  ;;  %v5475_v20 = vunpack.c.l.b16 %v5294_v10  ;;  %v5816_v14 = vsel %vm12121_vm8, %v10256_v44, %v5815_v8  ;;  %v5703_v2 = vld [vmem:[#allocation2 + $0x98] sm:$0xf] }
 0x3f4   : > { %v5315_v43 = vshll.u32 %v5039_v56, 16  ;;  %v10947_v56 = vld [vmem:[#allocation2 + $0x110] sm:$0xff] }
 0x3f5   : > { %6519 = vmatmul.bf16.gmra.mxu0 %v10979_v0  ;;  %6237 = vmatmul.bf16.gmra.mxu3 %v13735_v29  ;;  %v5824_v57 = vor.u32 %v5822_v48, %v5821_v52  ;;  %v13755_v5 = vpack.c.b16 %v5475_v20, %v5474_v24  ;;  %v5302_v48 = vor.u32 %v5301_v41, %v5298_v34  ;;  %v5841_v24 = vshrl.u32 %v5704_v16, 16 }
 0x3f6   : > { %v5313_v41 = vrot.slane %v5312_v23, 4  ;;  %v5317_v42 = vrot.slane %v5315_v43, 5 }
 0x3f7   : > { %16027 = vst [vmem:[#allocation41_spill] sm:$0xff] %v13755_v5 }
 0x3f8   : > { %v4013_v32 = vpop.f32.mrf.mxu3  ;;  %v4902_v53 = vpop.f32.mrf.mxu1  ;;  %v5318_v43 = vsel %vm12503_vm12, %v5313_v41, %v5317_v42 }
 0x3f9   : > { %v13748_v62 = vadd.f32 %v4013_v32, %v13435_v13  ;;  %v4978_v52 = vadd.f32 %v4902_v53, %v4696_v37  ;;  %v5825_v13 = vsel %vm12121_vm8, %v5817_v40, %v5824_v57  ;;  %v5832_v32 = vshrl.u32 %v5703_v2, 16  ;;  %v16028_v40 = vld [vmem:[#allocation46_spill] sm:$0xff]  ;;  %v16029_v57 = vld [vmem:[#allocation43_spill] sm:$0xff] }
 0x3fa   : > { %v5579_v0 = vpop.f32.mrf.mxu2  ;;  %v13761_v10 = vpop.f32.mrf.mxu0  ;;  %v6114_v31 = vunpack.c.l.b16 %v5825_v13  ;;  %v4697_v34 = vadd.f32 %v16029_v57, %v16028_v40  ;;  %v5040_v37 = vld [vmem:[#allocation2 + $0x128] sm:$0xf]  ;;  %v5827_v13 = vshrl.u32 %v5702_v30, 16 }
 0x3fb   : > { %v13753_v35 = vadd.f32 %v5579_v0, %v13716_v6  ;;  %v6113_v6 = vunpack.c.l.b16 %v5816_v14  ;;  %v5303_v0 = vrot.slane %v5302_v48, 4  ;;  %v10980_v14 = vld [vmem:[#allocation2 + $0x80] sm:$0xff]  ;;  %v5834_v48 = vrot.slane %v5832_v32, 7 }
 0x3fc   : > { %v5320_v40 = vshrl.u32 %v5040_v37, 16  ;;  %v5323_v23 = vshll.u32 %v5040_v37, 16 }
 0x3fd   : > { %v13771_v29 = vpack.c.b16 %v6114_v31, %v6113_v6  ;;  %v10257_v6 = vrot.slane %v5827_v13, 11  ;;  %v5839_v32 = vrot.slane %v5834_v48, 4 }
 0x3fe   : > { %v5322_v37 = vrot.slane %v5320_v40, 4 }
 0x3ff   : > { %5621 = vmatmul.bf16.gmra.mxu2 %v13755_v5  ;;  %v5041_v5 = vld [vmem:[#allocation2 + $0x12c] sm:$0xf]  ;;  %16030 = vst [vmem:[#allocation46_spill] sm:$0xff] %v13771_v29 }
 0x400   : > { %v4015_v20 = vpop.f32.mrf.mxu3  ;;  %v4905_v53 = vpop.f32.mrf.mxu1  ;;  %v5329_v30 = vshll.u32 %v5041_v5, 16 }
 0x401   : > { %v13765_v44 = vadd.f32 %v4015_v20, %v13459_v28  ;;  %v4979_v46 = vadd.f32 %v4905_v53, %v4697_v34  ;;  %v5843_v28 = vrot.slane %v5841_v24, 7  ;;  %v5835_v20 = vshll.u32 %v5703_v2, 16 }
 0x402   : > { %v5582_v8 = vpop.f32.mrf.mxu2  ;;  %v13778_v57 = vpop.f32.mrf.mxu0  ;;  %v5477_v34 = vunpack.c.l.b16 %v5318_v43  ;;  %v5325_v53 = vrot.slane %v5323_v23, 5  ;;  %v5331_v42 = vrot.slane %v5329_v30, 5  ;;  %v5707_v43 = vld [vmem:[#allocation2 + $0xb4] sm:$0xf] }
 0x403   : > { %v13769_v54 = vadd.f32 %v5582_v8, %v4977_v27  ;;  %4944 = vmatmul.bf16.gmra.mxu1 %v10947_v56  ;;  %v5308_v27 = vsel %vm12503_vm12, %v5303_v0, %v5307_v25  ;;  %v5333_v8 = vshrl.u32 %v5041_v5, 16  ;;  %v5837_v31 = vor.u32 %v5835_v20, %v5834_v48  ;;  %16031 = vst [vmem:[#allocation43_spill] sm:$0xff] %v13778_v57  ;;  %v16032_v0 = vld [vmem:[#allocation49_spill] sm:$0xff] }
 0x404   : > { %v5846_v24 = vor.u32 %v5844_v63, %v5843_v28  ;;  %v5476_v16 = vunpack.c.l.b16 %v5308_v27  ;;  %v5042_v63 = vld [vmem:[#allocation2 + $0x130] sm:$0x1]  ;;  %v5326_v23 = vor.u32 %v5325_v53, %v5322_v37  ;;  %v16035_v37 = vld [vmem:[#allocation50_spill] sm:$0xff] }
 0x405   : > { %6524 = vmatmul.bf16.gmra.mxu0 %v10980_v14  ;;  %6242 = vmatmul.bf16.gmra.mxu3 %v13771_v29  ;;  %v16033_v14 = vld [vmem:[#allocation47_spill] sm:$0xff]  ;;  %v5335_v5 = vrot.slane %v5333_v8, 4  ;;  %v5838_v40 = vsel %vm12121_vm8, %v10257_v6, %v5837_v31  ;;  %v5339_v30 = vshll.u32 %v5042_v63, 16  ;;  %v4699_v53 = vadd.f32 %v16035_v37, %v13378_v11  ;;  %v11010_v11 = vld [vmem:[%s15777_s4 + $0x208] sm:$0xff] }
 0x406   : > { %v4698_v41 = vadd.f32 %v16033_v14, %v16032_v0  ;;  %v13789_v20 = vpack.c.b16 %v5477_v34, %v5476_v16  ;;  %v5706_v27 = vld [vmem:[#allocation2 + $0xb0] sm:$0xf]  ;;  %v6115_v8 = vunpack.c.l.b16 %v5838_v40  ;;  %v5705_v34 = vld [vmem:[#allocation2 + $0xac] sm:$0x8]  ;;  %v5863_v0 = vshrl.u32 %v5707_v43, 16  ;;  %7189 = vmatpush.bf16.msra.mxu1 %v11010_v11 }
 0x407   : > { %v5327_v31 = vrot.slane %v5326_v23, 4  ;;  %v5849_v29 = vshrl.u32 %v5705_v34, 16  ;;  %v5044_v23 = vld [vmem:[#allocation2 + $0x144] sm:$0xf] }
 0x408   : > { %v4018_v2 = vpop.f32.mrf.mxu3  ;;  %v4907_v48 = vpop.f32.mrf.mxu1  ;;  %16034 = vst [vmem:[#allocation49_spill] sm:$0xff] %v13789_v20 }
 0x409   : > { %v13781_v56 = vadd.f32 %v4018_v2, %v13491_v39  ;;  %v13787_v28 = vadd.f32 %v4907_v48, %v4698_v41  ;;  %v5847_v39 = vsel %vm12121_vm8, %v5839_v32, %v5846_v24  ;;  %v5336_v2 = vor.u32 %v5335_v5, %v5331_v42  ;;  %v5043_v5 = vld [vmem:[#allocation2 + $0x140] sm:$0xf] }
 0x40a   : > { %v5584_v25 = vpop.f32.mrf.mxu2  ;;  %v6116_v16 = vunpack.c.l.b16 %v5847_v39  ;;  %v5341_v41 = vrot.slane %v5339_v30, 5  ;;  %v13804_v48 = vpop.f32.mrf.mxu0  ;;  %v10948_v39 = vld [vmem:[#allocation2 + $0x128] sm:$0xff]  ;;  %v5866_v30 = vshll.u32 %v5707_v43, 16  ;;  %v5332_v34 = vsel %vm12503_vm12, %v5327_v31, %v5331_v42  ;;  %v16038_v42 = vld [vmem:[#allocation53_spill] sm:$0xff] }
 0x40b   : > { %v13785_v13 = vadd.f32 %v5584_v25, %v4978_v52  ;;  %v11026_v52 = vld [vmem:[%s15779_s6 + $0x48] sm:$0xff]  ;;  %v5854_v25 = vshrl.u32 %v5706_v27, 16  ;;  %v5337_v14 = vrot.slane %v5336_v2, 4  ;;  %16036 = vst [vmem:[#allocation47_spill] sm:$0xff] %v13804_v48  ;;  %v5857_v2 = vshll.u32 %v5706_v27, 16 }
 0x40c   : > { %7426 = vmatpush.bf16.msra.mxu2 %v11026_v52  ;;  %v13808_v57 = vpack.c.b16 %v6116_v16, %v6115_v8  ;;  %v5353_v16 = vshll.u32 %v5044_v23, 16  ;;  %v5478_v27 = vunpack.c.l.b16 %v5332_v34  ;;  %v4700_v31 = vadd.f32 %v16038_v42, %v13425_v36 }
 0x40d   : > { %v5342_v8 = vsel %vm12503_vm12, %v5337_v14, %v5341_v41 }
 0x40e   : > { %16037 = vst [vmem:[#allocation50_spill] sm:$0xff] %v13808_v57  ;;  %v5479_v43 = vunpack.c.l.b16 %v5342_v8  ;;  %v5355_v14 = vrot.slane %v5353_v16, 5 }
 0x40f   : > { %5626 = vmatmul.bf16.gmra.mxu2 %v13789_v20  ;;  %v10981_v20 = vld [vmem:[#allocation2 + $0x98] sm:$0xff] }
 0x410   : > { %v4020_v6 = vpop.f32.mrf.mxu3  ;;  %v4910_v40 = vpop.f32.mrf.mxu1 }
 0x411   : > { %v13800_v32 = vadd.f32 %v4020_v6, %v13527_v7  ;;  %v4981_v52 = vadd.f32 %v4910_v40, %v4699_v53  ;;  %v5856_v7 = vrot.slane %v5854_v25, 7  ;;  %v5865_v6 = vrot.slane %v5863_v0, 7 }
 0x412   : > { %v5587_v24 = vpop.f32.mrf.mxu2  ;;  %v5357_v25 = vshrl.u32 %v5044_v23, 16  ;;  %v10258_v0 = vrot.slane %v5849_v29, 11  ;;  %v13828_v11 = vpop.f32.mrf.mxu0 }
 0x413   : > { %v13806_v63 = vadd.f32 %v5587_v24, %v4979_v46  ;;  %4949 = vmatmul.bf16.gmra.mxu1 %v10948_v39  ;;  %v5344_v46 = vshrl.u32 %v5043_v5, 16  ;;  %v5347_v24 = vshll.u32 %v5043_v5, 16  ;;  %v5859_v37 = vor.u32 %v5857_v2, %v5856_v7 }
 0x414   : > { %v5861_v53 = vrot.slane %v5856_v7, 4  ;;  %v5868_v40 = vor.u32 %v5866_v30, %v5865_v6  ;;  %v5359_v41 = vrot.slane %v5357_v25, 4  ;;  %v5045_v7 = vld [vmem:[#allocation2 + $0x148] sm:$0x1]  ;;  %v13830_v2 = vpack.c.b16 %v5479_v43, %v5478_v27 }
 0x415   : > { %6529 = vmatmul.bf16.gmra.mxu0 %v10981_v20  ;;  %6247 = vmatmul.bf16.gmra.mxu3 %v13808_v57  ;;  %v5346_v39 = vrot.slane %v5344_v46, 4  ;;  %v5349_v5 = vrot.slane %v5347_v24, 5  ;;  %v5709_v46 = vld [vmem:[#allocation2 + $0xc8] sm:$0xf]  ;;  %v5710_v24 = vld [vmem:[#allocation2 + $0xcc] sm:$0xf] }
 0x416   : > { %16039 = vst [vmem:[#allocation53_spill] sm:$0xff] %v13830_v2  ;;  %v5869_v30 = vsel %vm12121_vm8, %v5861_v53, %v5868_v40  ;;  %v5360_v34 = vor.u32 %v5359_v41, %v5355_v14  ;;  %v5876_v27 = vshrl.u32 %v5709_v46, 16  ;;  %v5885_v43 = vshrl.u32 %v5710_v24, 16  ;;  %v5046_v41 = vld [vmem:[#allocation2 + $0x158] sm:$0xf] }
 0x417   : > { %v5350_v36 = vor.u32 %v5349_v5, %v5346_v39  ;;  %v6118_v25 = vunpack.c.l.b16 %v5869_v30  ;;  %v16041_v39 = vld [vmem:[#allocation55_spill] sm:$0xff] }
 0x418   : > { %v4023_v20 = vpop.f32.mrf.mxu3  ;;  %v4912_v29 = vpop.f32.mrf.mxu1  ;;  %v4701_v5 = vadd.f32 %v16041_v39, %v13454_v59  ;;  %v5361_v42 = vrot.slane %v5360_v34, 4  ;;  %v10982_v30 = vld [vmem:[#allocation2 + $0xb0] sm:$0xff]  ;;  %v5368_v59 = vshrl.u32 %v5046_v41, 16  ;;  %v5371_v34 = vshll.u32 %v5046_v41, 16 }
 0x419   : > { %v13819_v57 = vadd.f32 %v4023_v20, %v13576_v49  ;;  %v13826_v6 = vadd.f32 %v4912_v29, %v4700_v31  ;;  %v5860_v49 = vsel %vm12121_vm8, %v10258_v0, %v5859_v37  ;;  %v5708_v20 = vld [vmem:[#allocation2 + $0xc4] sm:$0x8]  ;;  %v5351_v37 = vrot.slane %v5350_v36, 4 }
 0x41a   : > { %v5589_v48 = vpop.f32.mrf.mxu2  ;;  %v6117_v16 = vunpack.c.l.b16 %v5860_v49  ;;  %v10949_v49 = vld [vmem:[#allocation2 + $0x140] sm:$0xff]  ;;  %v5878_v36 = vrot.slane %v5876_v27, 7  ;;  %v5370_v41 = vrot.slane %v5368_v59, 4 }
 0x41b   : > { %v13824_v23 = vadd.f32 %v5589_v48, %v13787_v28  ;;  %v5363_v28 = vshll.u32 %v5045_v7, 16  ;;  %v2454_v48 = vld [vmem:[#allocation2 + $0x190] sm:$0x1] }
 0x41c   : > { %v2455_v8 = vsel %vm12166_vm9, 0, %v2454_v48  ;;  %v5871_v48 = vshrl.u32 %v5708_v20, 16  ;;  %v13846_v22 = vpack.c.b16 %v6118_v25, %v6117_v16  ;;  %v13853_v16 = vpop.f32.mrf.mxu0 }
 0x41d   : > { %2456 = vst [vmem:[#allocation2 + $0x190] sm:$0x1] %v2455_v8  ;;  %v5365_v31 = vrot.slane %v5363_v28, 5 }
 0x41e   : > { %16042 = vst [vmem:[#allocation55_spill] sm:$0xff] %v13846_v22  ;;  %v10259_v25 = vrot.slane %v5871_v48, 11 }
 0x41f   : > { %5631 = vmatmul.bf16.gmra.mxu2 %v13830_v2  ;;  %v5047_v2 = vld [vmem:[#allocation2 + $0x15c] sm:$0xf]  ;;  %v5366_v28 = vsel %vm12503_vm12, %v5361_v42, %v5365_v31 }
 0x420   : > { %v4025_v0 = vpop.f32.mrf.mxu3  ;;  %v4915_v7 = vpop.f32.mrf.mxu1  ;;  %v5377_v20 = vshll.u32 %v5047_v2, 16 }
 0x421   : > { %v13840_v53 = vadd.f32 %v4025_v0, %v13606_v1  ;;  %v4983_v8 = vadd.f32 %v4915_v7, %v4701_v5  ;;  %v5887_v1 = vrot.slane %v5885_v43, 7  ;;  %v5879_v0 = vshll.u32 %v5709_v46, 16 }
 0x422   : > { %v5592_v40 = vpop.f32.mrf.mxu2  ;;  %v5883_v43 = vrot.slane %v5878_v36, 4  ;;  %v5481_v5 = vunpack.c.l.b16 %v5366_v28  ;;  %v5373_v7 = vrot.slane %v5371_v34, 5  ;;  %v5379_v31 = vrot.slane %v5377_v20, 5  ;;  %v5712_v34 = vld [vmem:[#allocation2 + $0xe0] sm:$0xf] }
 0x423   : > { %16040 = vst [vmem:[#allocation85_spill] sm:$0xff] %v13840_v53  ;;  %v13844_v29 = vadd.f32 %v5592_v40, %v4981_v52  ;;  %4954 = vmatmul.bf16.gmra.mxu1 %v10949_v49  ;;  %v5888_v53 = vshll.u32 %v5710_v24, 16  ;;  %v5356_v52 = vsel %vm12503_vm12, %v5351_v37, %v5355_v14  ;;  %v5381_v40 = vshrl.u32 %v5047_v2, 16  ;;  %v16044_v37 = vld [vmem:[#allocation60_spill] sm:$0xff] }
 0x424   : > { %v5881_v27 = vor.u32 %v5879_v0, %v5878_v36  ;;  %v5480_v24 = vunpack.c.l.b16 %v5356_v52  ;;  %v5048_v36 = vld [vmem:[#allocation2 + $0x160] sm:$0x1]  ;;  %v5374_v59 = vor.u32 %v5373_v7, %v5370_v41  ;;  %v5713_v52 = vld [vmem:[#allocation2 + $0xe4] sm:$0xf] }
 0x425   : > { %6534 = vmatmul.bf16.gmra.mxu0 %v10982_v30  ;;  %6252 = vmatmul.bf16.gmra.mxu3 %v13846_v22  ;;  %v5890_v39 = vor.u32 %v5888_v53, %v5887_v1  ;;  %v16045_v30 = vld [vmem:[#allocation58_spill] sm:$0xff]  ;;  %v5383_v2 = vrot.slane %v5381_v40, 4  ;;  %v5387_v20 = vshll.u32 %v5048_v36, 16  ;;  %v16049_v7 = vld [vmem:[#allocation61_spill] sm:$0xff] }
 0x426   : > { %v4702_v42 = vadd.f32 %v16045_v30, %v16044_v37  ;;  %v13865_v1 = vpack.c.b16 %v5481_v5, %v5480_v24  ;;  %v5882_v0 = vsel %vm12121_vm8, %v10259_v25, %v5881_v27  ;;  %v5711_v24 = vld [vmem:[#allocation2 + $0xdc] sm:$0x8]  ;;  %v5898_v5 = vshrl.u32 %v5712_v34, 16  ;;  %v13875_v25 = vpop.f32.mrf.mxu0 }
 0x427   : > { %v5384_v28 = vor.u32 %v5383_v2, %v5379_v31  ;;  %v6119_v40 = vunpack.c.l.b16 %v5882_v0  ;;  %16047 = vst [vmem:[#allocation58_spill] sm:$0xff] %v13875_v25  ;;  %v4703_v37 = vadd.f32 %v16049_v7, %v13522_v58  ;;  %v5049_v2 = vld [vmem:[#allocation2 + $0x170] sm:$0xf]  ;;  %v10950_v0 = vld [vmem:[#allocation2 + $0x158] sm:$0xff]  ;;  %v5050_v25 = vld [vmem:[#allocation2 + $0x174] sm:$0xf] }
 0x428   : > { %v4028_v46 = vpop.f32.mrf.mxu3  ;;  %v4917_v48 = vpop.f32.mrf.mxu1  ;;  %16046 = vst [vmem:[#allocation60_spill] sm:$0xff] %v13865_v1  ;;  %v5901_v58 = vshll.u32 %v5712_v34, 16 }
 0x429   : > { %v13856_v49 = vadd.f32 %v4028_v46, %v13626_v33  ;;  %v13863_v53 = vadd.f32 %v4917_v48, %v4702_v42  ;;  %v5891_v33 = vsel %vm12121_vm8, %v5883_v43, %v5890_v39  ;;  %v5375_v43 = vrot.slane %v5374_v59, 4 }
 0x42a   : > { %v5594_v14 = vpop.f32.mrf.mxu2  ;;  %v6120_v46 = vunpack.c.l.b16 %v5891_v33  ;;  %v5385_v30 = vrot.slane %v5384_v28, 4  ;;  %v5389_v42 = vrot.slane %v5387_v20, 5  ;;  %v10983_v33 = vld [vmem:[#allocation2 + $0xc8] sm:$0xff]  ;;  %v5910_v28 = vshll.u32 %v5713_v52, 16 }
 0x42b   : > { %16043 = vst [vmem:[#allocation86_spill] sm:$0xff] %v13856_v49  ;;  %v13861_v22 = vadd.f32 %v5594_v14, %v13826_v6  ;;  %v11025_v6 = vld [vmem:[%s15779_s6 + $0x40] sm:$0xff]  ;;  %v5907_v14 = vshrl.u32 %v5713_v52, 16  ;;  %v5395_v20 = vshll.u32 %v5049_v2, 16 }
 0x42c   : > { %7427 = vmatpush.bf16.msra.mxu2 %v11025_v6  ;;  %v13884_v59 = vpack.c.b16 %v6120_v46, %v6119_v40  ;;  %v5900_v6 = vrot.slane %v5898_v5, 7  ;;  %v5390_v40 = vsel %vm12503_vm12, %v5385_v30, %v5389_v42  ;;  %v5401_v46 = vshll.u32 %v5050_v25, 16 }
 0x42d   : > { %v5405_v5 = vshrl.u32 %v5050_v25, 16  ;;  %v5483_v52 = vunpack.c.l.b16 %v5390_v40 }
 0x42e   : > { %16050 = vst [vmem:[#allocation61_spill] sm:$0xff] %v13884_v59  ;;  %v5905_v7 = vrot.slane %v5900_v6, 4  ;;  %v5403_v30 = vrot.slane %v5401_v46, 5  ;;  %v13899_v25 = vpop.f32.mrf.mxu0 }
 0x42f   : > { %5636 = vmatmul.bf16.gmra.mxu2 %v13865_v1  ;;  %v5893_v1 = vshrl.u32 %v5711_v24, 16  ;;  %v5380_v24 = vsel %vm12503_vm12, %v5375_v43, %v5379_v31  ;;  %v16052_v31 = vld [vmem:[#allocation66_spill] sm:$0xff]  ;;  %v16053_v43 = vld [vmem:[#allocation64_spill] sm:$0xff]  ;;  %v5407_v42 = vrot.slane %v5405_v5, 4  ;;  %v5714_v5 = vld [vmem:[#allocation2 + $0xf4] sm:$0x8] }
 0x430   : > { %v4030_v27 = vpop.f32.mrf.mxu3  ;;  %v4920_v36 = vpop.f32.mrf.mxu1  ;;  %v5482_v34 = vunpack.c.l.b16 %v5380_v24  ;;  %v5716_v24 = vld [vmem:[#allocation2 + $0xfc] sm:$0xf] }
 0x431   : > { %v13878_v39 = vadd.f32 %v4030_v27, %v13643_v26  ;;  %v4985_v49 = vadd.f32 %v4920_v36, %v4703_v37  ;;  %v5909_v26 = vrot.slane %v5907_v14, 7  ;;  %v11009_v27 = vld [vmem:[%s15777_s4 + $0x200] sm:$0xff]  ;;  %v10260_v14 = vrot.slane %v5893_v1, 11 }
 0x432   : > { %v5597_v41 = vpop.f32.mrf.mxu2  ;;  %7190 = vmatpush.bf16.msra.mxu1 %v11009_v27  ;;  %v5408_v40 = vor.u32 %v5407_v42, %v5403_v30 }
 0x433   : > { %16048 = vst [vmem:[#allocation87_spill] sm:$0xff] %v13878_v39  ;;  %v13882_v48 = vadd.f32 %v5597_v41, %v4983_v8  ;;  %4959 = vmatmul.bf16.gmra.mxu1 %v10950_v0  ;;  %v5392_v8 = vshrl.u32 %v5049_v2, 16  ;;  %v5903_v41 = vor.u32 %v5901_v58, %v5900_v6  ;;  %v5912_v37 = vor.u32 %v5910_v28, %v5909_v26  ;;  %v5051_v26 = vld [vmem:[#allocation2 + $0x178] sm:$0x1] }
 0x434   : > { %v5397_v2 = vrot.slane %v5395_v20, 5  ;;  %v4704_v39 = vadd.f32 %v16053_v43, %v16052_v31  ;;  %v13906_v58 = vpack.c.b16 %v5483_v52, %v5482_v34  ;;  %v5715_v20 = vld [vmem:[#allocation2 + $0xf8] sm:$0xf]  ;;  %v5411_v46 = vshll.u32 %v5051_v26, 16  ;;  %v10984_v26 = vld [vmem:[#allocation2 + $0xe0] sm:$0xff] }
 0x435   : > { %6539 = vmatmul.bf16.gmra.mxu0 %v10983_v33  ;;  %6257 = vmatmul.bf16.gmra.mxu3 %v13884_v59  ;;  %v5394_v0 = vrot.slane %v5392_v8, 4  ;;  %v5913_v28 = vsel %vm12121_vm8, %v5905_v7, %v5912_v37  ;;  %v5409_v37 = vrot.slane %v5408_v40, 4  ;;  %v5932_v40 = vshll.u32 %v5716_v24, 16 }
 0x436   : > { %16054 = vst [vmem:[#allocation66_spill] sm:$0xff] %v13906_v58 }
 0x437   : > { %v5398_v8 = vor.u32 %v5397_v2, %v5394_v0  ;;  %v5413_v0 = vrot.slane %v5411_v46, 5  ;;  %v5052_v2 = vld [vmem:[#allocation2 + $0x188] sm:$0xf] }
 0x438   : > { %v4033_v36 = vpop.f32.mrf.mxu3  ;;  %v4922_v6 = vpop.f32.mrf.mxu1  ;;  %v5419_v46 = vshll.u32 %v5052_v2, 16 }
 0x439   : > { %v13895_v33 = vadd.f32 %v4033_v36, %v13662_v3  ;;  %v13904_v27 = vadd.f32 %v4922_v6, %v4704_v39  ;;  %v5904_v3 = vsel %vm12121_vm8, %v10260_v14, %v5903_v41  ;;  %v5920_v39 = vshrl.u32 %v5715_v20, 16  ;;  %v16056_v41 = vld [vmem:[#allocation67_spill] sm:$0xff] }
 0x43a   : > { %v5599_v59 = vpop.f32.mrf.mxu2  ;;  %v5929_v36 = vshrl.u32 %v5716_v24, 16  ;;  %v5399_v52 = vrot.slane %v5398_v8, 4  ;;  %v4705_v7 = vadd.f32 %v16056_v41, %v13601_v21  ;;  %v10951_v6 = vld [vmem:[#allocation2 + $0x170] sm:$0xff]  ;;  %v5923_v21 = vshll.u32 %v5715_v20, 16 }
 0x43b   : > { %16051 = vst [vmem:[#allocation88_spill] sm:$0xff] %v13895_v33  ;;  %v13902_v1 = vadd.f32 %v5599_v59, %v13863_v53  ;;  %v6121_v53 = vunpack.c.l.b16 %v5904_v3  ;;  %v6122_v59 = vunpack.c.l.b16 %v5913_v28  ;;  %v5915_v3 = vshrl.u32 %v5714_v5, 16  ;;  %v5053_v28 = vld [vmem:[#allocation2 + $0x18c] sm:$0xf]  ;;  %v13924_v33 = vpop.f32.mrf.mxu0 }
 0x43c   : > { %16058 = vst [vmem:[#allocation89_spill] sm:$0xff] %v13924_v33  ;;  %v5404_v5 = vsel %vm12503_vm12, %v5399_v52, %v5403_v30  ;;  %v5421_v33 = vrot.slane %v5419_v46, 5  ;;  %v4706_v52 = vadd.f32 %v13603_v51, %v13621_v19 }
 0x43d   : > { %v13922_v8 = vpack.c.b16 %v6122_v59, %v6121_v53  ;;  %v5414_v53 = vsel %vm12503_vm12, %v5409_v37, %v5413_v0  ;;  %v5425_v59 = vshll.u32 %v5053_v28, 16  ;;  %v5484_v24 = vunpack.c.l.b16 %v5404_v5 }
 0x43f   : > { %5641 = vmatmul.bf16.gmra.mxu2 %v13906_v58  ;;  %16057 = vst [vmem:[#allocation67_spill] sm:$0xff] %v13922_v8  ;;  %v13936_v37 = vrot.slane %v5425_v59, 5 }
 0x440   : > { %v4035_v34 = vpop.f32.mrf.mxu3  ;;  %v4925_v42 = vpop.f32.mrf.mxu1 }
 0x441   : > { %v13914_v31 = vadd.f32 %v4035_v34, %v13680_v55  ;;  %v13920_v58 = vadd.f32 %v4925_v42, %v4705_v7  ;;  %v5922_v55 = vrot.slane %v5920_v39, 7  ;;  %v5931_v34 = vrot.slane %v5929_v36, 7 }
 0x442   : > { %v5602_v14 = vpop.f32.mrf.mxu2  ;;  %v5429_v39 = vshrl.u32 %v5053_v28, 16 }
 0x443   : > { %16055 = vst [vmem:[#allocation64_spill] sm:$0xff] %v13914_v31  ;;  %v13918_v43 = vadd.f32 %v5602_v14, %v4985_v49  ;;  %v6622_v31 = vld [vmem:[#allocation2 + $0x38] sm:$0xf]  ;;  %4964 = vmatmul.bf16.gmra.mxu1 %v10951_v6  ;;  %v5416_v49 = vshrl.u32 %v5052_v2, 16  ;;  %v10261_v14 = vrot.slane %v5915_v3, 11  ;;  %v5925_v41 = vor.u32 %v5923_v21, %v5922_v55 }
 0x444   : > { %v6671_v36 = vshrl.u32 %v6622_v31, 16  ;;  %v5927_v7 = vrot.slane %v5922_v55, 4  ;;  %v5934_v42 = vor.u32 %v5932_v40, %v5931_v34  ;;  %v6623_v6 = vld [vmem:[#allocation2 + $0x3c] sm:$0xf]  ;;  %v5431_v0 = vrot.slane %v5429_v39, 4 }
 0x445   : > { %6544 = vmatmul.bf16.gmra.mxu0 %v10984_v26  ;;  %6262 = vmatmul.bf16.gmra.mxu3 %v13922_v8  ;;  %v5485_v26 = vunpack.c.l.b16 %v5414_v53  ;;  %v5418_v2 = vrot.slane %v5416_v49, 4  ;;  %v11024_v3 = vld [vmem:[%s15779_s6 + $0x38] sm:$0xff]  ;;  %v5054_v34 = vld [vmem:[#allocation2 + $0x190] sm:$0x1]  ;;  %v6674_v21 = vshll.u32 %v6622_v31, 16  ;;  %v6680_v40 = vshll.u32 %v6623_v6, 16  ;;  %v13953_v31 = vpop.f32.mrf.mxu0 }
 0x446   : > { %7557 = vmatpush.bf16.msrb.mxu3 %v11024_v3  ;;  %v5926_v51 = vsel %vm12121_vm8, %v10261_v14, %v5925_v41  ;;  %v5935_v19 = vsel %vm12121_vm8, %v5927_v7, %v5934_v42  ;;  %v5718_v53 = vld [vmem:[#allocation2 + $0x110] sm:$0xf]  ;;  %v5435_v59 = vshll.u32 %v5054_v34, 16  ;;  %v5719_v39 = vld [vmem:[#allocation2 + $0x114] sm:$0xf]  ;;  %v11056_v14 = vld [vmem:[%s15779_s6 + $0x138] sm:$0xff] }
 0x447   : > { %v13946_v46 = vpack.c.b16 %v5485_v26, %v5484_v24  ;;  %v5422_v5 = vor.u32 %v5421_v33, %v5418_v2  ;;  %v13956_v24 = vrot.slane %v6680_v40, 5  ;;  %v6123_v41 = vunpack.c.l.b16 %v5926_v51  ;;  %v6624_v42 = vld [vmem:[#allocation2 + $0x40] sm:$0x1]  ;;  %8083 = vmatpush.bf16.msrb.mxu2 %v11056_v14  ;;  %v11040_v40 = vld [vmem:[%s15779_s6 + $0xb8] sm:$0xff] }
 0x448   : > { %v4038_v20 = vpop.f32.mrf.mxu3  ;;  %v4927_v55 = vpop.f32.mrf.mxu1  ;;  %v6124_v33 = vunpack.c.l.b16 %v5935_v19  ;;  %v5942_v7 = vshrl.u32 %v5718_v53, 16  ;;  %v10952_v19 = vld [vmem:[#allocation2 + $0x188] sm:$0xff]  ;;  %7711 = vmatpush.bf16.msrb.mxu0 %v11040_v40 }
 0x449   : > { %v13932_v8 = vadd.f32 %v4038_v20, %v13698_v60  ;;  %v6684_v60 = vshrl.u32 %v6623_v6, 16  ;;  %v13944_v49 = vadd.f32 %v4927_v55, %v4706_v52  ;;  %16059 = vst [vmem:[#allocation90_spill] sm:$0xff] %v13946_v46  ;;  %v6673_v6 = vrot.slane %v6671_v36, 4  ;;  %v5717_v52 = vld [vmem:[#allocation2 + $0x10c] sm:$0x8] }
 0x44a   : > { %v5604_v30 = vpop.f32.mrf.mxu2  ;;  %v6676_v20 = vrot.slane %v6674_v21, 5  ;;  %v4707_v55 = vadd.f32 %v13623_v17, %v13639_v38  ;;  %v5437_v21 = vrot.slane %v5435_v59, 5  ;;  %v5937_v17 = vshrl.u32 %v5717_v52, 16 }
 0x44b   : > { %v13942_v28 = vadd.f32 %v5604_v30, %v13904_v27  ;;  %v5432_v27 = vor.u32 %v5431_v0, %v13936_v37  ;;  %v6686_v26 = vrot.slane %v6684_v60, 4  ;;  %v5423_v30 = vrot.slane %v5422_v5, 4  ;;  %v10985_v5 = vld [vmem:[#allocation2 + $0xf8] sm:$0xff] }
 0x44c   : > { %v5951_v0 = vshrl.u32 %v5719_v39, 16  ;;  %v6677_v14 = vor.u32 %v6676_v20, %v6673_v6  ;;  %v5944_v38 = vrot.slane %v5942_v7, 7  ;;  %v5945_v20 = vshll.u32 %v5718_v53, 16 }
 0x44d   : > { %v5433_v34 = vrot.slane %v5432_v27, 4  ;;  %v11048_v27 = vld [vmem:[%s15779_s6 + $0xf8] sm:$0xff]  ;;  %v5428_v59 = vsel %vm12503_vm12, %v5423_v30, %v13936_v37  ;;  %v6626_v37 = vld [vmem:[#allocation2 + $0x54] sm:$0xf] }
 0x44e   : > { %7897 = vmatpush.bf16.msrb.mxu1 %v11048_v27  ;;  %v5947_v7 = vor.u32 %v5945_v20, %v5944_v38  ;;  %v5486_v40 = vunpack.c.l.b16 %v5428_v59  ;;  %v6708_v59 = vshrl.u32 %v6626_v37, 16 }
 0x44f   : > { %5646 = vmatmul.bf16.gmra.mxu2 %v13946_v46  ;;  %v5438_v6 = vsel %vm12503_vm12, %v5433_v34, %v5437_v21  ;;  %v16063_v34 = vld [vmem:[#allocation75_spill] sm:$0xff] }
 0x450   : > { %v4040_v2 = vpop.f32.mrf.mxu3  ;;  %v4930_v51 = vpop.f32.mrf.mxu1 }
 0x451   : > { %v13962_v3 = vadd.f32 %v4040_v2, %v13712_v18  ;;  %v6687_v18 = vor.u32 %v6686_v26, %v13956_v24  ;;  %v6690_v2 = vshll.u32 %v6624_v42, 16  ;;  %v13973_v46 = vadd.f32 %v4930_v51, %v4707_v55  ;;  %v13986_v55 = vpop.f32.mrf.mxu0 }
 0x452   : > { %v5607_v36 = vpop.f32.mrf.mxu2  ;;  %v5954_v26 = vshll.u32 %v5719_v39, 16  ;;  %v5487_v51 = vunpack.c.l.b16 %v5438_v6  ;;  %v16064_v39 = vld [vmem:[#allocation73_spill] sm:$0xff] }
 0x453   : > { %16060 = vst [vmem:[#allocation91_spill] sm:$0xff] %v13962_v3  ;;  %v13970_v60 = vadd.f32 %v5607_v36, %v13920_v58  ;;  %v13975_v3 = vpack.c.b16 %v6124_v33, %v6123_v41  ;;  %4969 = vmatmul.bf16.gmra.mxu1 %v10952_v19  ;;  %v5953_v58 = vrot.slane %v5951_v0, 7  ;;  %v6678_v41 = vrot.slane %v6677_v14, 4  ;;  %v6625_v36 = vld [vmem:[#allocation2 + $0x50] sm:$0xf] }
 0x454   : > { %v10262_v33 = vrot.slane %v5937_v17, 11  ;;  %v6688_v42 = vrot.slane %v6687_v18, 4  ;;  %v6692_v52 = vrot.slane %v6690_v2, 5  ;;  %v5949_v19 = vrot.slane %v5944_v38, 4 }
 0x455   : > { %16061 = vst [vmem:[#allocation92_spill] sm:$0xff] %v13975_v3  ;;  %6549 = vmatmul.bf16.gmra.mxu0 %v10985_v5  ;;  %6267 = vmatmul.bf16.gmra.mxu3 %v13975_v3  ;;  %v5956_v5 = vor.u32 %v5954_v26, %v5953_v58  ;;  %v4708_v21 = vadd.f32 %v16064_v39, %v16063_v34  ;;  %v6695_v17 = vshrl.u32 %v6625_v36, 16  ;;  %v6698_v27 = vshll.u32 %v6625_v36, 16  ;;  %v5721_v26 = vld [vmem:[#allocation2 + $0x128] sm:$0xf] }
 0x456   : > { %v6683_v2 = vsel %vm12503_vm12, %v6678_v41, %v13956_v24  ;;  %v6693_v58 = vsel %vm12503_vm12, %v6688_v42, %v6692_v52  ;;  %v14001_v6 = vpack.c.b16 %v5487_v51, %v5486_v40  ;;  %v5948_v20 = vsel %vm12121_vm8, %v10262_v33, %v5947_v7 }
 0x457   : > { %v7071_v24 = vunpack.c.l.b16 %v6683_v2  ;;  %v7072_v41 = vunpack.c.l.b16 %v6693_v58  ;;  %v6697_v36 = vrot.slane %v6695_v17, 4  ;;  %v6125_v34 = vunpack.c.l.b16 %v5948_v20  ;;  %v10986_v58 = vld [vmem:[#allocation2 + $0x110] sm:$0xff] }
 0x458   : > { %v6228_v0 = vpop.f32.mrf.mxu3  ;;  %v4932_v18 = vpop.f32.mrf.mxu1  ;;  %16065 = vst [vmem:[#allocation75_spill] sm:$0xff] %v14001_v6  ;;  %v5964_v51 = vshrl.u32 %v5721_v26, 16 }
 0x459   : > { %v13989_v30 = vadd.f32 %v6228_v0, %v13733_v12  ;;  %v4990_v38 = vadd.f32 %v4932_v18, %v4708_v21  ;;  %v6704_v12 = vshll.u32 %v6626_v37, 16  ;;  %v5722_v0 = vld [vmem:[#allocation2 + $0x12c] sm:$0xf]  ;;  %v6710_v37 = vrot.slane %v6708_v59, 4  ;;  %v6627_v21 = vld [vmem:[#allocation2 + $0x58] sm:$0x1]  ;;  %v14013_v2 = vpop.f32.mrf.mxu0 }
 0x45a   : > { %v5609_v53 = vpop.f32.mrf.mxu2  ;;  %v5973_v39 = vshrl.u32 %v5722_v0, 16  ;;  %v5720_v18 = vld [vmem:[#allocation2 + $0x124] sm:$0x8] }
 0x45b   : > { %16062 = vst [vmem:[#allocation93_spill] sm:$0xff] %v13989_v30  ;;  %v13994_v14 = vadd.f32 %v5609_v53, %v13944_v49  ;;  %v5957_v49 = vsel %vm12121_vm8, %v5949_v19, %v5956_v5  ;;  %v6700_v53 = vrot.slane %v6698_v27, 5  ;;  %v6706_v52 = vrot.slane %v6704_v12, 5  ;;  %v16066_v19 = vld [vmem:[#allocation76_spill] sm:$0xff] }
 0x45c   : > { %v6126_v42 = vunpack.c.l.b16 %v5957_v49  ;;  %v4709_v5 = vadd.f32 %v16066_v19, %v13675_v4  ;;  %v14018_v12 = vpack.c.b16 %v7072_v41, %v7071_v24  ;;  %v5959_v4 = vshrl.u32 %v5720_v18, 16  ;;  %v6628_v41 = vld [vmem:[#allocation2 + $0x68] sm:$0xf] }
 0x45d   : > { %v6701_v59 = vor.u32 %v6700_v53, %v6697_v36  ;;  %v5966_v19 = vrot.slane %v5964_v51, 7  ;;  %v5975_v30 = vrot.slane %v5973_v39, 7  ;;  %v16069_v51 = vld [vmem:[#allocation80_spill] sm:$0xff]  ;;  %v16070_v39 = vld [vmem:[#allocation78_spill] sm:$0xff] }
 0x45e   : > { %16067 = vst [vmem:[#allocation73_spill] sm:$0xff] %v14018_v12  ;;  %v14020_v49 = vpack.c.b16 %v6126_v42, %v6125_v34  ;;  %v10263_v53 = vrot.slane %v5959_v4, 11 }
 0x45f   : > { %5651 = vmatmul.bf16.gmra.mxu2 %v14001_v6  ;;  %v6702_v6 = vrot.slane %v6701_v59, 4  ;;  %v5971_v42 = vrot.slane %v5966_v19, 4 }
 0x460   : > { %v6230_v40 = vpop.f32.mrf.mxu3  ;;  %v4935_v27 = vpop.f32.mrf.mxu1  ;;  %16068 = vst [vmem:[#allocation76_spill] sm:$0xff] %v14020_v49 }
 0x461   : > { %v14009_v33 = vadd.f32 %v6230_v40, %v13753_v35  ;;  %v4991_v20 = vadd.f32 %v4935_v27, %v4709_v5  ;;  %v6711_v35 = vor.u32 %v6710_v37, %v6706_v52  ;;  %v6714_v40 = vshll.u32 %v6627_v21, 16  ;;  %v6629_v21 = vld [vmem:[#allocation2 + $0x6c] sm:$0xf] }
 0x462   : > { %v5612_v7 = vpop.f32.mrf.mxu2  ;;  %v4710_v27 = vadd.f32 %v16070_v39, %v16069_v51  ;;  %v6707_v59 = vsel %vm12503_vm12, %v6702_v6, %v6706_v52  ;;  %v6728_v4 = vshll.u32 %v6629_v21, 16  ;;  %v5725_v6 = vld [vmem:[#allocation2 + $0x144] sm:$0xf]  ;;  %v11209_v52 = vld [vmem:[#allocation2 + $0x8] sm:$0xff] }
 0x463   : > { %v14016_v17 = vadd.f32 %v5612_v7, %v13973_v46  ;;  %7191 = vmatmul.bf16.vlgmr.msra.gmra.mxu1 %v14018_v12  ;;  %v5967_v46 = vshll.u32 %v5721_v26, 16  ;;  %v5976_v7 = vshll.u32 %v5722_v0, 16  ;;  %v6712_v3 = vrot.slane %v6711_v35, 4  ;;  %v11023_v26 = vld [vmem:[%s15779_s6 + $0x30] sm:$0xff] }
 0x464   : > { %v6716_v24 = vrot.slane %v6714_v40, 5  ;;  %v6719_v35 = vshrl.u32 %v6628_v41, 16  ;;  %7558 = vmatpush.bf16.msrb.mxu3 %v11023_v26  ;;  %v6730_v26 = vrot.slane %v6728_v4, 5 }
 0x465   : > { %6554 = vmatmul.bf16.gmra.mxu0 %v10986_v58  ;;  %6272 = vmatmul.bf16.gmra.mxu3 %v14020_v49  ;;  %v5969_v34 = vor.u32 %v5967_v46, %v5966_v19  ;;  %v5978_v37 = vor.u32 %v5976_v7, %v5975_v30  ;;  %v6722_v30 = vshll.u32 %v6628_v41, 16  ;;  %v6732_v19 = vshrl.u32 %v6629_v21, 16  ;;  %v14040_v46 = vpop.f32.mrf.mxu0 }
 0x466   : > { %16071 = vst [vmem:[#allocation80_spill] sm:$0xff] %v14040_v46  ;;  %v7073_v41 = vunpack.c.l.b16 %v6707_v59  ;;  %v6721_v51 = vrot.slane %v6719_v35, 4  ;;  %v16072_v35 = vld [vmem:[#allocation81_spill] sm:$0xff] }
 0x467   : > { %v5979_v7 = vsel %vm12121_vm8, %v5971_v42, %v5978_v37  ;;  %v6724_v39 = vrot.slane %v6722_v30, 5  ;;  %v5995_v42 = vshrl.u32 %v5725_v6, 16  ;;  %v4711_v30 = vadd.f32 %v16072_v35, %v13709_v61  ;;  %v11047_v61 = vld [vmem:[%s15779_s6 + $0xf0] sm:$0xff] }
 0x468   : > { %v6233_v36 = vpop.f32.mrf.mxu3  ;;  %v4937_v58 = vpop.f32.mrf.mxu1  ;;  %v6128_v21 = vunpack.c.l.b16 %v5979_v7  ;;  %7898 = vmatpush.bf16.msrb.mxu1 %v11047_v61 }
 0x469   : > { %v14025_v5 = vadd.f32 %v6233_v36, %v13769_v54  ;;  %v14036_v40 = vadd.f32 %v4937_v58, %v4710_v27  ;;  %v6717_v54 = vsel %vm12503_vm12, %v6712_v3, %v6716_v24  ;;  %v5724_v36 = vld [vmem:[#allocation2 + $0x140] sm:$0xf]  ;;  %v11055_v3 = vld [vmem:[%s15779_s6 + $0x130] sm:$0xff]  ;;  %v5997_v35 = vrot.slane %v5995_v42, 7 }
 0x46a   : > { %v5614_v18 = vpop.f32.mrf.mxu2  ;;  %v6630_v27 = vld [vmem:[#allocation2 + $0x70] sm:$0x1]  ;;  %v5986_v58 = vshrl.u32 %v5724_v36, 16  ;;  %8084 = vmatpush.bf16.msrb.mxu2 %v11055_v3 }
 0x46b   : > { %v14032_v0 = vadd.f32 %v5614_v18, %v4990_v38  ;;  %v5970_v38 = vsel %vm12121_vm8, %v10263_v53, %v5969_v34  ;;  %v7074_v18 = vunpack.c.l.b16 %v6717_v54  ;;  %v6734_v53 = vrot.slane %v6732_v19, 4  ;;  %v5723_v54 = vld [vmem:[#allocation2 + $0x13c] sm:$0x8]  ;;  %v10987_v19 = vld [vmem:[#allocation2 + $0x128] sm:$0xff] }
 0x46c   : > { %v6127_v24 = vunpack.c.l.b16 %v5970_v38  ;;  %v11039_v38 = vld [vmem:[%s15779_s6 + $0xb0] sm:$0xff]  ;;  %v6738_v46 = vshll.u32 %v6630_v27, 16 }
 0x46d   : > { %7712 = vmatpush.bf16.msrb.mxu0 %v11039_v38 }
 0x46e   : > { %v14061_v49 = vpack.c.b16 %v6128_v21, %v6127_v24  ;;  %v5998_v24 = vshll.u32 %v5725_v6, 16  ;;  %v6740_v27 = vrot.slane %v6738_v46, 5 }
 0x46f   : > { %7428 = vmatmul.bf16.vlgmr.msra.gmra.mxu2 %v11209_v52  ;;  %v14059_v52 = vpack.c.b16 %v7074_v18, %v7073_v41  ;;  %v14068_v41 = vpop.f32.mrf.mxu0  ;;  %v5989_v18 = vshll.u32 %v5724_v36, 16 }
 0x470   : > { %v6235_v34 = vpop.f32.mrf.mxu3  ;;  %v4940_v4 = vpop.f32.mrf.mxu1  ;;  %16074 = vst [vmem:[#allocation81_spill] sm:$0xff] %v14061_v49 }
 0x471   : > { %v14050_v37 = vadd.f32 %v6235_v34, %v13785_v13  ;;  %16073 = vst [vmem:[#allocation78_spill] sm:$0xff] %v14059_v52  ;;  %v4993_v3 = vadd.f32 %v4940_v4, %v4711_v30  ;;  %v6725_v13 = vor.u32 %v6724_v39, %v6721_v51  ;;  %v6735_v34 = vor.u32 %v6734_v53, %v6730_v26  ;;  %v6631_v51 = vld [vmem:[#allocation2 + $0x80] sm:$0xf]  ;;  %v6632_v53 = vld [vmem:[#allocation2 + $0x84] sm:$0xf] }
 0x472   : > { %v5617_v59 = vpop.f32.mrf.mxu2  ;;  %v6752_v46 = vshll.u32 %v6632_v53, 16 }
 0x473   : > { %v14057_v7 = vadd.f32 %v5617_v59, %v4991_v20  ;;  %7196 = vmatmul.bf16.gmra.mxu1 %v14059_v52  ;;  %v5981_v20 = vshrl.u32 %v5723_v54, 16  ;;  %v5988_v59 = vrot.slane %v5986_v58, 7  ;;  %v6726_v39 = vrot.slane %v6725_v13, 4 }
 0x474   : > { %v6736_v21 = vrot.slane %v6735_v34, 4  ;;  %v6000_v52 = vor.u32 %v5998_v24, %v5997_v35  ;;  %v4712_v54 = vadd.f32 %v13714_v15, %v13729_v45  ;;  %v6743_v13 = vshrl.u32 %v6631_v51, 16  ;;  %v5727_v45 = vld [vmem:[#allocation2 + $0x158] sm:$0xf] }
 0x475   : > { %6559 = vmatmul.bf16.gmra.mxu0 %v10987_v19  ;;  %6277 = vmatmul.bf16.gmra.mxu3 %v14061_v49  ;;  %v10264_v38 = vrot.slane %v5981_v20, 11  ;;  %v5991_v4 = vor.u32 %v5989_v18, %v5988_v59  ;;  %v5993_v19 = vrot.slane %v5988_v59, 4  ;;  %v6746_v34 = vshll.u32 %v6631_v51, 16  ;;  %v11210_v18 = vld [vmem:[#allocation2 + $0x20] sm:$0xff] }
 0x476   : > { %v6731_v20 = vsel %vm12503_vm12, %v6726_v39, %v6730_v26  ;;  %v6756_v59 = vshrl.u32 %v6632_v53, 16  ;;  %v14088_v39 = vrot.slane %v6752_v46, 5  ;;  %v10988_v46 = vld [vmem:[#allocation2 + $0x140] sm:$0xff] }
 0x477   : > { %v5992_v35 = vsel %vm12121_vm8, %v10264_v38, %v5991_v4  ;;  %v6001_v15 = vsel %vm12121_vm8, %v5993_v19, %v6000_v52  ;;  %v7075_v24 = vunpack.c.l.b16 %v6731_v20  ;;  %v6008_v38 = vshrl.u32 %v5727_v45, 16 }
 0x478   : > { %v6238_v30 = vpop.f32.mrf.mxu3  ;;  %v4942_v6 = vpop.f32.mrf.mxu1  ;;  %v6130_v26 = vunpack.c.l.b16 %v6001_v15  ;;  %v4713_v20 = vadd.f32 %v13740_v9, %v13748_v62 }
 0x479   : > { %v14071_v58 = vadd.f32 %v6238_v30, %v13806_v63  ;;  %v14078_v61 = vadd.f32 %v4942_v6, %v4712_v54  ;;  %v6741_v63 = vsel %vm12503_vm12, %v6736_v21, %v6740_v27  ;;  %v6745_v30 = vrot.slane %v6743_v13, 4  ;;  %v14090_v27 = vpop.f32.mrf.mxu0  ;;  %v6633_v6 = vld [vmem:[#allocation2 + $0x88] sm:$0x1]  ;;  %v5726_v13 = vld [vmem:[#allocation2 + $0x154] sm:$0x8] }
 0x47a   : > { %v5619_v42 = vpop.f32.mrf.mxu2  ;;  %v7076_v51 = vunpack.c.l.b16 %v6741_v63  ;;  %v6129_v54 = vunpack.c.l.b16 %v5992_v35  ;;  %v6758_v21 = vrot.slane %v6756_v59, 4  ;;  %v6010_v9 = vrot.slane %v6008_v38, 7 }
 0x47b   : > { %v14076_v36 = vadd.f32 %v5619_v42, %v14036_v40  ;;  %v5728_v40 = vld [vmem:[#allocation2 + $0x15c] sm:$0xf]  ;;  %v6748_v42 = vrot.slane %v6746_v34, 5 }
 0x47c   : > { %v6017_v4 = vshrl.u32 %v5728_v40, 16  ;;  %v14099_v35 = vpack.c.b16 %v7076_v51, %v7075_v24  ;;  %v6759_v49 = vor.u32 %v6758_v21, %v14088_v39  ;;  %v6020_v24 = vshll.u32 %v5728_v40, 16 }
 0x47d   : > { %16075 = vst [vmem:[#allocation94_spill] sm:$0xff] %v14076_v36  ;;  %v6749_v59 = vor.u32 %v6748_v42, %v6745_v30  ;;  %v6635_v30 = vld [vmem:[#allocation2 + $0x9c] sm:$0xf] }
 0x47e   : > { %16076 = vst [vmem:[#allocation95_spill] sm:$0xff] %v14099_v35  ;;  %v6019_v62 = vrot.slane %v6017_v4, 7  ;;  %v6760_v42 = vrot.slane %v6759_v49, 4  ;;  %v4714_v4 = vadd.f32 %v13761_v10, %v13765_v44  ;;  %v6780_v40 = vshrl.u32 %v6635_v30, 16  ;;  %v11022_v49 = vld [vmem:[%s15779_s6 + $0x28] sm:$0xff] }
 0x47f   : > { %7433 = vmatmul.bf16.gmra.mxu2 %v11210_v18  ;;  %v14103_v18 = vpack.c.b16 %v6130_v26, %v6129_v54  ;;  %v6750_v51 = vrot.slane %v6749_v59, 4  ;;  %7559 = vmatpush.bf16.msrb.mxu3 %v11022_v49 }
 0x480   : > { %v6240_v53 = vpop.f32.mrf.mxu3  ;;  %v4945_v63 = vpop.f32.mrf.mxu1  ;;  %v6022_v12 = vor.u32 %v6020_v24, %v6019_v62  ;;  %v5731_v24 = vld [vmem:[#allocation2 + $0x174] sm:$0xf] }
 0x481   : > { %v14093_v52 = vadd.f32 %v6240_v53, %v13824_v23  ;;  %v14101_v15 = vadd.f32 %v4945_v63, %v4713_v20  ;;  %16077 = vst [vmem:[#allocation96_spill] sm:$0xff] %v14103_v18  ;;  %v6762_v23 = vshll.u32 %v6633_v6, 16  ;;  %v6003_v53 = vshrl.u32 %v5726_v13, 16  ;;  %v14116_v59 = vpop.f32.mrf.mxu0 }
 0x482   : > { %v5622_v19 = vpop.f32.mrf.mxu2 }
 0x483   : > { %v14097_v34 = vadd.f32 %v5622_v19, %v4993_v3  ;;  %7201 = vmatmul.bf16.gmra.mxu1 %v14099_v35  ;;  %v6634_v3 = vld [vmem:[#allocation2 + $0x98] sm:$0xf]  ;;  %v6011_v19 = vshll.u32 %v5727_v45, 16  ;;  %v6764_v20 = vrot.slane %v6762_v23, 5  ;;  %v10265_v21 = vrot.slane %v6003_v53, 11 }
 0x484   : > { %v6767_v54 = vshrl.u32 %v6634_v3, 16  ;;  %v6770_v26 = vshll.u32 %v6634_v3, 16  ;;  %v6776_v45 = vshll.u32 %v6635_v30, 16 }
 0x485   : > { %6564 = vmatmul.bf16.gmra.mxu0 %v10988_v46  ;;  %6282 = vmatmul.bf16.gmra.mxu3 %v14103_v18  ;;  %v6013_v6 = vor.u32 %v6011_v19, %v6010_v9  ;;  %v6015_v46 = vrot.slane %v6010_v9, 4  ;;  %v6765_v10 = vsel %vm12503_vm12, %v6760_v42, %v6764_v20  ;;  %v5730_v19 = vld [vmem:[#allocation2 + $0x170] sm:$0xf]  ;;  %v11054_v42 = vld [vmem:[%s15779_s6 + $0x128] sm:$0xff] }
 0x486   : > { %v6769_v44 = vrot.slane %v6767_v54, 4  ;;  %v6772_v62 = vrot.slane %v6770_v26, 5  ;;  %v14132_v30 = vrot.slane %v6776_v45, 5  ;;  %8085 = vmatpush.bf16.msrb.mxu2 %v11054_v42 }
 0x487   : > { %v6014_v3 = vsel %vm12121_vm8, %v10265_v21, %v6013_v6  ;;  %v6030_v6 = vshrl.u32 %v5730_v19, 16 }
 0x488   : > { %v6243_v63 = vpop.f32.mrf.mxu3  ;;  %v4947_v53 = vpop.f32.mrf.mxu1  ;;  %v6131_v20 = vunpack.c.l.b16 %v6014_v3  ;;  %v6773_v26 = vor.u32 %v6772_v62, %v6769_v44  ;;  %v11038_v3 = vld [vmem:[%s15779_s6 + $0xa8] sm:$0xff] }
 0x489   : > { %v14109_v13 = vadd.f32 %v6243_v63, %v13844_v29  ;;  %v6755_v29 = vsel %vm12503_vm12, %v6750_v51, %v14088_v39  ;;  %v14124_v9 = vadd.f32 %v4947_v53, %v4714_v4  ;;  %v6782_v63 = vrot.slane %v6780_v40, 4  ;;  %v11211_v39 = vld [vmem:[#allocation2 + $0x38] sm:$0xff]  ;;  %v6636_v4 = vld [vmem:[#allocation2 + $0xa0] sm:$0x1]  ;;  %v16079_v40 = vld [vmem:[#allocation43_spill] sm:$0xff]  ;;  %7713 = vmatpush.bf16.msrb.mxu0 %v11038_v3 }
 0x48a   : > { %v5624_v38 = vpop.f32.mrf.mxu2  ;;  %v7077_v51 = vunpack.c.l.b16 %v6755_v29  ;;  %v4715_v49 = vadd.f32 %v16079_v40, %v13781_v56  ;;  %v5729_v53 = vld [vmem:[#allocation2 + $0x16c] sm:$0x8]  ;;  %v6774_v56 = vrot.slane %v6773_v26, 4  ;;  %v14156_v40 = vpop.f32.mrf.mxu0  ;;  %v6042_v3 = vshll.u32 %v5731_v24, 16 }
 0x48b   : > { %v14119_v23 = vadd.f32 %v5624_v38, %v14078_v61  ;;  %v6023_v61 = vsel %vm12121_vm8, %v6015_v46, %v6022_v12  ;;  %v7078_v38 = vunpack.c.l.b16 %v6765_v10  ;;  %v6039_v12 = vshrl.u32 %v5731_v24, 16 }
 0x48c   : > { %v6132_v54 = vunpack.c.l.b16 %v6023_v61  ;;  %v6783_v29 = vor.u32 %v6782_v63, %v14132_v30  ;;  %v6786_v10 = vshll.u32 %v6636_v4, 16  ;;  %v10989_v61 = vld [vmem:[#allocation2 + $0x158] sm:$0xff]  ;;  %v11046_v63 = vld [vmem:[%s15779_s6 + $0xe8] sm:$0xff]  ;;  %v6638_v4 = vld [vmem:[#allocation2 + $0xb4] sm:$0xf] }
 0x48d   : > { %7899 = vmatpush.bf16.msrb.mxu1 %v11046_v63  ;;  %v6804_v18 = vshrl.u32 %v6638_v4, 16 }
 0x48f   : > { %7438 = vmatmul.bf16.gmra.mxu2 %v11211_v39  ;;  %v14149_v39 = vpack.c.b16 %v7078_v38, %v7077_v51  ;;  %v6041_v51 = vrot.slane %v6039_v12, 7  ;;  %v6784_v38 = vrot.slane %v6783_v29, 4 }
 0x490   : > { %v6245_v21 = vpop.f32.mrf.mxu3  ;;  %v4950_v62 = vpop.f32.mrf.mxu1 }
 0x491   : > { %v14138_v46 = vadd.f32 %v6245_v21, %v13861_v22  ;;  %16080 = vst [vmem:[#allocation43_spill] sm:$0xff] %v14149_v39  ;;  %v6637_v22 = vld [vmem:[#allocation2 + $0xb0] sm:$0xf]  ;;  %v4997_v42 = vadd.f32 %v4950_v62, %v4715_v49  ;;  %v14151_v21 = vpack.c.b16 %v6132_v54, %v6131_v20  ;;  %v6788_v20 = vrot.slane %v6786_v10, 5 }
 0x492   : > { %v5627_v45 = vpop.f32.mrf.mxu2  ;;  %v6791_v54 = vshrl.u32 %v6637_v22, 16  ;;  %v6794_v26 = vshll.u32 %v6637_v22, 16  ;;  %v6033_v49 = vshll.u32 %v5730_v19, 16  ;;  %v6800_v62 = vshll.u32 %v6638_v4, 16  ;;  %v16083_v10 = vld [vmem:[#allocation47_spill] sm:$0xff] }
 0x493   : > { %16078 = vst [vmem:[#allocation97_spill] sm:$0xff] %v14138_v46  ;;  %v14147_v44 = vadd.f32 %v5627_v45, %v14101_v15  ;;  %7206 = vmatmul.bf16.gmra.mxu1 %v14149_v39  ;;  %v6025_v15 = vshrl.u32 %v5729_v53, 16  ;;  %v6032_v45 = vrot.slane %v6030_v6, 7  ;;  %v6044_v12 = vor.u32 %v6042_v3, %v6041_v51 }
 0x494   : > { %16081 = vst [vmem:[#allocation98_spill] sm:$0xff] %v14151_v21  ;;  %v4716_v22 = vadd.f32 %v16083_v10, %v13800_v32  ;;  %v6789_v19 = vsel %vm12503_vm12, %v6784_v38, %v6788_v20  ;;  %v6793_v24 = vrot.slane %v6791_v54, 4  ;;  %v14173_v4 = vrot.slane %v6800_v62, 5  ;;  %v5733_v20 = vld [vmem:[#allocation2 + $0x188] sm:$0xf] }
 0x495   : > { %6569 = vmatmul.bf16.gmra.mxu0 %v10989_v61  ;;  %6287 = vmatmul.bf16.gmra.mxu3 %v14151_v21  ;;  %v6779_v61 = vsel %vm12503_vm12, %v6774_v56, %v14132_v30  ;;  %v10266_v39 = vrot.slane %v6025_v15, 11  ;;  %v6035_v53 = vor.u32 %v6033_v49, %v6032_v45  ;;  %v6037_v6 = vrot.slane %v6032_v45, 4  ;;  %v5734_v54 = vld [vmem:[#allocation2 + $0x18c] sm:$0xf]  ;;  %v11212_v49 = vld [vmem:[#allocation2 + $0x50] sm:$0xff] }
 0x496   : > { %v6796_v56 = vrot.slane %v6794_v26, 5  ;;  %v6806_v15 = vrot.slane %v6804_v18, 4  ;;  %v7079_v51 = vunpack.c.l.b16 %v6779_v61  ;;  %v7080_v38 = vunpack.c.l.b16 %v6789_v19  ;;  %v5732_v19 = vld [vmem:[#allocation2 + $0x184] sm:$0x8] }
 0x497   : > { %v6045_v32 = vsel %vm12121_vm8, %v6037_v6, %v6044_v12  ;;  %v4717_v6 = vadd.f32 %v13828_v11, %v13819_v57  ;;  %v11037_v57 = vld [vmem:[%s15779_s6 + $0xa0] sm:$0xff]  ;;  %v2352_v11 = vld [vmem:[#allocation2 + $0x19c] sm:$0x8] }
 0x498   : > { %v6248_v35 = vpop.f32.mrf.mxu3  ;;  %v4952_v30 = vpop.f32.mrf.mxu1  ;;  %v6797_v26 = vor.u32 %v6796_v56, %v6793_v24  ;;  %v6807_v18 = vor.u32 %v6806_v15, %v14173_v4  ;;  %v14189_v12 = vpack.c.b16 %v7080_v38, %v7079_v51  ;;  %v10990_v56 = vld [vmem:[#allocation2 + $0x170] sm:$0xff]  ;;  %7714 = vmatpush.bf16.msrb.mxu0 %v11037_v57 }
 0x499   : > { %v14164_v21 = vadd.f32 %v6248_v35, %v13882_v48  ;;  %v14175_v45 = vadd.f32 %v4952_v30, %v4716_v22  ;;  %v6639_v48 = vld [vmem:[#allocation2 + $0xb8] sm:$0x1]  ;;  %v6036_v35 = vsel %vm12121_vm8, %v10266_v39, %v6035_v53  ;;  %v6052_v22 = vshrl.u32 %v5733_v20, 16 }
 0x49a   : > { %v5629_v29 = vpop.f32.mrf.mxu2  ;;  %v6810_v3 = vshll.u32 %v6639_v48, 16  ;;  %v6133_v62 = vunpack.c.l.b16 %v6036_v35  ;;  %v6061_v39 = vshrl.u32 %v5734_v54, 16  ;;  %16085 = vst [vmem:[#allocation100_spill] sm:$0xff] %v14189_v12  ;;  %v6798_v15 = vrot.slane %v6797_v26, 4 }
 0x49b   : > { %16082 = vst [vmem:[#allocation99_spill] sm:$0xff] %v14164_v21  ;;  %v14171_v63 = vadd.f32 %v5629_v29, %v14124_v9  ;;  %v14181_v9 = vpop.f32.mrf.mxu0  ;;  %v6134_v29 = vunpack.c.l.b16 %v6045_v32  ;;  %v6808_v48 = vrot.slane %v6807_v18, 4  ;;  %v6640_v32 = vld [vmem:[#allocation2 + $0xc8] sm:$0xf]  ;;  %v6054_v51 = vrot.slane %v6052_v22, 7  ;;  %v11020_v22 = vld [vmem:[%s15779_s6 + $0x18] sm:$0xff] }
 0x49c   : > { %v6812_v35 = vrot.slane %v6810_v3, 5  ;;  %v6063_v38 = vrot.slane %v6061_v39, 7  ;;  %v2353_v18 = vsel %vm12107_vm5, 0, %v2352_v11  ;;  %v6641_v3 = vld [vmem:[#allocation2 + $0xcc] sm:$0xf]  ;;  %v11036_v39 = vld [vmem:[%s15779_s6 + $0x98] sm:$0xff] }
 0x49d   : > { %v14195_v36 = vpack.c.b16 %v6134_v29, %v6133_v62  ;;  %2354 = vst [vmem:[#allocation2 + $0x19c] sm:$0x8] %v2353_v18  ;;  %v6055_v62 = vshll.u32 %v5733_v20, 16  ;;  %v6064_v29 = vshll.u32 %v5734_v54, 16  ;;  %v6824_v20 = vshll.u32 %v6641_v3, 16  ;;  %v16089_v11 = vld [vmem:[#allocation85_spill] sm:$0xff]  ;;  %7715 = vmatpush.bf16.msrb.mxu0 %v11036_v39 }
 0x49e   : > { %v6828_v54 = vshrl.u32 %v6641_v3, 16  ;;  %v6059_v57 = vrot.slane %v6054_v51, 4  ;;  %v4718_v26 = vadd.f32 %v13853_v16, %v16089_v11  ;;  %v11035_v16 = vld [vmem:[%s15779_s6 + $0x90] sm:$0xff]  ;;  %v11213_v39 = vld [vmem:[#allocation2 + $0x68] sm:$0xff] }
 0x49f   : > { %7443 = vmatmul.bf16.gmra.mxu2 %v11212_v49  ;;  %16086 = vst [vmem:[#allocation101_spill] sm:$0xff] %v14195_v36 }
 0x4a0   : > { %v6250_v10 = vpop.f32.mrf.mxu3  ;;  %v4955_v24 = vpop.f32.mrf.mxu1 }
 0x4a1   : > { %v14185_v53 = vadd.f32 %v6250_v10, %v13902_v1  ;;  %v14193_v49 = vadd.f32 %v4955_v24, %v4717_v6  ;;  %v11021_v1 = vld [vmem:[%s15779_s6 + $0x20] sm:$0xff]  ;;  %v6803_v10 = vsel %vm12503_vm12, %v6798_v15, %v14173_v4  ;;  %v6815_v6 = vshrl.u32 %v6640_v32, 16  ;;  %7716 = vmatpush.bf16.msrb.mxu0 %v11035_v16 }
 0x4a2   : > { %v5632_v61 = vpop.f32.mrf.mxu2  ;;  %7560 = vmatpush.bf16.msrb.mxu3 %v11021_v1  ;;  %v6057_v15 = vor.u32 %v6055_v62, %v6054_v51  ;;  %v7081_v3 = vunpack.c.l.b16 %v6803_v10  ;;  %v5737_v51 = vld [vmem:[#allocation2 + $0x1a4] sm:$0xf]  ;;  %v14240_v10 = vrot.slane %v6824_v20, 5 }
 0x4a3   : > { %16084 = vst [vmem:[#allocation47_spill] sm:$0xff] %v14185_v53  ;;  %v14191_v30 = vadd.f32 %v5632_v61, %v4997_v42  ;;  %7211 = vmatmul.bf16.gmra.mxu1 %v14189_v12  ;;  %v6047_v42 = vshrl.u32 %v5732_v19, 16  ;;  %v6813_v61 = vsel %vm12503_vm12, %v6808_v48, %v6812_v35  ;;  %v6818_v19 = vshll.u32 %v6640_v32, 16  ;;  %v14218_v24 = vpop.f32.mrf.mxu0  ;;  %v11053_v20 = vld [vmem:[%s15779_s6 + $0x120] sm:$0xff] }
 0x4a4   : > { %v6066_v48 = vor.u32 %v6064_v29, %v6063_v38  ;;  %v6817_v38 = vrot.slane %v6815_v6, 4  ;;  %8086 = vmatpush.bf16.msrb.mxu2 %v11053_v20  ;;  %v6086_v46 = vshll.u32 %v5737_v51, 16 }
 0x4a5   : > { %6574 = vmatmul.bf16.gmra.mxu0 %v10990_v56  ;;  %6292 = vmatmul.bf16.gmra.mxu3 %v14195_v36  ;;  %v10267_v4 = vrot.slane %v6047_v42, 11  ;;  %v5736_v36 = vld [vmem:[#allocation2 + $0x1a0] sm:$0xf]  ;;  %v7082_v42 = vunpack.c.l.b16 %v6813_v61  ;;  %v6820_v62 = vrot.slane %v6818_v19, 5  ;;  %v6830_v61 = vrot.slane %v6828_v54, 4 }
 0x4a6   : > { %7561 = vmatpush.bf16.msrb.mxu3 %v11020_v22  ;;  %v6067_v29 = vsel %vm12121_vm8, %v6059_v57, %v6066_v48  ;;  %v6642_v22 = vld [vmem:[#allocation2 + $0xd0] sm:$0x1]  ;;  %v6074_v6 = vshrl.u32 %v5736_v36, 16  ;;  %v6083_v19 = vshrl.u32 %v5737_v51, 16  ;;  %v5735_v57 = vld [vmem:[#allocation2 + $0x19c] sm:$0x8] }
 0x4a7   : > { %v6821_v11 = vor.u32 %v6820_v62, %v6817_v38  ;;  %v6077_v21 = vshll.u32 %v5736_v36, 16  ;;  %v10991_v38 = vld [vmem:[#allocation2 + $0x188] sm:$0xff]  ;;  %v6069_v62 = vshrl.u32 %v5735_v57, 16  ;;  %v11017_v36 = vld [vmem:[%s15779_s6] sm:$0xff] }
 0x4a8   : > { %v6253_v56 = vpop.f32.mrf.mxu3  ;;  %v4957_v32 = vpop.f32.mrf.mxu1 }
 0x4a9   : > { %v14221_v35 = vadd.f32 %v6253_v56, %v13918_v43  ;;  %v14228_v12 = vadd.f32 %v4957_v32, %v4718_v26  ;;  %v11019_v43 = vld [vmem:[%s15779_s6 + $0x10] sm:$0xff]  ;;  %v11018_v56 = vld [vmem:[%s15779_s6 + $0x8] sm:$0xff]  ;;  %v6831_v26 = vor.u32 %v6830_v61, %v14240_v10  ;;  %v6834_v32 = vshll.u32 %v6642_v22, 16 }
 0x4aa   : > { %v5634_v1 = vpop.f32.mrf.mxu2  ;;  %7562 = vmatpush.bf16.msrb.mxu3 %v11019_v43  ;;  %v6085_v61 = vrot.slane %v6083_v19, 7  ;;  %v6822_v51 = vrot.slane %v6821_v11, 4  ;;  %v6643_v19 = vld [vmem:[#allocation2 + $0xe0] sm:$0xf] }
 0x4ab   : > { %16088 = vst [vmem:[#allocation15_spill] sm:$0xff] %v14221_v35  ;;  %v14226_v18 = vadd.f32 %v5634_v1, %v14175_v45  ;;  %v6058_v45 = vsel %vm12121_vm8, %v10267_v4, %v6057_v15  ;;  %v11034_v4 = vld [vmem:[%s15779_s6 + $0x88] sm:$0xff]  ;;  %v6136_v15 = vunpack.c.l.b16 %v6067_v29  ;;  %v14251_v1 = vpack.c.b16 %v7082_v42, %v7081_v3 }
 0x4ac   : > { %v6135_v54 = vunpack.c.l.b16 %v6058_v45  ;;  %v16092_v35 = vld [vmem:[#allocation58_spill] sm:$0xff]  ;;  %7717 = vmatpush.bf16.msrb.mxu0 %v11034_v4  ;;  %v14259_v45 = vpop.f32.mrf.mxu0  ;;  %v6076_v29 = vrot.slane %v6074_v6, 7  ;;  %v6832_v6 = vrot.slane %v6831_v26, 4  ;;  %v6839_v26 = vshrl.u32 %v6643_v19, 16 }
 0x4ad   : > { %16090 = vst [vmem:[#allocation85_spill] sm:$0xff] %v14251_v1 }
 0x4ae   : > { %7563 = vmatpush.bf16.msrb.mxu3 %v11018_v56  ;;  %v14264_v22 = vpack.c.b16 %v6136_v15, %v6135_v54  ;;  %v10268_v56 = vrot.slane %v6069_v62, 11  ;;  %v6079_v4 = vor.u32 %v6077_v21, %v6076_v29  ;;  %v6081_v20 = vrot.slane %v6076_v29, 4  ;;  %v6644_v15 = vld [vmem:[#allocation2 + $0xe4] sm:$0xf] }
 0x4af   : > { %7448 = vmatmul.bf16.gmra.mxu2 %v11213_v39  ;;  %v16091_v39 = vld [vmem:[#allocation86_spill] sm:$0xff]  ;;  %v6088_v54 = vor.u32 %v6086_v46, %v6085_v61  ;;  %v6842_v46 = vshll.u32 %v6643_v19, 16  ;;  %v6852_v61 = vshrl.u32 %v6644_v15, 16 }
 0x4b0   : > { %v6255_v48 = vpop.f32.mrf.mxu3  ;;  %v4719_v53 = vadd.f32 %v16092_v35, %v16091_v39  ;;  %v4960_v42 = vpop.f32.mrf.mxu1  ;;  %16093 = vst [vmem:[#allocation86_spill] sm:$0xff] %v14264_v22  ;;  %v11033_v35 = vld [vmem:[%s15779_s6 + $0x80] sm:$0xff]  ;;  %v16094_v39 = vld [vmem:[#allocation87_spill] sm:$0xff] }
 0x4b1   : > { %v14255_v43 = vadd.f32 %v6255_v48, %v13942_v28  ;;  %7718 = vmatpush.bf16.msrb.mxu0 %v11033_v35  ;;  %v6827_v48 = vsel %vm12503_vm12, %v6822_v51, %v14240_v10  ;;  %v4720_v21 = vadd.f32 %v13899_v25, %v16094_v39  ;;  %v6080_v10 = vsel %vm12121_vm8, %v10268_v56, %v6079_v4  ;;  %v10992_v56 = vld [vmem:[#allocation2 + $0x1a0] sm:$0xff] }
 0x4b2   : > { %v5637_v16 = vpop.f32.mrf.mxu2  ;;  %v5001_v28 = vadd.f32 %v4960_v42, %v4719_v53  ;;  %v6836_v53 = vrot.slane %v6834_v32, 5  ;;  %7564 = vmatpush.bf16.msrb.mxu3 %v11017_v36  ;;  %v6848_v42 = vshll.u32 %v6644_v15, 16  ;;  %v6089_v29 = vsel %vm12121_vm8, %v6081_v20, %v6088_v54  ;;  %v16095_v20 = vld [vmem:[#allocation88_spill] sm:$0xff]  ;;  %v16096_v54 = vld [vmem:[#allocation89_spill] sm:$0xff] }
 0x4b3   : > { %v14262_v3 = vadd.f32 %v5637_v16, %v14193_v49  ;;  %v11045_v49 = vld [vmem:[%s15779_s6 + $0xe0] sm:$0xff]  ;;  %7216 = vmatmul.bf16.gmra.mxu1 %v14251_v1  ;;  %v6137_v35 = vunpack.c.l.b16 %v6080_v10  ;;  %v7083_v51 = vunpack.c.l.b16 %v6827_v48  ;;  %v4721_v15 = vadd.f32 %v16096_v54, %v16095_v20  ;;  %v6661_v1 = vld [vmem:[#allocation2 + $0x170] sm:$0xf] }
 0x4b4   : > { %7900 = vmatpush.bf16.msrb.mxu1 %v11045_v49  ;;  %v6837_v11 = vsel %vm12503_vm12, %v6832_v6, %v6836_v53  ;;  %v6138_v49 = vunpack.c.l.b16 %v6089_v29  ;;  %v11214_v6 = vld [vmem:[#allocation2 + $0x80] sm:$0xff]  ;;  %v6841_v53 = vrot.slane %v6839_v26, 4  ;;  %v6850_v19 = vrot.slane %v6848_v42, 5 }
 0x4b5   : > { %6579 = vmatmul.bf16.gmra.mxu0 %v10991_v38  ;;  %6297 = vmatmul.bf16.gmra.mxu3 %v14264_v22  ;;  %v7084_v25 = vunpack.c.l.b16 %v6837_v11 }
 0x4b6   : > { %8269 = vmatpush.bf16.msra.mxu3 %v11064_v47 }
 0x4b7   : > { %v14303_v48 = vpack.c.b16 %v7084_v25, %v7083_v51  ;;  %v6647_v25 = vld [vmem:[#allocation2 + $0xfc] sm:$0xf] }
 0x4b8   : > { %v6258_v57 = vpop.f32.mrf.mxu3  ;;  %v4962_v62 = vpop.f32.mrf.mxu1 }
 0x4b9   : > { %v14283_v32 = vadd.f32 %v6258_v57, %v13970_v60  ;;  %v5002_v36 = vadd.f32 %v4962_v62, %v4720_v21  ;;  %v14294_v60 = vpop.f32.mrf.mxu0  ;;  %v6854_v57 = vrot.slane %v6852_v61, 4  ;;  %v14301_v21 = vpack.c.b16 %v6138_v49, %v6137_v35  ;;  %16098 = vst [vmem:[#allocation87_spill] sm:$0xff] %v14303_v48  ;;  %v6646_v49 = vld [vmem:[#allocation2 + $0xf8] sm:$0xf] }
 0x4ba   : > { %v5639_v16 = vpop.f32.mrf.mxu2  ;;  %v6866_v54 = vshll.u32 %v6646_v49, 16 }
 0x4bb   : > { %v14288_v38 = vadd.f32 %v5639_v16, %v14228_v12  ;;  %v6844_v12 = vrot.slane %v6842_v46, 5  ;;  %v6645_v16 = vld [vmem:[#allocation2 + $0xe8] sm:$0x1]  ;;  %16097 = vst [vmem:[#allocation58_spill] sm:$0xff] %v14301_v21  ;;  %v6855_v42 = vor.u32 %v6854_v57, %v6850_v19 }
 0x4bc   : > { %v6858_v62 = vshll.u32 %v6645_v16, 16 }
 0x4bd   : > { %v6845_v46 = vor.u32 %v6844_v12, %v6841_v53  ;;  %v6856_v61 = vrot.slane %v6855_v42, 4  ;;  %v16099_v53 = vld [vmem:[#allocation64_spill] sm:$0xff] }
 0x4be   : > { %v6860_v35 = vrot.slane %v6858_v62, 5  ;;  %v4722_v12 = vadd.f32 %v13953_v31, %v16099_v53  ;;  %v6868_v31 = vrot.slane %v6866_v54, 5  ;;  %v16101_v54 = vld [vmem:[#allocation5_spill] sm:$0xff] }
 0x4bf   : > { %7453 = vmatmul.bf16.gmra.mxu2 %v11214_v6  ;;  %v6846_v29 = vrot.slane %v6845_v46, 4 }
 0x4c0   : > { %v6260_v39 = vpop.f32.mrf.mxu3  ;;  %v4965_v26 = vpop.f32.mrf.mxu1 }
 0x4c1   : > { %v14297_v50 = vadd.f32 %v6260_v39, %v13994_v14  ;;  %v5003_v10 = vadd.f32 %v4965_v26, %v4721_v15  ;;  %v14309_v14 = vpop.f32.mrf.mxu0  ;;  %v6851_v39 = vsel %vm12503_vm12, %v6846_v29, %v6850_v19  ;;  %v6872_v15 = vshll.u32 %v6647_v25, 16  ;;  %v6648_v19 = vld [vmem:[#allocation2 + $0x100] sm:$0x1] }
 0x4c2   : > { %v5642_v4 = vpop.f32.mrf.mxu2  ;;  %v6876_v26 = vshrl.u32 %v6647_v25, 16  ;;  %v7085_v46 = vunpack.c.l.b16 %v6851_v39 }
 0x4c3   : > { %v14305_v11 = vadd.f32 %v5642_v4, %v5001_v28  ;;  %7221 = vmatmul.bf16.gmra.mxu1 %v14303_v48  ;;  %v6863_v4 = vshrl.u32 %v6646_v49, 16 }
 0x4c5   : > { %6584 = vmatmul.bf16.gmra.mxu0 %v10992_v56  ;;  %6302 = vmatmul.bf16.gmra.mxu3 %v14301_v21  ;;  %v6861_v56 = vsel %vm12503_vm12, %v6856_v61, %v6860_v35  ;;  %v6865_v62 = vrot.slane %v6863_v4, 4  ;;  %v4723_v35 = vadd.f32 %v13986_v55, %v13932_v8  ;;  %v6882_v4 = vshll.u32 %v6648_v19, 16  ;;  %v6651_v21 = vld [vmem:[#allocation2 + $0x118] sm:$0x1] }
 0x4c6   : > { %v7086_v42 = vunpack.c.l.b16 %v6861_v56 }
 0x4c7   : > { %v6869_v39 = vor.u32 %v6868_v31, %v6865_v62  ;;  %v6884_v55 = vrot.slane %v6882_v4, 5  ;;  %v16104_v31 = vld [vmem:[#allocation91_spill] sm:$0xff] }
 0x4c8   : > { %v6263_v51 = vpop.f32.mrf.mxu3  ;;  %v4967_v16 = vpop.f32.mrf.mxu1 }
 0x4c9   : > { %v14312_v28 = vadd.f32 %v6263_v51, %v14016_v17  ;;  %v5004_v20 = vadd.f32 %v4967_v16, %v4722_v12  ;;  %v11215_v17 = vld [vmem:[#allocation2 + $0x98] sm:$0xff]  ;;  %v6878_v51 = vrot.slane %v6876_v26, 4  ;;  %v14331_v12 = vpack.c.b16 %v7086_v42, %v7085_v46  ;;  %v6650_v26 = vld [vmem:[#allocation2 + $0x114] sm:$0xf] }
 0x4ca   : > { %v5644_v6 = vpop.f32.mrf.mxu2  ;;  %v6896_v19 = vshll.u32 %v6650_v26, 16 }
 0x4cb   : > { %v14316_v57 = vadd.f32 %v5644_v6, %v5002_v36  ;;  %v6874_v36 = vrot.slane %v6872_v15, 5  ;;  %v14322_v6 = vpop.f32.mrf.mxu0  ;;  %16100 = vst [vmem:[#allocation88_spill] sm:$0xff] %v14331_v12  ;;  %v6649_v15 = vld [vmem:[#allocation2 + $0x110] sm:$0xf] }
 0x4cc   : > { %v6890_v46 = vshll.u32 %v6649_v15, 16 }
 0x4cd   : > { %v6879_v56 = vor.u32 %v6878_v51, %v6874_v36  ;;  %v4724_v51 = vadd.f32 %v14013_v2, %v16104_v31  ;;  %v11216_v2 = vld [vmem:[#allocation2 + $0xb0] sm:$0xff] }
 0x4cf   : > { %7458 = vmatmul.bf16.gmra.mxu2 %v11215_v17  ;;  %v6870_v17 = vrot.slane %v6869_v39, 4  ;;  %v6880_v8 = vrot.slane %v6879_v56, 4 }
 0x4d0   : > { %v6265_v53 = vpop.f32.mrf.mxu3  ;;  %v4970_v25 = vpop.f32.mrf.mxu1 }
 0x4d1   : > { %v14325_v29 = vadd.f32 %v6265_v53, %v14032_v0  ;;  %v14333_v16 = vadd.f32 %v4970_v25, %v4723_v35  ;;  %v16102_v0 = vld [vmem:[#allocation20_spill] sm:$0xff]  ;;  %v6887_v53 = vshrl.u32 %v6649_v15, 16  ;;  %v6875_v56 = vsel %vm12503_vm12, %v6870_v17, %v6874_v36  ;;  %v16106_v36 = vld [vmem:[#allocation9_spill] sm:$0xff] }
 0x4d2   : > { %v5647_v61 = vpop.f32.mrf.mxu2  ;;  %v6898_v15 = vrot.slane %v6896_v19, 5  ;;  %v16107_v17 = vld [vmem:[#allocation24_spill] sm:$0xff]  ;;  %v6653_v19 = vld [vmem:[#allocation2 + $0x12c] sm:$0xf] }
 0x4d3   : > { %v14329_v49 = vadd.f32 %v5647_v61, %v5003_v10  ;;  %7226 = vmatmul.bf16.gmra.mxu1 %v14331_v12  ;;  %v6900_v61 = vshrl.u32 %v6650_v26, 16  ;;  %v14343_v35 = vpop.f32.mrf.mxu0  ;;  %v6889_v4 = vrot.slane %v6887_v53, 4  ;;  %v7087_v26 = vunpack.c.l.b16 %v6875_v56 }
 0x4d4   : > { %v6906_v12 = vshll.u32 %v6651_v21, 16 }
 0x4d5   : > { %7719 = vmatmul.bf16.vlgmr.msrb.gmra.mxu0 %v16101_v54  ;;  %7565 = vmatmul.bf16.vlgmr.msrb.gmra.mxu3 %v16102_v0  ;;  %v6892_v0 = vrot.slane %v6890_v46, 5  ;;  %v6652_v46 = vld [vmem:[#allocation2 + $0x128] sm:$0xf] }
 0x4d6   : > { %v6908_v53 = vrot.slane %v6906_v12, 5  ;;  %v6911_v56 = vshrl.u32 %v6652_v46, 16 }
 0x4d8   : > { %v6268_v10 = vpop.f32.mrf.mxu3  ;;  %v4972_v54 = vpop.f32.mrf.mxu1 }
 0x4d9   : > { %v14339_v42 = vadd.f32 %v6268_v10, %v14057_v7  ;;  %v14347_v39 = vadd.f32 %v4972_v54, %v4724_v51  ;;  %v6885_v7 = vsel %vm12503_vm12, %v6880_v8, %v6884_v55  ;;  %v6902_v10 = vrot.slane %v6900_v61, 4 }
 0x4da   : > { %v5649_v62 = vpop.f32.mrf.mxu2  ;;  %v7088_v31 = vunpack.c.l.b16 %v6885_v7  ;;  %v6914_v7 = vshll.u32 %v6652_v46, 16  ;;  %v16110_v46 = vld [vmem:[#allocation29_spill] sm:$0xff] }
 0x4db   : > { %16103 = vst [vmem:[#allocation89_spill] sm:$0xff] %v14339_v42  ;;  %v14345_v25 = vadd.f32 %v5649_v62, %v5004_v20  ;;  %v6893_v20 = vor.u32 %v6892_v0, %v6889_v4  ;;  %v6903_v62 = vor.u32 %v6902_v10, %v6898_v15  ;;  %v14355_v54 = vpop.f32.mrf.mxu0  ;;  %v6920_v4 = vshll.u32 %v6653_v19, 16 }
 0x4dc   : > { %v14353_v51 = vpack.c.b16 %v7088_v31, %v7087_v26  ;;  %v6924_v0 = vshrl.u32 %v6653_v19, 16  ;;  %v11217_v31 = vld [vmem:[#allocation2 + $0xc8] sm:$0xff]  ;;  %v6916_v12 = vrot.slane %v6914_v7, 5  ;;  %v6656_v7 = vld [vmem:[#allocation2 + $0x144] sm:$0xf] }
 0x4dd   : > { %v6894_v8 = vrot.slane %v6893_v20, 4  ;;  %v6904_v55 = vrot.slane %v6903_v62, 4  ;;  %v6913_v20 = vrot.slane %v6911_v56, 4  ;;  %v6922_v62 = vrot.slane %v6920_v4, 5  ;;  %v6655_v56 = vld [vmem:[#allocation2 + $0x140] sm:$0xf] }
 0x4de   : > { %16105 = vst [vmem:[#allocation64_spill] sm:$0xff] %v14353_v51 }
 0x4df   : > { %7463 = vmatmul.bf16.gmra.mxu2 %v11216_v2  ;;  %v6899_v61 = vsel %vm12503_vm12, %v6894_v8, %v6898_v15  ;;  %v6909_v21 = vsel %vm12503_vm12, %v6904_v55, %v6908_v53  ;;  %v6917_v15 = vor.u32 %v6916_v12, %v6913_v20  ;;  %v16109_v53 = vld [vmem:[#allocation25_spill] sm:$0xff]  ;;  %v6944_v20 = vshll.u32 %v6656_v7, 16 }
 0x4e0   : > { %v7089_v10 = vunpack.c.l.b16 %v6899_v61  ;;  %v7090_v2 = vunpack.c.l.b16 %v6909_v21  ;;  %v6948_v12 = vshrl.u32 %v6656_v7, 16 }
 0x4e1   : > { %v6918_v19 = vrot.slane %v6917_v15, 4 }
 0x4e3   : > { %7231 = vmatmul.bf16.gmra.mxu1 %v14353_v51  ;;  %v14364_v26 = vpop.f32.mrf.mxu0  ;;  %v14366_v51 = vpack.c.b16 %v7090_v2, %v7089_v10  ;;  %v6923_v4 = vsel %vm12503_vm12, %v6918_v19, %v6922_v62  ;;  %v6935_v10 = vshrl.u32 %v6655_v56, 16  ;;  %v6938_v2 = vshll.u32 %v6655_v56, 16  ;;  %v16113_v56 = vld [vmem:[#allocation10_spill] sm:$0xff] }
 0x4e5   : > { %7724 = vmatmul.bf16.gmra.mxu0 %v16106_v36  ;;  %7570 = vmatmul.bf16.gmra.mxu3 %v16107_v17  ;;  %v6926_v36 = vrot.slane %v6924_v0, 4  ;;  %v6654_v17 = vld [vmem:[#allocation2 + $0x130] sm:$0x1]  ;;  %16108 = vst [vmem:[#allocation5_spill] sm:$0xff] %v14366_v51 }
 0x4e6   : > { %v6930_v55 = vshll.u32 %v6654_v17, 16  ;;  %v7091_v17 = vunpack.c.l.b16 %v6923_v4 }
 0x4e7   : > { %v6927_v8 = vor.u32 %v6926_v36, %v6922_v62  ;;  %v11218_v36 = vld [vmem:[#allocation2 + $0xe0] sm:$0xff] }
 0x4e8   : > { %v6932_v21 = vrot.slane %v6930_v55, 5  ;;  %v6940_v55 = vrot.slane %v6938_v2, 5 }
 0x4e9   : > { %v6928_v61 = vrot.slane %v6927_v8, 4  ;;  %v6937_v8 = vrot.slane %v6935_v10, 4 }
 0x4eb   : > { %v6933_v0 = vsel %vm12503_vm12, %v6928_v61, %v6932_v21  ;;  %v6941_v62 = vor.u32 %v6940_v55, %v6937_v8  ;;  %v16112_v21 = vld [vmem:[#allocation26_spill] sm:$0xff]  ;;  %v16117_v8 = vld [vmem:[#allocation27_spill] sm:$0xff] }
 0x4ec   : > { %v7092_v15 = vunpack.c.l.b16 %v6933_v0 }
 0x4ed   : > { %v6942_v7 = vrot.slane %v6941_v62, 4  ;;  %v6659_v62 = vld [vmem:[#allocation2 + $0x15c] sm:$0xf] }
 0x4ee   : > { %v14379_v48 = vpack.c.b16 %v7092_v15, %v7091_v17  ;;  %v14393_v15 = vpop.f32.mrf.mxu3 }
 0x4ef   : > { %7468 = vmatmul.bf16.gmra.mxu2 %v11217_v31  ;;  %v14371_v31 = vpop.f32.mrf.mxu0  ;;  %16116 = vst [vmem:[#allocation24_spill] sm:$0xff] %v14393_v15 }
 0x4f0   : > { %16111 = vst [vmem:[#allocation20_spill] sm:$0xff] %v14379_v48 }
 0x4f3   : > { %7236 = vmatmul.bf16.gmra.mxu1 %v14366_v51  ;;  %v6657_v51 = vld [vmem:[#allocation2 + $0x148] sm:$0x1] }
 0x4f4   : > { %v6954_v61 = vshll.u32 %v6657_v51, 16 }
 0x4f5   : > { %7575 = vmatmul.bf16.gmra.mxu3 %v16109_v53  ;;  %7729 = vmatmul.bf16.gmra.mxu0 %v16110_v46  ;;  %v6946_v53 = vrot.slane %v6944_v20, 5  ;;  %v6950_v46 = vrot.slane %v6948_v12, 4  ;;  %v11219_v12 = vld [vmem:[#allocation2 + $0xf8] sm:$0xff] }
 0x4f6   : > { %v6956_v0 = vrot.slane %v6954_v61, 5 }
 0x4f7   : > { %v14377_v22 = vpop.f32.mrf.mxu0  ;;  %v6951_v19 = vor.u32 %v6950_v46, %v6946_v53  ;;  %v6947_v10 = vsel %vm12503_vm12, %v6942_v7, %v6946_v53  ;;  %v16119_v53 = vld [vmem:[#allocation14_spill] sm:$0xff]  ;;  %v6658_v46 = vld [vmem:[#allocation2 + $0x158] sm:$0xf] }
 0x4f8   : > { %v7093_v51 = vunpack.c.l.b16 %v6947_v10  ;;  %v6962_v61 = vshll.u32 %v6658_v46, 16 }
 0x4f9   : > { %v6952_v4 = vrot.slane %v6951_v19, 4  ;;  %v6959_v19 = vshrl.u32 %v6658_v46, 16 }
 0x4fb   : > { %v6957_v2 = vsel %vm12503_vm12, %v6952_v4, %v6956_v0  ;;  %v6961_v7 = vrot.slane %v6959_v19, 4  ;;  %v6964_v4 = vrot.slane %v6962_v61, 5  ;;  %v14407_v61 = vpop.f32.mrf.mxu1 }
 0x4fc   : > { %16121 = vst [vmem:[#allocation26_spill] sm:$0xff] %v14407_v61  ;;  %v6591_v61 = vadd.f32 %v14068_v41, %v14009_v33  ;;  %v16124_v41 = vld [vmem:[#allocation32_spill] sm:$0xff] }
 0x4ff   : > { %7473 = vmatmul.bf16.gmra.mxu2 %v11218_v36  ;;  %v14388_v20 = vpop.f32.mrf.mxu0  ;;  %v7094_v36 = vunpack.c.l.b16 %v6957_v2  ;;  %v6660_v2 = vld [vmem:[#allocation2 + $0x160] sm:$0x1] }
 0x500   : > { %16114 = vst [vmem:[#allocation91_spill] sm:$0xff] %v14388_v20  ;;  %v6663_v20 = vld [vmem:[#allocation2 + $0x178] sm:$0x1] }
 0x501   : > { %v14390_v17 = vpack.c.b16 %v7094_v36, %v7093_v51  ;;  %v6978_v36 = vshll.u32 %v6660_v2, 16 }
 0x503   : > { %7241 = vmatmul.bf16.gmra.mxu1 %v14379_v48  ;;  %16115 = vst [vmem:[#allocation9_spill] sm:$0xff] %v14390_v17  ;;  %v6980_v48 = vrot.slane %v6978_v36, 5 }
 0x505   : > { %7580 = vmatmul.bf16.gmra.mxu3 %v16112_v21  ;;  %7734 = vmatmul.bf16.gmra.mxu0 %v16113_v56  ;;  %v6968_v21 = vshll.u32 %v6659_v62, 16  ;;  %v6972_v56 = vshrl.u32 %v6659_v62, 16 }
 0x507   : > { %v14396_v55 = vpop.f32.mrf.mxu0  ;;  %v6970_v0 = vrot.slane %v6968_v21, 5  ;;  %v6974_v10 = vrot.slane %v6972_v56, 4  ;;  %v6983_v21 = vshrl.u32 %v6661_v1, 16  ;;  %v6986_v56 = vshll.u32 %v6661_v1, 16  ;;  %v11052_v1 = vld [vmem:[%s15779_s6 + $0x118] sm:$0xff] }
 0x508   : > { %16118 = vst [vmem:[#allocation25_spill] sm:$0xff] %v14396_v55  ;;  %v6662_v55 = vld [vmem:[#allocation2 + $0x174] sm:$0xf]  ;;  %8087 = vmatpush.bf16.msrb.mxu2 %v11052_v1 }
 0x509   : > { %v6975_v51 = vor.u32 %v6974_v10, %v6970_v0 }
 0x50f   : > { %7478 = vmatmul.bf16.gmra.mxu2 %v11219_v12  ;;  %v6965_v12 = vor.u32 %v6964_v4, %v6961_v7  ;;  %v14405_v19 = vpop.f32.mrf.mxu0  ;;  %v6992_v7 = vshll.u32 %v6662_v55, 16  ;;  %v6996_v4 = vshrl.u32 %v6662_v55, 16  ;;  %v11044_v55 = vld [vmem:[%s15779_s6 + $0xd8] sm:$0xff] }
 0x510   : > { %16120 = vst [vmem:[#allocation29_spill] sm:$0xff] %v14405_v19  ;;  %7901 = vmatpush.bf16.msrb.mxu1 %v11044_v55 }
 0x511   : > { %v6994_v36 = vrot.slane %v6992_v7, 5  ;;  %v6998_v15 = vrot.slane %v6996_v4, 4 }
 0x513   : > { %7246 = vmatmul.bf16.gmra.mxu1 %v14390_v17  ;;  %v6966_v17 = vrot.slane %v6965_v12, 4  ;;  %v6985_v12 = vrot.slane %v6983_v21, 4  ;;  %v7194_v21 = vpop.f32.mrf.mxu1 }
 0x514   : > { %v14428_v33 = vadd.f32 %v7194_v21, %v6591_v61  ;;  %v6592_v61 = vadd.f32 %v14090_v27, %v14025_v5 }
 0x515   : > { %7585 = vmatmul.bf16.gmra.mxu3 %v16117_v8  ;;  %7739 = vmatmul.bf16.gmra.mxu0 %v16119_v53  ;;  %v6976_v8 = vrot.slane %v6975_v51, 4  ;;  %v14399_v53 = vpop.f32.mrf.mxu2  ;;  %v6971_v46 = vsel %vm12503_vm12, %v6966_v17, %v6970_v0  ;;  %v6988_v51 = vrot.slane %v6986_v56, 5  ;;  %v6999_v0 = vor.u32 %v6998_v15, %v6994_v36 }
 0x516   : > { %v7095_v10 = vunpack.c.l.b16 %v6971_v46  ;;  %v11220_v46 = vld [vmem:[#allocation2 + $0x110] sm:$0xff]  ;;  %16123 = vst [vmem:[#allocation27_spill] sm:$0xff] %v14428_v33 }
 0x517   : > { %v6981_v62 = vsel %vm12503_vm12, %v6976_v8, %v6980_v48  ;;  %v6989_v17 = vor.u32 %v6988_v51, %v6985_v12  ;;  %v7002_v48 = vshll.u32 %v6663_v20, 16  ;;  %v6273_v8 = vpop.f32.mrf.mxu3  ;;  %v14425_v15 = vpop.f32.mrf.mxu0  ;;  %v7000_v7 = vrot.slane %v6999_v0, 4  ;;  %v16125_v0 = vld [vmem:[#allocation3_spill] sm:$0xff] }
 0x518   : > { %v7096_v2 = vunpack.c.l.b16 %v6981_v62  ;;  %v14420_v62 = vadd.f32 %v6273_v8, %v14097_v34  ;;  %v6665_v34 = vld [vmem:[#allocation2 + $0x18c] sm:$0xf] }
 0x519   : > { %v6990_v56 = vrot.slane %v6989_v17, 4  ;;  %v7004_v4 = vrot.slane %v7002_v48, 5  ;;  %v11051_v17 = vld [vmem:[%s15779_s6 + $0x110] sm:$0xff]  ;;  %v7016_v8 = vshll.u32 %v6665_v34, 16  ;;  %v7020_v1 = vshrl.u32 %v6665_v34, 16 }
 0x51a   : > { %v14409_v42 = vpack.c.b16 %v7096_v2, %v7095_v10  ;;  %v6664_v10 = vld [vmem:[#allocation2 + $0x188] sm:$0xf]  ;;  %8088 = vmatpush.bf16.msrb.mxu2 %v11051_v17 }
 0x51b   : > { %v7007_v2 = vshrl.u32 %v6664_v10, 16  ;;  %v7010_v48 = vshll.u32 %v6664_v10, 16 }
 0x51c   : > { %16122 = vst [vmem:[#allocation10_spill] sm:$0xff] %v14409_v42 }
 0x51d   : > { %v5654_v19 = vpop.f32.mrf.mxu2  ;;  %v7009_v27 = vrot.slane %v7007_v2, 4 }
 0x51e   : > { %v14423_v20 = vadd.f32 %v5654_v19, %v14347_v39  ;;  %v6995_v39 = vsel %vm12503_vm12, %v6990_v56, %v6994_v36  ;;  %v7005_v19 = vsel %vm12503_vm12, %v7000_v7, %v7004_v4  ;;  %v7012_v56 = vrot.slane %v7010_v48, 5 }
 0x51f   : > { %7483 = vmatmul.bf16.gmra.mxu2 %v11220_v46  ;;  %v6275_v12 = vpop.f32.mrf.mxu3  ;;  %v14446_v55 = vpop.f32.mrf.mxu0  ;;  %v7098_v5 = vunpack.c.l.b16 %v7005_v19  ;;  %v7018_v7 = vrot.slane %v7016_v8, 5  ;;  %v7022_v4 = vrot.slane %v7020_v1, 4 }
 0x520   : > { %v14444_v36 = vadd.f32 %v6275_v12, %v14119_v23  ;;  %v7197_v46 = vpop.f32.mrf.mxu1  ;;  %v6593_v23 = vadd.f32 %v14116_v59, %v14050_v37  ;;  %v11043_v12 = vld [vmem:[%s15779_s6 + $0xd0] sm:$0xff] }
 0x521   : > { %v14448_v21 = vadd.f32 %v7197_v46, %v6592_v61  ;;  %v11221_v61 = vld [vmem:[#allocation2 + $0x128] sm:$0xff]  ;;  %v7023_v19 = vor.u32 %v7022_v4, %v7018_v7  ;;  %7902 = vmatpush.bf16.msrb.mxu1 %v11043_v12  ;;  %v16129_v37 = vld [vmem:[#allocation19_spill] sm:$0xff] }
 0x523   : > { %7251 = vmatmul.bf16.gmra.mxu1 %v14409_v42  ;;  %16126 = vst [vmem:[#allocation14_spill] sm:$0xff] %v14448_v21  ;;  %v6666_v42 = vld [vmem:[#allocation2 + $0x190] sm:$0x1]  ;;  %v7024_v46 = vrot.slane %v7023_v19, 4  ;;  %v16153_v21 = vld [vmem:[#allocation45_spill] sm:$0xff] }
 0x524   : > { %v7026_v2 = vshll.u32 %v6666_v42, 16  ;;  %v16130_v42 = vld [vmem:[#allocation6_spill] sm:$0xff] }
 0x525   : > { %7744 = vmatmul.bf16.gmra.mxu0 %v16124_v41  ;;  %v14435_v51 = vpop.f32.mrf.mxu2  ;;  %7590 = vmatmul.bf16.gmra.mxu3 %v16125_v0  ;;  %v7097_v41 = vunpack.c.l.b16 %v6995_v39  ;;  %v7013_v39 = vor.u32 %v7012_v56, %v7009_v27 }
 0x527   : > { %v14450_v0 = vpack.c.b16 %v7098_v5, %v7097_v41  ;;  %v6278_v10 = vpop.f32.mrf.mxu3  ;;  %v14462_v48 = vpop.f32.mrf.mxu0  ;;  %v7014_v59 = vrot.slane %v7013_v39, 4  ;;  %v7028_v41 = vrot.slane %v7026_v2, 5 }
 0x528   : > { %v14460_v17 = vadd.f32 %v6278_v10, %v14147_v44  ;;  %v7199_v8 = vpop.f32.mrf.mxu1  ;;  %v6594_v44 = vadd.f32 %v14156_v40, %v14071_v58 }
 0x529   : > { %16127 = vst [vmem:[#allocation32_spill] sm:$0xff] %v14450_v0  ;;  %v14465_v1 = vadd.f32 %v7199_v8, %v6593_v23  ;;  %v7019_v56 = vsel %vm12503_vm12, %v7014_v59, %v7018_v7  ;;  %v7029_v4 = vsel %vm12503_vm12, %v7024_v46, %v7028_v41  ;;  %v6595_v7 = vadd.f32 %v14181_v9, %v14093_v52  ;;  %v11222_v8 = vld [vmem:[#allocation2 + $0x140] sm:$0xff]  ;;  %v11050_v9 = vld [vmem:[%s15779_s6 + $0x108] sm:$0xff] }
 0x52a   : > { %v7099_v39 = vunpack.c.l.b16 %v7019_v56  ;;  %v7100_v19 = vunpack.c.l.b16 %v7029_v4  ;;  %v16134_v41 = vld [vmem:[#allocation21_spill] sm:$0xff]  ;;  %v6596_v52 = vadd.f32 %v14218_v24, %v14109_v13  ;;  %8089 = vmatpush.bf16.msrb.mxu2 %v11050_v9  ;;  %v11042_v24 = vld [vmem:[%s15779_s6 + $0xc8] sm:$0xff] }
 0x52b   : > { %16128 = vst [vmem:[#allocation3_spill] sm:$0xff] %v14465_v1  ;;  %7903 = vmatpush.bf16.msrb.mxu1 %v11042_v24 }
 0x52c   : > { %v14484_v2 = vpack.c.b16 %v7100_v19, %v7099_v39 }
 0x52d   : > { %v14452_v34 = vpop.f32.mrf.mxu2 }
 0x52e   : > { %16132 = vst [vmem:[#allocation6_spill] sm:$0xff] %v14484_v2 }
 0x52f   : > { %7488 = vmatmul.bf16.gmra.mxu2 %v11221_v61  ;;  %v6280_v5 = vpop.f32.mrf.mxu3  ;;  %v14480_v23 = vpop.f32.mrf.mxu0 }
 0x530   : > { %v14478_v10 = vadd.f32 %v6280_v5, %v14171_v63  ;;  %v7202_v12 = vpop.f32.mrf.mxu1 }
 0x531   : > { %v14482_v61 = vadd.f32 %v7202_v12, %v6594_v44 }
 0x533   : > { %7256 = vmatmul.bf16.gmra.mxu1 %v14450_v0  ;;  %16131 = vst [vmem:[#allocation19_spill] sm:$0xff] %v14482_v61 }
 0x535   : > { %7749 = vmatmul.bf16.gmra.mxu0 %v16129_v37  ;;  %v14468_v27 = vpop.f32.mrf.mxu2  ;;  %7595 = vmatmul.bf16.gmra.mxu3 %v16130_v42 }
 0x537   : > { %v6283_v58 = vpop.f32.mrf.mxu3  ;;  %v14493_v37 = vpop.f32.mrf.mxu0 }
 0x538   : > { %v14491_v63 = vadd.f32 %v6283_v58, %v14191_v30  ;;  %v7204_v59 = vpop.f32.mrf.mxu1  ;;  %v16135_v30 = vld [vmem:[#allocation8_spill] sm:$0xff]  ;;  %v16137_v58 = vld [vmem:[#allocation97_spill] sm:$0xff] }
 0x539   : > { %v14496_v46 = vadd.f32 %v7204_v59, %v6595_v7  ;;  %v6597_v13 = vadd.f32 %v14259_v45, %v16137_v58  ;;  %v11223_v7 = vld [vmem:[#allocation2 + $0x158] sm:$0xff]  ;;  %v16140_v45 = vld [vmem:[#allocation99_spill] sm:$0xff] }
 0x53b   : > { %16133 = vst [vmem:[#allocation102_spill] sm:$0xff] %v14496_v46 }
 0x53d   : > { %v14486_v40 = vpop.f32.mrf.mxu2 }
 0x53f   : > { %7493 = vmatmul.bf16.gmra.mxu2 %v11222_v8  ;;  %v6285_v5 = vpop.f32.mrf.mxu3  ;;  %v14510_v56 = vpop.f32.mrf.mxu0 }
 0x540   : > { %v14508_v42 = vadd.f32 %v6285_v5, %v14226_v18  ;;  %v7207_v4 = vpop.f32.mrf.mxu1  ;;  %v16139_v5 = vld [vmem:[#allocation36_spill] sm:$0xff] }
 0x541   : > { %v14512_v12 = vadd.f32 %v7207_v4, %v6596_v52  ;;  %v16141_v4 = vld [vmem:[#allocation28_spill] sm:$0xff] }
 0x543   : > { %7261 = vmatmul.bf16.gmra.mxu1 %v14484_v2  ;;  %16136 = vst [vmem:[#allocation21_spill] sm:$0xff] %v14512_v12  ;;  %v6668_v2 = vld [vmem:[#allocation2 + $0x1a4] sm:$0xf] }
 0x544   : > { %v7040_v61 = vshll.u32 %v6668_v2, 16  ;;  %v7044_v0 = vshrl.u32 %v6668_v2, 16 }
 0x545   : > { %7754 = vmatmul.bf16.gmra.mxu0 %v16134_v41  ;;  %v14499_v44 = vpop.f32.mrf.mxu2  ;;  %7600 = vmatmul.bf16.gmra.mxu3 %v16135_v30  ;;  %v6598_v30 = vadd.f32 %v14294_v60, %v16140_v45 }
 0x547   : > { %v6288_v39 = vpop.f32.mrf.mxu3  ;;  %v14524_v8 = vpop.f32.mrf.mxu0 }
 0x548   : > { %v14522_v18 = vadd.f32 %v6288_v39, %v14262_v3  ;;  %v7209_v59 = vpop.f32.mrf.mxu1 }
 0x549   : > { %v14526_v41 = vadd.f32 %v7209_v59, %v6597_v13  ;;  %v16143_v59 = vld [vmem:[#allocation47_spill] sm:$0xff] }
 0x54b   : > { %16138 = vst [vmem:[#allocation8_spill] sm:$0xff] %v14526_v41  ;;  %v11224_v41 = vld [vmem:[#allocation2 + $0x170] sm:$0xff] }
 0x54d   : > { %v14514_v19 = vpop.f32.mrf.mxu2 }
 0x54f   : > { %7498 = vmatmul.bf16.gmra.mxu2 %v11223_v7  ;;  %v6290_v52 = vpop.f32.mrf.mxu3  ;;  %v14537_v3 = vpop.f32.mrf.mxu0 }
 0x550   : > { %v14535_v58 = vadd.f32 %v6290_v52, %v14288_v38  ;;  %v7212_v39 = vpop.f32.mrf.mxu1 }
 0x551   : > { %v14539_v7 = vadd.f32 %v7212_v39, %v6598_v30 }
 0x553   : > { %16142 = vst [vmem:[#allocation97_spill] sm:$0xff] %v14539_v7  ;;  %v16147_v7 = vld [vmem:[#allocation15_spill] sm:$0xff] }
 0x554   : > { %v6600_v12 = vadd.f32 %v14322_v6, %v16147_v7  ;;  %v6601_v6 = vadd.f32 %v14343_v35, %v14255_v43  ;;  %v11041_v7 = vld [vmem:[%s15779_s6 + $0xc0] sm:$0xff] }
 0x555   : > { %7759 = vmatmul.bf16.gmra.mxu0 %v16139_v5  ;;  %v14529_v9 = vpop.f32.mrf.mxu2  ;;  %7605 = vmatmul.bf16.gmra.mxu3 %v16141_v4  ;;  %v6599_v5 = vadd.f32 %v14309_v14, %v16143_v59  ;;  %v16145_v4 = vld [vmem:[#allocation39_spill] sm:$0xff]  ;;  %v11049_v14 = vld [vmem:[%s15779_s6 + $0x100] sm:$0xff] }
 0x556   : > { %8090 = vmatpush.bf16.msrb.mxu2 %v11049_v14  ;;  %7904 = vmatpush.bf16.msrb.mxu1 %v11041_v7 }
 0x557   : > { %v6293_v13 = vpop.f32.mrf.mxu3  ;;  %v14548_v45 = vpop.f32.mrf.mxu0 }
 0x558   : > { %v14546_v60 = vadd.f32 %v6293_v13, %v14305_v11  ;;  %v7214_v38 = vpop.f32.mrf.mxu1 }
 0x559   : > { %v14550_v52 = vadd.f32 %v7214_v38, %v6599_v5 }
 0x55b   : > { %16144 = vst [vmem:[#allocation36_spill] sm:$0xff] %v14550_v52  ;;  %v6667_v52 = vld [vmem:[#allocation2 + $0x1a0] sm:$0xf] }
 0x55c   : > { %v7031_v46 = vshrl.u32 %v6667_v52, 16  ;;  %v7034_v43 = vshll.u32 %v6667_v52, 16  ;;  %v6602_v52 = vadd.f32 %v14355_v54, %v14283_v32 }
 0x55d   : > { %v14541_v24 = vpop.f32.mrf.mxu2 }
 0x55e   : > { %v7033_v1 = vrot.slane %v7031_v46, 4 }
 0x55f   : > { %7503 = vmatmul.bf16.gmra.mxu2 %v11224_v41  ;;  %v6295_v30 = vpop.f32.mrf.mxu3  ;;  %v16148_v41 = vld [vmem:[#allocation12_spill] sm:$0xff]  ;;  %v14564_v13 = vpop.f32.mrf.mxu0 }
 0x560   : > { %v14562_v11 = vadd.f32 %v6295_v30, %v14316_v57  ;;  %v7217_v59 = vpop.f32.mrf.mxu1  ;;  %v11225_v57 = vld [vmem:[#allocation2 + $0x20] sm:$0xff] }
 0x561   : > { %v14566_v5 = vadd.f32 %v7217_v59, %v6600_v12 }
 0x563   : > { %16149 = vst [vmem:[#allocation28_spill] sm:$0xff] %v14566_v5 }
 0x565   : > { %7764 = vmatmul.bf16.gmra.mxu0 %v16145_v4  ;;  %v14553_v39 = vpop.f32.mrf.mxu2  ;;  %7610 = vmatmul.bf16.gmra.mxu3 %v16148_v41  ;;  %v2357_v41 = vld [vmem:[#allocation2 + $0x1a8] sm:$0x1] }
 0x566   : > { %16146 = vst [vmem:[#allocation99_spill] sm:$0xff] %v14553_v39  ;;  %v2358_v5 = vsel %vm12166_vm9, 0, %v2357_v41 }
 0x567   : > { %v6298_v38 = vpop.f32.mrf.mxu3  ;;  %v14578_v12 = vpop.f32.mrf.mxu0  ;;  %2359 = vst [vmem:[#allocation2 + $0x1a8] sm:$0x1] %v2358_v5 }
 0x568   : > { %v14576_v30 = vadd.f32 %v6298_v38, %v14329_v49  ;;  %v7219_v14 = vpop.f32.mrf.mxu1  ;;  %v7042_v49 = vrot.slane %v7040_v61, 5  ;;  %v7046_v38 = vrot.slane %v7044_v0, 4 }
 0x569   : > { %v14582_v35 = vadd.f32 %v7219_v14, %v6601_v6  ;;  %v16154_v6 = vld [vmem:[#allocation11_spill] sm:$0xff] }
 0x56b   : > { %16152 = vst [vmem:[#allocation39_spill] sm:$0xff] %v14582_v35 }
 0x56d   : > { %v14568_v4 = vpop.f32.mrf.mxu2 }
 0x56e   : > { %16150 = vst [vmem:[#allocation47_spill] sm:$0xff] %v14568_v4  ;;  %v7047_v4 = vor.u32 %v7046_v38, %v7042_v49  ;;  %v6603_v38 = vadd.f32 %v14364_v26, %v14297_v50 }
 0x56f   : > { %8091 = vmatmul.bf16.vlgmr.msrb.gmra.mxu2 %v11225_v57  ;;  %v7036_v57 = vrot.slane %v7034_v43, 5  ;;  %v6300_v59 = vpop.f32.mrf.mxu3  ;;  %v14593_v2 = vpop.f32.mrf.mxu0 }
 0x570   : > { %v14591_v5 = vadd.f32 %v6300_v59, %v14345_v25  ;;  %v7222_v46 = vpop.f32.mrf.mxu1  ;;  %v7048_v0 = vrot.slane %v7047_v4, 4  ;;  %v5687_v25 = vadd.f32 %v14399_v53, %v14333_v16  ;;  %v11226_v59 = vld [vmem:[#allocation2 + $0x38] sm:$0xff]  ;;  %v16158_v53 = vld [vmem:[#allocation51_spill] sm:$0xff] }
 0x571   : > { %v7037_v33 = vor.u32 %v7036_v57, %v7033_v1  ;;  %v14595_v61 = vadd.f32 %v7222_v46, %v6602_v52  ;;  %v11088_v46 = vld [vmem:[%s15779_s6 + $0x238] sm:$0xff] }
 0x572   : > { %8827 = vmatpush.bf16.msra.mxu2 %v11088_v46 }
 0x573   : > { %v7038_v39 = vrot.slane %v7037_v33, 4  ;;  %16155 = vst [vmem:[#allocation15_spill] sm:$0xff] %v14595_v61 }
 0x575   : > { %7769 = vmatmul.bf16.gmra.mxu0 %v16153_v21  ;;  %v14585_v41 = vpop.f32.mrf.mxu2  ;;  %7615 = vmatmul.bf16.gmra.mxu3 %v16154_v6  ;;  %v6669_v21 = vld [vmem:[#allocation2 + $0x1a8] sm:$0x1]  ;;  %v7043_v33 = vsel %vm12503_vm12, %v7038_v39, %v7042_v49  ;;  %v6604_v6 = vadd.f32 %v14371_v31, %v14312_v28 }
 0x576   : > { %v7050_v1 = vshll.u32 %v6669_v21, 16  ;;  %v7101_v14 = vunpack.c.l.b16 %v7043_v33  ;;  %v16159_v21 = vld [vmem:[#allocation13_spill] sm:$0xff] }
 0x577   : > { %v6303_v43 = vpop.f32.mrf.mxu3  ;;  %v14609_v4 = vpop.f32.mrf.mxu0 }
 0x578   : > { %v7052_v7 = vrot.slane %v7050_v1, 5  ;;  %v14607_v39 = vadd.f32 %v6303_v43, %v5687_v25  ;;  %v7224_v49 = vpop.f32.mrf.mxu1  ;;  %v11227_v25 = vld [vmem:[#allocation2 + $0x50] sm:$0xff] }
 0x579   : > { %v14616_v16 = vadd.f32 %v7224_v49, %v6603_v38  ;;  %v16163_v49 = vld [vmem:[#allocation56_spill] sm:$0xff] }
 0x57a   : > { %v7053_v32 = vsel %vm12503_vm12, %v7048_v0, %v7052_v7  ;;  %v11072_v7 = vld [vmem:[%s15779_s6 + $0x1b8] sm:$0xff] }
 0x57b   : > { %v7102_v54 = vunpack.c.l.b16 %v7053_v32  ;;  %16157 = vst [vmem:[#allocation22_spill] sm:$0xff] %v14616_v16  ;;  %8455 = vmatpush.bf16.msra.mxu0 %v11072_v7  ;;  %v6605_v32 = vadd.f32 %v14377_v22, %v14325_v29  ;;  %v16164_v22 = vld [vmem:[#allocation89_spill] sm:$0xff]  ;;  %v16165_v29 = vld [vmem:[#allocation91_spill] sm:$0xff]  ;;  %v16168_v7 = vld [vmem:[#allocation94_spill] sm:$0xff] }
 0x57d   : > { %v14603_v57 = vpop.f32.mrf.mxu2  ;;  %v14611_v52 = vpack.c.b16 %v7102_v54, %v7101_v14 }
 0x57f   : > { %8096 = vmatmul.bf16.gmra.mxu2 %v11226_v59  ;;  %16156 = vst [vmem:[#allocation12_spill] sm:$0xff] %v14611_v52  ;;  %7266 = vmatmul.bf16.gmra.mxu1 %v14611_v52  ;;  %v6305_v50 = vpop.f32.mrf.mxu3  ;;  %v14631_v1 = vpop.f32.mrf.mxu0  ;;  %v16162_v59 = vld [vmem:[#allocation4_spill] sm:$0xff] }
 0x580   : > { %v14629_v33 = vadd.f32 %v6305_v50, %v14423_v20  ;;  %v7227_v0 = vpop.f32.mrf.mxu1  ;;  %v11080_v20 = vld [vmem:[%s15779_s6 + $0x1f8] sm:$0xff]  ;;  %v6606_v50 = vadd.f32 %v16165_v29, %v16164_v22  ;;  %v11063_v29 = vld [vmem:[%s15779_s6 + $0x170] sm:$0xff] }
 0x581   : > { %v14636_v14 = vadd.f32 %v7227_v0, %v6604_v6  ;;  %8641 = vmatpush.bf16.msra.mxu1 %v11080_v20  ;;  %v16166_v6 = vld [vmem:[#allocation17_spill] sm:$0xff]  ;;  %8270 = vmatpush.bf16.msra.mxu3 %v11063_v29  ;;  %v11071_v29 = vld [vmem:[%s15779_s6 + $0x1b0] sm:$0xff] }
 0x582   : > { %8456 = vmatpush.bf16.msra.mxu0 %v11071_v29 }
 0x583   : > { %16160 = vst [vmem:[#allocation45_spill] sm:$0xff] %v14636_v14 }
 0x585   : > { %7774 = vmatmul.bf16.gmra.mxu0 %v16158_v53  ;;  %v14620_v26 = vpop.f32.mrf.mxu2  ;;  %7620 = vmatmul.bf16.gmra.mxu3 %v16159_v21 }
 0x587   : > { %v14638_v28 = vpop.f32.mrf.mxu3  ;;  %v14647_v43 = vpop.f32.mrf.mxu0 }
 0x588   : > { %v7229_v54 = vpop.f32.mrf.mxu1 }
 0x589   : > { %v14649_v38 = vadd.f32 %v7229_v54, %v6605_v32  ;;  %v16169_v32 = vld [vmem:[#allocation24_spill] sm:$0xff] }
 0x58a   : > { %v6325_v20 = vadd.f32 %v16169_v32, %v16168_v7 }
 0x58b   : > { %16161 = vst [vmem:[#allocation11_spill] sm:$0xff] %v14649_v38  ;;  %v11228_v38 = vld [vmem:[#allocation2 + $0x68] sm:$0xff] }
 0x58d   : > { %v14640_v31 = vpop.f32.mrf.mxu2 }
 0x58f   : > { %8101 = vmatmul.bf16.gmra.mxu2 %v11227_v25  ;;  %7905 = vmatmul.bf16.vlgmr.msrb.gmra.mxu1 %v16162_v59  ;;  %v14653_v47 = vpop.f32.mrf.mxu3  ;;  %v14660_v21 = vpop.f32.mrf.mxu0  ;;  %v16170_v59 = vld [vmem:[#allocation25_spill] sm:$0xff] }
 0x590   : > { %v7232_v46 = vpop.f32.mrf.mxu1 }
 0x591   : > { %v14662_v0 = vadd.f32 %v7232_v46, %v6606_v50  ;;  %v16173_v46 = vld [vmem:[#allocation63_spill] sm:$0xff] }
 0x593   : > { %16167 = vst [vmem:[#allocation51_spill] sm:$0xff] %v14662_v0  ;;  %v16175_v0 = vld [vmem:[#allocation34_spill] sm:$0xff] }
 0x595   : > { %7779 = vmatmul.bf16.gmra.mxu0 %v16163_v49  ;;  %v14655_v53 = vpop.f32.mrf.mxu2  ;;  %7625 = vmatmul.bf16.gmra.mxu3 %v16166_v6  ;;  %v6607_v49 = vadd.f32 %v16170_v59, %v6325_v20  ;;  %v16172_v6 = vld [vmem:[#allocation7_spill] sm:$0xff] }
 0x596   : > { %v11087_v59 = vld [vmem:[%s15779_s6 + $0x230] sm:$0xff] }
 0x597   : > { %v14666_v25 = vpop.f32.mrf.mxu3  ;;  %v14671_v22 = vpop.f32.mrf.mxu0  ;;  %8828 = vmatpush.bf16.msra.mxu2 %v11087_v59  ;;  %v16179_v59 = vld [vmem:[#allocation30_spill] sm:$0xff] }
 0x598   : > { %v7234_v14 = vpop.f32.mrf.mxu1 }
 0x599   : > { %v14676_v50 = vadd.f32 %v7234_v14, %v6607_v49 }
 0x59b   : > { %16171 = vst [vmem:[#allocation13_spill] sm:$0xff] %v14676_v50  ;;  %v11229_v50 = vld [vmem:[#allocation2 + $0x80] sm:$0xff] }
 0x59d   : > { %v14668_v54 = vpop.f32.mrf.mxu2 }
 0x59f   : > { %8106 = vmatmul.bf16.gmra.mxu2 %v11228_v38  ;;  %7910 = vmatmul.bf16.gmra.mxu1 %v16172_v6  ;;  %v14680_v7 = vpop.f32.mrf.mxu3  ;;  %v16174_v38 = vld [vmem:[#allocation29_spill] sm:$0xff]  ;;  %v14690_v49 = vpop.f32.mrf.mxu0 }
 0x5a0   : > { %v6608_v20 = vadd.f32 %v16174_v38, %v14420_v62  ;;  %v7237_v14 = vpop.f32.mrf.mxu1  ;;  %v6609_v38 = vadd.f32 %v14425_v15, %v14444_v36  ;;  %v6610_v15 = vadd.f32 %v14446_v55, %v14460_v17  ;;  %v16182_v36 = vld [vmem:[#allocation35_spill] sm:$0xff]  ;;  %v11062_v55 = vld [vmem:[%s15779_s6 + $0x168] sm:$0xff] }
 0x5a1   : > { %8271 = vmatpush.bf16.msra.mxu3 %v11062_v55  ;;  %v11070_v55 = vld [vmem:[%s15779_s6 + $0x1a8] sm:$0xff] }
 0x5a2   : > { %v14695_v6 = vadd.f32 %v7237_v14, %v6608_v20  ;;  %v16180_v14 = vld [vmem:[#allocation69_spill] sm:$0xff]  ;;  %8457 = vmatpush.bf16.msra.mxu0 %v11070_v55 }
 0x5a4   : > { %16176 = vst [vmem:[#allocation4_spill] sm:$0xff] %v14695_v6 }
 0x5a5   : > { %7784 = vmatmul.bf16.gmra.mxu0 %v16173_v46  ;;  %v14682_v32 = vpop.f32.mrf.mxu2  ;;  %7630 = vmatmul.bf16.gmra.mxu3 %v16175_v0  ;;  %v11079_v0 = vld [vmem:[%s15779_s6 + $0x1f0] sm:$0xff] }
 0x5a6   : > { %8642 = vmatpush.bf16.msra.mxu1 %v11079_v0  ;;  %v6611_v0 = vadd.f32 %v14462_v48, %v14478_v10  ;;  %v6612_v48 = vadd.f32 %v14480_v23, %v14491_v63  ;;  %v11086_v10 = vld [vmem:[%s15779_s6 + $0x228] sm:$0xff]  ;;  %v6613_v63 = vadd.f32 %v14493_v37, %v14508_v42  ;;  %v6614_v37 = vadd.f32 %v14510_v56, %v14522_v18  ;;  %v11069_v56 = vld [vmem:[%s15779_s6 + $0x1a0] sm:$0xff] }
 0x5a7   : > { %v14697_v46 = vpop.f32.mrf.mxu3  ;;  %v14706_v61 = vpop.f32.mrf.mxu0  ;;  %8829 = vmatpush.bf16.msra.mxu2 %v11086_v10  ;;  %v16193_v10 = vld [vmem:[#allocation16_spill] sm:$0xff]  ;;  %v11232_v18 = vld [vmem:[#allocation2 + $0xc8] sm:$0xff]  ;;  %8458 = vmatpush.bf16.msra.mxu0 %v11069_v56  ;;  %v11067_v56 = vld [vmem:[%s15779_s6 + $0x190] sm:$0xff] }
 0x5a8   : > { %v7239_v16 = vpop.f32.mrf.mxu1 }
 0x5a9   : > { %v14708_v20 = vadd.f32 %v7239_v16, %v6609_v38 }
 0x5ab   : > { %16178 = vst [vmem:[#allocation89_spill] sm:$0xff] %v14708_v20 }
 0x5ad   : > { %v14699_v62 = vpop.f32.mrf.mxu2 }
 0x5ae   : > { %16177 = vst [vmem:[#allocation56_spill] sm:$0xff] %v14699_v62 }
 0x5af   : > { %8111 = vmatmul.bf16.gmra.mxu2 %v11229_v50  ;;  %7915 = vmatmul.bf16.gmra.mxu1 %v16179_v59  ;;  %v14712_v29 = vpop.f32.mrf.mxu3  ;;  %v14719_v35 = vpop.f32.mrf.mxu0  ;;  %v11230_v59 = vld [vmem:[#allocation2 + $0x98] sm:$0xff] }
 0x5b0   : > { %v7242_v50 = vpop.f32.mrf.mxu1 }
 0x5b1   : > { %v14721_v52 = vadd.f32 %v7242_v50, %v6610_v15  ;;  %v16186_v15 = vld [vmem:[#allocation31_spill] sm:$0xff] }
 0x5b3   : > { %16183 = vst [vmem:[#allocation17_spill] sm:$0xff] %v14721_v52 }
 0x5b5   : > { %7789 = vmatmul.bf16.gmra.mxu0 %v16180_v14  ;;  %v14714_v6 = vpop.f32.mrf.mxu2  ;;  %7635 = vmatmul.bf16.gmra.mxu3 %v16182_v36  ;;  %v16187_v36 = vld [vmem:[#allocation72_spill] sm:$0xff] }
 0x5b6   : > { %16181 = vst [vmem:[#allocation91_spill] sm:$0xff] %v14714_v6 }
 0x5b7   : > { %v14723_v16 = vpop.f32.mrf.mxu3  ;;  %v14729_v20 = vpop.f32.mrf.mxu0 }
 0x5b8   : > { %v7244_v14 = vpop.f32.mrf.mxu1 }
 0x5b9   : > { %v14734_v17 = vadd.f32 %v7244_v14, %v6611_v0 }
 0x5bb   : > { %16185 = vst [vmem:[#allocation24_spill] sm:$0xff] %v14734_v17  ;;  %v11231_v17 = vld [vmem:[#allocation2 + $0xb0] sm:$0xff] }
 0x5bd   : > { %v14725_v38 = vpop.f32.mrf.mxu2 }
 0x5be   : > { %16184 = vst [vmem:[#allocation94_spill] sm:$0xff] %v14725_v38 }
 0x5bf   : > { %8116 = vmatmul.bf16.gmra.mxu2 %v11230_v59  ;;  %7920 = vmatmul.bf16.gmra.mxu1 %v16186_v15  ;;  %v14738_v50 = vpop.f32.mrf.mxu3  ;;  %v16189_v59 = vld [vmem:[#allocation38_spill] sm:$0xff]  ;;  %v14748_v14 = vpop.f32.mrf.mxu0 }
 0x5c0   : > { %v7247_v0 = vpop.f32.mrf.mxu1 }
 0x5c1   : > { %v14753_v15 = vadd.f32 %v7247_v0, %v6612_v48 }
 0x5c3   : > { %16190 = vst [vmem:[#allocation7_spill] sm:$0xff] %v14753_v15 }
 0x5c5   : > { %7794 = vmatmul.bf16.gmra.mxu0 %v16187_v36  ;;  %v14740_v52 = vpop.f32.mrf.mxu2  ;;  %7640 = vmatmul.bf16.gmra.mxu3 %v16189_v59  ;;  %v11078_v59 = vld [vmem:[%s15779_s6 + $0x1e8] sm:$0xff] }
 0x5c6   : > { %16188 = vst [vmem:[#allocation25_spill] sm:$0xff] %v14740_v52  ;;  %8643 = vmatpush.bf16.msra.mxu1 %v11078_v59 }
 0x5c7   : > { %v14755_v36 = vpop.f32.mrf.mxu3  ;;  %v14764_v38 = vpop.f32.mrf.mxu0 }
 0x5c8   : > { %v7249_v52 = vpop.f32.mrf.mxu1 }
 0x5c9   : > { %v14766_v48 = vadd.f32 %v7249_v52, %v6613_v63  ;;  %v6615_v52 = vadd.f32 %v14524_v8, %v14535_v58  ;;  %v11061_v63 = vld [vmem:[%s15779_s6 + $0x160] sm:$0xff]  ;;  %v11060_v8 = vld [vmem:[%s15779_s6 + $0x158] sm:$0xff] }
 0x5ca   : > { %8272 = vmatpush.bf16.msra.mxu3 %v11061_v63  ;;  %v11068_v58 = vld [vmem:[%s15779_s6 + $0x198] sm:$0xff]  ;;  %v11059_v63 = vld [vmem:[%s15779_s6 + $0x150] sm:$0xff] }
 0x5cb   : > { %16192 = vst [vmem:[#allocation29_spill] sm:$0xff] %v14766_v48  ;;  %8459 = vmatpush.bf16.msra.mxu0 %v11068_v58 }
 0x5cd   : > { %v14757_v23 = vpop.f32.mrf.mxu2 }
 0x5ce   : > { %16191 = vst [vmem:[#allocation63_spill] sm:$0xff] %v14757_v23  ;;  %8273 = vmatpush.bf16.msra.mxu3 %v11060_v8  ;;  %v11085_v8 = vld [vmem:[%s15779_s6 + $0x220] sm:$0xff] }
 0x5cf   : > { %8121 = vmatmul.bf16.gmra.mxu2 %v11231_v17  ;;  %7925 = vmatmul.bf16.gmra.mxu1 %v16193_v10  ;;  %v14769_v0 = vpop.f32.mrf.mxu3  ;;  %v14775_v15 = vpop.f32.mrf.mxu0 }
 0x5d0   : > { %v7252_v42 = vpop.f32.mrf.mxu1  ;;  %8460 = vmatpush.bf16.msra.mxu0 %v11067_v56  ;;  %8830 = vmatpush.bf16.msra.mxu2 %v11085_v8  ;;  %v11065_v56 = vld [vmem:[%s15779_s6 + $0x180] sm:$0xff] }
 0x5d1   : > { %v14777_v23 = vadd.f32 %v7252_v42, %v6614_v37  ;;  %v16198_v42 = vld [vmem:[#allocation33_spill] sm:$0xff] }
 0x5d2   : > { %8274 = vmatpush.bf16.msra.mxu3 %v11059_v63  ;;  %v11057_v63 = vld [vmem:[%s15779_s6 + $0x140] sm:$0xff] }
 0x5d3   : > { %16195 = vst [vmem:[#allocation30_spill] sm:$0xff] %v14777_v23  ;;  %v11233_v8 = vld [vmem:[#allocation2 + $0xe0] sm:$0xff] }
 0x5d5   : > { %v14771_v55 = vpop.f32.mrf.mxu2 }
 0x5d6   : > { %16194 = vst [vmem:[#allocation34_spill] sm:$0xff] %v14771_v55 }
 0x5d7   : > { %v14779_v17 = vpop.f32.mrf.mxu3  ;;  %v14791_v10 = vpop.f32.mrf.mxu0 }
 0x5d8   : > { %v7254_v59 = vpop.f32.mrf.mxu1 }
 0x5d9   : > { %v14793_v37 = vadd.f32 %v7254_v59, %v6615_v52  ;;  %v6616_v52 = vadd.f32 %v14537_v3, %v14546_v60  ;;  %v11058_v3 = vld [vmem:[%s15779_s6 + $0x148] sm:$0xff] }
 0x5da   : > { %v11066_v60 = vld [vmem:[%s15779_s6 + $0x188] sm:$0xff]  ;;  %8275 = vmatpush.bf16.msra.mxu3 %v11058_v3 }
 0x5db   : > { %16197 = vst [vmem:[#allocation35_spill] sm:$0xff] %v14793_v37  ;;  %8461 = vmatpush.bf16.msra.mxu0 %v11066_v60 }
 0x5dd   : > { %v14781_v6 = vpop.f32.mrf.mxu2 }
 0x5de   : > { %16196 = vst [vmem:[#allocation69_spill] sm:$0xff] %v14781_v6  ;;  %8276 = vmatpush.bf16.msra.mxu3 %v11057_v63 }
 0x5df   : > { %8126 = vmatmul.bf16.gmra.mxu2 %v11232_v18  ;;  %7930 = vmatmul.bf16.gmra.mxu1 %v16198_v42  ;;  %v14802_v18 = vpop.f32.mrf.mxu3  ;;  %v14814_v37 = vpop.f32.mrf.mxu0 }
 0x5e0   : > { %v7257_v59 = vpop.f32.mrf.mxu1  ;;  %8462 = vmatpush.bf16.msra.mxu0 %v11065_v56 }
 0x5e1   : > { %v14819_v58 = vadd.f32 %v7257_v59, %v6616_v52  ;;  %v6617_v52 = vadd.f32 %v14548_v45, %v14562_v11  ;;  %v11077_v59 = vld [vmem:[%s15779_s6 + $0x1e0] sm:$0xff]  ;;  %v16203_v45 = vld [vmem:[#allocation18_spill] sm:$0xff] }
 0x5e2   : > { %8644 = vmatpush.bf16.msra.mxu1 %v11077_v59  ;;  %v16204_v11 = vld [vmem:[#allocation42_spill] sm:$0xff]  ;;  %v6619_v59 = vadd.f32 %v14578_v12, %v14591_v5  ;;  %v6620_v5 = vadd.f32 %v14593_v2, %v14607_v39 }
 0x5e3   : > { %16200 = vst [vmem:[#allocation72_spill] sm:$0xff] %v14819_v58  ;;  %8277 = vmatmul.bf16.vlgmr.msra.gmra.mxu3 %v16204_v11 }
 0x5e5   : > { %v14804_v23 = vpop.f32.mrf.mxu2 }
 0x5e6   : > { %16199 = vst [vmem:[#allocation31_spill] sm:$0xff] %v14804_v23 }
 0x5e7   : > { %v14827_v42 = vpop.f32.mrf.mxu3  ;;  %v14842_v60 = vpop.f32.mrf.mxu0 }
 0x5e8   : > { %v7259_v3 = vpop.f32.mrf.mxu1 }
 0x5e9   : > { %v14844_v58 = vadd.f32 %v7259_v3, %v6617_v52 }
 0x5eb   : > { %16202 = vst [vmem:[#allocation16_spill] sm:$0xff] %v14844_v58 }
 0x5ed   : > { %v14829_v48 = vpop.f32.mrf.mxu2 }
 0x5ee   : > { %16201 = vst [vmem:[#allocation38_spill] sm:$0xff] %v14829_v48  ;;  %v16205_v48 = vld [vmem:[#allocation77_spill] sm:$0xff] }
 0x5ef   : > { %8131 = vmatmul.bf16.gmra.mxu2 %v11233_v8  ;;  %7935 = vmatmul.bf16.gmra.mxu1 %v16203_v45  ;;  %v14849_v23 = vpop.f32.mrf.mxu3  ;;  %v6618_v8 = vadd.f32 %v14564_v13, %v14576_v30  ;;  %v14855_v62 = vpop.f32.mrf.mxu0  ;;  %v11084_v13 = vld [vmem:[%s15779_s6 + $0x218] sm:$0xff]  ;;  %v16210_v30 = vld [vmem:[#allocation23_spill] sm:$0xff] }
 0x5f0   : > { %8463 = vmatmul.bf16.vlgmr.msra.gmra.mxu0 %v16205_v48  ;;  %v7262_v55 = vpop.f32.mrf.mxu1  ;;  %v11234_v48 = vld [vmem:[#allocation2 + $0xf8] sm:$0xff]  ;;  %8831 = vmatpush.bf16.msra.mxu2 %v11084_v13 }
 0x5f1   : > { %v14857_v52 = vadd.f32 %v7262_v55, %v6618_v8  ;;  %v16211_v55 = vld [vmem:[#allocation48_spill] sm:$0xff]  ;;  %v16212_v8 = vld [vmem:[#allocation82_spill] sm:$0xff] }
 0x5f2   : > { %v11076_v13 = vld [vmem:[%s15779_s6 + $0x1d8] sm:$0xff] }
 0x5f3   : > { %16207 = vst [vmem:[#allocation18_spill] sm:$0xff] %v14857_v52  ;;  %8282 = vmatmul.bf16.gmra.mxu3 %v16211_v55  ;;  %8645 = vmatpush.bf16.msra.mxu1 %v11076_v13  ;;  %v16218_v13 = vld [vmem:[#allocation54_spill] sm:$0xff] }
 0x5f5   : > { %v14851_v6 = vpop.f32.mrf.mxu2 }
 0x5f6   : > { %16206 = vst [vmem:[#allocation33_spill] sm:$0xff] %v14851_v6 }
 0x5f7   : > { %v14859_v63 = vpop.f32.mrf.mxu3  ;;  %v14865_v45 = vpop.f32.mrf.mxu0 }
 0x5f8   : > { %v7264_v3 = vpop.f32.mrf.mxu1 }
 0x5f9   : > { %v14867_v11 = vadd.f32 %v7264_v3, %v6619_v59 }
 0x5fb   : > { %16209 = vst [vmem:[#allocation77_spill] sm:$0xff] %v14867_v11  ;;  %v11235_v11 = vld [vmem:[#allocation2 + $0x110] sm:$0xff] }
 0x5fd   : > { %v14861_v56 = vpop.f32.mrf.mxu2 }
 0x5fe   : > { %16208 = vst [vmem:[#allocation42_spill] sm:$0xff] %v14861_v56 }
 0x5ff   : > { %8136 = vmatmul.bf16.gmra.mxu2 %v11234_v48  ;;  %7940 = vmatmul.bf16.gmra.mxu1 %v16210_v30  ;;  %v14875_v52 = vpop.f32.mrf.mxu3  ;;  %v14881_v48 = vpop.f32.mrf.mxu0 }
 0x600   : > { %8468 = vmatmul.bf16.gmra.mxu0 %v16212_v8  ;;  %v7267_v59 = vpop.f32.mrf.mxu1  ;;  %v6621_v8 = vadd.f32 %v14609_v4, %v14629_v33 }
 0x601   : > { %v14883_v3 = vadd.f32 %v7267_v59, %v6620_v5  ;;  %v16217_v5 = vld [vmem:[#allocation37_spill] sm:$0xff]  ;;  %v7567_v59 = vadd.f32 %v14638_v28, %v14435_v51 }
 0x603   : > { %16214 = vst [vmem:[#allocation48_spill] sm:$0xff] %v14883_v3  ;;  %8287 = vmatmul.bf16.gmra.mxu3 %v16218_v13  ;;  %v16219_v3 = vld [vmem:[#allocation84_spill] sm:$0xff]  ;;  %v7800_v4 = vadd.f32 %v14631_v1, %v7567_v59  ;;  %v11083_v1 = vld [vmem:[%s15779_s6 + $0x210] sm:$0xff] }
 0x604   : > { %v16222_v59 = vld [vmem:[#allocation40_spill] sm:$0xff]  ;;  %8832 = vmatpush.bf16.msra.mxu2 %v11083_v1 }
 0x605   : > { %v14877_v12 = vpop.f32.mrf.mxu2 }
 0x606   : > { %16213 = vst [vmem:[#allocation23_spill] sm:$0xff] %v14877_v12 }
 0x607   : > { %v14888_v30 = vpop.f32.mrf.mxu3  ;;  %v14894_v39 = vpop.f32.mrf.mxu0 }
 0x608   : > { %v7269_v2 = vpop.f32.mrf.mxu1 }
 0x609   : > { %v14896_v58 = vadd.f32 %v7269_v2, %v6621_v8  ;;  %v7569_v2 = vadd.f32 %v14653_v47, %v14452_v34  ;;  %v7572_v34 = vadd.f32 %v14666_v25, %v14468_v27  ;;  %v16223_v47 = vld [vmem:[#allocation59_spill] sm:$0xff]  ;;  %v7574_v25 = vadd.f32 %v14680_v7, %v14486_v40  ;;  %v16226_v40 = vld [vmem:[#allocation65_spill] sm:$0xff]  ;;  %v16227_v7 = vld [vmem:[#allocation50_spill] sm:$0xff] }
 0x60a   : > { %v11075_v27 = vld [vmem:[%s15779_s6 + $0x1d0] sm:$0xff] }
 0x60b   : > { %16216 = vst [vmem:[#allocation103_spill] sm:$0xff] %v14896_v58  ;;  %v7801_v28 = vadd.f32 %v14647_v43, %v7569_v2  ;;  %v7802_v2 = vadd.f32 %v14660_v21, %v7572_v34  ;;  %8646 = vmatpush.bf16.msra.mxu1 %v11075_v27  ;;  %v11237_v21 = vld [vmem:[#allocation2 + $0x140] sm:$0xff] }
 0x60d   : > { %v14890_v55 = vpop.f32.mrf.mxu2 }
 0x60e   : > { %16215 = vst [vmem:[#allocation82_spill] sm:$0xff] %v14890_v55 }
 0x60f   : > { %8141 = vmatmul.bf16.gmra.mxu2 %v11235_v11  ;;  %7945 = vmatmul.bf16.gmra.mxu1 %v16217_v5  ;;  %v14903_v55 = vpop.f32.mrf.mxu3  ;;  %v14908_v33 = vpop.f32.mrf.mxu0 }
 0x610   : > { %8473 = vmatmul.bf16.gmra.mxu0 %v16219_v3  ;;  %v7906_v11 = vpop.f32.mrf.mxu1  ;;  %v11236_v3 = vld [vmem:[#allocation2 + $0x128] sm:$0xff] }
 0x611   : > { %v7986_v8 = vadd.f32 %v7906_v11, %v7800_v4  ;;  %v16224_v4 = vld [vmem:[#allocation46_spill] sm:$0xff] }
 0x613   : > { %8292 = vmatmul.bf16.gmra.mxu3 %v16223_v47  ;;  %v7803_v47 = vadd.f32 %v14671_v22, %v7574_v25 }
 0x615   : > { %v14905_v12 = vpop.f32.mrf.mxu2 }
 0x616   : > { %16220 = vst [vmem:[#allocation37_spill] sm:$0xff] %v14905_v12 }
 0x617   : > { %v14912_v5 = vpop.f32.mrf.mxu3  ;;  %v14917_v13 = vpop.f32.mrf.mxu0 }
 0x618   : > { %v7908_v58 = vpop.f32.mrf.mxu1 }
 0x619   : > { %v7987_v12 = vadd.f32 %v7908_v58, %v7801_v28 }
 0x61d   : > { %v14914_v51 = vpop.f32.mrf.mxu2 }
 0x61e   : > { %16221 = vst [vmem:[#allocation54_spill] sm:$0xff] %v14914_v51 }
 0x61f   : > { %8146 = vmatmul.bf16.gmra.mxu2 %v11236_v3  ;;  %7950 = vmatmul.bf16.gmra.mxu1 %v16222_v59  ;;  %v14927_v43 = vpop.f32.mrf.mxu3  ;;  %v14932_v28 = vpop.f32.mrf.mxu0 }
 0x620   : > { %8478 = vmatmul.bf16.gmra.mxu0 %v16224_v4  ;;  %v7911_v3 = vpop.f32.mrf.mxu1 }
 0x621   : > { %v7988_v51 = vadd.f32 %v7911_v3, %v7802_v2  ;;  %v16225_v2 = vld [vmem:[#allocation44_spill] sm:$0xff]  ;;  %v7577_v3 = vadd.f32 %v14697_v46, %v14499_v44 }
 0x623   : > { %8297 = vmatmul.bf16.gmra.mxu3 %v16226_v40  ;;  %v7804_v25 = vadd.f32 %v14690_v49, %v7577_v3  ;;  %v16228_v3 = vld [vmem:[#allocation52_spill] sm:$0xff] }
 0x625   : > { %v8092_v11 = vpop.f32.mrf.mxu2 }
 0x626   : > { %v14930_v58 = vadd.f32 %v8092_v11, %v7986_v8 }
 0x627   : > { %v14939_v1 = vpop.f32.mrf.mxu3  ;;  %v14944_v34 = vpop.f32.mrf.mxu0 }
 0x628   : > { %v7913_v4 = vpop.f32.mrf.mxu1 }
 0x629   : > { %v7989_v11 = vadd.f32 %v7913_v4, %v7803_v47  ;;  %v7579_v47 = vadd.f32 %v14712_v29, %v14514_v19  ;;  %v7582_v19 = vadd.f32 %v14723_v16, %v14529_v9  ;;  %v11074_v9 = vld [vmem:[%s15779_s6 + $0x1c8] sm:$0xff]  ;;  %v7584_v16 = vadd.f32 %v14738_v50, %v14541_v24 }
 0x62a   : > { %8647 = vmatpush.bf16.msra.mxu1 %v11074_v9  ;;  %v16233_v50 = vld [vmem:[#allocation74_spill] sm:$0xff] }
 0x62b   : > { %v7805_v46 = vadd.f32 %v14706_v61, %v7579_v47  ;;  %v16230_v61 = vld [vmem:[#allocation55_spill] sm:$0xff] }
 0x62d   : > { %v8094_v59 = vpop.f32.mrf.mxu2 }
 0x62e   : > { %v14942_v8 = vadd.f32 %v8094_v59, %v7987_v12 }
 0x62f   : > { %8151 = vmatmul.bf16.gmra.mxu2 %v11237_v21  ;;  %7955 = vmatmul.bf16.gmra.mxu1 %v16225_v2  ;;  %v14951_v27 = vpop.f32.mrf.mxu3  ;;  %v14956_v56 = vpop.f32.mrf.mxu0  ;;  %v11238_v2 = vld [vmem:[#allocation2 + $0x158] sm:$0xff] }
 0x630   : > { %8483 = vmatmul.bf16.gmra.mxu0 %v16227_v7  ;;  %v7916_v59 = vpop.f32.mrf.mxu1 }
 0x631   : > { %v7990_v21 = vadd.f32 %v7916_v59, %v7804_v25  ;;  %v7806_v59 = vadd.f32 %v14719_v35, %v7582_v19  ;;  %v7807_v35 = vadd.f32 %v14729_v20, %v7584_v16 }
 0x635   : > { %v8097_v22 = vpop.f32.mrf.mxu2 }
 0x636   : > { %v14954_v12 = vadd.f32 %v8097_v22, %v7988_v51  ;;  %v11082_v51 = vld [vmem:[%s15779_s6 + $0x208] sm:$0xff] }
 0x637   : > { %v14960_v4 = vpop.f32.mrf.mxu3  ;;  %8833 = vmatpush.bf16.msra.mxu2 %v11082_v51  ;;  %v14971_v29 = vpop.f32.mrf.mxu0  ;;  %v16229_v22 = vld [vmem:[#allocation70_spill] sm:$0xff] }
 0x638   : > { %v7918_v7 = vpop.f32.mrf.mxu1  ;;  %8302 = vmatmul.bf16.gmra.mxu3 %v16229_v22 }
 0x639   : > { %v7991_v49 = vadd.f32 %v7918_v7, %v7805_v46 }
 0x63d   : > { %v8099_v44 = vpop.f32.mrf.mxu2 }
 0x63e   : > { %v14963_v40 = vadd.f32 %v8099_v44, %v7989_v11 }
 0x63f   : > { %8156 = vmatmul.bf16.gmra.mxu2 %v11238_v2  ;;  %7960 = vmatmul.bf16.gmra.mxu1 %v16228_v3  ;;  %v14975_v11 = vpop.f32.mrf.mxu3  ;;  %v14985_v2 = vpop.f32.mrf.mxu0 }
 0x640   : > { %8488 = vmatmul.bf16.gmra.mxu0 %v16230_v61  ;;  %v7921_v44 = vpop.f32.mrf.mxu1  ;;  %v16231_v61 = vld [vmem:[#allocation57_spill] sm:$0xff] }
 0x641   : > { %v7992_v46 = vadd.f32 %v7921_v44, %v7806_v59  ;;  %v16234_v59 = vld [vmem:[#allocation61_spill] sm:$0xff] }
 0x645   : > { %v8102_v25 = vpop.f32.mrf.mxu2 }
 0x646   : > { %v14978_v47 = vadd.f32 %v8102_v25, %v7990_v21  ;;  %v11239_v21 = vld [vmem:[#allocation2 + $0x170] sm:$0xff] }
 0x647   : > { %v14987_v7 = vpop.f32.mrf.mxu3  ;;  %v16232_v25 = vld [vmem:[#allocation99_spill] sm:$0xff] }
 0x648   : > { %v7923_v19 = vpop.f32.mrf.mxu1  ;;  %v7587_v24 = vadd.f32 %v14755_v36, %v16232_v25  ;;  %8307 = vmatmul.bf16.gmra.mxu3 %v16233_v50  ;;  %v15008_v36 = vpop.f32.mrf.mxu0  ;;  %v15023_v25 = vld [vmem:[%s15006_s26 + $0x10] sm:$0xff] }
 0x649   : > { %v7993_v22 = vadd.f32 %v7923_v19, %v7807_v35  ;;  %16236 = vst [vmem:[#allocation40_spill] sm:$0xff] %v15008_v36  ;;  %v15013_v35 = vld [vmem:[%s15006_s26] sm:$0xff]  ;;  %v15018_v19 = vld [vmem:[%s15006_s26 + $0x8] sm:$0xff] }
 0x64a   : > { %v7808_v20 = vadd.f32 %v14748_v14, %v7587_v24  ;;  %16237 = vst [vmem:[#allocation59_spill] sm:$0xff] %v15013_v35  ;;  %v9017_v24 = vsel %vm9015_vm13, %v15018_v19, 0.0  ;;  %v9094_v50 = vmul.f32 %v15018_v19, %v15018_v19  ;;  %v11081_v36 = vld [vmem:[%s15779_s6 + $0x200] sm:$0xff] }
 0x64b   : > { %16239 = vst [vmem:[#allocation46_spill] sm:$0xff] %v15018_v19  ;;  %v9019_v19 = vsel %vm9015_vm13, %v15023_v25, 0.0  ;;  %8834 = vmatpush.bf16.msra.mxu2 %v11081_v36  ;;  %v15064_v36 = vld [vmem:[%s15006_s26 + $0x20] sm:$0xff] }
 0x64c   : > { %16240 = vst [vmem:[#allocation44_spill] sm:$0xff] %v15023_v25 }
 0x64d   : > { %v8104_v51 = vpop.f32.mrf.mxu2  ;;  %16246 = vst [vmem:[#allocation52_spill] sm:$0xff] %v15064_v36 }
 0x64e   : > { %v14990_v3 = vadd.f32 %v8104_v51, %v7991_v49 }
 0x64f   : > { %8161 = vmatmul.bf16.gmra.mxu2 %v11239_v21  ;;  %7965 = vmatmul.bf16.gmra.mxu1 %v16231_v61  ;;  %v14998_v44 = vpop.f32.mrf.mxu3  ;;  %v16238_v21 = vld [vmem:[#allocation47_spill] sm:$0xff]  ;;  %v9016_v61 = vsel %vm9015_vm13, %v15013_v35, 0.0 }
 0x650   : > { %8493 = vmatmul.bf16.gmra.mxu0 %v16234_v59  ;;  %16235 = vst [vmem:[#allocation84_spill] sm:$0xff] %v14998_v44  ;;  %v7926_v16 = vpop.f32.mrf.mxu1  ;;  %v7589_v14 = vadd.f32 %v14769_v0, %v16238_v21  ;;  %v15041_v44 = vpop.f32.mrf.mxu0 }
 0x651   : > { %v7994_v51 = vadd.f32 %v7926_v16, %v7808_v20  ;;  %v11240_v20 = vld [vmem:[#allocation2 + $0x188] sm:$0xff] }
 0x652   : > { %v7809_v0 = vadd.f32 %v14764_v38, %v7589_v14  ;;  %v9095_v38 = vmul.f32 %v15023_v25, %v15023_v25  ;;  %v9126_v14 = vsel %vm9015_vm13, %v9094_v50, 0.0 }
 0x654   : > { %v9128_v50 = vsel %vm9015_vm13, %v9095_v38, 0.0  ;;  %v9023_v38 = vsel %vm9015_vm13, %v15064_v36, 0.0 }
 0x655   : > { %v8107_v9 = vpop.f32.mrf.mxu2 }
 0x656   : > { %v15010_v49 = vadd.f32 %v8107_v9, %v7992_v46  ;;  %v9093_v46 = vmul.f32 %v15013_v35, %v15013_v35  ;;  %v9018_v35 = vadd.f32 %v9017_v24, %v9016_v61  ;;  %v15051_v61 = vld [vmem:[%s15006_s26 + $0x18] sm:$0xff]  ;;  %v16244_v24 = vld [vmem:[#allocation79_spill] sm:$0xff] }
 0x657   : > { %v15031_v59 = vpop.f32.mrf.mxu3  ;;  %16243 = vst [vmem:[#allocation50_spill] sm:$0xff] %v15051_v61 }
 0x658   : > { %16241 = vst [vmem:[#allocation65_spill] sm:$0xff] %v15031_v59  ;;  %v7928_v21 = vpop.f32.mrf.mxu1  ;;  %v16242_v59 = vld [vmem:[#allocation62_spill] sm:$0xff]  ;;  %8312 = vmatmul.bf16.gmra.mxu3 %v16244_v24 }
 0x659   : > { %v7995_v6 = vadd.f32 %v7928_v21, %v7809_v0  ;;  %v16245_v0 = vld [vmem:[#allocation67_spill] sm:$0xff]  ;;  %v9021_v21 = vsel %vm9015_vm13, %v15051_v61, 0.0 }
 0x65d   : > { %v8109_v9 = vpop.f32.mrf.mxu2 }
 0x65e   : > { %v15034_v16 = vadd.f32 %v8109_v9, %v7993_v22  ;;  %v9125_v22 = vsel %vm9015_vm13, %v9093_v46, 0.0  ;;  %v7592_v9 = vadd.f32 %v14779_v17, %v14585_v41  ;;  %v9096_v46 = vmul.f32 %v15051_v61, %v15051_v61 }
 0x65f   : > { %8166 = vmatmul.bf16.gmra.mxu2 %v11240_v20  ;;  %7970 = vmatmul.bf16.gmra.mxu1 %v16242_v59  ;;  %v9020_v20 = vadd.f32 %v9019_v19, %v9018_v35  ;;  %v9127_v59 = vadd.f32 %v9126_v14, %v9125_v22  ;;  %v15060_v25 = vpop.f32.mrf.mxu3  ;;  %v11073_v22 = vld [vmem:[%s15779_s6 + $0x1c0] sm:$0xff]  ;;  %v9097_v61 = vmul.f32 %v15064_v36, %v15064_v36  ;;  %v16251_v36 = vld [vmem:[#allocation68_spill] sm:$0xff] }
 0x660   : > { %8498 = vmatmul.bf16.gmra.mxu0 %v16245_v0  ;;  %v7810_v17 = vadd.f32 %v14775_v15, %v7592_v9  ;;  %v7931_v35 = vpop.f32.mrf.mxu1  ;;  %v9130_v15 = vsel %vm9015_vm13, %v9096_v46, 0.0  ;;  %8648 = vmatpush.bf16.msra.mxu1 %v11073_v22  ;;  %v15079_v9 = vld [vmem:[%s15006_s26 + $0x28] sm:$0xff]  ;;  %v15093_v22 = vld [vmem:[%s15006_s26 + $0x30] sm:$0xff] }
 0x661   : > { %v9022_v14 = vadd.f32 %v9021_v21, %v9020_v20  ;;  %v9129_v0 = vadd.f32 %v9128_v50, %v9127_v59  ;;  %16248 = vst [vmem:[#allocation55_spill] sm:$0xff] %v15079_v9  ;;  %v9025_v59 = vsel %vm9015_vm13, %v15079_v9, 0.0  ;;  %v9098_v21 = vmul.f32 %v15079_v9, %v15079_v9 }
 0x662   : > { %v7996_v19 = vadd.f32 %v7931_v35, %v7810_v17  ;;  %v9132_v50 = vsel %vm9015_vm13, %v9097_v61, 0.0  ;;  %v9027_v61 = vsel %vm9015_vm13, %v15093_v22, 0.0  ;;  %v9099_v9 = vmul.f32 %v15093_v22, %v15093_v22 }
 0x663   : > { %v9024_v17 = vadd.f32 %v9023_v38, %v9022_v14  ;;  %v9131_v20 = vadd.f32 %v9130_v15, %v9129_v0 }
 0x665   : > { %v8112_v41 = vpop.f32.mrf.mxu2  ;;  %v9026_v15 = vadd.f32 %v9025_v59, %v9024_v17  ;;  %v16253_v17 = vld [vmem:[#allocation92_spill] sm:$0xff] }
 0x666   : > { %v15066_v24 = vadd.f32 %v8112_v41, %v7994_v51  ;;  %v7594_v51 = vadd.f32 %v14802_v18, %v14603_v57  ;;  %v15081_v41 = vpop.f32.mrf.mxu0  ;;  %v16249_v18 = vld [vmem:[#allocation73_spill] sm:$0xff] }
 0x667   : > { %v15088_v46 = vpop.f32.mrf.mxu3 }
 0x668   : > { %16247 = vst [vmem:[#allocation70_spill] sm:$0xff] %v15066_v24  ;;  %v7811_v57 = vadd.f32 %v14791_v10, %v7594_v51  ;;  %v7933_v0 = vpop.f32.mrf.mxu1  ;;  %v9133_v24 = vadd.f32 %v9132_v50, %v9131_v20  ;;  %v9134_v10 = vsel %vm9015_vm13, %v9098_v21, 0.0  ;;  %v7597_v51 = vadd.f32 %v14827_v42, %v14620_v26 }
 0x669   : > { %v9028_v20 = vadd.f32 %v9027_v61, %v9026_v15 }
 0x66a   : > { %v7997_v38 = vadd.f32 %v7933_v0, %v7811_v57  ;;  %v9136_v57 = vsel %vm9015_vm13, %v9099_v9, 0.0  ;;  %v15121_v0 = vld [vmem:[%s15006_s26 + $0x40] sm:$0xff] }
 0x66b   : > { %16254 = vst [vmem:[#allocation99_spill] sm:$0xff] %v15121_v0  ;;  %v9101_v9 = vmul.f32 %v15121_v0, %v15121_v0 }
 0x66d   : > { %v8114_v35 = vpop.f32.mrf.mxu2 }
 0x66e   : > { %v15095_v14 = vadd.f32 %v8114_v35, %v7995_v6  ;;  %v15106_v6 = vld [vmem:[%s15006_s26 + $0x38] sm:$0xff]  ;;  %v16252_v35 = vld [vmem:[#allocation83_spill] sm:$0xff]  ;;  %v15110_v59 = vpop.f32.mrf.mxu0 }
 0x66f   : > { %8835 = vmatmul.bf16.vlgmr.msra.gmra.mxu2 %v16249_v18  ;;  %7975 = vmatmul.bf16.gmra.mxu1 %v16251_v36  ;;  %v9135_v36 = vadd.f32 %v9134_v10, %v9133_v24  ;;  %v9029_v50 = vsel %vm9015_vm13, %v15106_v6, 0.0  ;;  %v9100_v21 = vmul.f32 %v15106_v6, %v15106_v6  ;;  %v15117_v26 = vpop.f32.mrf.mxu3  ;;  %v7812_v18 = vadd.f32 %v14814_v37, %v7597_v51  ;;  %v15133_v51 = vld [vmem:[%s15006_s26 + $0x48] sm:$0xff] }
 0x670   : > { %16250 = vst [vmem:[#allocation57_spill] sm:$0xff] %v15095_v14  ;;  %8317 = vmatmul.bf16.gmra.mxu3 %v16252_v35  ;;  %8503 = vmatmul.bf16.gmra.mxu0 %v16253_v17  ;;  %v7936_v24 = vpop.f32.mrf.mxu1  ;;  %v9030_v10 = vadd.f32 %v9029_v50, %v9028_v20  ;;  %v9031_v17 = vsel %vm9015_vm13, %v15121_v0, 0.0  ;;  %v7599_v37 = vadd.f32 %v14849_v23, %v14640_v31  ;;  %v9033_v20 = vsel %vm9015_vm13, %v15133_v51, 0.0  ;;  %v15145_v31 = vld [vmem:[%s15006_s26 + $0x50] sm:$0xff] }
 0x671   : > { %v7998_v61 = vadd.f32 %v7936_v24, %v7812_v18  ;;  %v9137_v35 = vadd.f32 %v9136_v57, %v9135_v36  ;;  %v9138_v14 = vsel %vm9015_vm13, %v9100_v21, 0.0  ;;  %16256 = vst [vmem:[#allocation61_spill] sm:$0xff] %v15133_v51  ;;  %v9102_v36 = vmul.f32 %v15133_v51, %v15133_v51  ;;  %v16257_v24 = vld [vmem:[#allocation78_spill] sm:$0xff]  ;;  %v16260_v51 = vld [vmem:[#allocation71_spill] sm:$0xff] }
 0x672   : > { %v9140_v50 = vsel %vm9015_vm13, %v9101_v9, 0.0  ;;  %v7813_v21 = vadd.f32 %v14842_v60, %v7599_v37  ;;  %16258 = vst [vmem:[#allocation47_spill] sm:$0xff] %v15145_v31  ;;  %v9035_v9 = vsel %vm9015_vm13, %v15145_v31, 0.0  ;;  %v9103_v60 = vmul.f32 %v15145_v31, %v15145_v31  ;;  %v8995_v31 = vld [vmem:[%s15006_s26 + $0x60] sm:$0xff] }
 0x673   : > { %v9142_v37 = vsel %vm9015_vm13, %v9102_v36, 0.0 }
 0x675   : > { %v8117_v42 = vpop.f32.mrf.mxu2 }
 0x676   : > { %v15123_v15 = vadd.f32 %v8117_v42, %v7996_v19  ;;  %v9032_v19 = vadd.f32 %v9031_v17, %v9030_v10  ;;  %v9139_v42 = vadd.f32 %v9138_v14, %v9137_v35  ;;  %v15147_v23 = vpop.f32.mrf.mxu0 }
 0x677   : > { %v15140_v57 = vpop.f32.mrf.mxu3 }
 0x678   : > { %16255 = vst [vmem:[#allocation74_spill] sm:$0xff] %v15123_v15  ;;  %v7938_v10 = vpop.f32.mrf.mxu1  ;;  %v9034_v17 = vadd.f32 %v9033_v20, %v9032_v19  ;;  %v9141_v15 = vadd.f32 %v9140_v50, %v9139_v42  ;;  %v9144_v50 = vsel %vm9015_vm13, %v9103_v60, 0.0 }
 0x679   : > { %v7999_v35 = vadd.f32 %v7938_v10, %v7813_v21  ;;  %v16262_v21 = vld [vmem:[#allocation76_spill] sm:$0xff] }
 0x67a   : > { %v9036_v19 = vadd.f32 %v9035_v9, %v9034_v17  ;;  %v9143_v42 = vadd.f32 %v9142_v37, %v9141_v15  ;;  %v9039_v17 = vsel %vm9015_vm13, %v8995_v31, 0.0  ;;  %v9105_v9 = vmul.f32 %v8995_v31, %v8995_v31  ;;  %v8997_v31 = vld [vmem:[%s15006_s26 + $0x70] sm:$0xff] }
 0x67b   : > { %v7604_v37 = vadd.f32 %v14875_v52, %v14668_v54 }
 0x67d   : > { %v8119_v18 = vpop.f32.mrf.mxu2 }
 0x67e   : > { %v15149_v14 = vadd.f32 %v8119_v18, %v7997_v38  ;;  %v8994_v38 = vld [vmem:[%s15006_s26 + $0x58] sm:$0xff]  ;;  %v16261_v18 = vld [vmem:[#allocation41_spill] sm:$0xff]  ;;  %v15170_v15 = vpop.f32.mrf.mxu0 }
 0x67f   : > { %8840 = vmatmul.bf16.gmra.mxu2 %v16257_v24  ;;  %7980 = vmatmul.bf16.gmra.mxu1 %v16260_v51  ;;  %v7602_v24 = vadd.f32 %v14859_v63, %v14655_v53  ;;  %v9037_v51 = vsel %vm9015_vm13, %v8994_v38, 0.0  ;;  %v9104_v20 = vmul.f32 %v8994_v38, %v8994_v38  ;;  %v15164_v10 = vpop.f32.mrf.mxu3  ;;  %v8996_v38 = vld [vmem:[%s15006_s26 + $0x68] sm:$0xff] }
 0x680   : > { %16259 = vst [vmem:[#allocation62_spill] sm:$0xff] %v15149_v14  ;;  %8322 = vmatmul.bf16.gmra.mxu3 %v16261_v18  ;;  %8508 = vmatmul.bf16.gmra.mxu0 %v16262_v21  ;;  %v7941_v63 = vpop.f32.mrf.mxu1  ;;  %v9038_v0 = vadd.f32 %v9037_v51, %v9036_v19  ;;  %v9145_v21 = vadd.f32 %v9144_v50, %v9143_v42  ;;  %v9148_v19 = vsel %vm9015_vm13, %v9105_v9, 0.0  ;;  %v9043_v9 = vsel %vm9015_vm13, %v8997_v31, 0.0 }
 0x681   : > { %v7814_v36 = vadd.f32 %v14855_v62, %v7602_v24  ;;  %v9146_v60 = vsel %vm9015_vm13, %v9104_v20, 0.0  ;;  %v7815_v50 = vadd.f32 %v14865_v45, %v7604_v37  ;;  %v7607_v37 = vadd.f32 %v14888_v30, %v14682_v32  ;;  %v8999_v32 = vld [vmem:[%s15006_s26 + $0x80] sm:$0xff] }
 0x682   : > { %v9040_v62 = vadd.f32 %v9039_v17, %v9038_v0  ;;  %v9147_v24 = vadd.f32 %v9146_v60, %v9145_v21  ;;  %v11241_v17 = vld [vmem:[#allocation2 + $0x38] sm:$0xff]  ;;  %v9107_v60 = vmul.f32 %v8997_v31, %v8997_v31 }
 0x683   : > { %v8000_v18 = vadd.f32 %v7941_v63, %v7814_v36  ;;  %v16263_v36 = vld [vmem:[#allocation95_spill] sm:$0xff] }
 0x684   : > { %v9149_v21 = vadd.f32 %v9148_v19, %v9147_v24 }
 0x685   : > { %v8122_v14 = vpop.f32.mrf.mxu2 }
 0x686   : > { %v15168_v53 = vadd.f32 %v8122_v14, %v7998_v61  ;;  %v9041_v61 = vsel %vm9015_vm13, %v8996_v38, 0.0  ;;  %v9106_v14 = vmul.f32 %v8996_v38, %v8996_v38  ;;  %v8998_v38 = vld [vmem:[%s15006_s26 + $0x78] sm:$0xff] }
 0x687   : > { %v8278_v42 = vpop.f32.mrf.mxu3  ;;  %v9042_v63 = vadd.f32 %v9041_v61, %v9040_v62  ;;  %v9045_v61 = vsel %vm9015_vm13, %v8998_v38, 0.0  ;;  %v9108_v19 = vmul.f32 %v8998_v38, %v8998_v38  ;;  %v16266_v38 = vld [vmem:[#allocation56_spill] sm:$0xff] }
 0x688   : > { %v15183_v20 = vadd.f32 %v8278_v42, %v14930_v58  ;;  %v7943_v52 = vpop.f32.mrf.mxu1  ;;  %v9150_v45 = vsel %vm9015_vm13, %v9106_v14, 0.0  ;;  %v15192_v58 = vpop.f32.mrf.mxu0  ;;  %v16265_v42 = vld [vmem:[#allocation81_spill] sm:$0xff] }
 0x689   : > { %v8001_v0 = vadd.f32 %v7943_v52, %v7815_v50  ;;  %v9044_v62 = vadd.f32 %v9043_v9, %v9042_v63  ;;  %v9151_v24 = vadd.f32 %v9150_v45, %v9149_v21  ;;  %v9047_v9 = vsel %vm9015_vm13, %v8999_v32, 0.0 }
 0x68a   : > { %v9109_v45 = vmul.f32 %v8999_v32, %v8999_v32 }
 0x68b   : > { %v9046_v63 = vadd.f32 %v9045_v61, %v9044_v62 }
 0x68c   : > { %v9156_v62 = vsel %vm9015_vm13, %v9109_v45, 0.0 }
 0x68d   : > { %v8124_v51 = vpop.f32.mrf.mxu2 }
 0x68e   : > { %v15185_v54 = vadd.f32 %v8124_v51, %v7999_v35  ;;  %v16264_v35 = vld [vmem:[#allocation49_spill] sm:$0xff]  ;;  %v9152_v51 = vsel %vm9015_vm13, %v9107_v60, 0.0  ;;  %v9154_v60 = vsel %vm9015_vm13, %v9108_v19, 0.0  ;;  %v9001_v19 = vld [vmem:[%s15006_s26 + $0x90] sm:$0xff] }
 0x68f   : > { %8845 = vmatmul.bf16.gmra.mxu2 %v16263_v36  ;;  %8649 = vmatmul.bf16.vlgmr.msra.gmra.mxu1 %v11241_v17  ;;  %v8280_v50 = vpop.f32.mrf.mxu3  ;;  %v7816_v36 = vadd.f32 %v14881_v48, %v7607_v37  ;;  %v9153_v21 = vadd.f32 %v9152_v51, %v9151_v24  ;;  %v9000_v48 = vld [vmem:[%s15006_s26 + $0x88] sm:$0xff]  ;;  %v9048_v37 = vadd.f32 %v9047_v9, %v9046_v63  ;;  %v11242_v9 = vld [vmem:[#allocation2 + $0x50] sm:$0xff]  ;;  %v9051_v45 = vsel %vm9015_vm13, %v9001_v19, 0.0 }
 0x690   : > { %8327 = vmatmul.bf16.gmra.mxu3 %v16264_v35  ;;  %8513 = vmatmul.bf16.gmra.mxu0 %v16265_v42  ;;  %v15201_v30 = vadd.f32 %v8280_v50, %v14942_v8  ;;  %v7946_v52 = vpop.f32.mrf.mxu1  ;;  %v7609_v35 = vadd.f32 %v14903_v55, %v16266_v38  ;;  %v15210_v8 = vpop.f32.mrf.mxu0  ;;  %v9110_v50 = vmul.f32 %v9000_v48, %v9000_v48  ;;  %v16268_v38 = vld [vmem:[#allocation91_spill] sm:$0xff] }
 0x691   : > { %v8002_v17 = vadd.f32 %v7946_v52, %v7816_v36  ;;  %v9155_v42 = vadd.f32 %v9154_v60, %v9153_v21  ;;  %v9111_v60 = vmul.f32 %v9001_v19, %v9001_v19 }
 0x692   : > { %v7817_v51 = vadd.f32 %v14894_v39, %v7609_v35  ;;  %v9158_v39 = vsel %vm9015_vm13, %v9110_v50, 0.0  ;;  %v7612_v35 = vadd.f32 %v14912_v5, %v16268_v38 }
 0x693   : > { %v9157_v21 = vadd.f32 %v9156_v62, %v9155_v42 }
 0x694   : > { %v7818_v50 = vadd.f32 %v14908_v33, %v7612_v35  ;;  %v9004_v35 = vld [vmem:[%s15006_s26 + $0xa8] sm:$0xff] }
 0x695   : > { %v8127_v14 = vpop.f32.mrf.mxu2 }
 0x696   : > { %v15203_v31 = vadd.f32 %v8127_v14, %v8000_v18  ;;  %v9049_v18 = vsel %vm9015_vm13, %v9000_v48, 0.0  ;;  %v16267_v14 = vld [vmem:[#allocation43_spill] sm:$0xff]  ;;  %v9002_v48 = vld [vmem:[%s15006_s26 + $0x98] sm:$0xff] }
 0x697   : > { %v8283_v24 = vpop.f32.mrf.mxu3  ;;  %v9050_v63 = vadd.f32 %v9049_v18, %v9048_v37  ;;  %v9053_v37 = vsel %vm9015_vm13, %v9002_v48, 0.0  ;;  %v9112_v42 = vmul.f32 %v9002_v48, %v9002_v48  ;;  %v9160_v18 = vsel %vm9015_vm13, %v9111_v60, 0.0  ;;  %v16271_v48 = vld [vmem:[#allocation94_spill] sm:$0xff] }
 0x698   : > { %v15218_v55 = vadd.f32 %v8283_v24, %v14954_v12  ;;  %v7948_v32 = vpop.f32.mrf.mxu1  ;;  %v16269_v12 = vld [vmem:[#allocation53_spill] sm:$0xff]  ;;  %v15233_v19 = vpop.f32.mrf.mxu0  ;;  %v7614_v33 = vadd.f32 %v14927_v43, %v16271_v48 }
 0x699   : > { %v8003_v52 = vadd.f32 %v7948_v32, %v7817_v51  ;;  %v9052_v24 = vadd.f32 %v9051_v45, %v9050_v63  ;;  %v9162_v38 = vsel %vm9015_vm13, %v9112_v42, 0.0  ;;  %v16273_v48 = vld [vmem:[#allocation25_spill] sm:$0xff] }
 0x69d   : > { %v8129_v61 = vpop.f32.mrf.mxu2 }
 0x69e   : > { %v15220_v36 = vadd.f32 %v8129_v61, %v8001_v0  ;;  %v16270_v0 = vld [vmem:[#allocation96_spill] sm:$0xff]  ;;  %v9159_v61 = vadd.f32 %v9158_v39, %v9157_v21 }
 0x69f   : > { %8850 = vmatmul.bf16.gmra.mxu2 %v16267_v14  ;;  %8654 = vmatmul.bf16.gmra.mxu1 %v11242_v9  ;;  %v8285_v62 = vpop.f32.mrf.mxu3  ;;  %v9003_v14 = vld [vmem:[%s15006_s26 + $0xa0] sm:$0xff]  ;;  %v9054_v9 = vadd.f32 %v9053_v37, %v9052_v24  ;;  %v16272_v37 = vld [vmem:[#allocation100_spill] sm:$0xff] }
 0x6a0   : > { %8332 = vmatmul.bf16.gmra.mxu3 %v16269_v12  ;;  %8518 = vmatmul.bf16.gmra.mxu0 %v16270_v0  ;;  %v15236_v5 = vadd.f32 %v8285_v62, %v14963_v40  ;;  %v7951_v63 = vpop.f32.mrf.mxu1  ;;  %v9161_v45 = vadd.f32 %v9160_v18, %v9159_v61  ;;  %v9055_v60 = vsel %vm9015_vm13, %v9003_v14, 0.0  ;;  %v9113_v39 = vmul.f32 %v9003_v14, %v9003_v14  ;;  %v9005_v18 = vld [vmem:[%s15006_s26 + $0xb0] sm:$0xff] }
 0x6a1   : > { %v8004_v21 = vadd.f32 %v7951_v63, %v7818_v50  ;;  %v9056_v12 = vadd.f32 %v9055_v60, %v9054_v9  ;;  %v9057_v40 = vsel %vm9015_vm13, %v9004_v35, 0.0  ;;  %v7819_v61 = vadd.f32 %v14917_v13, %v7614_v33  ;;  %v11243_v60 = vld [vmem:[#allocation2 + $0x68] sm:$0xff]  ;;  %v9006_v33 = vld [vmem:[%s15006_s26 + $0xb8] sm:$0xff] }
 0x6a2   : > { %v9163_v0 = vadd.f32 %v9162_v38, %v9161_v45  ;;  %v9164_v62 = vsel %vm9015_vm13, %v9113_v39, 0.0  ;;  %v15255_v45 = vpop.f32.mrf.mxu0  ;;  %v9059_v13 = vsel %vm9015_vm13, %v9005_v18, 0.0  ;;  %v9115_v39 = vmul.f32 %v9005_v18, %v9005_v18 }
 0x6a3   : > { %v9058_v63 = vadd.f32 %v9057_v40, %v9056_v12  ;;  %v9061_v40 = vsel %vm9015_vm13, %v9006_v33, 0.0 }
 0x6a4   : > { %v9165_v9 = vadd.f32 %v9164_v62, %v9163_v0  ;;  %v9116_v62 = vmul.f32 %v9006_v33, %v9006_v33 }
 0x6a5   : > { %v8132_v51 = vpop.f32.mrf.mxu2  ;;  %v9060_v12 = vadd.f32 %v9059_v13, %v9058_v63 }
 0x6a6   : > { %v15238_v32 = vadd.f32 %v8132_v51, %v8002_v17  ;;  %v9114_v17 = vmul.f32 %v9004_v35, %v9004_v35  ;;  %v16275_v35 = vld [vmem:[#allocation98_spill] sm:$0xff] }
 0x6a7   : > { %v8288_v51 = vpop.f32.mrf.mxu3  ;;  %v9062_v63 = vadd.f32 %v9061_v40, %v9060_v12 }
 0x6a8   : > { %v15251_v42 = vadd.f32 %v8288_v51, %v14978_v47  ;;  %v7953_v50 = vpop.f32.mrf.mxu1  ;;  %v9166_v38 = vsel %vm9015_vm13, %v9114_v17, 0.0  ;;  %v7617_v47 = vadd.f32 %v14939_v1, %v16273_v48  ;;  %v9168_v51 = vsel %vm9015_vm13, %v9115_v39, 0.0  ;;  %v16276_v48 = vld [vmem:[#allocation63_spill] sm:$0xff] }
 0x6a9   : > { %v8005_v14 = vadd.f32 %v7953_v50, %v7819_v61  ;;  %v9167_v0 = vadd.f32 %v9166_v38, %v9165_v9  ;;  %v9170_v39 = vsel %vm9015_vm13, %v9116_v62, 0.0  ;;  %v7619_v33 = vadd.f32 %v14951_v27, %v16276_v48  ;;  %v9009_v62 = vld [vmem:[%s15006_s26 + $0xd0] sm:$0xff] }
 0x6aa   : > { %v7820_v17 = vadd.f32 %v14932_v28, %v7617_v47  ;;  %v9008_v28 = vld [vmem:[%s15006_s26 + $0xc8] sm:$0xff]  ;;  %v15278_v47 = vpop.f32.mrf.mxu0 }
 0x6ab   : > { %v9169_v9 = vadd.f32 %v9168_v51, %v9167_v0  ;;  %v7821_v51 = vadd.f32 %v14944_v34, %v7619_v33  ;;  %v9010_v33 = vld [vmem:[%s15006_s26 + $0xd8] sm:$0xff] }
 0x6ad   : > { %v8134_v24 = vpop.f32.mrf.mxu2 }
 0x6ae   : > { %v15253_v43 = vadd.f32 %v8134_v24, %v8003_v52  ;;  %v16274_v52 = vld [vmem:[#allocation60_spill] sm:$0xff] }
 0x6af   : > { %8855 = vmatmul.bf16.gmra.mxu2 %v16272_v37  ;;  %8659 = vmatmul.bf16.gmra.mxu1 %v11243_v60  ;;  %v8290_v24 = vpop.f32.mrf.mxu3  ;;  %v9007_v37 = vld [vmem:[%s15006_s26 + $0xc0] sm:$0xff] }
 0x6b0   : > { %8337 = vmatmul.bf16.gmra.mxu3 %v16274_v52  ;;  %8523 = vmatmul.bf16.gmra.mxu0 %v16275_v35  ;;  %v15269_v1 = vadd.f32 %v8290_v24, %v14990_v3  ;;  %v7956_v50 = vpop.f32.mrf.mxu1  ;;  %v9063_v13 = vsel %vm9015_vm13, %v9007_v37, 0.0  ;;  %v9117_v38 = vmul.f32 %v9007_v37, %v9007_v37  ;;  %v9171_v52 = vadd.f32 %v9170_v39, %v9169_v9  ;;  %v16277_v24 = vld [vmem:[#allocation85_spill] sm:$0xff]  ;;  %v16278_v39 = vld [vmem:[#allocation34_spill] sm:$0xff] }
 0x6b1   : > { %v8006_v60 = vadd.f32 %v7956_v50, %v7820_v17  ;;  %v9064_v3 = vadd.f32 %v9063_v13, %v9062_v63  ;;  %v9118_v35 = vmul.f32 %v9008_v28, %v9008_v28  ;;  %v11244_v9 = vld [vmem:[#allocation2 + $0x80] sm:$0xff]  ;;  %v9067_v13 = vsel %vm9015_vm13, %v9009_v62, 0.0 }
 0x6b2   : > { %v9172_v12 = vsel %vm9015_vm13, %v9117_v38, 0.0  ;;  %v9119_v38 = vmul.f32 %v9009_v62, %v9009_v62  ;;  %v7622_v48 = vadd.f32 %v14960_v4, %v16278_v39  ;;  %v9011_v4 = vld [vmem:[%s15006_s26 + $0xe0] sm:$0xff] }
 0x6b3   : > { %v9173_v63 = vadd.f32 %v9172_v12, %v9171_v52  ;;  %v9174_v34 = vsel %vm9015_vm13, %v9118_v35, 0.0  ;;  %v9069_v52 = vsel %vm9015_vm13, %v9010_v33, 0.0  ;;  %v16281_v39 = vld [vmem:[#allocation69_spill] sm:$0xff] }
 0x6b4   : > { %v9176_v12 = vsel %vm9015_vm13, %v9119_v38, 0.0 }
 0x6b5   : > { %v8137_v61 = vpop.f32.mrf.mxu2 }
 0x6b6   : > { %v15271_v18 = vadd.f32 %v8137_v61, %v8004_v21  ;;  %v9065_v21 = vsel %vm9015_vm13, %v9008_v28, 0.0 }
 0x6b7   : > { %v8293_v0 = vpop.f32.mrf.mxu3  ;;  %v9066_v50 = vadd.f32 %v9065_v21, %v9064_v3  ;;  %v15297_v3 = vpop.f32.mrf.mxu0  ;;  %v9120_v21 = vmul.f32 %v9010_v33, %v9010_v33  ;;  %v7624_v33 = vadd.f32 %v14975_v11, %v16281_v39  ;;  %v16284_v39 = vld [vmem:[#allocation90_spill] sm:$0xff] }
 0x6b8   : > { %v15286_v27 = vadd.f32 %v8293_v0, %v15010_v49  ;;  %v7958_v17 = vpop.f32.mrf.mxu1  ;;  %v16279_v49 = vld [vmem:[#allocation66_spill] sm:$0xff]  ;;  %v9175_v0 = vadd.f32 %v9174_v34, %v9173_v63  ;;  %v9121_v34 = vmul.f32 %v9011_v4, %v9011_v4 }
 0x6b9   : > { %v8007_v37 = vadd.f32 %v7958_v17, %v7821_v51  ;;  %v9068_v28 = vadd.f32 %v9067_v13, %v9066_v50  ;;  %v7822_v51 = vadd.f32 %v14956_v56, %v7622_v48  ;;  %v9071_v13 = vsel %vm9015_vm13, %v9011_v4, 0.0  ;;  %v9012_v56 = vld [vmem:[%s15006_s26 + $0xe8] sm:$0xff] }
 0x6ba   : > { %v9178_v38 = vsel %vm9015_vm13, %v9120_v21, 0.0 }
 0x6bb   : > { %v9070_v63 = vadd.f32 %v9069_v52, %v9068_v28  ;;  %v7823_v28 = vadd.f32 %v14971_v29, %v7624_v33  ;;  %v9013_v52 = vld [vmem:[%s15006_s26 + $0xf0] sm:$0xff]  ;;  %v16285_v33 = vld [vmem:[#allocation86_spill] sm:$0xff] }
 0x6bc   : > { %v16283_v29 = vld [vmem:[#allocation31_spill] sm:$0xff] }
 0x6bd   : > { %v8139_v40 = vpop.f32.mrf.mxu2  ;;  %v9072_v48 = vadd.f32 %v9071_v13, %v9070_v63  ;;  %v9014_v63 = vld [vmem:[%s15006_s26 + $0xf8] sm:$0xff]  ;;  %v9123_v13 = vmul.f32 %v9013_v52, %v9013_v52 }
 0x6be   : > { %v15288_v61 = vadd.f32 %v8139_v40, %v8005_v14  ;;  %v16280_v14 = vld [vmem:[#allocation101_spill] sm:$0xff] }
 0x6bf   : > { %8860 = vmatmul.bf16.gmra.mxu2 %v16277_v24  ;;  %8664 = vmatmul.bf16.gmra.mxu1 %v11244_v9  ;;  %v8295_v40 = vpop.f32.mrf.mxu3  ;;  %v9177_v9 = vadd.f32 %v9176_v12, %v9175_v0  ;;  %v16282_v0 = vld [vmem:[#allocation87_spill] sm:$0xff]  ;;  %v15318_v12 = vpop.f32.mrf.mxu0 }
 0x6c0   : > { %8342 = vmatmul.bf16.gmra.mxu3 %v16279_v49  ;;  %8528 = vmatmul.bf16.gmra.mxu0 %v16280_v14  ;;  %v15304_v24 = vadd.f32 %v8295_v40, %v15034_v16  ;;  %v7961_v17 = vpop.f32.mrf.mxu1  ;;  %v9073_v16 = vsel %vm9015_vm13, %v9012_v56, 0.0  ;;  %v9180_v14 = vsel %vm9015_vm13, %v9121_v34, 0.0 }
 0x6c1   : > { %v8008_v50 = vadd.f32 %v7961_v17, %v7822_v51  ;;  %v9179_v49 = vadd.f32 %v9178_v38, %v9177_v9  ;;  %v9074_v51 = vadd.f32 %v9073_v16, %v9072_v48  ;;  %v11245_v17 = vld [vmem:[#allocation2 + $0x98] sm:$0xff]  ;;  %v9075_v9 = vsel %vm9015_vm13, %v9013_v52, 0.0 }
 0x6c2   : > { %v7627_v38 = vadd.f32 %v14987_v7, %v16283_v29  ;;  %v9184_v16 = vsel %vm9015_vm13, %v9123_v13, 0.0  ;;  %v11288_v7 = vmov 256.0  }
 0x6c3   : > { %v9181_v4 = vadd.f32 %v9180_v14, %v9179_v49  ;;  %v9124_v49 = vmul.f32 %v9014_v63, %v9014_v63  ;;  %11203 = vrcp.f32 %v11288_v7 }
 0x6c5   : > { %v8142_v35 = vpop.f32.mrf.mxu2 }
 0x6c6   : > { %v15306_v62 = vadd.f32 %v8142_v35, %v8006_v60  ;;  %v9122_v60 = vmul.f32 %v9012_v56, %v9012_v56  ;;  %v9077_v56 = vsel %vm9015_vm13, %v9014_v63, 0.0 }
 0x6c8   : > { %v7963_v11 = vpop.f32.mrf.mxu1  ;;  %v9182_v34 = vsel %vm9015_vm13, %v9122_v60, 0.0 }
 0x6c9   : > { %v8009_v35 = vadd.f32 %v7963_v11, %v7823_v28  ;;  %v9183_v48 = vadd.f32 %v9182_v34, %v9181_v4  ;;  %v16288_v4 = vld [vmem:[#allocation84_spill] sm:$0xff] }
 0x6cb   : > { %v9185_v11 = vadd.f32 %v9184_v16, %v9183_v48 }
 0x6cd   : > { %v8144_v40 = vpop.f32.mrf.mxu2 }
 0x6ce   : > { %v15320_v21 = vadd.f32 %v8144_v40, %v8007_v37  ;;  %v9076_v37 = vadd.f32 %v9075_v9, %v9074_v51  ;;  %v7824_v40 = vadd.f32 %v14985_v2, %v7627_v38  ;;  %v9186_v51 = vsel %vm9015_vm13, %v9124_v49, 0.0  ;;  %v16287_v9 = vld [vmem:[#allocation38_spill] sm:$0xff]  ;;  %v11204_v38 = vpop.eup %11203 }
 0x6cf   : > { %8865 = vmatmul.bf16.gmra.mxu2 %v16282_v0  ;;  %8669 = vmatmul.bf16.gmra.mxu1 %v11245_v17  ;;  %v15334_v17 = vpop.f32.mrf.mxu0  ;;  %v7629_v63 = vadd.f32 %v16288_v4, %v16287_v9  ;;  %v9187_v13 = vadd.f32 %v9186_v51, %v9185_v11  ;;  %v9086_v49 = vmul.f32 256.0, %v11204_v38  ;;  %v16294_v11 = vld [vmem:[#allocation75_spill] sm:$0xff]  ;;  %v16295_v51 = vld [vmem:[#allocation58_spill] sm:$0xff]  ;;  %vm9090_vm14 = vweird.f32 %v11204_v38 }
 0x6d0   : > { %8347 = vmatmul.bf16.gmra.mxu3 %v16284_v39  ;;  %8533 = vmatmul.bf16.gmra.mxu0 %v16285_v33  ;;  %v7966_v60 = vpop.f32.mrf.mxu1  ;;  %v9078_v52 = vadd.f32 %v9077_v56, %v9076_v37  ;;  %v16289_v39 = vld [vmem:[#allocation40_spill] sm:$0xff] }
 0x6d1   : > { %v8010_v0 = vadd.f32 %v7966_v60, %v7824_v40  ;;  %v7825_v2 = vadd.f32 %v16289_v39, %v7629_v63  ;;  %v9188_v16 = vrot.slane %v9187_v13, 4  ;;  %v16292_v40 = vld [vmem:[#allocation33_spill] sm:$0xff] }
 0x6d2   : > { %v9079_v34 = vrot.slane %v9078_v52, 4  ;;  %v16293_v60 = vld [vmem:[#allocation65_spill] sm:$0xff] }
 0x6d3   : > { %v7632_v7 = vadd.f32 %v16293_v60, %v16292_v40  ;;  %v9189_v63 = vadd.f32 %v9188_v16, %v9187_v13  ;;  %v16296_v40 = vld [vmem:[#allocation42_spill] sm:$0xff]  ;;  %v16297_v16 = vld [vmem:[#allocation64_spill] sm:$0xff] }
 0x6d4   : > { %v9080_v48 = vadd.f32 %v9079_v34, %v9078_v52  ;;  %v7634_v60 = vadd.f32 %v15060_v25, %v16296_v40 }
 0x6d5   : > { %v8147_v14 = vpop.f32.mrf.mxu2  ;;  %v7826_v39 = vadd.f32 %v15041_v44, %v7632_v7 }
 0x6d6   : > { %v15332_v28 = vadd.f32 %v8147_v14, %v8008_v50  ;;  %v16290_v50 = vld [vmem:[#allocation88_spill] sm:$0xff]  ;;  %v11246_v14 = vld [vmem:[#allocation2 + $0xb0] sm:$0xff]  ;;  %v9081_v4 = vrot.slane %v9080_v48, 2  ;;  %v7827_v13 = vadd.f32 %v15081_v41, %v7634_v60 }
 0x6d7   : > { %v15345_v9 = vpop.f32.mrf.mxu0 }
 0x6d8   : > { %16286 = vst [vmem:[#allocation79_spill] sm:$0xff] %v15332_v28  ;;  %v7968_v37 = vpop.f32.mrf.mxu1 }
 0x6d9   : > { %v8011_v56 = vadd.f32 %v7968_v37, %v7825_v2  ;;  %v9190_v37 = vrot.slane %v9189_v63, 2 }
 0x6dd   : > { %v8149_v29 = vpop.f32.mrf.mxu2 }
 0x6de   : > { %v15341_v33 = vadd.f32 %v8149_v29, %v8009_v35  ;;  %v9087_v35 = vsub.f32 1.0, %v9086_v49 }
 0x6df   : > { %8870 = vmatmul.bf16.gmra.mxu2 %v16290_v50  ;;  %8674 = vmatmul.bf16.gmra.mxu1 %v11246_v14  ;;  %v9082_v50 = vadd.f32 %v9081_v4, %v9080_v48  ;;  %v11247_v4 = vld [vmem:[#allocation2 + $0xc8] sm:$0xff] }
 0x6e0   : > { %16291 = vst [vmem:[#allocation67_spill] sm:$0xff] %v15341_v33  ;;  %8352 = vmatmul.bf16.gmra.mxu3 %v16294_v11  ;;  %8538 = vmatmul.bf16.gmra.mxu0 %v16295_v51  ;;  %v7971_v34 = vpop.f32.mrf.mxu1  ;;  %v9088_v14 = vmul.f32 %v11204_v38, %v9087_v35  ;;  %v9191_v11 = vadd.f32 %v9190_v37, %v9189_v63 }
 0x6e1   : > { %v8012_v2 = vadd.f32 %v7971_v34, %v7826_v39  ;;  %v9083_v33 = vrot.slane %v9082_v50, 1 }
 0x6e2   : > { %v9089_v28 = vadd.f32 %v11204_v38, %v9088_v14  ;;  %v9192_v48 = vrot.slane %v9191_v11, 1 }
 0x6e3   : > { %v9084_v7 = vadd.f32 %v9083_v33, %v9082_v50  ;;  %v16299_v50 = vld [vmem:[#allocation82_spill] sm:$0xff] }
 0x6e4   : > { %v9091_v35 = vsel %vm9090_vm14, %v11204_v38, %v9089_v28  ;;  %v9193_v39 = vadd.f32 %v9192_v48, %v9191_v11  ;;  %v7639_v28 = vadd.f32 %v15117_v26, %v16299_v50  ;;  %v11249_v50 = vld [vmem:[#allocation2 + $0xf8] sm:$0xff] }
 0x6e5   : > { %v8152_v29 = vpop.f32.mrf.mxu2  ;;  %v15360_v63 = vmul.f32 %v9091_v35, %v9084_v7 }
 0x6e6   : > { %v15350_v52 = vadd.f32 %v8152_v29, %v8010_v0  ;;  %v16298_v29 = vld [vmem:[#allocation23_spill] sm:$0xff]  ;;  %v9194_v40 = vmul.f32 %v9193_v39, %v9091_v35 }
 0x6e7   : > { %v7637_v25 = vadd.f32 %v15088_v46, %v16298_v29  ;;  %v9195_v33 = vmul.f32 %v15360_v63, %v15360_v63  ;;  %v7829_v46 = vadd.f32 %v15147_v23, %v7639_v28  ;;  %v16302_v29 = vld [vmem:[#allocation54_spill] sm:$0xff] }
 0x6e8   : > { %v7973_v0 = vpop.f32.mrf.mxu1 }
 0x6e9   : > { %v8013_v49 = vadd.f32 %v7973_v0, %v7827_v13  ;;  %v7828_v41 = vadd.f32 %v15110_v59, %v7637_v25  ;;  %v9196_v38 = vsub.f32 %v9194_v40, %v9195_v33  ;;  %v16301_v0 = vld [vmem:[#allocation37_spill] sm:$0xff] }
 0x6ea   : > { %v7642_v7 = vadd.f32 %v15140_v57, %v16301_v0 }
 0x6eb   : > { %v9229_v13 = vadd.f32 1e-05, %v9196_v38 }
 0x6ec   : > { %v7830_v26 = vadd.f32 %v15170_v15, %v7642_v7 }
 0x6ed   : > { %v8154_v51 = vpop.f32.mrf.mxu2  ;;  %11205 = vrsqrt.f32 %v9229_v13  ;;  %vm9236_vm15 = vweird.f32 %v9229_v13 }
 0x6ee   : > { %v15356_v44 = vadd.f32 %v8154_v51, %v8011_v56  ;;  %v16300_v51 = vld [vmem:[#allocation5_spill] sm:$0xff] }
 0x6ef   : > { %8875 = vmatmul.bf16.gmra.mxu2 %v16297_v16  ;;  %8679 = vmatmul.bf16.gmra.mxu1 %v11247_v4  ;;  %v11248_v16 = vld [vmem:[#allocation2 + $0xe0] sm:$0xff] }
 0x6f0   : > { %v7976_v56 = vpop.f32.mrf.mxu1 }
 0x6f1   : > { %v8014_v14 = vadd.f32 %v7976_v56, %v7828_v41  ;;  %v16303_v56 = vld [vmem:[#allocation20_spill] sm:$0xff] }
 0x6f3   : > { %v11206_v25 = vpop.eup %11205 }
 0x6f4   : > { %v9231_v39 = vmul.f32 %v11206_v25, %v9229_v13  ;;  %vm9237_vm0 = vweird.f32 %v11206_v25  ;;  %v16308_v13 = vld [vmem:[#allocation59_spill] sm:$0xff] }
 0x6f5   : > { %v8157_v34 = vpop.f32.mrf.mxu2  ;;  %vm9238_vm1 = vmor %vm9236_vm15, %vm9237_vm0 }
 0x6f6   : > { %v15363_v37 = vadd.f32 %v8157_v34, %v8012_v2  ;;  %v9232_v15 = vmul.f32 %v11206_v25, %v9231_v39 }
 0x6f8   : > { %v7978_v59 = vpop.f32.mrf.mxu1 }
 0x6f9   : > { %v8015_v2 = vadd.f32 %v7978_v59, %v7829_v46  ;;  %v16304_v46 = vld [vmem:[#allocation93_spill] sm:$0xff] }
 0x6fd   : > { %v8159_v60 = vpop.f32.mrf.mxu2 }
 0x6fe   : > { %v15371_v11 = vadd.f32 %v8159_v60, %v8013_v49  ;;  %v7644_v49 = vadd.f32 %v15164_v10, %v16302_v29  ;;  %v9197_v29 = vsub.f32 %v16308_v13, %v15360_v63 }
 0x6ff   : > { %8880 = vmatmul.bf16.gmra.mxu2 %v16300_v51  ;;  %8684 = vmatmul.bf16.gmra.mxu1 %v11248_v16  ;;  %v16305_v51 = vld [vmem:[#allocation80_spill] sm:$0xff] }
 0x700   : > { %v7981_v35 = vpop.f32.mrf.mxu1  ;;  %v7831_v41 = vadd.f32 %v15192_v58, %v7644_v49  ;;  %v6590_v59 = vadd.f32 %v16305_v51, %v16304_v46  ;;  %v16306_v58 = vld [vmem:[#allocation26_spill] sm:$0xff]  ;;  %v11250_v49 = vld [vmem:[#allocation2 + $0x110] sm:$0xff] }
 0x701   : > { %v8016_v23 = vadd.f32 %v7981_v35, %v7830_v26  ;;  %v16310_v46 = vld [vmem:[#allocation46_spill] sm:$0xff] }
 0x702   : > { %v7272_v16 = vadd.f32 %v16306_v58, %v6590_v59  ;;  %v9198_v51 = vsub.f32 %v16310_v46, %v15360_v63 }
 0x705   : > { %v8162_v48 = vpop.f32.mrf.mxu2 }
 0x706   : > { %v15376_v4 = vadd.f32 %v8162_v48, %v8014_v14  ;;  %v9233_v14 = vmul.f32 0.5, %v9232_v15  ;;  %v16307_v48 = vld [vmem:[#allocation9_spill] sm:$0xff] }
 0x708   : > { %v7983_v57 = vpop.f32.mrf.mxu1  ;;  %v9234_v10 = vsub.f32 1.5, %v9233_v14 }
 0x709   : > { %v8017_v33 = vadd.f32 %v7983_v57, %v7831_v41 }
 0x70a   : > { %v9235_v0 = vmul.f32 %v11206_v25, %v9234_v10  ;;  %v16309_v10 = vld [vmem:[#allocation27_spill] sm:$0xff] }
 0x70c   : > { %v15400_v39 = vsel %vm9238_vm1, %v11206_v25, %v9235_v0  ;;  %v15427_v0 = vpop.f32.mrf.mxu3 }
 0x70d   : > { %v8164_v34 = vpop.f32.mrf.mxu2  ;;  %v9240_v41 = vmul.f32 %v15400_v39, %v9197_v29  ;;  %v9241_v59 = vmul.f32 %v15400_v39, %v9198_v51 }
 0x70e   : > { %v15382_v40 = vadd.f32 %v8164_v34, %v8015_v2  ;;  %v15392_v2 = vld [vmem:[%s15778_s5] ss:$0 sm:$0xff]  ;;  %v8544_v34 = vadd.f32 %v15210_v8, %v15183_v20  ;;  %v8545_v8 = vadd.f32 %v15233_v19, %v15201_v30  ;;  %v16313_v30 = vld [vmem:[#allocation44_spill] sm:$0xff] }
 0x70f   : > { %8885 = vmatmul.bf16.gmra.mxu2 %v16303_v56  ;;  %8689 = vmatmul.bf16.gmra.mxu1 %v11249_v50  ;;  %v7308_v25 = vadd.f32 %v15392_v2, %v16309_v10  ;;  %v9199_v19 = vsub.f32 %v16313_v30, %v15360_v63 }
 0x710   : > { %v8650_v60 = vpop.f32.mrf.mxu1 }
 0x711   : > { %v8730_v57 = vadd.f32 %v8650_v60, %v8544_v34  ;;  %v9273_v58 = vadd.f32 1.0, %v7308_v25 }
 0x713   : > { %v9305_v29 = vmul.f32 %v9273_v58, %v9241_v59  ;;  %v16315_v58 = vld [vmem:[#allocation50_spill] sm:$0xff] }
 0x715   : > { %v8167_v28 = vpop.f32.mrf.mxu2 }
 0x716   : > { %v15384_v38 = vadd.f32 %v8167_v28, %v8016_v23  ;;  %v7307_v23 = vadd.f32 %v15392_v2, %v7272_v16 }
 0x718   : > { %v8652_v35 = vpop.f32.mrf.mxu1  ;;  %v9272_v56 = vadd.f32 1.0, %v7307_v23 }
 0x719   : > { %v8731_v16 = vadd.f32 %v8652_v35, %v8545_v8  ;;  %v11251_v35 = vld [vmem:[#allocation2 + $0x128] sm:$0xff] }
 0x71a   : > { %v9304_v28 = vmul.f32 %v9272_v56, %v9240_v41  ;;  %v15435_v56 = vpop.f32.mrf.mxu0 }
 0x71d   : > { %v8169_v7 = vpop.f32.mrf.mxu2 }
 0x71e   : > { %v15395_v26 = vadd.f32 %v8169_v7, %v8017_v33  ;;  %v15408_v33 = vld [vmem:[%s15780_s7] ss:$0 sm:$0xff] }
 0x71f   : > { %8890 = vmatmul.bf16.gmra.mxu2 %v16307_v48  ;;  %8694 = vmatmul.bf16.gmra.mxu1 %v11250_v49  ;;  %v16311_v48 = vld [vmem:[#allocation10_spill] sm:$0xff] }
 0x720   : > { %v8655_v14 = vpop.f32.mrf.mxu1  ;;  %v16312_v49 = vld [vmem:[#allocation14_spill] sm:$0xff] }
 0x721   : > { %v7309_v34 = vadd.f32 %v15392_v2, %v16312_v49 }
 0x725   : > { %v8836_v50 = vpop.f32.mrf.mxu2 }
 0x726   : > { %v8916_v15 = vadd.f32 %v8836_v50, %v8730_v57  ;;  %v8546_v57 = vadd.f32 %v15255_v45, %v15218_v55  ;;  %v9200_v55 = vsub.f32 %v16315_v58, %v15360_v63 }
 0x728   : > { %v8951_v20 = vadd.f32 %v15408_v33, %v8916_v15  ;;  %v8657_v13 = vpop.f32.mrf.mxu1  ;;  %v9242_v15 = vmul.f32 %v15400_v39, %v9199_v19  ;;  %v8732_v10 = vadd.f32 %v8655_v14, %v8546_v57  ;;  %v8547_v14 = vadd.f32 %v15278_v47, %v15236_v5  ;;  %v16318_v5 = vld [vmem:[#allocation52_spill] sm:$0xff] }
 0x729   : > { %v9201_v47 = vsub.f32 %v16318_v5, %v15360_v63 }
 0x72a   : > { %v9336_v60 = vadd.f32 %v9304_v28, %v8951_v20  ;;  %v9274_v28 = vadd.f32 1.0, %v7309_v34  ;;  %v15442_v20 = vpop.f32.mrf.mxu3  ;;  %v16316_v34 = vld [vmem:[#allocation32_spill] sm:$0xff] }
 0x72c   : > { %9368 = vst.msk [vmem:[%s15420_s16] sm:$0xff] %vm9015_vm13, %v9336_v60  ;;  %v9306_v8 = vmul.f32 %v9274_v28, %v9242_v15  ;;  %v16314_v60 = vld [vmem:[#allocation3_spill] sm:$0xff]  ;;  %v11252_v15 = vld [vmem:[#allocation2 + $0x140] sm:$0xff]  ;;  %v8548_v28 = vadd.f32 %v15297_v3, %v15251_v42 }
 0x72d   : > { %v8838_v7 = vpop.f32.mrf.mxu2  ;;  %v7310_v59 = vadd.f32 %v15392_v2, %v16314_v60 }
 0x72e   : > { %v8917_v23 = vadd.f32 %v8838_v7, %v8731_v16  ;;  %v9243_v7 = vmul.f32 %v15400_v39, %v9200_v55 }
 0x72f   : > { %8895 = vmatmul.bf16.gmra.mxu2 %v16311_v48  ;;  %8699 = vmatmul.bf16.gmra.mxu1 %v11251_v35  ;;  %v9275_v48 = vadd.f32 1.0, %v7310_v59  ;;  %v16317_v35 = vld [vmem:[#allocation19_spill] sm:$0xff] }
 0x730   : > { %v8952_v41 = vadd.f32 %v15408_v33, %v8917_v23  ;;  %v8660_v51 = vpop.f32.mrf.mxu1  ;;  %v15452_v23 = vpop.f32.mrf.mxu0  ;;  %v7311_v57 = vadd.f32 %v15392_v2, %v16317_v35  ;;  %v16321_v35 = vld [vmem:[#allocation6_spill] sm:$0xff] }
 0x732   : > { %v9337_v50 = vadd.f32 %v9305_v29, %v8952_v41  ;;  %v8733_v29 = vadd.f32 %v8657_v13, %v8547_v14  ;;  %v9307_v41 = vmul.f32 %v9275_v48, %v9243_v7  ;;  %v15462_v13 = vpop.f32.mrf.mxu3  ;;  %v16319_v14 = vld [vmem:[#allocation102_spill] sm:$0xff]  ;;  %v16320_v7 = vld [vmem:[#allocation55_spill] sm:$0xff] }
 0x733   : > { %v9202_v42 = vsub.f32 %v16320_v7, %v15360_v63  ;;  %v16323_v7 = vld [vmem:[#allocation8_spill] sm:$0xff] }
 0x734   : > { %9369 = vst.msk [vmem:[%s15420_s16 + $0x8] sm:$0xff] %vm9015_vm13, %v9337_v50 }
 0x735   : > { %v8841_v25 = vpop.f32.mrf.mxu2 }
 0x736   : > { %v8918_v46 = vadd.f32 %v8841_v25, %v8732_v10  ;;  %v9244_v25 = vmul.f32 %v15400_v39, %v9201_v47 }
 0x738   : > { %v8953_v45 = vadd.f32 %v15408_v33, %v8918_v46  ;;  %v8662_v19 = vpop.f32.mrf.mxu1  ;;  %v9276_v46 = vadd.f32 1.0, %v7311_v57  ;;  %v15469_v59 = vpop.f32.mrf.mxu0 }
 0x73a   : > { %v9338_v16 = vadd.f32 %v9306_v8, %v8953_v45  ;;  %v8734_v8 = vadd.f32 %v8660_v51, %v8548_v28  ;;  %v9308_v45 = vmul.f32 %v9276_v46, %v9244_v25  ;;  %v8549_v51 = vadd.f32 %v15318_v12, %v15269_v1 }
 0x73b   : > { %v9203_v1 = vsub.f32 %v15093_v22, %v15360_v63 }
 0x73c   : > { %9370 = vst.msk [vmem:[%s15420_s16 + $0x10] sm:$0xff] %vm9015_vm13, %v9338_v16  ;;  %v7312_v16 = vadd.f32 %v15392_v2, %v16319_v14 }
 0x73d   : > { %v8843_v49 = vpop.f32.mrf.mxu2  ;;  %v9246_v46 = vmul.f32 %v15400_v39, %v9203_v1  ;;  %v16327_v1 = vld [vmem:[#allocation99_spill] sm:$0xff] }
 0x73e   : > { %v8919_v30 = vadd.f32 %v8843_v49, %v8733_v29  ;;  %v15478_v29 = vpop.f32.mrf.mxu3  ;;  %v9245_v49 = vmul.f32 %v15400_v39, %v9202_v42  ;;  %v7314_v42 = vadd.f32 %v15392_v2, %v16323_v7 }
 0x73f   : > { %8900 = vmatmul.bf16.gmra.mxu2 %v16316_v34  ;;  %8704 = vmatmul.bf16.gmra.mxu1 %v11252_v15  ;;  %v9277_v34 = vadd.f32 1.0, %v7312_v16 }
 0x740   : > { %v8954_v50 = vadd.f32 %v15408_v33, %v8919_v30  ;;  %v8665_v55 = vpop.f32.mrf.mxu1  ;;  %v8735_v30 = vadd.f32 %v8662_v19, %v8549_v51  ;;  %v15488_v12 = vpop.f32.mrf.mxu0  ;;  %v11253_v19 = vld [vmem:[#allocation2 + $0x158] sm:$0xff] }
 0x741   : > { %v9309_v47 = vmul.f32 %v9277_v34, %v9245_v49  ;;  %v9279_v49 = vadd.f32 1.0, %v7314_v42 }
 0x742   : > { %v9339_v10 = vadd.f32 %v9307_v41, %v8954_v50  ;;  %v16322_v50 = vld [vmem:[#allocation21_spill] sm:$0xff] }
 0x743   : > { %v7313_v15 = vadd.f32 %v15392_v2, %v16322_v50 }
 0x744   : > { %9371 = vst.msk [vmem:[%s15420_s16 + $0x18] sm:$0xff] %vm9015_vm13, %v9339_v10  ;;  %v8550_v10 = vadd.f32 %v15334_v17, %v15286_v27  ;;  %v9204_v27 = vsub.f32 %v15106_v6, %v15360_v63 }
 0x745   : > { %v8846_v60 = vpop.f32.mrf.mxu2 }
 0x746   : > { %v8920_v58 = vadd.f32 %v8846_v60, %v8734_v8  ;;  %v9278_v8 = vadd.f32 1.0, %v7313_v15  ;;  %v8736_v60 = vadd.f32 %v8665_v55, %v8550_v10  ;;  %v8551_v55 = vadd.f32 %v15345_v9, %v15304_v24  ;;  %v16326_v24 = vld [vmem:[#allocation97_spill] sm:$0xff] }
 0x747   : > { %v7315_v9 = vadd.f32 %v15392_v2, %v16326_v24 }
 0x748   : > { %v8955_v3 = vadd.f32 %v15408_v33, %v8920_v58  ;;  %v8667_v5 = vpop.f32.mrf.mxu1  ;;  %v15496_v58 = vpop.f32.mrf.mxu3  ;;  %v9310_v16 = vmul.f32 %v9278_v8, %v9246_v46 }
 0x749   : > { %v8737_v34 = vadd.f32 %v8667_v5, %v8551_v55  ;;  %v9205_v5 = vsub.f32 %v16327_v1, %v15360_v63  ;;  %v9280_v46 = vadd.f32 1.0, %v7315_v9  ;;  %v16330_v55 = vld [vmem:[#allocation61_spill] sm:$0xff] }
 0x74a   : > { %v9340_v48 = vadd.f32 %v9308_v45, %v8955_v3  ;;  %v15503_v3 = vpop.f32.mrf.mxu0 }
 0x74c   : > { %9372 = vst.msk [vmem:[%s15420_s16 + $0x20] sm:$0xff] %vm9015_vm13, %v9340_v48  ;;  %v9247_v48 = vmul.f32 %v15400_v39, %v9204_v27 }
 0x74d   : > { %v8848_v41 = vpop.f32.mrf.mxu2 }
 0x74e   : > { %v8921_v57 = vadd.f32 %v8848_v41, %v8735_v30  ;;  %v16324_v41 = vld [vmem:[#allocation12_spill] sm:$0xff]  ;;  %v9311_v15 = vmul.f32 %v9279_v49, %v9247_v48 }
 0x74f   : > { %8905 = vmatmul.bf16.gmra.mxu2 %v16321_v35  ;;  %8709 = vmatmul.bf16.gmra.mxu1 %v11253_v19  ;;  %v16325_v35 = vld [vmem:[#allocation70_spill] sm:$0xff]  ;;  %v11254_v19 = vld [vmem:[#allocation2 + $0x170] sm:$0xff] }
 0x750   : > { %v8956_v28 = vadd.f32 %v15408_v33, %v8921_v57  ;;  %v8670_v14 = vpop.f32.mrf.mxu1  ;;  %v8366_v6 = vadd.f32 %v15427_v0, %v16325_v35  ;;  %v15513_v50 = vpop.f32.mrf.mxu3  ;;  %v9248_v0 = vmul.f32 %v15400_v39, %v9205_v5  ;;  %v16332_v5 = vld [vmem:[#allocation28_spill] sm:$0xff] }
 0x752   : > { %v9341_v25 = vadd.f32 %v9309_v47, %v8956_v28  ;;  %v8552_v10 = vadd.f32 %v15435_v56, %v8366_v6  ;;  %v15522_v8 = vpop.f32.mrf.mxu0  ;;  %v9312_v27 = vmul.f32 %v9280_v46, %v9248_v0  ;;  %v16331_v6 = vld [vmem:[#allocation74_spill] sm:$0xff] }
 0x754   : > { %9373 = vst.msk [vmem:[%s15420_s16 + $0x28] sm:$0xff] %vm9015_vm13, %v9341_v25 }
 0x755   : > { %v8851_v22 = vpop.f32.mrf.mxu2 }
 0x756   : > { %v8922_v45 = vadd.f32 %v8851_v22, %v8736_v60  ;;  %v8738_v60 = vadd.f32 %v8670_v14, %v8552_v10  ;;  %v11255_v10 = vld [vmem:[#allocation2 + $0x188] sm:$0xff] }
 0x758   : > { %v8957_v17 = vadd.f32 %v15408_v33, %v8922_v45  ;;  %v8672_v47 = vpop.f32.mrf.mxu1  ;;  %v16328_v45 = vld [vmem:[#allocation57_spill] sm:$0xff]  ;;  %v15533_v49 = vpop.f32.mrf.mxu3 }
 0x75a   : > { %v9342_v51 = vadd.f32 %v9310_v16, %v8957_v17  ;;  %v8367_v16 = vadd.f32 %v15442_v20, %v16328_v45  ;;  %v16329_v17 = vld [vmem:[#allocation36_spill] sm:$0xff] }
 0x75b   : > { %v7316_v56 = vadd.f32 %v15392_v2, %v16329_v17 }
 0x75c   : > { %9374 = vst.msk [vmem:[%s15420_s16 + $0x30] sm:$0xff] %vm9015_vm13, %v9342_v51  ;;  %v9206_v51 = vsub.f32 %v16330_v55, %v15360_v63  ;;  %v8553_v14 = vadd.f32 %v15452_v23, %v8367_v16  ;;  %v7317_v23 = vadd.f32 %v15392_v2, %v16332_v5  ;;  %v16334_v16 = vld [vmem:[#allocation62_spill] sm:$0xff]  ;;  %v16335_v55 = vld [vmem:[#allocation39_spill] sm:$0xff] }
 0x75d   : > { %v8853_v30 = vpop.f32.mrf.mxu2 }
 0x75e   : > { %v8923_v57 = vadd.f32 %v8853_v30, %v8737_v34  ;;  %v9249_v30 = vmul.f32 %v15400_v39, %v9206_v51  ;;  %v8739_v20 = vadd.f32 %v8672_v47, %v8553_v14  ;;  %v11256_v51 = vld [vmem:[%s15006_s26 + $0x58] sm:$0xff] }
 0x75f   : > { %8910 = vmatmul.bf16.gmra.mxu2 %v16324_v41  ;;  %8714 = vmatmul.bf16.gmra.mxu1 %v11254_v19  ;;  %v9281_v41 = vadd.f32 1.0, %v7316_v56 }
 0x760   : > { %v8958_v28 = vadd.f32 %v15408_v33, %v8923_v57  ;;  %v8675_v42 = vpop.f32.mrf.mxu1  ;;  %v8368_v57 = vadd.f32 %v15462_v13, %v16331_v6  ;;  %v15549_v0 = vpop.f32.mrf.mxu3 }
 0x761   : > { %v9313_v1 = vmul.f32 %v9281_v41, %v9249_v30 }
 0x762   : > { %v9343_v25 = vadd.f32 %v9311_v15, %v8958_v28  ;;  %v15541_v15 = vpop.f32.mrf.mxu0  ;;  %v16333_v28 = vld [vmem:[#allocation47_spill] sm:$0xff] }
 0x763   : > { %v9207_v19 = vsub.f32 %v16333_v28, %v15360_v63  ;;  %v11257_v28 = vld [vmem:[%s15006_s26 + $0x60] sm:$0xff] }
 0x764   : > { %9375 = vst.msk [vmem:[%s15420_s16 + $0x38] sm:$0xff] %vm9015_vm13, %v9343_v25  ;;  %v8554_v25 = vadd.f32 %v15469_v59, %v8368_v57  ;;  %v7318_v59 = vadd.f32 %v15392_v2, %v16335_v55  ;;  %v8370_v57 = vadd.f32 %v15496_v58, %v15168_v53  ;;  %v11259_v55 = vld [vmem:[%s15006_s26 + $0x68] sm:$0xff] }
 0x765   : > { %v8856_v22 = vpop.f32.mrf.mxu2  ;;  %v9250_v46 = vmul.f32 %v15400_v39, %v9207_v19  ;;  %v9209_v19 = vsub.f32 %v11257_v28, %v15360_v63 }
 0x766   : > { %v8924_v7 = vadd.f32 %v8856_v22, %v8738_v60  ;;  %v9282_v60 = vadd.f32 1.0, %v7317_v23  ;;  %v8740_v22 = vadd.f32 %v8675_v42, %v8554_v25  ;;  %v16336_v23 = vld [vmem:[#allocation15_spill] sm:$0xff]  ;;  %v8556_v25 = vadd.f32 %v15503_v3, %v8370_v57  ;;  %v16338_v57 = vld [vmem:[#allocation45_spill] sm:$0xff] }
 0x767   : > { %v9252_v58 = vmul.f32 %v15400_v39, %v9209_v19 }
 0x768   : > { %v8959_v48 = vadd.f32 %v15408_v33, %v8924_v7  ;;  %v8677_v9 = vpop.f32.mrf.mxu1  ;;  %v8369_v7 = vadd.f32 %v15478_v29, %v16334_v16  ;;  %v9314_v56 = vmul.f32 %v9282_v60, %v9250_v46  ;;  %v9283_v29 = vadd.f32 1.0, %v7318_v59 }
 0x769   : > { %v9210_v59 = vsub.f32 %v11259_v55, %v15360_v63 }
 0x76a   : > { %v9344_v34 = vadd.f32 %v9312_v27, %v8959_v48  ;;  %v9208_v48 = vsub.f32 %v11256_v51, %v15360_v63  ;;  %v15560_v14 = vpop.f32.mrf.mxu0 }
 0x76c   : > { %9376 = vst.msk [vmem:[%s15420_s16 + $0x40] sm:$0xff] %vm9015_vm13, %v9344_v34  ;;  %v8555_v34 = vadd.f32 %v15488_v12, %v8369_v7  ;;  %v9251_v41 = vmul.f32 %v15400_v39, %v9208_v48  ;;  %v7319_v12 = vadd.f32 %v15392_v2, %v16336_v23 }
 0x76d   : > { %v8858_v35 = vpop.f32.mrf.mxu2 }
 0x76e   : > { %v8925_v24 = vadd.f32 %v8858_v35, %v8739_v20  ;;  %v8741_v20 = vadd.f32 %v8677_v9, %v8555_v34  ;;  %v15567_v35 = vpop.f32.mrf.mxu3  ;;  %v9315_v5 = vmul.f32 %v9283_v29, %v9251_v41  ;;  %v8372_v41 = vadd.f32 %v15533_v49, %v15203_v31 }
 0x76f   : > { %8719 = vmatmul.bf16.gmra.mxu1 %v11255_v10 }
 0x770   : > { %v8960_v47 = vadd.f32 %v15408_v33, %v8925_v24  ;;  %v8680_v17 = vpop.f32.mrf.mxu1 }
 0x771   : > { %v8742_v46 = vadd.f32 %v8680_v17, %v8556_v25 }
 0x772   : > { %v9345_v13 = vadd.f32 %v9313_v1, %v8960_v47  ;;  %v11258_v47 = vld [vmem:[#allocation2 + $0x1a0] sm:$0xff]  ;;  %v15576_v10 = vpop.f32.mrf.mxu0 }
 0x774   : > { %9377 = vst.msk [vmem:[%s15420_s16 + $0x48] sm:$0xff] %vm9015_vm13, %v9345_v13  ;;  %v9284_v13 = vadd.f32 1.0, %v7319_v12  ;;  %v8558_v12 = vadd.f32 %v15541_v15, %v8372_v41  ;;  %v11261_v15 = vld [vmem:[%s15006_s26 + $0x78] sm:$0xff] }
 0x775   : > { %v8861_v45 = vpop.f32.mrf.mxu2 }
 0x776   : > { %v8926_v27 = vadd.f32 %v8861_v45, %v8740_v22  ;;  %v8371_v22 = vadd.f32 %v15513_v50, %v15185_v54  ;;  %v15584_v7 = vpop.f32.mrf.mxu3 }
 0x778   : > { %v8961_v42 = vadd.f32 %v15408_v33, %v8926_v27  ;;  %v8682_v1 = vpop.f32.mrf.mxu1  ;;  %v9316_v27 = vmul.f32 %v9284_v13, %v9252_v58  ;;  %v8557_v51 = vadd.f32 %v15522_v8, %v8371_v22  ;;  %v7321_v8 = vadd.f32 %v15392_v2, %v16338_v57 }
 0x779   : > { %v9212_v22 = vsub.f32 %v11261_v15, %v15360_v63 }
 0x77a   : > { %v9346_v30 = vadd.f32 %v9314_v56, %v8961_v42  ;;  %v16337_v56 = vld [vmem:[#allocation22_spill] sm:$0xff]  ;;  %v9253_v42 = vmul.f32 %v15400_v39, %v9210_v59  ;;  %v15593_v50 = vpop.f32.mrf.mxu0  ;;  %v8743_v34 = vadd.f32 %v8682_v1, %v8557_v51  ;;  %v8374_v59 = vadd.f32 %v15567_v35, %v15238_v32 }
 0x77b   : > { %v7320_v3 = vadd.f32 %v15392_v2, %v16337_v56 }
 0x77c   : > { %9378 = vst.msk [vmem:[%s15420_s16 + $0x50] sm:$0xff] %vm9015_vm13, %v9346_v30 }
 0x77d   : > { %v8863_v6 = vpop.f32.mrf.mxu2  ;;  %v9285_v54 = vadd.f32 1.0, %v7320_v3  ;;  %v9255_v3 = vmul.f32 %v15400_v39, %v9212_v22 }
 0x77e   : > { %v8927_v24 = vadd.f32 %v8863_v6, %v8741_v20  ;;  %v8323_v1 = vpop.f32.mrf.mxu3 }
 0x77f   : > { %8724 = vmatmul.bf16.gmra.mxu1 %v11258_v47  ;;  %v9317_v6 = vmul.f32 %v9285_v54, %v9253_v42  ;;  %v8373_v47 = vadd.f32 %v15549_v0, %v15220_v36  ;;  %v16340_v42 = vld [vmem:[#allocation51_spill] sm:$0xff] }
 0x780   : > { %v8962_v9 = vadd.f32 %v15408_v33, %v8927_v24  ;;  %v8685_v16 = vpop.f32.mrf.mxu1  ;;  %v11260_v24 = vld [vmem:[%s15006_s26 + $0x70] sm:$0xff]  ;;  %v7323_v54 = vadd.f32 %v15392_v2, %v16340_v42 }
 0x781   : > { %v8744_v31 = vadd.f32 %v8685_v16, %v8558_v12  ;;  %v8559_v16 = vadd.f32 %v15560_v14, %v8373_v47  ;;  %v11262_v14 = vld [vmem:[%s15006_s26 + $0x80] sm:$0xff] }
 0x782   : > { %v9347_v53 = vadd.f32 %v9315_v5, %v8962_v9  ;;  %v9211_v5 = vsub.f32 %v11260_v24, %v15360_v63  ;;  %v9286_v9 = vadd.f32 1.0, %v7321_v8  ;;  %v8509_v25 = vpop.f32.mrf.mxu0  ;;  %v9288_v57 = vadd.f32 1.0, %v7323_v54 }
 0x783   : > { %v8375_v24 = vadd.f32 %v15584_v7, %v15253_v43 }
 0x784   : > { %9379 = vst.msk [vmem:[%s15420_s16 + $0x58] sm:$0xff] %vm9015_vm13, %v9347_v53  ;;  %v9254_v19 = vmul.f32 %v15400_v39, %v9211_v5 }
 0x785   : > { %v8866_v60 = vpop.f32.mrf.mxu2  ;;  %v8561_v47 = vadd.f32 %v15593_v50, %v8375_v24 }
 0x786   : > { %v8928_v45 = vadd.f32 %v8866_v60, %v8742_v46  ;;  %v9318_v13 = vmul.f32 %v9286_v9, %v9254_v19  ;;  %v16339_v46 = vld [vmem:[#allocation11_spill] sm:$0xff]  ;;  %v8325_v56 = vpop.f32.mrf.mxu3 }
 0x787   : > { %v7322_v60 = vadd.f32 %v15392_v2, %v16339_v46  ;;  %v8376_v46 = vadd.f32 %v8323_v1, %v15271_v18 }
 0x788   : > { %v8963_v17 = vadd.f32 %v15408_v33, %v8928_v45  ;;  %v8687_v20 = vpop.f32.mrf.mxu1 }
 0x789   : > { %v9287_v36 = vadd.f32 1.0, %v7322_v60  ;;  %v8745_v0 = vadd.f32 %v8687_v20, %v8559_v16  ;;  %v16342_v16 = vld [vmem:[#allocation4_spill] sm:$0xff] }
 0x78a   : > { %v9348_v48 = vadd.f32 %v9316_v27, %v8963_v17 }
 0x78c   : > { %9380 = vst.msk [vmem:[%s15420_s16 + $0x60] sm:$0xff] %vm9015_vm13, %v9348_v48  ;;  %v9319_v48 = vmul.f32 %v9287_v36, %v9255_v3  ;;  %v11264_v3 = vld [vmem:[%s15006_s26 + $0x90] sm:$0xff] }
 0x78d   : > { %v8868_v30 = vpop.f32.mrf.mxu2  ;;  %v9215_v50 = vsub.f32 %v11264_v3, %v15360_v63  ;;  %v11267_v3 = vld [vmem:[%s15006_s26 + $0xa8] sm:$0xff] }
 0x78e   : > { %v8929_v29 = vadd.f32 %v8868_v30, %v8743_v34  ;;  %v9213_v34 = vsub.f32 %v11262_v14, %v15360_v63  ;;  %v8511_v30 = vpop.f32.mrf.mxu0  ;;  %v8328_v35 = vpop.f32.mrf.mxu3 }
 0x790   : > { %v8964_v23 = vadd.f32 %v15408_v33, %v8929_v29  ;;  %v8690_v58 = vpop.f32.mrf.mxu1  ;;  %v8560_v29 = vadd.f32 %v15576_v10, %v8374_v59  ;;  %v11263_v10 = vld [vmem:[%s15006_s26 + $0x88] sm:$0xff]  ;;  %v9258_v59 = vmul.f32 %v15400_v39, %v9215_v50 }
 0x791   : > { %v9214_v9 = vsub.f32 %v11263_v10, %v15360_v63  ;;  %v16344_v10 = vld [vmem:[#allocation17_spill] sm:$0xff] }
 0x792   : > { %v9349_v28 = vadd.f32 %v9317_v6, %v8964_v23  ;;  %v9256_v6 = vmul.f32 %v15400_v39, %v9213_v34  ;;  %v8746_v32 = vadd.f32 %v8690_v58, %v8560_v29  ;;  %v16343_v34 = vld [vmem:[#allocation89_spill] sm:$0xff]  ;;  %v11265_v29 = vld [vmem:[%s15006_s26 + $0x98] sm:$0xff] }
 0x793   : > { %v9257_v58 = vmul.f32 %v15400_v39, %v9214_v9  ;;  %v7327_v9 = vadd.f32 %v15392_v2, %v16344_v10 }
 0x794   : > { %9381 = vst.msk [vmem:[%s15420_s16 + $0x68] sm:$0xff] %vm9015_vm13, %v9349_v28  ;;  %v9320_v12 = vmul.f32 %v9288_v57, %v9256_v6  ;;  %v16341_v28 = vld [vmem:[#allocation13_spill] sm:$0xff] }
 0x795   : > { %v8871_v49 = vpop.f32.mrf.mxu2  ;;  %v7324_v19 = vadd.f32 %v15392_v2, %v16341_v28 }
 0x796   : > { %v8930_v53 = vadd.f32 %v8871_v49, %v8744_v31  ;;  %v8514_v49 = vpop.f32.mrf.mxu0  ;;  %v8330_v22 = vpop.f32.mrf.mxu3 }
 0x798   : > { %v8965_v45 = vadd.f32 %v15408_v33, %v8930_v53  ;;  %v8692_v51 = vpop.f32.mrf.mxu1 }
 0x799   : > { %v8747_v43 = vadd.f32 %v8692_v51, %v8561_v47 }
 0x79a   : > { %v9350_v27 = vadd.f32 %v9318_v13, %v8965_v45  ;;  %v9289_v13 = vadd.f32 1.0, %v7324_v19 }
 0x79c   : > { %9382 = vst.msk [vmem:[%s15420_s16 + $0x70] sm:$0xff] %vm9015_vm13, %v9350_v27  ;;  %v9321_v45 = vmul.f32 %v9289_v13, %v9257_v58  ;;  %v7325_v27 = vadd.f32 %v15392_v2, %v16342_v16  ;;  %v16345_v16 = vld [vmem:[#allocation24_spill] sm:$0xff] }
 0x79d   : > { %v8873_v55 = vpop.f32.mrf.mxu2 }
 0x79e   : > { %v8931_v17 = vadd.f32 %v8873_v55, %v8745_v0  ;;  %v8562_v0 = vadd.f32 %v8509_v25, %v8376_v46  ;;  %v8516_v51 = vpop.f32.mrf.mxu0  ;;  %v9216_v25 = vsub.f32 %v11265_v29, %v15360_v63  ;;  %v8333_v6 = vpop.f32.mrf.mxu3  ;;  %v8379_v46 = vadd.f32 %v8330_v22, %v15320_v21  ;;  %v11268_v29 = vld [vmem:[%s15006_s26 + $0xb0] sm:$0xff] }
 0x7a0   : > { %v8966_v41 = vadd.f32 %v15408_v33, %v8931_v17  ;;  %v8695_v23 = vpop.f32.mrf.mxu1  ;;  %v9290_v17 = vadd.f32 1.0, %v7325_v27  ;;  %v7328_v27 = vadd.f32 %v15392_v2, %v16345_v16  ;;  %v16350_v16 = vld [vmem:[#allocation30_spill] sm:$0xff] }
 0x7a1   : > { %v8748_v18 = vadd.f32 %v8695_v23, %v8562_v0  ;;  %v8565_v0 = vadd.f32 %v8516_v51, %v8379_v46  ;;  %v9219_v51 = vsub.f32 %v11268_v29, %v15360_v63 }
 0x7a2   : > { %v9351_v20 = vadd.f32 %v9319_v48, %v8966_v41  ;;  %v8377_v48 = vadd.f32 %v8325_v56, %v15288_v61  ;;  %v9322_v14 = vmul.f32 %v9290_v17, %v9258_v59  ;;  %v7326_v41 = vadd.f32 %v15392_v2, %v16343_v34  ;;  %v16347_v34 = vld [vmem:[#allocation7_spill] sm:$0xff] }
 0x7a3   : > { %v8378_v56 = vadd.f32 %v8328_v35, %v15306_v62  ;;  %v9293_v17 = vadd.f32 1.0, %v7328_v27  ;;  %v7331_v27 = vadd.f32 %v15392_v2, %v16350_v16 }
 0x7a4   : > { %9383 = vst.msk [vmem:[%s15420_s16 + $0x78] sm:$0xff] %vm9015_vm13, %v9351_v20  ;;  %v8563_v57 = vadd.f32 %v8511_v30, %v8377_v48  ;;  %v9291_v24 = vadd.f32 1.0, %v7326_v41  ;;  %v7329_v41 = vadd.f32 %v15392_v2, %v16347_v34  ;;  %v11271_v34 = vld [vmem:[%s15006_s26 + $0xc8] sm:$0xff] }
 0x7a5   : > { %v8876_v8 = vpop.f32.mrf.mxu2 }
 0x7a6   : > { %v8932_v5 = vadd.f32 %v8876_v8, %v8746_v32  ;;  %v9259_v8 = vmul.f32 %v15400_v39, %v9216_v25  ;;  %v8519_v23 = vpop.f32.mrf.mxu0  ;;  %v8335_v13 = vpop.f32.mrf.mxu3 }
 0x7a8   : > { %v8967_v31 = vadd.f32 %v15408_v33, %v8932_v5  ;;  %v8697_v15 = vpop.f32.mrf.mxu1  ;;  %v9323_v19 = vmul.f32 %v9291_v24, %v9259_v8  ;;  %v9262_v8 = vmul.f32 %v15400_v39, %v9219_v51  ;;  %v9294_v24 = vadd.f32 1.0, %v7329_v41 }
 0x7a9   : > { %v8749_v5 = vadd.f32 %v8697_v15, %v8563_v57  ;;  %v9222_v41 = vsub.f32 %v11271_v34, %v15360_v63 }
 0x7aa   : > { %v9352_v53 = vadd.f32 %v9320_v12, %v8967_v31  ;;  %v11266_v31 = vld [vmem:[%s15006_s26 + $0xa0] sm:$0xff]  ;;  %v9326_v10 = vmul.f32 %v9294_v24, %v9262_v8 }
 0x7ab   : > { %v9217_v30 = vsub.f32 %v11266_v31, %v15360_v63 }
 0x7ac   : > { %9384 = vst.msk [vmem:[%s15420_s16 + $0x80] sm:$0xff] %vm9015_vm13, %v9352_v53  ;;  %v8564_v53 = vadd.f32 %v8514_v49, %v8378_v56  ;;  %v9218_v49 = vsub.f32 %v11267_v3, %v15360_v63  ;;  %v11270_v3 = vld [vmem:[%s15006_s26 + $0xc0] sm:$0xff] }
 0x7ad   : > { %v8878_v7 = vpop.f32.mrf.mxu2 }
 0x7ae   : > { %v8933_v60 = vadd.f32 %v8878_v7, %v8747_v43  ;;  %v9260_v43 = vmul.f32 %v15400_v39, %v9217_v30  ;;  %v9292_v7 = vadd.f32 1.0, %v7327_v9  ;;  %v8521_v50 = vpop.f32.mrf.mxu0  ;;  %v9261_v59 = vmul.f32 %v15400_v39, %v9218_v49  ;;  %v8338_v21 = vpop.f32.mrf.mxu3  ;;  %v16349_v9 = vld [vmem:[#allocation29_spill] sm:$0xff]  ;;  %v11269_v30 = vld [vmem:[%s15006_s26 + $0xb8] sm:$0xff] }
 0x7af   : > { %v7330_v31 = vadd.f32 %v15392_v2, %v16349_v9  ;;  %v8382_v46 = vadd.f32 %v8338_v21, %v15350_v52  ;;  %v9221_v49 = vsub.f32 %v11270_v3, %v15360_v63 }
 0x7b0   : > { %v8968_v36 = vadd.f32 %v15408_v33, %v8933_v60  ;;  %v8700_v54 = vpop.f32.mrf.mxu1 }
 0x7b1   : > { %v8750_v62 = vadd.f32 %v8700_v54, %v8564_v53 }
 0x7b2   : > { %v9353_v55 = vadd.f32 %v9321_v45, %v8968_v36  ;;  %v9324_v45 = vmul.f32 %v9292_v7, %v9260_v43  ;;  %v9295_v7 = vadd.f32 1.0, %v7330_v31 }
 0x7b4   : > { %9385 = vst.msk [vmem:[%s15420_s16 + $0x88] sm:$0xff] %vm9015_vm13, %v9353_v55 }
 0x7b5   : > { %v8881_v1 = vpop.f32.mrf.mxu2 }
 0x7b6   : > { %v8934_v42 = vadd.f32 %v8881_v1, %v8748_v18  ;;  %v16346_v1 = vld [vmem:[#allocation79_spill] sm:$0xff] }
 0x7b7   : > { %v8380_v48 = vadd.f32 %v8333_v6, %v16346_v1 }
 0x7b8   : > { %v8969_v20 = vadd.f32 %v15408_v33, %v8934_v42  ;;  %v8702_v28 = vpop.f32.mrf.mxu1 }
 0x7b9   : > { %v8751_v18 = vadd.f32 %v8702_v28, %v8565_v0  ;;  %v8566_v57 = vadd.f32 %v8519_v23, %v8380_v48  ;;  %v9220_v23 = vsub.f32 %v11269_v30, %v15360_v63 }
 0x7ba   : > { %v9354_v32 = vadd.f32 %v9322_v14, %v8969_v20  ;;  %v9325_v14 = vmul.f32 %v9293_v17, %v9261_v59  ;;  %v8524_v20 = vpop.f32.mrf.mxu0  ;;  %v9264_v59 = vmul.f32 %v15400_v39, %v9221_v49  ;;  %v9296_v17 = vadd.f32 1.0, %v7331_v27 }
 0x7bb   : > { %v9263_v43 = vmul.f32 %v15400_v39, %v9220_v23  ;;  %v8568_v0 = vadd.f32 %v8524_v20, %v8382_v46  ;;  %v11273_v46 = vld [vmem:[%s15006_s26 + $0xd8] sm:$0xff] }
 0x7bc   : > { %9386 = vst.msk [vmem:[%s15420_s16 + $0x90] sm:$0xff] %vm9015_vm13, %v9354_v32 }
 0x7bd   : > { %v8883_v61 = vpop.f32.mrf.mxu2 }
 0x7be   : > { %v8935_v12 = vadd.f32 %v8883_v61, %v8749_v5  ;;  %v16348_v61 = vld [vmem:[#allocation67_spill] sm:$0xff] }
 0x7bf   : > { %v8381_v56 = vadd.f32 %v8335_v13, %v16348_v61  ;;  %v16352_v61 = vld [vmem:[#allocation72_spill] sm:$0xff] }
 0x7c0   : > { %v8970_v47 = vadd.f32 %v15408_v33, %v8935_v12  ;;  %v8705_v15 = vpop.f32.mrf.mxu1 }
 0x7c1   : > { %v8752_v5 = vadd.f32 %v8705_v15, %v8566_v57  ;;  %v8567_v53 = vadd.f32 %v8521_v50, %v8381_v56  ;;  %v9265_v57 = vmul.f32 %v15400_v39, %v9222_v41  ;;  %v7333_v56 = vadd.f32 %v15392_v2, %v16352_v61 }
 0x7c2   : > { %v9355_v58 = vadd.f32 %v9323_v19, %v8970_v47  ;;  %v8340_v19 = vpop.f32.mrf.mxu3 }
 0x7c3   : > { %v8383_v21 = vadd.f32 %v8340_v19, %v15356_v44 }
 0x7c4   : > { %9387 = vst.msk [vmem:[%s15420_s16 + $0x98] sm:$0xff] %vm9015_vm13, %v9355_v58 }
 0x7c5   : > { %v8886_v35 = vpop.f32.mrf.mxu2 }
 0x7c6   : > { %v8936_v60 = vadd.f32 %v8886_v35, %v8750_v62  ;;  %v8526_v62 = vpop.f32.mrf.mxu0 }
 0x7c7   : > { %v8569_v51 = vadd.f32 %v8526_v62, %v8383_v21  ;;  %v11274_v21 = vld [vmem:[%s15006_s26 + $0xe0] sm:$0xff] }
 0x7c8   : > { %v8971_v36 = vadd.f32 %v15408_v33, %v8936_v60  ;;  %v8707_v54 = vpop.f32.mrf.mxu1 }
 0x7c9   : > { %v8753_v13 = vadd.f32 %v8707_v54, %v8567_v53  ;;  %v16351_v54 = vld [vmem:[#allocation35_spill] sm:$0xff] }
 0x7ca   : > { %v9356_v55 = vadd.f32 %v9324_v45, %v8971_v36  ;;  %v9327_v45 = vmul.f32 %v9295_v7, %v9263_v43  ;;  %v8343_v36 = vpop.f32.mrf.mxu3 }
 0x7cb   : > { %v8384_v24 = vadd.f32 %v8343_v36, %v15363_v37 }
 0x7cc   : > { %9388 = vst.msk [vmem:[%s15420_s16 + $0xa0] sm:$0xff] %vm9015_vm13, %v9356_v55 }
 0x7cd   : > { %v8888_v22 = vpop.f32.mrf.mxu2 }
 0x7ce   : > { %v8937_v42 = vadd.f32 %v8888_v22, %v8751_v18  ;;  %v8529_v22 = vpop.f32.mrf.mxu0 }
 0x7cf   : > { %v8570_v31 = vadd.f32 %v8529_v22, %v8384_v24  ;;  %v9225_v22 = vsub.f32 %v11274_v21, %v15360_v63 }
 0x7d0   : > { %v8972_v25 = vadd.f32 %v15408_v33, %v8937_v42  ;;  %v8710_v28 = vpop.f32.mrf.mxu1  ;;  %v9328_v42 = vmul.f32 %v9296_v17, %v9264_v59 }
 0x7d1   : > { %v8754_v18 = vadd.f32 %v8710_v28, %v8568_v0 }
 0x7d2   : > { %v9357_v32 = vadd.f32 %v9325_v14, %v8972_v25  ;;  %v7332_v14 = vadd.f32 %v15392_v2, %v16351_v54  ;;  %v8345_v20 = vpop.f32.mrf.mxu3  ;;  %v9268_v54 = vmul.f32 %v15400_v39, %v9225_v22 }
 0x7d3   : > { %v8385_v43 = vadd.f32 %v8345_v20, %v15371_v11 }
 0x7d4   : > { %9389 = vst.msk [vmem:[%s15420_s16 + $0xa8] sm:$0xff] %vm9015_vm13, %v9357_v32  ;;  %v9297_v32 = vadd.f32 1.0, %v7332_v14 }
 0x7d5   : > { %v8891_v6 = vpop.f32.mrf.mxu2 }
 0x7d6   : > { %v8938_v12 = vadd.f32 %v8891_v6, %v8752_v5  ;;  %v9329_v6 = vmul.f32 %v9297_v32, %v9265_v57  ;;  %v8531_v19 = vpop.f32.mrf.mxu0  ;;  %v16355_v57 = vld [vmem:[#allocation77_spill] sm:$0xff] }
 0x7d7   : > { %v8571_v16 = vadd.f32 %v8531_v19, %v8385_v43  ;;  %v7336_v32 = vadd.f32 %v15392_v2, %v16355_v57 }
 0x7d8   : > { %v8973_v47 = vadd.f32 %v15408_v33, %v8938_v12  ;;  %v8712_v15 = vpop.f32.mrf.mxu1  ;;  %v11272_v12 = vld [vmem:[%s15006_s26 + $0xd0] sm:$0xff] }
 0x7d9   : > { %v8755_v44 = vadd.f32 %v8712_v15, %v8569_v51  ;;  %v9223_v28 = vsub.f32 %v11272_v12, %v15360_v63  ;;  %v9301_v12 = vadd.f32 1.0, %v7336_v32 }
 0x7da   : > { %v9358_v58 = vadd.f32 %v9326_v10, %v8973_v47  ;;  %v9298_v47 = vadd.f32 1.0, %v7333_v56  ;;  %v8348_v37 = vpop.f32.mrf.mxu3 }
 0x7db   : > { %v9266_v23 = vmul.f32 %v15400_v39, %v9223_v28  ;;  %v8386_v0 = vadd.f32 %v8348_v37, %v15376_v4 }
 0x7dc   : > { %9390 = vst.msk [vmem:[%s15420_s16 + $0xb0] sm:$0xff] %vm9015_vm13, %v9358_v58 }
 0x7dd   : > { %v8893_v35 = vpop.f32.mrf.mxu2  ;;  %v9330_v62 = vmul.f32 %v9298_v47, %v9266_v23  ;;  %v16356_v23 = vld [vmem:[#allocation48_spill] sm:$0xff] }
 0x7de   : > { %v8939_v60 = vadd.f32 %v8893_v35, %v8753_v13  ;;  %v16353_v13 = vld [vmem:[#allocation16_spill] sm:$0xff]  ;;  %v7337_v47 = vadd.f32 %v15392_v2, %v16356_v23 }
 0x7df   : > { %v7334_v35 = vadd.f32 %v15392_v2, %v16353_v13 }
 0x7e0   : > { %v8974_v50 = vadd.f32 %v15408_v33, %v8939_v60  ;;  %v8715_v48 = vpop.f32.mrf.mxu1  ;;  %v9224_v60 = vsub.f32 %v11273_v46, %v15360_v63 }
 0x7e1   : > { %v8756_v53 = vadd.f32 %v8715_v48, %v8570_v31 }
 0x7e2   : > { %v9359_v55 = vadd.f32 %v9327_v45, %v8974_v50  ;;  %v8534_v45 = vpop.f32.mrf.mxu0  ;;  %v9267_v49 = vmul.f32 %v15400_v39, %v9224_v60  ;;  %v9299_v50 = vadd.f32 1.0, %v7334_v35  ;;  %v8350_v59 = vpop.f32.mrf.mxu3  ;;  %v9302_v35 = vadd.f32 1.0, %v7337_v47 }
 0x7e3   : > { %v8572_v48 = vadd.f32 %v8534_v45, %v8386_v0  ;;  %v8387_v51 = vadd.f32 %v8350_v59, %v15382_v40 }
 0x7e4   : > { %9391 = vst.msk [vmem:[%s15420_s16 + $0xb8] sm:$0xff] %vm9015_vm13, %v9359_v55  ;;  %v9331_v17 = vmul.f32 %v9299_v50, %v9267_v49  ;;  %v11277_v49 = vld [vmem:[%s15006_s26 + $0xf8] sm:$0xff] }
 0x7e5   : > { %v8896_v52 = vpop.f32.mrf.mxu2  ;;  %v9228_v50 = vsub.f32 %v11277_v49, %v15360_v63 }
 0x7e6   : > { %v8940_v1 = vadd.f32 %v8896_v52, %v8754_v18  ;;  %v16354_v18 = vld [vmem:[#allocation18_spill] sm:$0xff] }
 0x7e7   : > { %v7335_v52 = vadd.f32 %v15392_v2, %v16354_v18  ;;  %v9271_v59 = vmul.f32 %v15400_v39, %v9228_v50 }
 0x7e8   : > { %v8975_v29 = vadd.f32 %v15408_v33, %v8940_v1  ;;  %v8717_v9 = vpop.f32.mrf.mxu1 }
 0x7e9   : > { %v8757_v36 = vadd.f32 %v8717_v9, %v8571_v16  ;;  %v9300_v14 = vadd.f32 1.0, %v7335_v52 }
 0x7ea   : > { %v9360_v25 = vadd.f32 %v9328_v42, %v8975_v29  ;;  %v8536_v34 = vpop.f32.mrf.mxu0 }
 0x7eb   : > { %v9332_v20 = vmul.f32 %v9300_v14, %v9268_v54 }
 0x7ec   : > { %9392 = vst.msk [vmem:[%s15420_s16 + $0xc0] sm:$0xff] %vm9015_vm13, %v9360_v25 }
 0x7ed   : > { %v8898_v8 = vpop.f32.mrf.mxu2 }
 0x7ee   : > { %v8941_v5 = vadd.f32 %v8898_v8, %v8755_v44  ;;  %v11275_v44 = vld [vmem:[%s15006_s26 + $0xe8] sm:$0xff] }
 0x7ef   : > { %v9226_v8 = vsub.f32 %v11275_v44, %v15360_v63 }
 0x7f0   : > { %v8976_v10 = vadd.f32 %v15408_v33, %v8941_v5  ;;  %v8720_v3 = vpop.f32.mrf.mxu1  ;;  %v8353_v5 = vpop.f32.mrf.mxu3 }
 0x7f1   : > { %v8758_v41 = vadd.f32 %v8720_v3, %v8572_v48  ;;  %v9269_v56 = vmul.f32 %v15400_v39, %v9226_v8 }
 0x7f2   : > { %v9361_v30 = vadd.f32 %v9329_v6, %v8976_v10  ;;  %v8573_v6 = vadd.f32 %v8536_v34, %v8387_v51  ;;  %v8539_v40 = vpop.f32.mrf.mxu0  ;;  %v8388_v10 = vadd.f32 %v8353_v5, %v15384_v38 }
 0x7f4   : > { %9393 = vst.msk [vmem:[%s15420_s16 + $0xc8] sm:$0xff] %vm9015_vm13, %v9361_v30  ;;  %v9333_v30 = vmul.f32 %v9301_v12, %v9269_v56  ;;  %v8574_v43 = vadd.f32 %v8539_v40, %v8388_v10 }
 0x7f5   : > { %v8901_v58 = vpop.f32.mrf.mxu2 }
 0x7f6   : > { %v8942_v7 = vadd.f32 %v8901_v58, %v8756_v53  ;;  %v11276_v53 = vld [vmem:[%s15006_s26 + $0xf0] sm:$0xff] }
 0x7f7   : > { %v9227_v37 = vsub.f32 %v11276_v53, %v15360_v63 }
 0x7f8   : > { %v8977_v15 = vadd.f32 %v15408_v33, %v8942_v7  ;;  %v8722_v4 = vpop.f32.mrf.mxu1 }
 0x7f9   : > { %v8759_v28 = vadd.f32 %v8722_v4, %v8573_v6  ;;  %v9270_v13 = vmul.f32 %v15400_v39, %v9227_v37 }
 0x7fa   : > { %v9362_v27 = vadd.f32 %v9330_v62, %v8977_v15  ;;  %v8355_v62 = vpop.f32.mrf.mxu3  ;;  %v8541_v45 = vpop.f32.mrf.mxu0 }
 0x7fb   : > { %v8389_v60 = vadd.f32 %v8355_v62, %v15395_v26  ;;  %v9334_v16 = vmul.f32 %v9302_v35, %v9270_v13 }
 0x7fc   : > { %9394 = vst.msk [vmem:[%s15420_s16 + $0xd0] sm:$0xff] %vm9015_vm13, %v9362_v27  ;;  %v16357_v27 = vld [vmem:[#allocation103_spill] sm:$0xff] }
 0x7fd   : > { %v8903_v11 = vpop.f32.mrf.mxu2  ;;  %v7338_v3 = vadd.f32 %v15392_v2, %v16357_v27  ;;  %v8575_v0 = vadd.f32 %v8541_v45, %v8389_v60 }
 0x7fe   : > { %v8943_v55 = vadd.f32 %v8903_v11, %v8757_v36 }
 0x800   : > { %v8978_v1 = vadd.f32 %v15408_v33, %v8943_v55  ;;  %v8725_v31 = vpop.f32.mrf.mxu1 }
 0x801   : > { %v8760_v46 = vadd.f32 %v8725_v31, %v8574_v43 }
 0x802   : > { %v9363_v42 = vadd.f32 %v9331_v17, %v8978_v1  ;;  %v9303_v17 = vadd.f32 1.0, %v7338_v3 }
 0x804   : > { %9395 = vst.msk [vmem:[%s15420_s16 + $0xd8] sm:$0xff] %vm9015_vm13, %v9363_v42  ;;  %v9335_v21 = vmul.f32 %v9303_v17, %v9271_v59 }
 0x805   : > { %v8906_v29 = vpop.f32.mrf.mxu2 }
 0x806   : > { %v8944_v25 = vadd.f32 %v8906_v29, %v8758_v41 }
 0x808   : > { %v8979_v24 = vadd.f32 %v15408_v33, %v8944_v25  ;;  %v8727_v11 = vpop.f32.mrf.mxu1 }
 0x809   : > { %v8761_v18 = vadd.f32 %v8727_v11, %v8575_v0 }
 0x80a   : > { %v9364_v61 = vadd.f32 %v9332_v20, %v8979_v24 }
 0x80c   : > { %9396 = vst.msk [vmem:[%s15420_s16 + $0xe0] sm:$0xff] %vm9015_vm13, %v9364_v61 }
 0x80d   : > { %v8908_v19 = vpop.f32.mrf.mxu2 }
 0x80e   : > { %v8945_v9 = vadd.f32 %v8908_v19, %v8759_v28 }
 0x810   : > { %v8980_v58 = vadd.f32 %v15408_v33, %v8945_v9 }
 0x812   : > { %v9365_v7 = vadd.f32 %v9333_v30, %v8980_v58 }
 0x814   : > { %9397 = vst.msk [vmem:[%s15420_s16 + $0xe8] sm:$0xff] %vm9015_vm13, %v9365_v7 }
 0x815   : > { %v8911_v38 = vpop.f32.mrf.mxu2 }
 0x816   : > { %v8946_v15 = vadd.f32 %v8911_v38, %v8760_v46 }
 0x818   : > { %v8981_v36 = vadd.f32 %v15408_v33, %v8946_v15 }
 0x81a   : > { %v9366_v55 = vadd.f32 %v9334_v16, %v8981_v36 }
 0x81c   : > { %9398 = vst.msk [vmem:[%s15420_s16 + $0xf0] sm:$0xff] %vm9015_vm13, %v9366_v55 }
 0x81d   : > { %v8913_v26 = vpop.f32.mrf.mxu2 }
 0x81e   : > { %v8947_v52 = vadd.f32 %v8913_v26, %v8761_v18 }
 0x820   : > { %v8982_v2 = vadd.f32 %v15408_v33, %v8947_v52 }
 0x822   : > { %v9367_v22 = vadd.f32 %v9335_v21, %v8982_v2 }
 0x824   : > { %9399 = vst.msk [vmem:[%s15420_s16 + $0xf8] sm:$0xff] %vm9015_vm13, %v9367_v22 }
 0x825 PF: > { %s18_s27 = sadd.s32 1, %s11284_s27  }
 0x826   : > { %p15_p4 = scmp.ge.s32.totalorder %s18_s27, 4  }
 0x828   :  { %17 = sbr.rel (!%p15_p4) target bundleno = 1 (0x1), region = 114 }

</bundles_post_ra>
